<compile_context>
chip_gen: v6e
topology: v6e:2x2x1
jax: 0.10.0
libtpu: 0.0.40
codegen_flags: <defaults>
</compile_context>

<pallas_src>
import jax
import jax.numpy as jnp
from jax.experimental import pallas as pl
from jax.experimental.pallas import tpu as pltpu

WIN = 7                        # skimage default win_size
HALO = WIN - 1                 # 6 rows/cols of window overlap
K1, K2 = 0.01, 0.03            # skimage defaults
NPW = WIN * WIN                # 49 (use_sample_covariance=True folded into constants)
SLAB_PAD = 8                   # tile starts at sublane offset 8 (aligned slab stores)
OFF = SLAB_PAD - HALO          # 2: halo rows occupy slab rows 2..7


def _custom_loss_kernel(consts_ref,                  # SMEM (2,): [C1*49^2, C2*48*49]
                        halo_pred_ref, halo_gt_ref,  # (8, W) per-core top halo
                        pred_ref, gt_ref,            # (T, W) row tiles
                        band_ref,                    # (W, W) banded column-sum ones
                        sse_out_ref, ssum_out_ref,   # (1, 1) per-core partial sums
                        sx_ref, sy_ref,              # (T+8, W) slabs (carried halo)
                        sse_ref, ssum_ref):          # (8, W) vector accumulators
    core = pl.program_id(0)
    step = pl.program_id(1)
    nsteps = pl.num_programs(1)
    T, W = pred_ref.shape
    Wv = W - HALO

    c1s = consts_ref[0]
    c2s = consts_ref[1]

    xb = pred_ref[...]            # pred tile (im2 in the skimage call)
    yb = gt_ref[...]              # gt tile   (im1 in the skimage call)

    # ---- per-core init: zero accumulators, load the top halo from HBM -------
    @pl.when(step == 0)
    def _():
        sse_ref[...] = jnp.zeros_like(sse_ref)
        ssum_ref[...] = jnp.zeros_like(ssum_ref)
        sx_ref[0:SLAB_PAD, :] = halo_pred_ref[...]   # rows 0..1 zero, 2..7 halo
        sy_ref[0:SLAB_PAD, :] = halo_gt_ref[...]

    # carried halo: bottom 6 rows of the previous tile -> slab rows 2..7
    @pl.when(step > 0)
    def _():
        sx_ref[OFF:SLAB_PAD, :] = sx_ref[T + OFF:T + SLAB_PAD, :]
        sy_ref[OFF:SLAB_PAD, :] = sy_ref[T + OFF:T + SLAB_PAD, :]

    # 8-aligned tile store into the slab (no masked vst.msk)
    sx_ref[SLAB_PAD:, :] = xb
    sy_ref[SLAB_PAD:, :] = yb

    def fold_rows(a):             # (T, W) -> (8, W) (or (1, W)) element-wise partials
        if T % 8 == 0:
            return jnp.sum(a.reshape(T // 8, 8, W), axis=0)
        return jnp.sum(a, axis=0, keepdims=True)

    def accumulate(acc_ref, part):
        if part.shape[0] == 8:
            acc_ref[...] += part
        else:
            acc_ref[0:1, :] += part

    # ---- MSE partial (vector accumulator; no per-step cross-lane reduce) ----
    d = xb - yb
    accumulate(sse_ref, fold_rows(d * d))

    slab_x = sx_ref[...]          # (T+8, W) pred slab
    slab_y = sy_ref[...]          # (T+8, W) gt slab
    band = band_ref[...]          # (W, W) banded ones (cols >= Wv zeroed)

    def window_sums(p):
        # 7-tap row (sublane) sum via a 1+2+4 tree over slab rows OFF..OFF+T+5
        u1 = p[OFF:OFF + T + 5, :] + p[OFF + 1:OFF + T + 6, :]
        u2 = u1[0:T + 3, :] + u1[2:T + 5, :]
        r = u2[0:T, :] + u1[4:T + 4, :] + p[OFF + 6:OFF + T + 6, :]   # (T, W)
        # 7-tap column (lane) sum on the otherwise idle MXU
        return jnp.dot(r, band, preferred_element_type=jnp.float32,
                       precision=jax.lax.Precision.HIGHEST)           # (T, W)

    sum_gt = window_sums(slab_y)
    sum_pr = window_sums(slab_x)
    sum_gt2 = window_sums(slab_y * slab_y)
    sum_pr2 = window_sums(slab_x * slab_x)
    sum_gp = window_sums(slab_y * slab_x)

    # ---- scaled SSIM map (identical ratio to skimage's formula) -------------
    # ux = sum_gt/49 etc.; the /49 and the 49/48 covariance factor are folded
    # into c1s = C1*49^2 and c2s = C2*48*49 (computed in the wrapper).
    P = sum_gt * sum_pr
    Q = sum_gt * sum_gt + sum_pr * sum_pr
    A1 = 2.0 * P + c1s
    B1 = Q + c1s
    A2 = 2.0 * (float(NPW) * sum_gp - P) + c2s
    B2 = float(NPW) * (sum_gt2 + sum_pr2) - Q + c2s

    den = B1 * B2
    inv = pl.reciprocal(den, approx=True)      # EUP slot
    inv = inv * (2.0 - den * inv)              # one Newton step -> ~exact f32
    S = (A1 * A2) * inv                        # (T, W); cols >= Wv are dummies

    col_valid = jax.lax.broadcasted_iota(jnp.int32, (1, W), 1) < Wv
    accumulate(ssum_ref, jnp.where(col_valid, fold_rows(S), 0.0))

    # first tile of core 0: the top 6 window rows hang above the image -> remove
    @pl.when(jnp.logical_and(core == 0, step == 0))
    def _():
        top = jnp.sum(S[0:HALO, :], axis=0, keepdims=True)            # (1, W)
        ssum_ref[0:1, :] -= jnp.where(col_valid, top, 0.0)

    # ---- finalize: one cross-lane/sublane reduce per core --------------------
    @pl.when(step == nsteps - 1)
    def _():
        sse_out_ref[...] = jnp.sum(sse_ref[...], keepdims=True)
        ssum_out_ref[...] = jnp.sum(ssum_ref[...], keepdims=True)


def _pick_tiling(H, W, tile_h=None, ncores=None):
    """Choose (num cores, tile_h, vmem_limit) with a generation-aware VMEM budget."""
    try:
        vmem_cap = pltpu.get_tpu_info().vmem_capacity_bytes
    except Exception:
        vmem_cap = 128 * 1024 * 1024
    if vmem_cap >= 100 * (1 << 20):          # v5e / v6e: 128 MiB physical VMEM
        budget, vmem_limit = 24 << 20, 64 << 20
    else:                                     # v7x: 64 MiB per TensorCore
        budget, vmem_limit = 12 << 20, 40 << 20
    # ~28 live f32 (row, W) planes per tile row: 2x double-buffered inputs,
    # two slabs, per-plane tree temporaries, 5 window sums, SSIM temporaries.
    cap = max(8, budget // (28 * 4 * W))

    def best_tile(rows):
        if tile_h is not None:
            ok = rows % tile_h == 0 and (tile_h % 8 == 0 or tile_h == rows)
            return tile_h if ok else None
        t = (min(rows, cap) // 8) * 8
        while t >= 8:
            if rows % t == 0:
                return t
            t -= 8
        return None

    for nc in ([ncores] if ncores is not None else [2, 1]):
        if nc < 1 or H % nc != 0:
            continue
        t = best_tile(H // nc)
        if t is not None:
            return nc, t, vmem_limit
    # TODO(synk): support a ragged (masked) last tile for heights with no
    # multiple-of-8 divisor instead of falling back to one full-image tile.
    return 1, H, vmem_limit


def custom_loss(depth_pred, depth_gt, tile_h=None, ncores=None):
    """depth_pred, depth_gt: (H, W) float32 depth maps. Returns scalar float32 loss."""
    pred = depth_pred.astype(jnp.float32)
    gt = depth_gt.astype(jnp.float32)
    assert pred.shape == gt.shape and pred.ndim == 2
    H, W = pred.shape
    assert H >= WIN and W >= WIN, "images must be at least 7x7 for SSIM"

    nc, T, vmem_limit = _pick_tiling(H, W, tile_h, ncores)
    rows_per_core = H // nc
    n_inner = rows_per_core // T
    Wv = W - HALO

    # data_range = pred.max() - pred.min(), exactly as the torch code — a cheap
    # global XLA reduce so C1/C2 are available to every tile as SMEM scalars.
    data_range = jnp.max(pred) - jnp.min(pred)
    c1s = (K1 * data_range) ** 2 * float(NPW * NPW)           # C1 * 49^2
    c2s = (K2 * data_range) ** 2 * float((NPW - 1) * NPW)     # C2 * 48*49
    consts = jnp.stack([c1s, c2s]).astype(jnp.float32)        # scalar-prefetch (SMEM)

    # banded ones matrix: out column j sums input columns j..j+6 (zero beyond Wv)
    ii = jnp.arange(W, dtype=jnp.int32).reshape(W, 1)
    jj = jnp.arange(W, dtype=jnp.int32).reshape(1, W)
    band = ((jj <= ii) & (ii <= jj + HALO) & (jj < Wv)).astype(jnp.float32)

    # per-core top halo, 8-row aligned block: rows 0..1 zero, rows 2..7 = the 6
    # image rows above the core's first tile (zeros for core 0).
    halo_pred = jnp.zeros((nc, SLAB_PAD, W), jnp.float32)
    halo_gt = jnp.zeros((nc, SLAB_PAD, W), jnp.float32)
    for c in range(1, nc):
        r0 = c * rows_per_core
        halo_pred = halo_pred.at[c, OFF:, :].set(pred[r0 - HALO:r0, :])
        halo_gt = halo_gt.at[c, OFF:, :].set(gt[r0 - HALO:r0, :])

    sse_parts, ssum_parts = pl.pallas_call(
        _custom_loss_kernel,
        out_shape=(jax.ShapeDtypeStruct((nc, 1, 1), jnp.float32),
                   jax.ShapeDtypeStruct((nc, 1, 1), jnp.float32)),
        grid_spec=pltpu.PrefetchScalarGridSpec(
            num_scalar_prefetch=1,
            grid=(nc, n_inner),
            in_specs=[
                pl.BlockSpec((None, SLAB_PAD, W), lambda c, i, k: (c, 0, 0)),  # halo pred
                pl.BlockSpec((None, SLAB_PAD, W), lambda c, i, k: (c, 0, 0)),  # halo gt
                pl.BlockSpec((T, W), lambda c, i, k: (c * n_inner + i, 0)),    # pred tile
                pl.BlockSpec((T, W), lambda c, i, k: (c * n_inner + i, 0)),    # gt tile
                pl.BlockSpec((W, W), lambda c, i, k: (0, 0)),                  # band (resident)
            ],
            out_specs=[
                pl.BlockSpec((None, 1, 1), lambda c, i, k: (c, 0, 0)),         # sse partial
                pl.BlockSpec((None, 1, 1), lambda c, i, k: (c, 0, 0)),         # ssim partial
            ],
            scratch_shapes=[
                pltpu.VMEM((T + SLAB_PAD, W), jnp.float32),   # pred slab (carried halo)
                pltpu.VMEM((T + SLAB_PAD, W), jnp.float32),   # gt   slab (carried halo)
                pltpu.VMEM((8, W), jnp.float32),              # running sum((pred-gt)^2)
                pltpu.VMEM((8, W), jnp.float32),              # running sum(SSIM map)
            ]),
        compiler_params=pltpu.CompilerParams(
            # leading axis "parallel": sharded across the 2 TensorCores on v7x;
            # inner axis sequential (carried halo + accumulators in scratch).
            dimension_semantics=("parallel", "arbitrary"),
            vmem_limit_bytes=vmem_limit),
    )(consts, halo_pred, halo_gt, pred, gt, band)

    mse = jnp.sum(sse_parts) / (H * W)
    mssim = jnp.sum(ssum_parts) / ((H - HALO) * (W - HALO))
    return mse * jnp.exp(1.0 - mssim)


# ---- pure-JAX reference (skimage math, no Pallas) for the sanity check -------
def _reference_loss(pred, gt):
    pred = pred.astype(jnp.float32)
    gt = gt.astype(jnp.float32)
    H, W = pred.shape
    mse = jnp.mean((pred - gt) ** 2)
    data_range = jnp.max(pred) - jnp.min(pred)
    Hv, Wv = H - WIN + 1, W - WIN + 1
    cov_norm = NPW / (NPW - 1.0)

    def win_mean(a):
        r = sum(a[k:k + Hv, :] for k in range(WIN))
        c = sum(r[:, k:k + Wv] for k in range(WIN))
        return c / float(NPW)

    ux, uy = win_mean(gt), win_mean(pred)
    uxx, uyy, uxy = win_mean(gt * gt), win_mean(pred * pred), win_mean(gt * pred)
    vx = cov_norm * (uxx - ux * ux)
    vy = cov_norm * (uyy - uy * uy)
    vxy = cov_norm * (uxy - ux * uy)
    C1 = (K1 * data_range) ** 2
    C2 = (K2 * data_range) ** 2
    S = ((2 * ux * uy + C1) * (2 * vxy + C2)) / ((ux * ux + uy * uy + C1) * (vx + vy + C2))
    mssim = jnp.mean(S)
    return mse * jnp.exp(1.0 - mssim)


if __name__ == "__main__":
    key = jax.random.PRNGKey(0)
    k1, k2 = jax.random.split(key)
    H, W = 128, 256          # small single-channel depth maps, lane-dense width
    depth_gt = jax.random.uniform(k1, (H, W), dtype=jnp.float32)
    depth_pred = depth_gt + 0.1 * jax.random.normal(k2, (H, W), dtype=jnp.float32)

    # 2-core split, 2 tiles per core: exercises HBM halo + carried halo + accumulators
    loss_split = custom_loss(depth_pred, depth_gt, tile_h=32)
    # single-core, 4-tile path
    loss_single = custom_loss(depth_pred, depth_gt, tile_h=32, ncores=1)
    # auto-tiled path
    loss_auto = custom_loss(depth_pred, depth_gt)
    ref = _reference_loss(depth_pred, depth_gt)
    jax.block_until_ready((loss_split, loss_single, loss_auto, ref))

    assert jnp.allclose(loss_split, ref, rtol=5e-4, atol=1e-6), (loss_split, ref)
    assert jnp.allclose(loss_single, ref, rtol=5e-4, atol=1e-6), (loss_single, ref)
    assert jnp.allclose(loss_auto, ref, rtol=5e-4, atol=1e-6), (loss_auto, ref)
    print("KERNEL_OK")
</pallas_src>

<mosaic_0001>
module attributes {stable_mosaic.version = 11 : i64} {
  func.func @_custom_loss_kernel(%arg0: i32, %arg1: i32, %arg2: memref<2xf32, #tpu.memory_space<smem>>, %arg3: memref<1x8x256xf32, #tpu.memory_space<vmem>>, %arg4: memref<1x8x256xf32, #tpu.memory_space<vmem>>, %arg5: memref<32x256xf32, #tpu.memory_space<vmem>>, %arg6: memref<32x256xf32, #tpu.memory_space<vmem>>, %arg7: memref<256x256xf32, #tpu.memory_space<vmem>>, %arg8: memref<1x1x1xf32, #tpu.memory_space<vmem>>, %arg9: memref<1x1x1xf32, #tpu.memory_space<vmem>>, %arg10: memref<40x256xf32, #tpu.memory_space<vmem>>, %arg11: memref<40x256xf32, #tpu.memory_space<vmem>>, %arg12: memref<8x256xf32, #tpu.memory_space<vmem>>, %arg13: memref<8x256xf32, #tpu.memory_space<vmem>>) attributes {dimension_semantics = [#tpu.dimension_semantics<parallel>, #tpu.dimension_semantics<arbitrary>], iteration_bounds = array<i64: 2, 2>, scalar_prefetch = 1 : i64, scratch_operands = 4 : i64, tpu.core_type = #tpu.core_type<tc>, window_params = [{transform_indices = @transform_0, window_bounds = array<i64: 1, 8, 256>}, {transform_indices = @transform_1, window_bounds = array<i64: 1, 8, 256>}, {transform_indices = @transform_2, window_bounds = array<i64: 32, 256>}, {transform_indices = @transform_3, window_bounds = array<i64: 32, 256>}, {pipeline_mode = #tpu.pipeline_mode<synchronous>, transform_indices = @transform_4, window_bounds = array<i64: 256, 256>}, {transform_indices = @transform_5, window_bounds = array<i64: 1, 1, 1>}, {transform_indices = @transform_6, window_bounds = array<i64: 1, 1, 1>}]} {
    %c0 = arith.constant 0 : index
    %0 = memref.load %arg2[%c0] : memref<2xf32, #tpu.memory_space<smem>>
    %c1 = arith.constant 1 : index
    %1 = memref.load %arg2[%c1] : memref<2xf32, #tpu.memory_space<smem>>
    %c0_0 = arith.constant 0 : index
    %c0_1 = arith.constant 0 : index
    %2 = vector.load %arg5[%c0_0, %c0_1] : memref<32x256xf32, #tpu.memory_space<vmem>>, vector<32x256xf32>
    %c0_2 = arith.constant 0 : index
    %c0_3 = arith.constant 0 : index
    %3 = vector.load %arg6[%c0_2, %c0_3] : memref<32x256xf32, #tpu.memory_space<vmem>>, vector<32x256xf32>
    %c0_i32 = arith.constant 0 : i32
    %4 = arith.cmpi eq, %arg1, %c0_i32 : i32
    %5 = arith.extui %4 : i1 to i32
    %c0_i32_4 = arith.constant 0 : i32
    %6 = arith.cmpi ne, %5, %c0_i32_4 : i32
    scf.if %6 {
      %cst_40 = arith.constant 0.000000e+00 : f32
      %136 = vector.broadcast %cst_40 : f32 to vector<8x256xf32>
      %c0_41 = arith.constant 0 : index
      %c0_42 = arith.constant 0 : index
      %137 = vector.load %arg12[%c0_41, %c0_42] : memref<8x256xf32, #tpu.memory_space<vmem>>, vector<8x256xf32>
      tpu.vector_store %arg12[%c0_41, %c0_42], %136 {strides = array<i32>} : memref<8x256xf32, #tpu.memory_space<vmem>>, vector<8x256xf32>,
      %cst_43 = arith.constant 0.000000e+00 : f32
      %138 = vector.broadcast %cst_43 : f32 to vector<8x256xf32>
      %c0_44 = arith.constant 0 : index
      %c0_45 = arith.constant 0 : index
      %139 = vector.load %arg13[%c0_44, %c0_45] : memref<8x256xf32, #tpu.memory_space<vmem>>, vector<8x256xf32>
      tpu.vector_store %arg13[%c0_44, %c0_45], %138 {strides = array<i32>} : memref<8x256xf32, #tpu.memory_space<vmem>>, vector<8x256xf32>,
      %c0_46 = arith.constant 0 : index
      %c0_47 = arith.constant 0 : index
      %c0_48 = arith.constant 0 : index
      %140 = vector.load %arg3[%c0_46, %c0_47, %c0_48] : memref<1x8x256xf32, #tpu.memory_space<vmem>>, vector<1x8x256xf32>
      %141 = vector.shape_cast %140 : vector<1x8x256xf32> to vector<8x256xf32>
      %c0_49 = arith.constant 0 : index
      %c0_50 = arith.constant 0 : index
      %142 = vector.load %arg10[%c0_49, %c0_50] : memref<40x256xf32, #tpu.memory_space<vmem>>, vector<8x256xf32>
      tpu.vector_store %arg10[%c0_49, %c0_50], %141 {strides = array<i32>} : memref<40x256xf32, #tpu.memory_space<vmem>>, vector<8x256xf32>,
      %c0_51 = arith.constant 0 : index
      %c0_52 = arith.constant 0 : index
      %c0_53 = arith.constant 0 : index
      %143 = vector.load %arg4[%c0_51, %c0_52, %c0_53] : memref<1x8x256xf32, #tpu.memory_space<vmem>>, vector<1x8x256xf32>
      %144 = vector.shape_cast %143 : vector<1x8x256xf32> to vector<8x256xf32>
      %c0_54 = arith.constant 0 : index
      %c0_55 = arith.constant 0 : index
      %145 = vector.load %arg11[%c0_54, %c0_55] : memref<40x256xf32, #tpu.memory_space<vmem>>, vector<8x256xf32>
      tpu.vector_store %arg11[%c0_54, %c0_55], %144 {strides = array<i32>} : memref<40x256xf32, #tpu.memory_space<vmem>>, vector<8x256xf32>,
    } else {
    }
    %c0_i32_5 = arith.constant 0 : i32
    %7 = arith.cmpi sgt, %arg1, %c0_i32_5 : i32
    %8 = arith.extui %7 : i1 to i32
    %c0_i32_6 = arith.constant 0 : i32
    %9 = arith.cmpi ne, %8, %c0_i32_6 : i32
    scf.if %9 {
      %c34 = arith.constant 34 : index
      %c0_40 = arith.constant 0 : index
      %136 = vector.load %arg10[%c34, %c0_40] : memref<40x256xf32, #tpu.memory_space<vmem>>, vector<6x256xf32>
      %c2 = arith.constant 2 : index
      %c0_41 = arith.constant 0 : index
      %137 = vector.load %arg10[%c2, %c0_41] : memref<40x256xf32, #tpu.memory_space<vmem>>, vector<6x256xf32>
      tpu.vector_store %arg10[%c2, %c0_41], %136 {strides = array<i32>} : memref<40x256xf32, #tpu.memory_space<vmem>>, vector<6x256xf32>,
      %c34_42 = arith.constant 34 : index
      %c0_43 = arith.constant 0 : index
      %138 = vector.load %arg11[%c34_42, %c0_43] : memref<40x256xf32, #tpu.memory_space<vmem>>, vector<6x256xf32>
      %c2_44 = arith.constant 2 : index
      %c0_45 = arith.constant 0 : index
      %139 = vector.load %arg11[%c2_44, %c0_45] : memref<40x256xf32, #tpu.memory_space<vmem>>, vector<6x256xf32>
      tpu.vector_store %arg11[%c2_44, %c0_45], %138 {strides = array<i32>} : memref<40x256xf32, #tpu.memory_space<vmem>>, vector<6x256xf32>,
    } else {
    }
    %c8 = arith.constant 8 : index
    %c0_7 = arith.constant 0 : index
    %10 = vector.load %arg10[%c8, %c0_7] : memref<40x256xf32, #tpu.memory_space<vmem>>, vector<32x256xf32>
    tpu.vector_store %arg10[%c8, %c0_7], %2 {strides = array<i32>} : memref<40x256xf32, #tpu.memory_space<vmem>>, vector<32x256xf32>,
    %c8_8 = arith.constant 8 : index
    %c0_9 = arith.constant 0 : index
    %11 = vector.load %arg11[%c8_8, %c0_9] : memref<40x256xf32, #tpu.memory_space<vmem>>, vector<32x256xf32>
    tpu.vector_store %arg11[%c8_8, %c0_9], %3 {strides = array<i32>} : memref<40x256xf32, #tpu.memory_space<vmem>>, vector<32x256xf32>,
    %12 = arith.subf %2, %3 : vector<32x256xf32>
    %13 = arith.mulf %12, %12 : vector<32x256xf32>
    %14 = vector.shape_cast %13 : vector<32x256xf32> to vector<4x8x256xf32>
    %cst = arith.constant dense<0.000000e+00> : vector<8x256xf32>
    %15 = vector.multi_reduction <add>, %14, %cst [0] : vector<4x8x256xf32> to vector<8x256xf32>
    %c0_10 = arith.constant 0 : index
    %c0_11 = arith.constant 0 : index
    %16 = vector.load %arg12[%c0_10, %c0_11] : memref<8x256xf32, #tpu.memory_space<vmem>>, vector<8x256xf32>
    %17 = arith.addf %16, %15 : vector<8x256xf32>
    %c0_12 = arith.constant 0 : index
    %c0_13 = arith.constant 0 : index
    %18 = vector.load %arg12[%c0_12, %c0_13] : memref<8x256xf32, #tpu.memory_space<vmem>>, vector<8x256xf32>
    tpu.vector_store %arg12[%c0_12, %c0_13], %17 {strides = array<i32>} : memref<8x256xf32, #tpu.memory_space<vmem>>, vector<8x256xf32>,
    %c0_14 = arith.constant 0 : index
    %c0_15 = arith.constant 0 : index
    %19 = vector.load %arg10[%c0_14, %c0_15] : memref<40x256xf32, #tpu.memory_space<vmem>>, vector<40x256xf32>
    %c0_16 = arith.constant 0 : index
    %c0_17 = arith.constant 0 : index
    %20 = vector.load %arg11[%c0_16, %c0_17] : memref<40x256xf32, #tpu.memory_space<vmem>>, vector<40x256xf32>
    %c0_18 = arith.constant 0 : index
    %c0_19 = arith.constant 0 : index
    %21 = vector.load %arg7[%c0_18, %c0_19] : memref<256x256xf32, #tpu.memory_space<vmem>>, vector<256x256xf32>
    %22 = vector.extract_strided_slice %20 {offsets = [2, 0], sizes = [37, 256], strides = [1, 1]} : vector<40x256xf32> to vector<37x256xf32>
    %23 = vector.extract_strided_slice %20 {offsets = [3, 0], sizes = [37, 256], strides = [1, 1]} : vector<40x256xf32> to vector<37x256xf32>
    %24 = arith.addf %22, %23 : vector<37x256xf32>
    %25 = vector.extract_strided_slice %24 {offsets = [0, 0], sizes = [35, 256], strides = [1, 1]} : vector<37x256xf32> to vector<35x256xf32>
    %26 = vector.extract_strided_slice %24 {offsets = [2, 0], sizes = [35, 256], strides = [1, 1]} : vector<37x256xf32> to vector<35x256xf32>
    %27 = arith.addf %25, %26 : vector<35x256xf32>
    %28 = vector.extract_strided_slice %27 {offsets = [0, 0], sizes = [32, 256], strides = [1, 1]} : vector<35x256xf32> to vector<32x256xf32>
    %29 = vector.extract_strided_slice %24 {offsets = [4, 0], sizes = [32, 256], strides = [1, 1]} : vector<37x256xf32> to vector<32x256xf32>
    %30 = arith.addf %28, %29 : vector<32x256xf32>
    %31 = vector.extract_strided_slice %20 {offsets = [8, 0], sizes = [32, 256], strides = [1, 1]} : vector<40x256xf32> to vector<32x256xf32>
    %32 = arith.addf %30, %31 : vector<32x256xf32>
    %cst_20 = arith.constant dense<0.000000e+00> : vector<32x256xf32>
    %33 = tpu.matmul %32, %21, %cst_20 {dimension_numbers = #tpu.dot_dimension_numbers<[1], [0], [0], [1], [0, 0, 1, 1], [], []>, precision = #tpu.contract_precision<fp32>} : vector<32x256xf32>, vector<256x256xf32>, vector<32x256xf32> -> vector<32x256xf32>
    %34 = vector.extract_strided_slice %19 {offsets = [2, 0], sizes = [37, 256], strides = [1, 1]} : vector<40x256xf32> to vector<37x256xf32>
    %35 = vector.extract_strided_slice %19 {offsets = [3, 0], sizes = [37, 256], strides = [1, 1]} : vector<40x256xf32> to vector<37x256xf32>
    %36 = arith.addf %34, %35 : vector<37x256xf32>
    %37 = vector.extract_strided_slice %36 {offsets = [0, 0], sizes = [35, 256], strides = [1, 1]} : vector<37x256xf32> to vector<35x256xf32>
    %38 = vector.extract_strided_slice %36 {offsets = [2, 0], sizes = [35, 256], strides = [1, 1]} : vector<37x256xf32> to vector<35x256xf32>
    %39 = arith.addf %37, %38 : vector<35x256xf32>
    %40 = vector.extract_strided_slice %39 {offsets = [0, 0], sizes = [32, 256], strides = [1, 1]} : vector<35x256xf32> to vector<32x256xf32>
    %41 = vector.extract_strided_slice %36 {offsets = [4, 0], sizes = [32, 256], strides = [1, 1]} : vector<37x256xf32> to vector<32x256xf32>
    %42 = arith.addf %40, %41 : vector<32x256xf32>
    %43 = vector.extract_strided_slice %19 {offsets = [8, 0], sizes = [32, 256], strides = [1, 1]} : vector<40x256xf32> to vector<32x256xf32>
    %44 = arith.addf %42, %43 : vector<32x256xf32>
    %cst_21 = arith.constant dense<0.000000e+00> : vector<32x256xf32>
    %45 = tpu.matmul %44, %21, %cst_21 {dimension_numbers = #tpu.dot_dimension_numbers<[1], [0], [0], [1], [0, 0, 1, 1], [], []>, precision = #tpu.contract_precision<fp32>} : vector<32x256xf32>, vector<256x256xf32>, vector<32x256xf32> -> vector<32x256xf32>
    %46 = arith.mulf %20, %20 : vector<40x256xf32>
    %47 = vector.extract_strided_slice %46 {offsets = [2, 0], sizes = [37, 256], strides = [1, 1]} : vector<40x256xf32> to vector<37x256xf32>
    %48 = vector.extract_strided_slice %46 {offsets = [3, 0], sizes = [37, 256], strides = [1, 1]} : vector<40x256xf32> to vector<37x256xf32>
    %49 = arith.addf %47, %48 : vector<37x256xf32>
    %50 = vector.extract_strided_slice %49 {offsets = [0, 0], sizes = [35, 256], strides = [1, 1]} : vector<37x256xf32> to vector<35x256xf32>
    %51 = vector.extract_strided_slice %49 {offsets = [2, 0], sizes = [35, 256], strides = [1, 1]} : vector<37x256xf32> to vector<35x256xf32>
    %52 = arith.addf %50, %51 : vector<35x256xf32>
    %53 = vector.extract_strided_slice %52 {offsets = [0, 0], sizes = [32, 256], strides = [1, 1]} : vector<35x256xf32> to vector<32x256xf32>
    %54 = vector.extract_strided_slice %49 {offsets = [4, 0], sizes = [32, 256], strides = [1, 1]} : vector<37x256xf32> to vector<32x256xf32>
    %55 = arith.addf %53, %54 : vector<32x256xf32>
    %56 = vector.extract_strided_slice %46 {offsets = [8, 0], sizes = [32, 256], strides = [1, 1]} : vector<40x256xf32> to vector<32x256xf32>
    %57 = arith.addf %55, %56 : vector<32x256xf32>
    %cst_22 = arith.constant dense<0.000000e+00> : vector<32x256xf32>
    %58 = tpu.matmul %57, %21, %cst_22 {dimension_numbers = #tpu.dot_dimension_numbers<[1], [0], [0], [1], [0, 0, 1, 1], [], []>, precision = #tpu.contract_precision<fp32>} : vector<32x256xf32>, vector<256x256xf32>, vector<32x256xf32> -> vector<32x256xf32>
    %59 = arith.mulf %19, %19 : vector<40x256xf32>
    %60 = vector.extract_strided_slice %59 {offsets = [2, 0], sizes = [37, 256], strides = [1, 1]} : vector<40x256xf32> to vector<37x256xf32>
    %61 = vector.extract_strided_slice %59 {offsets = [3, 0], sizes = [37, 256], strides = [1, 1]} : vector<40x256xf32> to vector<37x256xf32>
    %62 = arith.addf %60, %61 : vector<37x256xf32>
    %63 = vector.extract_strided_slice %62 {offsets = [0, 0], sizes = [35, 256], strides = [1, 1]} : vector<37x256xf32> to vector<35x256xf32>
    %64 = vector.extract_strided_slice %62 {offsets = [2, 0], sizes = [35, 256], strides = [1, 1]} : vector<37x256xf32> to vector<35x256xf32>
    %65 = arith.addf %63, %64 : vector<35x256xf32>
    %66 = vector.extract_strided_slice %65 {offsets = [0, 0], sizes = [32, 256], strides = [1, 1]} : vector<35x256xf32> to vector<32x256xf32>
    %67 = vector.extract_strided_slice %62 {offsets = [4, 0], sizes = [32, 256], strides = [1, 1]} : vector<37x256xf32> to vector<32x256xf32>
    %68 = arith.addf %66, %67 : vector<32x256xf32>
    %69 = vector.extract_strided_slice %59 {offsets = [8, 0], sizes = [32, 256], strides = [1, 1]} : vector<40x256xf32> to vector<32x256xf32>
    %70 = arith.addf %68, %69 : vector<32x256xf32>
    %cst_23 = arith.constant dense<0.000000e+00> : vector<32x256xf32>
    %71 = tpu.matmul %70, %21, %cst_23 {dimension_numbers = #tpu.dot_dimension_numbers<[1], [0], [0], [1], [0, 0, 1, 1], [], []>, precision = #tpu.contract_precision<fp32>} : vector<32x256xf32>, vector<256x256xf32>, vector<32x256xf32> -> vector<32x256xf32>
    %72 = arith.mulf %20, %19 : vector<40x256xf32>
    %73 = vector.extract_strided_slice %72 {offsets = [2, 0], sizes = [37, 256], strides = [1, 1]} : vector<40x256xf32> to vector<37x256xf32>
    %74 = vector.extract_strided_slice %72 {offsets = [3, 0], sizes = [37, 256], strides = [1, 1]} : vector<40x256xf32> to vector<37x256xf32>
    %75 = arith.addf %73, %74 : vector<37x256xf32>
    %76 = vector.extract_strided_slice %75 {offsets = [0, 0], sizes = [35, 256], strides = [1, 1]} : vector<37x256xf32> to vector<35x256xf32>
    %77 = vector.extract_strided_slice %75 {offsets = [2, 0], sizes = [35, 256], strides = [1, 1]} : vector<37x256xf32> to vector<35x256xf32>
    %78 = arith.addf %76, %77 : vector<35x256xf32>
    %79 = vector.extract_strided_slice %78 {offsets = [0, 0], sizes = [32, 256], strides = [1, 1]} : vector<35x256xf32> to vector<32x256xf32>
    %80 = vector.extract_strided_slice %75 {offsets = [4, 0], sizes = [32, 256], strides = [1, 1]} : vector<37x256xf32> to vector<32x256xf32>
    %81 = arith.addf %79, %80 : vector<32x256xf32>
    %82 = vector.extract_strided_slice %72 {offsets = [8, 0], sizes = [32, 256], strides = [1, 1]} : vector<40x256xf32> to vector<32x256xf32>
    %83 = arith.addf %81, %82 : vector<32x256xf32>
    %cst_24 = arith.constant dense<0.000000e+00> : vector<32x256xf32>
    %84 = tpu.matmul %83, %21, %cst_24 {dimension_numbers = #tpu.dot_dimension_numbers<[1], [0], [0], [1], [0, 0, 1, 1], [], []>, precision = #tpu.contract_precision<fp32>} : vector<32x256xf32>, vector<256x256xf32>, vector<32x256xf32> -> vector<32x256xf32>
    %85 = arith.mulf %33, %45 : vector<32x256xf32>
    %86 = arith.mulf %33, %33 : vector<32x256xf32>
    %87 = arith.mulf %45, %45 : vector<32x256xf32>
    %88 = arith.addf %86, %87 : vector<32x256xf32>
    %cst_25 = arith.constant 2.000000e+00 : f32
    %89 = vector.broadcast %cst_25 : f32 to vector<32x256xf32>
    %90 = arith.mulf %89, %85 : vector<32x256xf32>
    %91 = vector.broadcast %0 : f32 to vector<32x256xf32>
    %92 = arith.addf %90, %91 : vector<32x256xf32>
    %93 = vector.broadcast %0 : f32 to vector<32x256xf32>
    %94 = arith.addf %88, %93 : vector<32x256xf32>
    %cst_26 = arith.constant 4.900000e+01 : f32
    %95 = vector.broadcast %cst_26 : f32 to vector<32x256xf32>
    %96 = arith.mulf %95, %84 : vector<32x256xf32>
    %97 = arith.subf %96, %85 : vector<32x256xf32>
    %cst_27 = arith.constant 2.000000e+00 : f32
    %98 = vector.broadcast %cst_27 : f32 to vector<32x256xf32>
    %99 = arith.mulf %98, %97 : vector<32x256xf32>
    %100 = vector.broadcast %1 : f32 to vector<32x256xf32>
    %101 = arith.addf %99, %100 : vector<32x256xf32>
    %102 = arith.addf %58, %71 : vector<32x256xf32>
    %cst_28 = arith.constant 4.900000e+01 : f32
    %103 = vector.broadcast %cst_28 : f32 to vector<32x256xf32>
    %104 = arith.mulf %103, %102 : vector<32x256xf32>
    %105 = arith.subf %104, %88 : vector<32x256xf32>
    %106 = vector.broadcast %1 : f32 to vector<32x256xf32>
    %107 = arith.addf %105, %106 : vector<32x256xf32>
    %108 = arith.mulf %94, %107 : vector<32x256xf32>
    %109 = tpu.reciprocal %108 {approx = true} : vector<32x256xf32> -> vector<32x256xf32>
    %110 = arith.mulf %108, %109 : vector<32x256xf32>
    %cst_29 = arith.constant 2.000000e+00 : f32
    %111 = vector.broadcast %cst_29 : f32 to vector<32x256xf32>
    %112 = arith.subf %111, %110 : vector<32x256xf32>
    %113 = arith.mulf %109, %112 : vector<32x256xf32>
    %114 = arith.mulf %92, %101 : vector<32x256xf32>
    %115 = arith.mulf %114, %113 : vector<32x256xf32>
    %116 = tpu.iota {dimensions = array<i32: 1>} : vector<1x256xi32>
    %c250_i32 = arith.constant 250 : i32
    %117 = vector.broadcast %c250_i32 : i32 to vector<1x256xi32>
    %118 = arith.cmpi slt, %116, %117 : vector<1x256xi32>
    %119 = vector.shape_cast %115 : vector<32x256xf32> to vector<4x8x256xf32>
    %cst_30 = arith.constant dense<0.000000e+00> : vector<8x256xf32>
    %120 = vector.multi_reduction <add>, %119, %cst_30 [0] : vector<4x8x256xf32> to vector<8x256xf32>
    %cst_31 = arith.constant 0.000000e+00 : f32
    %121 = vector.shape_cast %118 : vector<1x256xi1> to vector<1x256xi1>
    %122 = vector.broadcast %121 : vector<1x256xi1> to vector<8x256xi1>
    %123 = vector.broadcast %cst_31 : f32 to vector<8x256xf32>
    %124 = arith.select %122, %120, %123 : vector<8x256xi1>, vector<8x256xf32>
    %c0_32 = arith.constant 0 : index
    %c0_33 = arith.constant 0 : index
    %125 = vector.load %arg13[%c0_32, %c0_33] : memref<8x256xf32, #tpu.memory_space<vmem>>, vector<8x256xf32>
    %126 = arith.addf %125, %124 : vector<8x256xf32>
    %c0_34 = arith.constant 0 : index
    %c0_35 = arith.constant 0 : index
    %127 = vector.load %arg13[%c0_34, %c0_35] : memref<8x256xf32, #tpu.memory_space<vmem>>, vector<8x256xf32>
    tpu.vector_store %arg13[%c0_34, %c0_35], %126 {strides = array<i32>} : memref<8x256xf32, #tpu.memory_space<vmem>>, vector<8x256xf32>,
    %c0_i32_36 = arith.constant 0 : i32
    %128 = arith.cmpi eq, %arg0, %c0_i32_36 : i32
    %c0_i32_37 = arith.constant 0 : i32
    %129 = arith.cmpi eq, %arg1, %c0_i32_37 : i32
    %130 = arith.andi %128, %129 : i1
    %131 = arith.extui %130 : i1 to i32
    %c0_i32_38 = arith.constant 0 : i32
    %132 = arith.cmpi ne, %131, %c0_i32_38 : i32
    scf.if %132 {
      %136 = vector.extract_strided_slice %115 {offsets = [0, 0], sizes = [6, 256], strides = [1, 1]} : vector<32x256xf32> to vector<6x256xf32>
      %cst_40 = arith.constant dense<0.000000e+00> : vector<256xf32>
      %137 = vector.multi_reduction <add>, %136, %cst_40 [0] : vector<6x256xf32> to vector<256xf32>
      %138 = vector.shape_cast %137 : vector<256xf32> to vector<1x256xf32>
      %c0_41 = arith.constant 0 : index
      %c0_42 = arith.constant 0 : index
      %139 = vector.load %arg13[%c0_41, %c0_42] : memref<8x256xf32, #tpu.memory_space<vmem>>, vector<1x256xf32>
      %cst_43 = arith.constant 0.000000e+00 : f32
      %140 = vector.broadcast %cst_43 : f32 to vector<1x256xf32>
      %141 = arith.select %118, %138, %140 : vector<1x256xi1>, vector<1x256xf32>
      %142 = arith.subf %139, %141 : vector<1x256xf32>
      %c0_44 = arith.constant 0 : index
      %c0_45 = arith.constant 0 : index
      %143 = vector.load %arg13[%c0_44, %c0_45] : memref<8x256xf32, #tpu.memory_space<vmem>>, vector<1x256xf32>
      tpu.vector_store %arg13[%c0_44, %c0_45], %142 {strides = array<i32>} : memref<8x256xf32, #tpu.memory_space<vmem>>, vector<1x256xf32>,
    } else {
    }
    %c1_i32 = arith.constant 1 : i32
    %133 = arith.cmpi eq, %arg1, %c1_i32 : i32
    %134 = arith.extui %133 : i1 to i32
    %c0_i32_39 = arith.constant 0 : i32
    %135 = arith.cmpi ne, %134, %c0_i32_39 : i32
    scf.if %135 {
      %c0_40 = arith.constant 0 : index
      %c0_41 = arith.constant 0 : index
      %136 = vector.load %arg12[%c0_40, %c0_41] : memref<8x256xf32, #tpu.memory_space<vmem>>, vector<8x256xf32>
      %137 = vector.shape_cast %136 : vector<8x256xf32> to vector<1x8x256xf32>
      %cst_42 = arith.constant dense<0.000000e+00> : vector<1xf32>
      %138 = vector.multi_reduction <add>, %137, %cst_42 [1, 2] : vector<1x8x256xf32> to vector<1xf32>
      %139 = vector.shape_cast %138 : vector<1xf32> to vector<1x1x1xf32>
      %140 = vector.extract %139[0, 0, 0] : f32 from vector<1x1x1xf32>
      %141 = vector.broadcast %140 : f32 to vector<1x1xf32>
      %c0_43 = arith.constant 0 : index
      %c0_44 = arith.constant 0 : index
      %c0_45 = arith.constant 0 : index
      %142 = vector.load %arg8[%c0_43, %c0_44, %c0_45] : memref<1x1x1xf32, #tpu.memory_space<vmem>>, vector<1x1x1xf32>
      %143 = vector.shape_cast %142 : vector<1x1x1xf32> to vector<1x1xf32>
      %144 = vector.shape_cast %141 : vector<1x1xf32> to vector<1x1x1xf32>
      tpu.vector_store %arg8[%c0_43, %c0_44, %c0_45], %144 {strides = array<i32>} : memref<1x1x1xf32, #tpu.memory_space<vmem>>, vector<1x1x1xf32>,
      %c0_46 = arith.constant 0 : index
      %c0_47 = arith.constant 0 : index
      %145 = vector.load %arg13[%c0_46, %c0_47] : memref<8x256xf32, #tpu.memory_space<vmem>>, vector<8x256xf32>
      %146 = vector.shape_cast %145 : vector<8x256xf32> to vector<1x8x256xf32>
      %cst_48 = arith.constant dense<0.000000e+00> : vector<1xf32>
      %147 = vector.multi_reduction <add>, %146, %cst_48 [1, 2] : vector<1x8x256xf32> to vector<1xf32>
      %148 = vector.shape_cast %147 : vector<1xf32> to vector<1x1x1xf32>
      %149 = vector.extract %148[0, 0, 0] : f32 from vector<1x1x1xf32>
      %150 = vector.broadcast %149 : f32 to vector<1x1xf32>
      %c0_49 = arith.constant 0 : index
      %c0_50 = arith.constant 0 : index
      %c0_51 = arith.constant 0 : index
      %151 = vector.load %arg9[%c0_49, %c0_50, %c0_51] : memref<1x1x1xf32, #tpu.memory_space<vmem>>, vector<1x1x1xf32>
      %152 = vector.shape_cast %151 : vector<1x1x1xf32> to vector<1x1xf32>
      %153 = vector.shape_cast %150 : vector<1x1xf32> to vector<1x1x1xf32>
      tpu.vector_store %arg9[%c0_49, %c0_50, %c0_51], %153 {strides = array<i32>} : memref<1x1x1xf32, #tpu.memory_space<vmem>>, vector<1x1x1xf32>,
    } else {
    }
    return
  }
  func.func @transform_0(%arg0: i32, %arg1: i32, %arg2: memref<2xf32, #tpu.memory_space<smem>>) -> (i32, i32, i32) {
    %c0_i32 = arith.constant 0 : i32
    %c0_i32_0 = arith.constant 0 : i32
    %c0_i32_1 = arith.constant 0 : i32
    return %arg0, %c0_i32, %c0_i32_0 : i32, i32, i32
  }
  func.func @transform_1(%arg0: i32, %arg1: i32, %arg2: memref<2xf32, #tpu.memory_space<smem>>) -> (i32, i32, i32) {
    %c0_i32 = arith.constant 0 : i32
    %c0_i32_0 = arith.constant 0 : i32
    %c0_i32_1 = arith.constant 0 : i32
    return %arg0, %c0_i32, %c0_i32_0 : i32, i32, i32
  }
  func.func @transform_2(%arg0: i32, %arg1: i32, %arg2: memref<2xf32, #tpu.memory_space<smem>>) -> (i32, i32) {
    %c2_i32 = arith.constant 2 : i32
    %0 = arith.muli %arg0, %c2_i32 : i32
    %1 = arith.addi %0, %arg1 : i32
    %c0_i32 = arith.constant 0 : i32
    %c0_i32_0 = arith.constant 0 : i32
    return %1, %c0_i32 : i32, i32
  }
  func.func @transform_3(%arg0: i32, %arg1: i32, %arg2: memref<2xf32, #tpu.memory_space<smem>>) -> (i32, i32) {
    %c2_i32 = arith.constant 2 : i32
    %0 = arith.muli %arg0, %c2_i32 : i32
    %1 = arith.addi %0, %arg1 : i32
    %c0_i32 = arith.constant 0 : i32
    %c0_i32_0 = arith.constant 0 : i32
    return %1, %c0_i32 : i32, i32
  }
  func.func @transform_4(%arg0: i32, %arg1: i32, %arg2: memref<2xf32, #tpu.memory_space<smem>>) -> (i32, i32) {
    %c0_i32 = arith.constant 0 : i32
    %c0_i32_0 = arith.constant 0 : i32
    %c0_i32_1 = arith.constant 0 : i32
    return %c0_i32, %c0_i32_0 : i32, i32
  }
  func.func @transform_5(%arg0: i32, %arg1: i32, %arg2: memref<2xf32, #tpu.memory_space<smem>>) -> (i32, i32, i32) {
    %c0_i32 = arith.constant 0 : i32
    %c0_i32_0 = arith.constant 0 : i32
    %c0_i32_1 = arith.constant 0 : i32
    return %arg0, %c0_i32, %c0_i32_0 : i32, i32, i32
  }
  func.func @transform_6(%arg0: i32, %arg1: i32, %arg2: memref<2xf32, #tpu.memory_space<smem>>) -> (i32, i32, i32) {
    %c0_i32 = arith.constant 0 : i32
    %c0_i32_0 = arith.constant 0 : i32
    %c0_i32_1 = arith.constant 0 : i32
    return %arg0, %c0_i32, %c0_i32_0 : i32, i32, i32
  }
}

</mosaic_0001>

<bundles_post_ra>
// kernel: tpu_custom_call.1
= control target key start
LH: loop header
LB: loop body
LE: loop exit
PB: predicated region body
PF: predicated region fallthrough
CT: control target
= control target key end

     0   :  { %s9967_s24 = smov [#allocation7]   ;;  %s14986_s0 = inlined_call_operand.hbm [shape: f32[2], index: 0, kind: input, shape index: {}]   ;;  %s14987_s1 = inlined_call_operand.hbm [shape: f32[2,8,256], index: 1, kind: input, shape index: {}]   ;;  %s14988_s2 = inlined_call_operand.hbm [shape: f32[2,8,256], index: 2, kind: input, shape index: {}]   ;;  %s14989_s3 = inlined_call_operand.hbm [shape: f32[128,256], index: 3, kind: input, shape index: {}]   ;;  %s14990_s4 = inlined_call_operand.hbm [shape: f32[128,256], index: 4, kind: input, shape index: {}]   ;;  %s14991_s5 = inlined_call_operand.hbm [shape: f32[256,256], index: 5, kind: input, shape index: {}]   ;;  %s14992_s6 = inlined_call_operand.vmem [shape: f32[2,1,1], index: 6, kind: output, shape index: {0}]   ;;  %s14993_s7 = inlined_call_operand.vmem [shape: f32[2,1,1], index: 7, kind: output, shape index: {1}]  }
   0x1   :  { %15825 = sst [smem:[#allocation302_spill]] %s14987_s1 }
   0x2   :  { %15826 = sst [smem:[#allocation303_spill]] %s14988_s2 }
   0x3   :  { %15827 = sst [smem:[#allocation304_spill]] %s14989_s3 }
   0x4   :  { %15828 = sst [smem:[#allocation305_spill]] %s14991_s5 }
   0x5   :  { %15829 = sst [smem:[#allocation306_spill]] %s14992_s6 }
   0x6   :  { %15830 = sst [smem:[#allocation307_spill]] %s14993_s7 }
   0x7   :  { %14 = dma.hbm_to_smem %s14986_s0, 16, %s9967_s24, [#allocation6] }
   0x8   :  { %9901 = dma.done.wait [#allocation6], 16 }
   0x9   :  { %9902 = vsyncadd [#allocation6], 4294967280 }
   0xa   :  { %16 = sfence }
   0xb   :  { %17 = vsyncpa [#allocation9], 0 }
   0xc   :  { %19 = vsyncpa [#allocation9 + $0x1], 0 }
   0xd   :  { %20 = vsyncpa [#allocation11], 0 }
   0xe   :  { %22 = vsyncpa [#allocation11 + $0x1], 0 }
   0xf   :  { %23 = vsyncpa [#allocation14], 0 }
  0x10   :  { %25 = vsyncpa [#allocation14 + $0x1], 0  ;;  %s10020_s27 = smov 0   ;;  %s10022_s28 = smov 0  }
  0x11   :  { %s10024_s29 = smov 0   ;;  %s10026_s30 = smov 0  }
  0x12   :  { %s10028_s8 = smov 0   ;;  %s10030_s0 = smov 0  }
  0x13   :  { %s10032_s9 = smov 0   ;;  %s10034_s10 = smov 0  }
  0x14   :  { %s10036_s11 = smov 0   ;;  %s10038_s12 = smov 0  }
  0x15   :  { %s10040_s13 = smov 0  }
  0x16 LB: > { %15831 = sst [smem:[#allocation22_spill]] %s9929_s28  ;;  %s14994_s14 = sadd.s32 4294967295, %s9965_s13   ;;  %s9965_s13 = sphi %s10040_s13, %s31_s13   ;;  %s9961_s12 = sphi %s10038_s12, %s17671_s12   ;;  %s9957_s11 = sphi %s10036_s11, %s17670_s11   ;;  %s9953_s10 = sphi %s10034_s10, %s17669_s10   ;;  %s9949_s9 = sphi %s10032_s9, %s17668_s9   ;;  %s9945_s0 = sphi %s10030_s0, %s17667_s0   ;;  %s9941_s8 = sphi %s10028_s8, %s17666_s8   ;;  %s9937_s30 = sphi %s10026_s30, %s17665_s30   ;;  %s9933_s29 = sphi %s10024_s29, %s17664_s29   ;;  %s9929_s28 = sphi %s10022_s28, %s17663_s28   ;;  %s9925_s27 = sphi %s10020_s27, %s17662_s27  }
  0x17   : > { %15832 = sst [smem:[#allocation23_spill]] %s9949_s9  ;;  %p119_p0 = scmp.ne.s32.totalorder %s9929_s28, %s9925_s27 }
  0x18   : > { %15833 = sst [smem:[#allocation24_spill]] %s9953_s10  ;;  %p10077_p1 = scmp.eq.s32.totalorder %s14994_s14, 0 }
  0x19   : > { %p9472_p2 = scmp.ge.s32.totalorder %s9965_s13, 1  ;;  %p233_p3 = scmp.lt.s32.totalorder %s9965_s13, 5 }
  0x1a   : > { %s15834_s15 = scalar_select %p10077_p1, 1, 0 }
  0x1b   : > { %p10085_p4 = por %p119_p0, %p10077_p1  ;;  %p10089_p5 = pnand %p9472_p2, %p233_p3 }
  0x1c   : > { %15835 = sst [smem:[#allocation25_spill]] %s15834_s15  ;;  %s9968_s18 = smov [#allocation15]  }
  0x1d   : > { %s15836_s16 = scalar_select %p10085_p4, 1, 0 }
  0x1e   : > { %s245_s19 = sshll.u32 %s9968_s18, 4  ;;  %p9525_p6 = pneg %p10089_p5  ;;  %s246_s19 = int_to_ptr.vmem [resolvable:$true] %s245_s19 }
  0x1f   : > { %15837 = sst [smem:[#allocation26_spill]] %s15836_s16  ;;  %s9730_s20 = scalar_lea.vmem %s246_s19, 8192 }
  0x20   : > { %p9526_p7 = pnand %p9525_p6, %p10077_p1  ;;  %p9731_p9 = scmp.ne.s32.totalorder %s246_s19, %s9730_s20 }
  0x21   : > { %p9738_p12 = scmp.lt.s32.totalorder %s246_s19, %s246_s19  ;;  %p9739_p13 = scmp.lt.s32.totalorder %s9730_s20, %s9730_s20 }
  0x22   : > { %p9721_p8 = pneg %p9526_p7 }
  0x23   : > { %p9740_p0 = por %p9739_p13, %p9738_p12 }
  0x24   : > { %p9733_p10 = pnand %p9731_p9, %p9721_p8 }
  0x26   : > { %p9734_p11 = pneg %p9733_p10 }
  0x28   : > { %p9741_p2 = pnand %p9740_p0, %p9734_p11 }
  0x2a   : > { %9744 = shalt.err (!%p9741_p2)
}
  0x2b   : > { %s14995_s21 = smov 256   ;;  %s14997_s22 = smov 16  }
  0x2c   : > { %s15839_s5 = sld [smem:[#allocation305_spill]]  ;;  %s14999_s25 = sadd.s32 1, %s9957_s11 }
  0x2d   : > { %p10106_p3 = scmp.ge.s32.totalorder %s14999_s25, 2  ;;  %s43_s27 = sadd.s32 1, %s9961_s12 }
  0x2e   : > { %s50_s18 = sadd.s32 1, %s9945_s0  ;;  %p57_p6 = scmp.ne.s32.totalorder %s9945_s0, %s9941_s8 }
  0x2f   : > { %s17673_s27 = smov (!%p10106_p3, %s43_s27), %s9961_s12  ;;  %p58_p8 = scmp.eq.s32.totalorder %s9965_s13, 0 }
  0x30   : > { %p45_p9 = scmp.ge.s32.totalorder %s17673_s27, 2  ;;  %p113_p10 = scmp.ne.s32.totalorder %s9933_s29, %s9929_s28 }
  0x31   : > { %p59_p11 = por %p58_p8, %p57_p6  ;;  %p9543_p0 = scmp.lt.s32.totalorder %s9965_s13, 4 }
  0x32   : > { %9528 = dma.hbm_to_vmem [thread:$0]  (!%p9526_p7), %s15839_s5, 8192, %s246_s19, [#allocation14], %s14995_s21, %s14995_s21, %s14997_s22  }
  0x33   : > { %p63_p7 = scmp.ne.s32.totalorder %s9941_s8, %s9937_s30  ;;  %s17675_s27 = smov (%p45_p9, %s17673_s27), 0 }
  0x34   : > { %p10130_p13 = por %p113_p10, %p58_p8  ;;  %s47_s30 = ssub.s32 %s9961_s12, %s17675_s27 }
  0x35   : > { %p10124_p12 = por %p10077_p1, %p63_p7  ;;  %s15002_s23 = sand.u32 1, %s9945_s0  }
  0x36   : > { %p48_p2 = scmp.eq.s32.totalorder %s47_s30, 0  ;;  %s9475_s24 = sshll.u32 %s15002_s23, 4 }
  0x37   : > { %s9503_s14 = sshll.u32 %s9961_s12, 8  ;;  %p10143_p6 = pnand %p9543_p0, %p59_p11 }
  0x38   : > { %s10148_s22 = scalar_select %p48_p2, %s9945_s0, %s50_s18  }
  0x39   : > { %s15005_s25 = sand.u32 1, %s9965_s13   ;;  %s15845_s2 = sld [smem:[#allocation303_spill]] }
  0x3a   : > { %15844 = sst [smem:[#allocation27_spill]] %s10148_s22  ;;  %s282_s9 = scalar_lea.vmem [#allocation10], %s9475_s24 }
  0x3b   : > { %s290_s10 = sshll.u32 %s282_s9, 4  ;;  %p10158_p8 = pnand %p9543_p0, %p10130_p13  ;;  %s291_s10 = int_to_ptr.vmem [resolvable:$true] %s290_s10 }
  0x3c   : > { %s10164_s23 = scalar_lea.sflag [#allocation11], %s15005_s25  ;;  %p9747_p7 = pneg %p10143_p6 }
  0x3d   : > { %s9758_s18 = scalar_lea.vmem %s291_s10, 256  ;;  %s9971_s5 = smov [#allocation10]  }
  0x3e   : > { %p9759_p9 = scmp.ne.s32.totalorder %s291_s10, %s9758_s18  ;;  %s9763_s7 = sshll.u32 %s9971_s5, 4  ;;  %s9764_s7 = int_to_ptr.vmem [resolvable:$false] %s9763_s7 }
  0x3f   : > { %s288_s6 = scalar_lea.hbm %s15845_s2, %s9503_s14  ;;  %s9765_s9 = scalar_lea.vmem %s9764_s7, 512 }
  0x40   : > { %p9761_p10 = pnand %p9759_p9, %p9747_p7  ;;  %p9766_p2 = scmp.lt.s32.totalorder %s291_s10, %s9764_s7 }
  0x41   : > { %p9767_p13 = scmp.lt.s32.totalorder %s9765_s9, %s9758_s18 }
  0x42   : > { %p9762_p11 = pneg %p9761_p10 }
  0x43   : > { %p9768_p0 = por %p9767_p13, %p9766_p2 }
  0x45   : > { %p9769_p1 = pnand %p9768_p0, %p9762_p11 }
  0x47   : > { %9772 = shalt.err (!%p9769_p1)
}
  0x48   : > { %9535 = dma.hbm_to_vmem [thread:$0]  (!%p10143_p6), %s288_s6, 256, %s291_s10, %s10164_s23  }
  0x49   : > { %s15847_s1 = sld [smem:[#allocation302_spill]]  ;;  %s263_s22 = scalar_lea.vmem [#allocation8], %s9475_s24 }
  0x4a   : > { %s271_s5 = sshll.u32 %s263_s22, 4  ;;  %s9468_s15 = sshll.u32 %s9961_s12, 1  ;;  %s272_s5 = int_to_ptr.vmem [resolvable:$true] %s271_s5 }
  0x4b   : > { %s15848_s7 = sand.u32 1, %s9945_s0   ;;  %s9786_s9 = scalar_lea.vmem %s272_s5, 256 }
  0x4c   : > { %s260_s18 = scalar_lea.sflag [#allocation9], %s15848_s7  ;;  %p9787_p9 = scmp.ne.s32.totalorder %s272_s5, %s9786_s9 }
  0x4d   : > { %s9972_s16 = smov [#allocation8]  }
  0x4e   : > { %p9789_p1 = pnand %p9787_p9, %p9747_p7  ;;  %s9791_s28 = sshll.u32 %s9972_s16, 4  ;;  %s9792_s28 = int_to_ptr.vmem [resolvable:$false] %s9791_s28 }
  0x4f   : > { %s269_s2 = scalar_lea.hbm %s15847_s1, %s9503_s14  ;;  %s9793_s6 = scalar_lea.vmem %s9792_s28, 512 }
  0x50   : > { %p9790_p10 = pneg %p9789_p1  ;;  %p9794_p11 = scmp.lt.s32.totalorder %s272_s5, %s9792_s28 }
  0x51   : > { %p9795_p2 = scmp.lt.s32.totalorder %s9793_s6, %s9786_s9 }
  0x53   : > { %p9796_p13 = por %p9795_p2, %p9794_p11 }
  0x55   : > { %p9797_p0 = pnand %p9796_p13, %p9790_p10 }
  0x57   : > { %9800 = shalt.err (!%p9797_p0)
}
  0x58   : > { %9532 = dma.hbm_to_vmem [thread:$0]  (!%p10143_p6), %s269_s2, 256, %s272_s5, %s260_s18  }
  0x59   : > { %s15849_s10 = sadd.s32 1, %s9957_s11  ;;  %s10192_s28 = sadd.s32 %s9957_s11, %s9468_s15 }
  0x5a   : > { %s17677_s10 = smov (%p10106_p3, %s15849_s10), 0  ;;  %s9469_s14 = sshll.u32 %s17675_s27, 1 }
  0x5b   : > { %s102_s16 = sadd.s32 %s9469_s14, %s17677_s10  ;;  %s106_s21 = sadd.s32 1, %s9933_s29 }
  0x5c   : > { %s103_s22 = ssub.s32 %s10192_s28, %s102_s16  ;;  %s299_s25 = sand.u32 1, %s9933_s29  }
  0x5d   : > { %p104_p7 = scmp.eq.s32.totalorder %s103_s22, 0  ;;  %s9481_s24 = sshll.u32 %s299_s25, 6 }
  0x5e   : > { %s9506_s20 = sshll.u32 %s10192_s28, 10  ;;  %s15850_s3 = sld [smem:[#allocation304_spill]] }
  0x5f   : > { %s10201_s2 = scalar_select %p104_p7, %s9933_s29, %s106_s21  }
  0x60   : > { %s301_s18 = scalar_lea.vmem [#allocation12], %s9481_s24  ;;  %p9803_p3 = pneg %p10158_p8 }
  0x61   : > { %s311_s15 = sshll.u32 %s301_s18, 4  ;;  %s9973_s6 = smov [#allocation12]   ;;  %s312_s15 = int_to_ptr.vmem [resolvable:$true] %s311_s15 }
  0x62   : > { %s9814_s9 = scalar_lea.vmem %s312_s15, 1024  ;;  %s9819_s14 = sshll.u32 %s9973_s6, 4  ;;  %s9820_s14 = int_to_ptr.vmem [resolvable:$false] %s9819_s14 }
  0x63   : > { %p9815_p6 = scmp.ne.s32.totalorder %s312_s15, %s9814_s9  ;;  %s9821_s28 = scalar_lea.vmem %s9820_s14, 2048 }
  0x64   : > { %s310_s7 = scalar_lea.hbm %s15850_s3, %s9506_s20  ;;  %p9822_p10 = scmp.lt.s32.totalorder %s312_s15, %s9820_s14 }
  0x65   : > { %p9817_p9 = pnand %p9815_p6, %p9803_p3  ;;  %p9823_p11 = scmp.lt.s32.totalorder %s9821_s28, %s9814_s9 }
  0x67   : > { %p9818_p1 = pneg %p9817_p9  ;;  %p9824_p2 = por %p9823_p11, %p9822_p10 }
  0x69   : > { %p9825_p13 = pnand %p9824_p2, %p9818_p1 }
  0x6b   : > { %9828 = shalt.err (!%p9825_p13)
}
  0x6c   : > { %s15851_s16 = smov 16   ;;  %s15852_s21 = smov 256  }
  0x6d   : > { %9538 = dma.hbm_to_vmem [thread:$0]  (!%p10158_p8), %s310_s7, 1024, %s312_s15, %s10164_s23, %s15852_s21, %s15852_s21, %s15851_s16  }
  0x6e   : > { %s334_s26 = scalar_lea.hbm %s14990_s4, %s9506_s20  ;;  %s325_s5 = scalar_lea.vmem [#allocation13], %s9481_s24 }
  0x6f   : > { %s335_s18 = sshll.u32 %s325_s5, 4  ;;  %s15853_s9 = sand.u32 1, %s9965_s13   ;;  %s336_s18 = int_to_ptr.vmem [resolvable:$true] %s335_s18 }
  0x70   : > { %s322_s6 = scalar_lea.sflag [#allocation14], %s15853_s9  ;;  %s9842_s14 = scalar_lea.vmem %s336_s18, 1024 }
  0x71   : > { %p9843_p0 = scmp.ne.s32.totalorder %s336_s18, %s9842_s14  ;;  %s9974_s28 = smov [#allocation13]  }
  0x72   : > { %s9847_s1 = sshll.u32 %s9974_s28, 4  ;;  %s9848_s1 = int_to_ptr.vmem [resolvable:$false] %s9847_s1 }
  0x73   : > { %p9845_p7 = pnand %p9843_p0, %p9803_p3  ;;  %s9849_s3 = scalar_lea.vmem %s9848_s1, 2048 }
  0x74   : > { %p9850_p9 = scmp.lt.s32.totalorder %s336_s18, %s9848_s1  ;;  %p9851_p1 = scmp.lt.s32.totalorder %s9849_s3, %s9842_s14 }
  0x75   : > { %p9846_p6 = pneg %p9845_p7 }
  0x76   : > { %p9852_p10 = por %p9851_p1, %p9850_p9 }
  0x78   : > { %p9853_p11 = pnand %p9852_p10, %p9846_p6 }
  0x7a   : > { %9856 = shalt.err (!%p9853_p11)
}
  0x7b   : > { %9541 = dma.hbm_to_vmem [thread:$0]  (!%p10158_p8), %s334_s26, 1024, %s336_s18, %s322_s6, %s15852_s21, %s15852_s21, %s15851_s16  }
  0x7c   : > { %347 = sbr.rel (%p10089_p5) target bundleno = 1849 (0x739), region = 40 }
  0x81   : > { %s349_s23 = sand.u32 1, %s9941_s8  }
  0x82   : > { %s10233_s24 = sshll.u32 %s349_s23, 4  ;;  %s350_s1 = scalar_lea.sflag [#allocation9], %s349_s23 }
  0x83   : > { %s353_s3 = scalar_lea.vmem [#allocation8], %s10233_s24 }
  0x84   : > { %9904 = dma.done.wait (%p10124_p12), %s350_s1, 256  }
  0x85   : > { %9906 = vsyncadd (%p10124_p12), %s350_s1, 4294967040  ;;  %s15854_s30 = sadd.s32 4294967295, %s9965_s13   ;;  %s362_s7 = scalar_lea.vmem [#allocation10], %s10233_s24 }
  0x86   : > { %s358_s20 = sand.u32 1, %s15854_s30  }
  0x87   : > { %s359_s17 = scalar_lea.sflag [#allocation11], %s358_s20 }
  0x88   : > { %9908 = dma.done.wait (%p10124_p12), %s359_s17, 256  }
  0x89   : > { %9910 = vsyncadd (%p10124_p12), %s359_s17, 4294967040  ;;  %s15855_s15 = sld [smem:[#allocation22_spill]] }
  0x8f   : > { %s369_s21 = sand.u32 1, %s15855_s15  }
  0x90   : > { %s9494_s22 = sshll.u32 %s369_s21, 6 }
  0x91   : > { %s371_s25 = scalar_lea.vmem [#allocation12], %s9494_s22 }
  0x92   : > { %9912 = dma.done.wait (%p10085_p4), %s359_s17, 1024  }
  0x93   : > { %9914 = vsyncadd (%p10085_p4), %s359_s17, 4294966272  ;;  %s377_s26 = scalar_lea.sflag [#allocation14], %s358_s20  ;;  %s380_s5 = scalar_lea.vmem [#allocation13], %s9494_s22 }
  0x94   : > { %9916 = dma.done.wait (%p10085_p4), %s377_s26, 1024  }
  0x95   : > { %9918 = vsyncadd (%p10085_p4), %s377_s26, 4294966272  ;;  %s15857_s19 = sld [smem:[#allocation25_spill]] }
  0x9b   : > { %p15858_p5 = scmp.ne.s32.totalorder %s15857_s19, 0 }
  0x9d   : > { %9920 = dma.done.wait (%p15858_p5), [#allocation14], 8192  }
  0x9e   : > { %9922 = vsyncadd (%p15858_p5), [#allocation14], 4294959104  ;;  %s15859_s18 = sld [smem:[#allocation24_spill]]  ;;  %v443_v0 = vld [vmem:[%s371_s25] sm:$0xff]  ;;  %v444_v1 = vld [vmem:[%s371_s25 + $0x8] sm:$0xff] }
  0x9f   : > { %s15860_s9 = sld [smem:[#allocation23_spill]]  ;;  %v445_v2 = vld [vmem:[%s371_s25 + $0x10] sm:$0xff]  ;;  %v446_v3 = vld [vmem:[%s371_s25 + $0x18] sm:$0xff]  ;;  %v447_v4 = vld [vmem:[%s371_s25 + $0x20] sm:$0xff] }
  0xa0   : > { %s10262_s6 = sld [smem:[#allocation7]]  ;;  %v448_v5 = vld [vmem:[%s371_s25 + $0x28] sm:$0xff]  ;;  %v449_v6 = vld [vmem:[%s371_s25 + $0x30] sm:$0xff]  ;;  %v450_v7 = vld [vmem:[%s371_s25 + $0x38] sm:$0xff] }
  0xa1   : > { %s10264_s14 = sld [smem:[#allocation7 + $0x1]]  ;;  %v451_v8 = vld [vmem:[%s380_s5] sm:$0xff]  ;;  %v10277_v9 = vld [vmem:[%s380_s5 + $0x8] sm:$0xff]  ;;  %v453_v10 = vld [vmem:[%s380_s5 + $0x10] sm:$0xff] }
  0xa2   : > { %s15861_s1 = sld [smem:[#allocation306_spill]]  ;;  %v10279_v11 = vld [vmem:[%s380_s5 + $0x18] sm:$0xff]  ;;  %v455_v12 = vld [vmem:[%s380_s5 + $0x20] sm:$0xff]  ;;  %v10281_v13 = vld [vmem:[%s380_s5 + $0x28] sm:$0xff] }
  0xa3   : > { %s15862_s15 = sld [smem:[#allocation307_spill]]  ;;  %v457_v14 = vld [vmem:[%s380_s5 + $0x30] sm:$0xff]  ;;  %v458_v15 = vld [vmem:[%s380_s5 + $0x38] sm:$0xff] }
  0xa4   : > { %p435_p12 = scmp.lt.s32.totalorder %s15859_s18, 1 }
  0xa5   : > { %p459_p8 = scmp.eq.s32.totalorder %s15860_s9, 0  ;;  %p9498_p4 = scmp.ne.s32.totalorder %s15860_s9, 0 }
  0xa6   : > { %s17679_s18 = smov (!%p435_p12, %s15859_s18), 1 }
  0xa7   : > { %462 = sbr.rel (%p9498_p4) target bundleno = 177 (0xb1), region = 64 }
  0xa8   : > { %s437_s30 = scalar_lea.vmem %s15861_s1, %s17679_s18 }
  0xa9   : > { %s440_s16 = scalar_lea.vmem %s15862_s15, %s17679_s18 }
  0xac   : > { %v467_v16 = vld [vmem:[%s353_s3] sm:$0xff]  ;;  %v468_v17 = vld [vmem:[%s353_s3 + $0x8] sm:$0xff]  ;;  %v9975_v19 = vmov 0.0  }
  0xad   : > { %v471_v18 = vld [vmem:[%s362_s7] sm:$0xff]  ;;  %463 = vst [vmem:[#allocation4 + $0x8] sm:$0xff] %v9975_v19  ;;  %464 = vst [vmem:[#allocation4] sm:$0xff] %v9975_v19  ;;  %v472_v20 = vld [vmem:[%s362_s7 + $0x8] sm:$0xff] }
  0xae   : > { %465 = vst [vmem:[#allocation5] sm:$0xff] %v9975_v19  ;;  %466 = vst [vmem:[#allocation5 + $0x8] sm:$0xff] %v9975_v19 }
  0xaf   : > { %469 = vst [vmem:[#allocation2 + $0x20] sm:$0xff] %v467_v16  ;;  %470 = vst [vmem:[#allocation2] sm:$0xff] %v468_v17 }
  0xb0   : > { %473 = vst [vmem:[#allocation3 + $0x38] sm:$0xff] %v471_v18  ;;  %474 = vst [vmem:[#allocation3] sm:$0xff] %v472_v20 }
  0xb1 PF: > { %s15863_s21 = sld [smem:[#allocation23_spill]] }
  0xb7   : > { %p9499_p3 = scmp.le.s32.totalorder %s15863_s21, 0 }
  0xb9   : > { %478 = sbr.rel (%p9499_p3) target bundleno = 193 (0xc1), region = 68 }
  0xbe   : > { %v479_v21 = vld [vmem:[#allocation2 + $0x48] sm:$0xfc]  ;;  %v480_v22 = vld [vmem:[#allocation2 + $0x40] sm:$0xfc]  ;;  %v483_v23 = vld [vmem:[#allocation3 + $0x40] sm:$0xfc] }
  0xbf   : > { %481 = vst [vmem:[#allocation2 + $0x20] sm:$0xfc] %v479_v21  ;;  %482 = vst [vmem:[#allocation2] sm:$0xfc] %v480_v22  ;;  %v484_v24 = vld [vmem:[#allocation3 + $0x30] sm:$0xfc] }
  0xc0   : > { %485 = vst [vmem:[#allocation3 + $0x38] sm:$0xfc] %v483_v23  ;;  %486 = vst [vmem:[#allocation3] sm:$0xfc] %v484_v24 }
  0xc1 PF: > { %v503_v25 = vsub.f32 %v443_v0, %v451_v8  ;;  %v504_v26 = vsub.f32 %v444_v1, %v10277_v9  ;;  %v505_v27 = vsub.f32 %v445_v2, %v453_v10  ;;  %v506_v28 = vsub.f32 %v446_v3, %v10279_v11  ;;  %496 = vst [vmem:[#allocation3 + $0x8] sm:$0xff] %v10277_v9  ;;  %v582_v33 = vld [vmem:[#allocation15 + $0xf8] sm:$0xff]  ;;  %v581_v34 = vld [vmem:[#allocation15 + $0xf0] sm:$0xff]  ;;  %v580_v35 = vld [vmem:[#allocation15 + $0xe8] sm:$0xff]  ;;  %s17635_s24 = sld [smem:[#allocation24_spill]] }
  0xc2   : > { %498 = vst [vmem:[#allocation3 + $0x48] sm:$0xff] %v10279_v11  ;;  %500 = vst [vmem:[#allocation3 + $0x10] sm:$0xff] %v10281_v13  ;;  %v507_v29 = vsub.f32 %v447_v4, %v455_v12  ;;  %v508_v30 = vsub.f32 %v448_v5, %v10281_v13  ;;  %v509_v31 = vsub.f32 %v449_v6, %v457_v14  ;;  %v579_v40 = vld [vmem:[#allocation15 + $0xe0] sm:$0xff]  ;;  %v578_v41 = vld [vmem:[#allocation15 + $0xd8] sm:$0xff]  ;;  %v10303_v51 = vand.u32 4294901760, %v582_v33 }
  0xc3   : > { %495 = vst [vmem:[#allocation3 + $0x28] sm:$0xff] %v451_v8  ;;  %497 = vst [vmem:[#allocation3 + $0x20] sm:$0xff] %v453_v10  ;;  %v510_v32 = vsub.f32 %v450_v7, %v458_v15  ;;  %v511_v36 = vmul.f32 %v503_v25, %v503_v25  ;;  %v512_v37 = vmul.f32 %v504_v26, %v504_v26  ;;  %v577_v42 = vld [vmem:[#allocation15 + $0xd0] sm:$0xff]  ;;  %v10299_v47 = vld [vmem:[#allocation15 + $0xc8] sm:$0xff]  ;;  %v10305_v52 = vand.u32 4294901760, %v581_v34 }
  0xc4   : > { %499 = vst [vmem:[#allocation3 + $0x18] sm:$0xff] %v455_v12  ;;  %502 = vst [vmem:[#allocation3 + $0x30] sm:$0xff] %v458_v15  ;;  %v513_v38 = vmul.f32 %v505_v27, %v505_v27  ;;  %v514_v39 = vmul.f32 %v506_v28, %v506_v28  ;;  %v515_v43 = vmul.f32 %v507_v29, %v507_v29  ;;  %v10301_v48 = vld [vmem:[#allocation15 + $0xc0] sm:$0xff]  ;;  %v10307_v53 = vld [vmem:[#allocation15 + $0xb8] sm:$0xff]  ;;  %v10311_v55 = vand.u32 4294901760, %v580_v35 }
  0xc5   : > { %501 = vst [vmem:[#allocation3 + $0x40] sm:$0xff] %v457_v14  ;;  %488 = vst [vmem:[#allocation2 + $0x18] sm:$0xff] %v444_v1  ;;  %v516_v44 = vmul.f32 %v508_v30, %v508_v30  ;;  %v517_v45 = vmul.f32 %v509_v31, %v509_v31  ;;  %v518_v46 = vmul.f32 %v510_v32, %v510_v32  ;;  %v10309_v54 = vld [vmem:[#allocation15 + $0xb0] sm:$0xff]  ;;  %v10313_v56 = vand.u32 4294901760, %v579_v40  ;;  %v10319_v59 = vld [vmem:[#allocation15 + $0xa8] sm:$0xff] }
  0xc6   : > { %490 = vst [vmem:[#allocation2 + $0x10] sm:$0xff] %v446_v3  ;;  %492 = vst [vmem:[#allocation2 + $0x28] sm:$0xff] %v448_v5  ;;  %v519_v49 = vadd.f32 %v513_v38, %v511_v36  ;;  %v522_v50 = vadd.f32 %v514_v39, %v512_v37  ;;  %v10315_v57 = vand.u32 4294901760, %v578_v41  ;;  %v10317_v58 = vand.u32 4294901760, %v577_v42  ;;  %824 = vmatprep.subr.mxu0 %v10303_v51  ;;  %v525_v1 = vld [vmem:[#allocation4 + $0x8] sm:$0xff]  ;;  %v10365_v19 = vld [vmem:[#allocation15 + $0x90] sm:$0xff] }
  0xc7   : > { %487 = vst [vmem:[#allocation2 + $0x38] sm:$0xff] %v443_v0  ;;  %489 = vst [vmem:[#allocation2 + $0x8] sm:$0xff] %v445_v2  ;;  %v10323_v62 = vand.u32 4294901760, %v10299_v47  ;;  %v10326_v63 = vand.u32 4294901760, %v10301_v48  ;;  %v10328_v0 = vld [vmem:[#allocation15 + $0xa0] sm:$0xff]  ;;  %826 = vmatpush1.msra.mxu0 %v10305_v52  ;;  %v10332_v3 = vand.u32 4294901760, %v10307_v53  ;;  %v10350_v14 = vsub.f32 %v580_v35, %v10311_v55 }
  0xc8   : > { %491 = vst [vmem:[#allocation2 + $0x30] sm:$0xff] %v447_v4  ;;  %494 = vst [vmem:[#allocation2 + $0x40] sm:$0xff] %v450_v7  ;;  %v520_v60 = vadd.f32 %v519_v49, %v515_v43  ;;  %v523_v61 = vadd.f32 %v522_v50, %v516_v44  ;;  %v526_v2 = vld [vmem:[#allocation4] sm:$0xff]  ;;  %v10335_v4 = vsub.f32 %v582_v33, %v10303_v51  ;;  %v10338_v5 = vand.u32 4294901760, %v10309_v54  ;;  %v10343_v7 = vld [vmem:[#allocation15 + $0x98] sm:$0xff]  ;;  %p9212_p2 = scmp.eq.s32.totalorder %s17635_s24, 0 }
  0xc9   : > { %493 = vst [vmem:[#allocation2 + $0x48] sm:$0xff] %v449_v6  ;;  %15864 = vst [vmem:[#allocation28_spill] sm:$0xff] %v10303_v51  ;;  %v10341_v6 = vsub.f32 %v581_v34, %v10305_v52  ;;  %828 = vmatprep.subr.mxu0 %v10311_v55  ;;  %v10347_v12 = vand.u32 4294901760, %v10319_v59  ;;  %v10360_v17 = vand.u32 4294901760, %v10328_v0  ;;  %v10363_v18 = vsub.f32 %v579_v40, %v10313_v56  ;;  %v10367_v20 = vld [vmem:[#allocation15 + $0x88] sm:$0xff]  ;;  %v10387_v29 = vld [vmem:[#allocation15 + $0x80] sm:$0xff] }
  0xca   : > { %15865 = vst [vmem:[#allocation29_spill] sm:$0xff] %v10305_v52  ;;  %15866 = vst [vmem:[#allocation30_spill] sm:$0xff] %v10311_v55  ;;  %v521_v8 = vadd.f32 %v520_v60, %v517_v45  ;;  %v524_v10 = vadd.f32 %v523_v61, %v518_v46  ;;  %830 = vmatpush1.msra.mxu0 %v10313_v56  ;;  %v10354_v15 = vand.u32 4294901760, %v10335_v4  ;;  %v10371_v23 = vand.u32 4294901760, %v10350_v14  ;;  %v10401_v34 = vld [vmem:[#allocation15 + $0x78] sm:$0xff]  ;;  %v10413_v39 = vld [vmem:[#allocation15 + $0x70] sm:$0xff]  ;;  %p14881_p13 = pnand %p9212_p2, %p459_p8 }
  0xcb   : > { %15867 = vst [vmem:[#allocation31_spill] sm:$0xff] %v10313_v56  ;;  %15868 = vst [vmem:[#allocation32_spill] sm:$0xff] %v10315_v57  ;;  %v10357_v16 = vand.u32 4294901760, %v10341_v6  ;;  %832 = vmatprep.subr.mxu0 %v10315_v57  ;;  %v10374_v24 = vand.u32 4294901760, %v10343_v7  ;;  %v10382_v27 = vand.u32 4294901760, %v10363_v18  ;;  %v10385_v28 = vsub.f32 %v578_v41, %v10315_v57  ;;  %v10428_v44 = vld [vmem:[#allocation15 + $0x68] sm:$0xff] }
  0xcc   : > { %15869 = vst [vmem:[#allocation33_spill] sm:$0xff] %v10317_v58  ;;  %15870 = vst [vmem:[#allocation34_spill] sm:$0xff] %v10323_v62  ;;  %v527_v21 = vadd.f32 %v525_v1, %v521_v8  ;;  %v528_v22 = vadd.f32 %v526_v2, %v524_v10  ;;  %834 = vmatpush1.msra.mxu0 %v10317_v58  ;;  %v1019_v25 = vsub.f32 %v10335_v4, %v10354_v15  ;;  %v10457_v1 = vld [vmem:[#allocation15 + $0x60] sm:$0xff]  ;;  %vm625_vm0 = vcmask 1046528  }
  0xcd   : > { %15871 = vst [vmem:[#allocation35_spill] sm:$0xff] %v10326_v63  ;;  %15872 = vst [vmem:[#allocation36_spill] sm:$0xff] %v10332_v3  ;;  %v1025_v26 = vsub.f32 %v10341_v6, %v10357_v16  ;;  %836 = vmatprep.subr.mxu0 %v10323_v62  ;;  %v1031_v30 = vsub.f32 %v10350_v14, %v10371_v23  ;;  %v10393_v31 = vand.u32 4294901760, %v10365_v19  ;;  %v10399_v33 = vand.u32 4294901760, %v10367_v20 }
  0xce   : > { %15873 = vst [vmem:[#allocation37_spill] sm:$0xff] %v10335_v4  ;;  %15874 = vst [vmem:[#allocation38_spill] sm:$0xff] %v10338_v5  ;;  %v10396_v32 = vsub.f32 %v577_v42, %v10317_v58  ;;  %838 = vmatpush1.msra.mxu0 %v10326_v63  ;;  %v10404_v35 = vand.u32 4294901760, %v1019_v25  ;;  %v1037_v37 = vsub.f32 %v10363_v18, %v10382_v27  ;;  %v10411_v38 = vand.u32 4294901760, %v10385_v28 }
  0xcf   : > { %15875 = vst [vmem:[#allocation39_spill] sm:$0xff] %v10341_v6  ;;  %15876 = vst [vmem:[#allocation40_spill] sm:$0xff] %v10347_v12  ;;  %v10406_v36 = vand.u32 4294901760, %v1025_v26  ;;  %840 = vmatprep.subr.mxu0 %v10332_v3  ;;  %v10416_v40 = vand.u32 4294901760, %v1031_v30  ;;  %v10423_v42 = vsub.f32 %v10299_v47, %v10323_v62  ;;  %v10426_v43 = vand.u32 4294901760, %v10387_v29 }
  0xd0   : > { %15877 = vst [vmem:[#allocation41_spill] sm:$0xff] %v10350_v14  ;;  %15878 = vst [vmem:[#allocation42_spill] sm:$0xff] %v10354_v15  ;;  %v10419_v41 = vand.u32 4294901760, %v10396_v32  ;;  %1021 = vmatprep.subr.mxu1 %v10404_v35  ;;  %842 = vmatpush1.msra.mxu0 %v10338_v5  ;;  %v10432_v45 = vand.u32 4294901760, %v1037_v37  ;;  %v1043_v46 = vsub.f32 %v10385_v28, %v10411_v38  ;;  %v10441_v47 = vand.u32 4294901760, %v10401_v34  ;;  %v10604_v15 = vld [vmem:[#allocation15 + $0x20] sm:$0xff] }
  0xd1   : > { %15879 = vst [vmem:[#allocation43_spill] sm:$0xff] %v10357_v16  ;;  %15880 = vst [vmem:[#allocation44_spill] sm:$0xff] %v10360_v17  ;;  %v10438_v49 = vsub.f32 %v10301_v48, %v10326_v63  ;;  %1027 = vmatpush1.msra.mxu1 %v10406_v36  ;;  %844 = vmatprep.subr.mxu0 %v10347_v12  ;;  %v10448_v60 = vand.u32 4294901760, %v10423_v42  ;;  %v10452_v61 = vsub.f32 %v10307_v53, %v10332_v3  ;;  %vm674_vm1 = vcmask 1045504  }
  0xd2   : > { %15881 = vst [vmem:[#allocation45_spill] sm:$0xff] %v10363_v18  ;;  %15882 = vst [vmem:[#allocation46_spill] sm:$0xff] %v10371_v23  ;;  %v1049_v50 = vsub.f32 %v10396_v32, %v10419_v41  ;;  %v10455_v48 = vand.u32 4294901760, %v10413_v39  ;;  %1033 = vmatprep.subr.mxu1 %v10416_v40  ;;  %846 = vmatpush1.msra.mxu0 %v10360_v17  ;;  %v10461_v2 = vand.u32 4294901760, %v1043_v46  ;;  %v10471_v53 = vand.u32 4294901760, %v10428_v44  ;;  %v10575_v23 = vld [vmem:[#allocation15 + $0x28] sm:$0xff] }
  0xd3   : > { %15883 = vst [vmem:[#allocation47_spill] sm:$0xff] %v10374_v24  ;;  %15884 = vst [vmem:[#allocation48_spill] sm:$0xff] %v10382_v27  ;;  %v10464_v8 = vand.u32 4294901760, %v10438_v49  ;;  %v10468_v10 = vsub.f32 %v10309_v54, %v10338_v5  ;;  %1039 = vmatpush1.msra.mxu1 %v10432_v45  ;;  %848 = vmatprep.subr.mxu0 %v10374_v24  ;;  %v1055_v25 = vsub.f32 %v10423_v42, %v10448_v60  ;;  %v10559_v27 = vld [vmem:[#allocation15 + $0x30] sm:$0xff]  ;;  %vm713_vm2 = vcmask 1043456  }
  0xd4   : > { %15885 = vst [vmem:[#allocation49_spill] sm:$0xff] %v10385_v28  ;;  %529 = vst [vmem:[#allocation4 + $0x8] sm:$0xff] %v527_v21  ;;  %v10473_v21 = vld [vmem:[#allocation15 + $0x58] sm:$0xff]  ;;  %v10482_v26 = vand.u32 4294901760, %v10452_v61  ;;  %v10486_v54 = vsub.f32 %v10319_v59, %v10347_v12  ;;  %1045 = vmatprep.subr.mxu1 %v10461_v2  ;;  %850 = vmatpush1.msra.mxu0 %v10393_v31  ;;  %v10496_v46 = vand.u32 4294901760, %v10457_v1  ;;  %vm752_vm3 = vcmask 1041408  }
  0xd5   : > { %530 = vst [vmem:[#allocation4] sm:$0xff] %v528_v22  ;;  %15886 = vst [vmem:[#allocation50_spill] sm:$0xff] %v10393_v31  ;;  %v10477_v22 = vand.u32 4294901760, %v1049_v50  ;;  %v1061_v30 = vsub.f32 %v10438_v49, %v10464_v8  ;;  %v10493_v37 = vand.u32 4294901760, %v10468_v10  ;;  %v10500_v50 = vsub.f32 %v10328_v0, %v10360_v17  ;;  %852 = vmatprep.subr.mxu0 %v10399_v33 }
  0xd6   : > { %15887 = vst [vmem:[#allocation51_spill] sm:$0xff] %v10396_v32  ;;  %15888 = vst [vmem:[#allocation52_spill] sm:$0xff] %v10399_v33  ;;  %v10506_v59 = vand.u32 4294901760, %v1055_v25  ;;  %854 = vmatpush1.msra.mxu0 %v10426_v43  ;;  %v10585_v16 = vsub.f32 %v10387_v29, %v10426_v43  ;;  %v10602_v29 = vand.u32 4294901760, %v10559_v27 }
  0xd7   : > { %15889 = vst [vmem:[#allocation53_spill] sm:$0xff] %v10404_v35  ;;  %15890 = vst [vmem:[#allocation54_spill] sm:$0xff] %v10406_v36  ;;  %1051 = vmatpush1.msra.mxu1 %v10477_v22  ;;  %v10514_v36 = vand.u32 4294901760, %v10473_v21  ;;  %v10516_v35 = vld [vmem:[#allocation15 + $0x48] sm:$0xff]  ;;  %v10519_v0 = vand.u32 4294901760, %v1061_v30  ;;  %v10524_v25 = vand.u32 4294901760, %v10500_v50  ;;  %856 = vmatprep.subr.mxu0 %v10441_v47 }
  0xd8   : > { %15891 = vst [vmem:[#allocation55_spill] sm:$0xff] %v10411_v38  ;;  %15892 = vst [vmem:[#allocation56_spill] sm:$0xff] %v10416_v40  ;;  %v10511_v40 = vand.u32 4294901760, %v10486_v54  ;;  %1057 = vmatprep.subr.mxu1 %v10506_v59  ;;  %858 = vmatpush1.msra.mxu0 %v10455_v48  ;;  %v10557_v38 = vand.u32 4294901760, %v10516_v35 }
  0xd9   : > { %15893 = vst [vmem:[#allocation57_spill] sm:$0xff] %v10419_v41  ;;  %15894 = vst [vmem:[#allocation58_spill] sm:$0xff] %v10423_v42  ;;  %v10543_v41 = vsub.f32 %v10365_v19, %v10393_v31  ;;  %1063 = vmatpush1.msra.mxu1 %v10519_v0  ;;  %860 = vmatprep.subr.mxu0 %v10471_v53  ;;  %v11366_v31 = vld [vmem:[#allocation3 + $0x20] sm:$0xff] }
  0xda   : > { %15895 = vst [vmem:[#allocation59_spill] sm:$0xff] %v10426_v43  ;;  %15896 = vst [vmem:[#allocation60_spill] sm:$0xff] %v10432_v45  ;;  %v10502_v45 = vld [vmem:[#allocation15 + $0x50] sm:$0xff]  ;;  %v1079_v30 = vsub.f32 %v10486_v54, %v10511_v40  ;;  %862 = vmatpush1.msra.mxu0 %v10496_v46  ;;  %v10615_v43 = vsub.f32 %v10413_v39, %v10455_v48 }
  0xdb   : > { %15897 = vst [vmem:[#allocation61_spill] sm:$0xff] %v10438_v49  ;;  %15898 = vst [vmem:[#allocation62_spill] sm:$0xff] %v10441_v47  ;;  %864 = vmatprep.subr.mxu0 %v10514_v36 }
  0xdc   : > { %15899 = vst [vmem:[#allocation63_spill] sm:$0xff] %v10448_v60  ;;  %15900 = vst [vmem:[#allocation64_spill] sm:$0xff] %v10452_v61  ;;  %v10563_v19 = vand.u32 4294901760, %v1079_v30 }
  0xdd   : > { %15901 = vst [vmem:[#allocation65_spill] sm:$0xff] %v10455_v48  ;;  %15902 = vst [vmem:[#allocation66_spill] sm:$0xff] %v10461_v2  ;;  %v1067_v2 = vsub.f32 %v10452_v61, %v10482_v26  ;;  %v10642_v48 = vand.u32 4294901760, %v10604_v15 }
  0xde   : > { %15903 = vst [vmem:[#allocation67_spill] sm:$0xff] %v10464_v8  ;;  %15904 = vst [vmem:[#allocation68_spill] sm:$0xff] %v10468_v10  ;;  %v10530_v8 = vld [vmem:[#allocation15 + $0x40] sm:$0xff] }
  0xdf   : > { %15905 = vst [vmem:[#allocation69_spill] sm:$0xff] %v10471_v53  ;;  %15906 = vst [vmem:[#allocation70_spill] sm:$0xff] %v10477_v22  ;;  %v1073_v22 = vsub.f32 %v10468_v10, %v10493_v37  ;;  %v10534_v60 = vand.u32 4294901760, %v1067_v2  ;;  %v1085_v2 = vsub.f32 %v10500_v50, %v10524_v25 }
  0xe0   : > { %15907 = vst [vmem:[#allocation71_spill] sm:$0xff] %v10482_v26  ;;  %15908 = vst [vmem:[#allocation72_spill] sm:$0xff] %v10486_v54  ;;  %v10528_v26 = vsub.f32 %v10343_v7, %v10374_v24  ;;  %v10545_v7 = vld [vmem:[#allocation15 + $0x38] sm:$0xff] }
  0xe1   : > { %15909 = vst [vmem:[#allocation73_spill] sm:$0xff] %v10493_v37  ;;  %15910 = vst [vmem:[#allocation74_spill] sm:$0xff] %v10496_v46  ;;  %v10539_v37 = vand.u32 4294901760, %v10502_v45  ;;  %1069 = vmatprep.subr.mxu1 %v10534_v60 }
  0xe2   : > { %15911 = vst [vmem:[#allocation75_spill] sm:$0xff] %v10500_v50  ;;  %15912 = vst [vmem:[#allocation76_spill] sm:$0xff] %v10506_v59  ;;  %v10549_v59 = vand.u32 4294901760, %v1073_v22  ;;  %v10566_v22 = vand.u32 4294901760, %v10543_v41 }
  0xe3   : > { %15913 = vst [vmem:[#allocation77_spill] sm:$0xff] %v10511_v40  ;;  %15914 = vst [vmem:[#allocation78_spill] sm:$0xff] %v10514_v36  ;;  %v10554_v40 = vand.u32 4294901760, %v10528_v26  ;;  %866 = vmatpush1.msra.mxu0 %v10539_v37 }
  0xe4   : > { %15915 = vst [vmem:[#allocation79_spill] sm:$0xff] %v10519_v0  ;;  %15916 = vst [vmem:[#allocation80_spill] sm:$0xff] %v10524_v25  ;;  %v10570_v0 = vsub.f32 %v10367_v20, %v10399_v33  ;;  %v10573_v25 = vand.u32 4294901760, %v10530_v8  ;;  %1075 = vmatpush1.msra.mxu1 %v10549_v59  ;;  %v10588_v20 = vand.u32 4294901760, %v10545_v7  ;;  %868 = vmatprep.subr.mxu0 %v10557_v38 }
  0xe5   : > { %15917 = vst [vmem:[#allocation81_spill] sm:$0xff] %v10528_v26  ;;  %15918 = vst [vmem:[#allocation82_spill] sm:$0xff] %v10534_v60  ;;  %v10579_v60 = vand.u32 4294901760, %v1085_v2  ;;  %v1091_v30 = vsub.f32 %v10528_v26, %v10554_v40  ;;  %1081 = vmatprep.subr.mxu1 %v10563_v19  ;;  %v10632_v33 = vsub.f32 %v10428_v44, %v10471_v53 }
  0xe6   : > { %15919 = vst [vmem:[#allocation83_spill] sm:$0xff] %v10539_v37  ;;  %15920 = vst [vmem:[#allocation84_spill] sm:$0xff] %v10543_v41  ;;  %v10595_v2 = vand.u32 4294901760, %v10570_v0  ;;  %870 = vmatpush1.msra.mxu0 %v10573_v25 }
  0xe7   : > { %15921 = vst [vmem:[#allocation85_spill] sm:$0xff] %v10549_v59  ;;  %15922 = vst [vmem:[#allocation86_spill] sm:$0xff] %v10554_v40  ;;  %v1097_v59 = vsub.f32 %v10543_v41, %v10566_v22  ;;  %v10599_v40 = vsub.f32 %v10401_v34, %v10441_v47  ;;  %1087 = vmatpush1.msra.mxu1 %v10579_v60  ;;  %v10618_v34 = vand.u32 4294901760, %v10575_v23  ;;  %v10620_v47 = vld [vmem:[#allocation15 + $0x18] sm:$0xff]  ;;  %872 = vmatprep.subr.mxu0 %v10588_v20 }
  0xe8   : > { %15923 = vst [vmem:[#allocation87_spill] sm:$0xff] %v10557_v38  ;;  %15924 = vst [vmem:[#allocation88_spill] sm:$0xff] %v10563_v19  ;;  %v10607_v19 = vand.u32 4294901760, %v1091_v30  ;;  %v1103_v30 = vsub.f32 %v10570_v0, %v10595_v2  ;;  %v10660_v53 = vand.u32 4294901760, %v10620_v47  ;;  %874 = vmatpush1.msra.mxu0 %v10602_v29 }
  0xe9   : > { %15925 = vst [vmem:[#allocation89_spill] sm:$0xff] %v10566_v22  ;;  %15926 = vst [vmem:[#allocation90_spill] sm:$0xff] %v10570_v0  ;;  %v10611_v22 = vand.u32 4294901760, %v10585_v16  ;;  %v10622_v41 = vand.u32 4294901760, %v1097_v59  ;;  %v10639_v59 = vand.u32 4294901760, %v10615_v43  ;;  %v10648_v0 = vld [vmem:[#allocation15 + $0x10] sm:$0xff]  ;;  %876 = vmatprep.subr.mxu0 %v10618_v34 }
  0xea   : > { %15927 = vst [vmem:[#allocation91_spill] sm:$0xff] %v10573_v25  ;;  %15928 = vst [vmem:[#allocation92_spill] sm:$0xff] %v10579_v60  ;;  %v10628_v60 = vand.u32 4294901760, %v10599_v40  ;;  %1093 = vmatprep.subr.mxu1 %v10607_v19  ;;  %v10651_v44 = vand.u32 4294901760, %v1103_v30  ;;  %878 = vmatpush1.msra.mxu0 %v10642_v48 }
  0xeb   : > { %15929 = vst [vmem:[#allocation93_spill] sm:$0xff] %v10585_v16  ;;  %15930 = vst [vmem:[#allocation94_spill] sm:$0xff] %v10588_v20  ;;  %v1109_v39 = vsub.f32 %v10585_v16, %v10611_v22  ;;  %1099 = vmatpush1.msra.mxu1 %v10622_v41  ;;  %v10662_v16 = vld [vmem:[#allocation15 + $0x8] sm:$0xff]  ;;  %v1121_v30 = vsub.f32 %v10615_v43, %v10639_v59  ;;  %880 = vmatprep.subr.mxu0 %v10660_v53 }
  0xec   : > { %15931 = vst [vmem:[#allocation95_spill] sm:$0xff] %v10595_v2  ;;  %15932 = vst [vmem:[#allocation96_spill] sm:$0xff] %v10599_v40  ;;  %v10646_v2 = vsub.f32 %v10457_v1, %v10496_v46  ;;  %v10676_v46 = vld [vmem:[#allocation15] sm:$0xff]  ;;  %1105 = vmatprep.subr.mxu1 %v10651_v44 }
  0xed   : > { %15933 = vst [vmem:[#allocation97_spill] sm:$0xff] %v10602_v29  ;;  %15934 = vst [vmem:[#allocation98_spill] sm:$0xff] %v10607_v19  ;;  %v1115_v19 = vsub.f32 %v10599_v40, %v10628_v60  ;;  %v10664_v1 = vand.u32 4294901760, %v1109_v39 }
  0xee   : > { %15935 = vst [vmem:[#allocation99_spill] sm:$0xff] %v10611_v22  ;;  %15936 = vst [vmem:[#allocation100_spill] sm:$0xff] %v10615_v43  ;;  %v10657_v22 = vand.u32 4294901760, %v10632_v33  ;;  %v10689_v43 = vsub.f32 %v10502_v45, %v10539_v37  ;;  %v10721_v37 = vld [vmem:[#allocation15 + $0x1e8] sm:$0xff] }
  0xef   : > { %15937 = vst [vmem:[#allocation101_spill] sm:$0xff] %v10618_v34  ;;  %15938 = vst [vmem:[#allocation102_spill] sm:$0xff] %v10622_v41  ;;  %v10670_v41 = vand.u32 4294901760, %v10646_v2  ;;  %v10679_v40 = vand.u32 4294901760, %v1115_v19  ;;  %1111 = vmatpush1.msra.mxu1 %v10664_v1 }
  0xf0   : > { %15939 = vst [vmem:[#allocation103_spill] sm:$0xff] %v10628_v60  ;;  %15940 = vst [vmem:[#allocation104_spill] sm:$0xff] %v10632_v33  ;;  %v10674_v60 = vsub.f32 %v10473_v21, %v10514_v36  ;;  %v1127_v39 = vsub.f32 %v10632_v33, %v10657_v22  ;;  %v10691_v21 = vld [vmem:[#allocation15 + $0x1f8] sm:$0xff]  ;;  %v10694_v36 = vand.u32 4294901760, %v1121_v30  ;;  %v10705_v33 = vld [vmem:[#allocation15 + $0x1f0] sm:$0xff]  ;;  %v10712_v30 = vand.u32 4294901760, %v10689_v43 }
  0xf1   : > { %15941 = vst [vmem:[#allocation105_spill] sm:$0xff] %v10639_v59  ;;  %15942 = vst [vmem:[#allocation106_spill] sm:$0xff] %v10642_v48  ;;  %v10685_v59 = vand.u32 4294901760, %v10648_v0  ;;  %v1133_v19 = vsub.f32 %v10646_v2, %v10670_v41  ;;  %1117 = vmatprep.subr.mxu1 %v10679_v40 }
  0xf2   : > { %15943 = vst [vmem:[#allocation107_spill] sm:$0xff] %v10646_v2  ;;  %15944 = vst [vmem:[#allocation108_spill] sm:$0xff] %v10651_v44  ;;  %v10700_v44 = vand.u32 4294901760, %v10674_v60  ;;  %v10708_v45 = vand.u32 4294901760, %v1127_v39  ;;  %1123 = vmatpush1.msra.mxu1 %v10694_v36 }
  0xf3   : > { %15945 = vst [vmem:[#allocation109_spill] sm:$0xff] %v10657_v22  ;;  %15946 = vst [vmem:[#allocation110_spill] sm:$0xff] %v10660_v53  ;;  %v10703_v22 = vand.u32 4294901760, %v10662_v16  ;;  %v10724_v2 = vand.u32 4294901760, %v1133_v19  ;;  %882 = vmatpush1.msra.mxu0 %v10685_v59 }
  0xf4   : > { %15947 = vst [vmem:[#allocation111_spill] sm:$0xff] %v10664_v1  ;;  %15948 = vst [vmem:[#allocation112_spill] sm:$0xff] %v10670_v41  ;;  %v10716_v1 = vsub.f32 %v10516_v35, %v10557_v38  ;;  %v10719_v41 = vand.u32 4294901760, %v10676_v46  ;;  %v1139_v39 = vsub.f32 %v10674_v60, %v10700_v44  ;;  %v10734_v35 = vand.u32 4294901760, %v10691_v21  ;;  %1129 = vmatprep.subr.mxu1 %v10708_v45 }
  0xf5   : > { %15949 = vst [vmem:[#allocation113_spill] sm:$0xff] %v10674_v60  ;;  %15950 = vst [vmem:[#allocation114_spill] sm:$0xff] %v10679_v40  ;;  %v10731_v40 = vsub.f32 %v10530_v8, %v10573_v25  ;;  %v1145_v38 = vsub.f32 %v10689_v43, %v10712_v30  ;;  %884 = vmatprep.subr.mxu0 %v10703_v22  ;;  %v10748_v8 = vand.u32 4294901760, %v10705_v33  ;;  %1135 = vmatpush1.msra.mxu1 %v10724_v2 }
  0xf6   : > { %15951 = vst [vmem:[#allocation115_spill] sm:$0xff] %v10685_v59  ;;  %15952 = vst [vmem:[#allocation116_spill] sm:$0xff] %v10689_v43  ;;  %v10741_v19 = vand.u32 4294901760, %v10716_v1  ;;  %886 = vmatpush1.msra.mxu0 %v10719_v41  ;;  %v10761_v25 = vsub.f32 %v10559_v27, %v10602_v29  ;;  %v10778_v60 = vsub.f32 %v10575_v23, %v10618_v34 }
  0xf7   : > { %15953 = vst [vmem:[#allocation117_spill] sm:$0xff] %v10694_v36  ;;  %15954 = vst [vmem:[#allocation118_spill] sm:$0xff] %v10700_v44  ;;  %v10745_v36 = vsub.f32 %v10545_v7, %v10588_v20  ;;  %v10750_v44 = vld [vmem:[#allocation15 + $0x1e0] sm:$0xff]  ;;  %v10764_v7 = vand.u32 4294901760, %v10721_v37  ;;  %v10766_v20 = vld [vmem:[#allocation15 + $0x1d8] sm:$0xff]  ;;  %v10768_v43 = vand.u32 4294901760, %v1145_v38  ;;  %888 = vmatprep.subr.mxu0 %v10734_v35  ;;  %v10792_v29 = vsub.f32 %v10604_v15, %v10642_v48 }
  0xf8   : > { %15955 = vst [vmem:[#allocation119_spill] sm:$0xff] %v10703_v22  ;;  %15956 = vst [vmem:[#allocation120_spill] sm:$0xff] %v10708_v45  ;;  %v10753_v45 = vand.u32 4294901760, %v1139_v39  ;;  %v1151_v39 = vsub.f32 %v10716_v1, %v10741_v19  ;;  %890 = vmatpush2.msra.mxu0 %v10748_v8  ;;  %v10785_v38 = vand.u32 4294901760, %v10761_v25  ;;  %v10806_v34 = vand.u32 4294901760, %v10766_v20  ;;  %v10822_v48 = vld [vmem:[#allocation15 + $0x1c0] sm:$0xff] }
  0xf9   : > { %15957 = vst [vmem:[#allocation121_spill] sm:$0xff] %v10712_v30  ;;  %15958 = vst [vmem:[#allocation122_spill] sm:$0xff] %v10716_v1  ;;  %v10757_v30 = vand.u32 4294901760, %v10731_v40  ;;  %v10794_v1 = vld [vmem:[#allocation15 + $0x1d0] sm:$0xff]  ;;  %892 = vmatprep.subr.mxu0 %v10764_v7 }
  0xfa   : > { %15959 = vst [vmem:[#allocation123_spill] sm:$0xff] %v10719_v41  ;;  %15960 = vst [vmem:[#allocation124_spill] sm:$0xff] %v10724_v2  ;;  %v10774_v2 = vand.u32 4294901760, %v10745_v36  ;;  %1141 = vmatprep.subr.mxu1 %v10753_v45  ;;  %v10797_v23 = vand.u32 4294901760, %v1151_v39  ;;  %v10816_v39 = vand.u32 4294901760, %v10792_v29 }
  0xfb   : > { %15961 = vst [vmem:[#allocation125_spill] sm:$0xff] %v10731_v40  ;;  %15962 = vst [vmem:[#allocation126_spill] sm:$0xff] %v10734_v35  ;;  %v1157_v27 = vsub.f32 %v10731_v40, %v10757_v30  ;;  %1147 = vmatpush1.msra.mxu1 %v10768_v43  ;;  %v10808_v40 = vld [vmem:[#allocation15 + $0x1c8] sm:$0xff] }
  0xfc   : > { %15963 = vst [vmem:[#allocation127_spill] sm:$0xff] %v10741_v19  ;;  %15964 = vst [vmem:[#allocation128_spill] sm:$0xff] %v10745_v36  ;;  %v10788_v19 = vand.u32 4294901760, %v10750_v44  ;;  %1153 = vmatprep.subr.mxu1 %v10797_v23 }
  0xfd   : > { %15965 = vst [vmem:[#allocation129_spill] sm:$0xff] %v10748_v8  ;;  %15966 = vst [vmem:[#allocation130_spill] sm:$0xff] %v10753_v45  ;;  %v1163_v45 = vsub.f32 %v10745_v36, %v10774_v2  ;;  %v10810_v15 = vand.u32 4294901760, %v1157_v27 }
  0xfe   : > { %15967 = vst [vmem:[#allocation131_spill] sm:$0xff] %v10757_v30  ;;  %15968 = vst [vmem:[#allocation132_spill] sm:$0xff] %v10761_v25  ;;  %v10803_v30 = vand.u32 4294901760, %v10778_v60  ;;  %894 = vmatpush2.msra.mxu0 %v10788_v19 }
  0xff   : > { %15969 = vst [vmem:[#allocation133_spill] sm:$0xff] %v10764_v7  ;;  %15970 = vst [vmem:[#allocation134_spill] sm:$0xff] %v10768_v43  ;;  %v1169_v43 = vsub.f32 %v10761_v25, %v10785_v38  ;;  %v10825_v36 = vand.u32 4294901760, %v1163_v45  ;;  %896 = vmatprep.subr.mxu0 %v10806_v34  ;;  %v10835_v25 = vsub.f32 %v10648_v0, %v10685_v59  ;;  %1159 = vmatpush1.msra.mxu1 %v10810_v15  ;;  %v10866_v59 = vld [vmem:[#allocation15 + $0x1a8] sm:$0xff] }
 0x100   : > { %15971 = vst [vmem:[#allocation135_spill] sm:$0xff] %v10774_v2  ;;  %15972 = vst [vmem:[#allocation136_spill] sm:$0xff] %v10778_v60  ;;  %v10820_v2 = vsub.f32 %v10620_v47, %v10660_v53  ;;  %v1175_v27 = vsub.f32 %v10778_v60, %v10803_v30  ;;  %v10837_v47 = vld [vmem:[#allocation15 + $0x1b8] sm:$0xff]  ;;  %v1181_v45 = vsub.f32 %v10792_v29, %v10816_v39  ;;  %v10850_v60 = vld [vmem:[#allocation15 + $0x1b0] sm:$0xff] }
 0x101   : > { %15973 = vst [vmem:[#allocation137_spill] sm:$0xff] %v10785_v38  ;;  %15974 = vst [vmem:[#allocation138_spill] sm:$0xff] %v10788_v19  ;;  %v10831_v38 = vand.u32 4294901760, %v10794_v1  ;;  %v10840_v53 = vand.u32 4294901760, %v1169_v43  ;;  %1165 = vmatprep.subr.mxu1 %v10825_v36  ;;  %v10857_v43 = vand.u32 4294901760, %v10835_v25 }
 0x102   : > { %15975 = vst [vmem:[#allocation139_spill] sm:$0xff] %v10792_v29  ;;  %15976 = vst [vmem:[#allocation140_spill] sm:$0xff] %v10797_v23  ;;  %v10845_v23 = vand.u32 4294901760, %v10820_v2  ;;  %v10853_v0 = vand.u32 4294901760, %v1175_v27  ;;  %v10869_v29 = vand.u32 4294901760, %v1181_v45 }
 0x103   : > { %15977 = vst [vmem:[#allocation141_spill] sm:$0xff] %v10803_v30  ;;  %15978 = vst [vmem:[#allocation142_spill] sm:$0xff] %v10806_v34  ;;  %v10848_v30 = vand.u32 4294901760, %v10808_v40  ;;  %898 = vmatpush2.msra.mxu0 %v10831_v38  ;;  %1171 = vmatpush1.msra.mxu1 %v10840_v53 }
 0x104   : > { %15979 = vst [vmem:[#allocation143_spill] sm:$0xff] %v10810_v15  ;;  %15980 = vst [vmem:[#allocation144_spill] sm:$0xff] %v10816_v39  ;;  %v10861_v15 = vsub.f32 %v10662_v16, %v10703_v22  ;;  %v10864_v39 = vand.u32 4294901760, %v10822_v48  ;;  %v1187_v27 = vsub.f32 %v10820_v2, %v10845_v23  ;;  %v10879_v16 = vand.u32 4294901760, %v10837_v47  ;;  %1177 = vmatprep.subr.mxu1 %v10853_v0 }
 0x105   : > { %15981 = vst [vmem:[#allocation145_spill] sm:$0xff] %v10820_v2  ;;  %15982 = vst [vmem:[#allocation146_spill] sm:$0xff] %v10825_v36  ;;  %900 = vmatprep.subr.mxu0 %v10848_v30  ;;  %v10876_v36 = vsub.f32 %v10676_v46, %v10719_v41  ;;  %v1193_v22 = vsub.f32 %v10835_v25, %v10857_v43  ;;  %v10893_v46 = vand.u32 4294901760, %v10850_v60  ;;  %1183 = vmatpush1.msra.mxu1 %v10869_v29 }
 0x106   : > { %15983 = vst [vmem:[#allocation147_spill] sm:$0xff] %v10831_v38  ;;  %15984 = vst [vmem:[#allocation148_spill] sm:$0xff] %v10835_v25  ;;  %v10885_v45 = vand.u32 4294901760, %v10861_v15  ;;  %902 = vmatpush2.msra.mxu0 %v10864_v39  ;;  %v10906_v41 = vsub.f32 %v10705_v33, %v10748_v8  ;;  %v10923_v2 = vsub.f32 %v10721_v37, %v10764_v7 }
 0x107   : > { %15985 = vst [vmem:[#allocation149_spill] sm:$0xff] %v10840_v53  ;;  %15986 = vst [vmem:[#allocation150_spill] sm:$0xff] %v10845_v23  ;;  %v10890_v53 = vsub.f32 %v10691_v21, %v10734_v35  ;;  %v10895_v23 = vld [vmem:[#allocation15 + $0x1a0] sm:$0xff]  ;;  %904 = vmatprep.subr.mxu0 %v10879_v16  ;;  %v10909_v21 = vand.u32 4294901760, %v10866_v59  ;;  %v10911_v35 = vld [vmem:[#allocation15 + $0x198] sm:$0xff]  ;;  %v10913_v25 = vand.u32 4294901760, %v1193_v22  ;;  %v10937_v8 = vsub.f32 %v10750_v44, %v10788_v19 }
 0x108   : > { %15987 = vst [vmem:[#allocation151_spill] sm:$0xff] %v10848_v30  ;;  %15988 = vst [vmem:[#allocation152_spill] sm:$0xff] %v10853_v0  ;;  %v10898_v0 = vand.u32 4294901760, %v1187_v27  ;;  %v1199_v27 = vsub.f32 %v10861_v15, %v10885_v45  ;;  %906 = vmatpush2.msra.mxu0 %v10893_v46  ;;  %v10929_v22 = vand.u32 4294901760, %v10906_v41  ;;  %v10950_v7 = vand.u32 4294901760, %v10911_v35 }
 0x109   : > { %15989 = vst [vmem:[#allocation153_spill] sm:$0xff] %v10857_v43  ;;  %15990 = vst [vmem:[#allocation154_spill] sm:$0xff] %v10861_v15  ;;  %v10901_v43 = vand.u32 4294901760, %v10876_v36  ;;  %908 = vmatprep.subr.mxu0 %v10909_v21  ;;  %v10939_v15 = vld [vmem:[#allocation15 + $0x190] sm:$0xff] }
 0x10a   : > { %15991 = vst [vmem:[#allocation155_spill] sm:$0xff] %v10864_v39  ;;  %15992 = vst [vmem:[#allocation156_spill] sm:$0xff] %v10869_v29  ;;  %v10918_v29 = vand.u32 4294901760, %v10890_v53  ;;  %1189 = vmatprep.subr.mxu1 %v10898_v0  ;;  %v10942_v37 = vand.u32 4294901760, %v1199_v27  ;;  %v1217_v44 = vsub.f32 %v10906_v41, %v10929_v22  ;;  %v10960_v27 = vand.u32 4294901760, %v10937_v8 }
 0x10b   : > { %15993 = vst [vmem:[#allocation157_spill] sm:$0xff] %v10876_v36  ;;  %15994 = vst [vmem:[#allocation158_spill] sm:$0xff] %v10879_v16  ;;  %v1205_v33 = vsub.f32 %v10876_v36, %v10901_v43  ;;  %1195 = vmatpush1.msra.mxu1 %v10913_v25  ;;  %v10952_v36 = vld [vmem:[#allocation15 + $0x188] sm:$0xff] }
 0x10c   : > { %15995 = vst [vmem:[#allocation159_spill] sm:$0xff] %v10885_v45  ;;  %15996 = vst [vmem:[#allocation160_spill] sm:$0xff] %v10890_v53  ;;  %v10933_v45 = vand.u32 4294901760, %v10895_v23  ;;  %1201 = vmatprep.subr.mxu1 %v10942_v37 }
 0x10d   : > { %15997 = vst [vmem:[#allocation161_spill] sm:$0xff] %v10893_v46  ;;  %15998 = vst [vmem:[#allocation162_spill] sm:$0xff] %v10898_v0  ;;  %v1211_v0 = vsub.f32 %v10890_v53, %v10918_v29  ;;  %v10954_v26 = vand.u32 4294901760, %v1205_v33 }
 0x10e   : > { %15999 = vst [vmem:[#allocation163_spill] sm:$0xff] %v10901_v43  ;;  %16000 = vst [vmem:[#allocation164_spill] sm:$0xff] %v10906_v41  ;;  %v10947_v43 = vand.u32 4294901760, %v10923_v2  ;;  %910 = vmatpush2.msra.mxu0 %v10933_v45  ;;  %v10979_v41 = vsub.f32 %v10794_v1, %v10831_v38  ;;  %v11010_v38 = vld [vmem:[#allocation15 + $0x168] sm:$0xff] }
 0x10f   : > { %16001 = vst [vmem:[#allocation165_spill] sm:$0xff] %v10909_v21  ;;  %16002 = vst [vmem:[#allocation166_spill] sm:$0xff] %v10913_v25  ;;  %v10964_v25 = vsub.f32 %v10766_v20, %v10806_v34  ;;  %v10969_v19 = vand.u32 4294901760, %v1211_v0  ;;  %912 = vmatprep.subr.mxu0 %v10950_v7  ;;  %v10981_v20 = vld [vmem:[#allocation15 + $0x178] sm:$0xff]  ;;  %1207 = vmatpush1.msra.mxu1 %v10954_v26  ;;  %v10984_v34 = vand.u32 4294901760, %v1217_v44 }
 0x110   : > { %16003 = vst [vmem:[#allocation167_spill] sm:$0xff] %v10918_v29  ;;  %16004 = vst [vmem:[#allocation168_spill] sm:$0xff] %v10923_v2  ;;  %v10966_v29 = vld [vmem:[#allocation15 + $0x180] sm:$0xff]  ;;  %v1223_v33 = vsub.f32 %v10923_v2, %v10947_v43  ;;  %v1229_v0 = vsub.f32 %v10937_v8, %v10960_v27  ;;  %v10994_v2 = vld [vmem:[#allocation15 + $0x170] sm:$0xff]  ;;  %v11001_v44 = vand.u32 4294901760, %v10979_v41 }
 0x111   : > { %16005 = vst [vmem:[#allocation169_spill] sm:$0xff] %v10929_v22  ;;  %16006 = vst [vmem:[#allocation170_spill] sm:$0xff] %v10933_v45  ;;  %v10975_v22 = vand.u32 4294901760, %v10939_v15  ;;  %1213 = vmatprep.subr.mxu1 %v10969_v19 }
 0x112   : > { %16007 = vst [vmem:[#allocation171_spill] sm:$0xff] %v10937_v8  ;;  %16008 = vst [vmem:[#allocation172_spill] sm:$0xff] %v10942_v37  ;;  %v10989_v37 = vand.u32 4294901760, %v10964_v25  ;;  %v10997_v1 = vand.u32 4294901760, %v1223_v33  ;;  %1219 = vmatpush2.msra.mxu1 %v10984_v34  ;;  %v11013_v8 = vand.u32 4294901760, %v1229_v0 }
 0x113   : > { %16009 = vst [vmem:[#allocation173_spill] sm:$0xff] %v10947_v43  ;;  %16010 = vst [vmem:[#allocation174_spill] sm:$0xff] %v10950_v7  ;;  %v10992_v43 = vand.u32 4294901760, %v10952_v36  ;;  %914 = vmatpush2.msra.mxu0 %v10975_v22 }
 0x114   : > { %16011 = vst [vmem:[#allocation175_spill] sm:$0xff] %v10954_v26  ;;  %16012 = vst [vmem:[#allocation176_spill] sm:$0xff] %v10960_v27  ;;  %v11005_v26 = vsub.f32 %v10808_v40, %v10848_v30  ;;  %v11008_v27 = vand.u32 4294901760, %v10966_v29  ;;  %v1235_v33 = vsub.f32 %v10964_v25, %v10989_v37  ;;  %v11023_v40 = vand.u32 4294901760, %v10981_v20  ;;  %1225 = vmatprep.subr.mxu1 %v10997_v1 }
 0x115   : > { %16013 = vst [vmem:[#allocation177_spill] sm:$0xff] %v10964_v25  ;;  %16014 = vst [vmem:[#allocation178_spill] sm:$0xff] %v10969_v19  ;;  %916 = vmatprep.subr.mxu0 %v10992_v43  ;;  %v11020_v19 = vsub.f32 %v10822_v48, %v10864_v39  ;;  %v1241_v30 = vsub.f32 %v10979_v41, %v11001_v44  ;;  %v11037_v48 = vand.u32 4294901760, %v10994_v2  ;;  %1231 = vmatpush2.msra.mxu1 %v11013_v8 }
 0x116   : > { %16015 = vst [vmem:[#allocation179_spill] sm:$0xff] %v10975_v22  ;;  %16016 = vst [vmem:[#allocation180_spill] sm:$0xff] %v10979_v41  ;;  %v11029_v0 = vand.u32 4294901760, %v11005_v26  ;;  %918 = vmatpush2.msra.mxu0 %v11008_v27  ;;  %v11050_v39 = vsub.f32 %v10850_v60, %v10893_v46  ;;  %v11067_v25 = vsub.f32 %v10866_v59, %v10909_v21 }
 0x117   : > { %16017 = vst [vmem:[#allocation181_spill] sm:$0xff] %v10984_v34  ;;  %16018 = vst [vmem:[#allocation182_spill] sm:$0xff] %v10989_v37  ;;  %v11034_v34 = vsub.f32 %v10837_v47, %v10879_v16  ;;  %v11039_v37 = vld [vmem:[#allocation15 + $0x160] sm:$0xff]  ;;  %920 = vmatprep.subr.mxu0 %v11023_v40  ;;  %v11053_v47 = vand.u32 4294901760, %v11010_v38  ;;  %v11055_v16 = vld [vmem:[#allocation15 + $0x158] sm:$0xff]  ;;  %v11057_v41 = vand.u32 4294901760, %v1241_v30  ;;  %v11081_v46 = vsub.f32 %v10895_v23, %v10933_v45 }
 0x118   : > { %16019 = vst [vmem:[#allocation183_spill] sm:$0xff] %v10992_v43  ;;  %16020 = vst [vmem:[#allocation184_spill] sm:$0xff] %v10997_v1  ;;  %v11042_v1 = vand.u32 4294901760, %v1235_v33  ;;  %v1247_v33 = vsub.f32 %v11005_v26, %v11029_v0  ;;  %922 = vmatpush2.msra.mxu0 %v11037_v48  ;;  %v11073_v30 = vand.u32 4294901760, %v11050_v39  ;;  %v11094_v21 = vand.u32 4294901760, %v11055_v16 }
 0x119   : > { %16021 = vst [vmem:[#allocation185_spill] sm:$0xff] %v11001_v44  ;;  %16022 = vst [vmem:[#allocation186_spill] sm:$0xff] %v11005_v26  ;;  %v11045_v44 = vand.u32 4294901760, %v11020_v19  ;;  %924 = vmatprep.subr.mxu0 %v11053_v47  ;;  %v11083_v26 = vld [vmem:[#allocation15 + $0x150] sm:$0xff] }
 0x11a   : > { %16023 = vst [vmem:[#allocation187_spill] sm:$0xff] %v11008_v27  ;;  %16024 = vst [vmem:[#allocation188_spill] sm:$0xff] %v11013_v8  ;;  %v11062_v8 = vand.u32 4294901760, %v11034_v34  ;;  %1237 = vmatprep.subr.mxu1 %v11042_v1  ;;  %v11086_v59 = vand.u32 4294901760, %v1247_v33  ;;  %v1265_v23 = vsub.f32 %v11050_v39, %v11073_v30  ;;  %v11104_v33 = vand.u32 4294901760, %v11081_v46 }
 0x11b   : > { %16025 = vst [vmem:[#allocation189_spill] sm:$0xff] %v11020_v19  ;;  %16026 = vst [vmem:[#allocation190_spill] sm:$0xff] %v11023_v40  ;;  %v1253_v60 = vsub.f32 %v11020_v19, %v11045_v44  ;;  %1243 = vmatpush2.msra.mxu1 %v11057_v41  ;;  %v11096_v19 = vld [vmem:[#allocation15 + $0x148] sm:$0xff] }
 0x11c   : > { %16027 = vst [vmem:[#allocation191_spill] sm:$0xff] %v11029_v0  ;;  %16028 = vst [vmem:[#allocation192_spill] sm:$0xff] %v11034_v34  ;;  %v11077_v0 = vand.u32 4294901760, %v11039_v37  ;;  %1249 = vmatprep.subr.mxu1 %v11086_v59 }
 0x11d   : > { %16029 = vst [vmem:[#allocation193_spill] sm:$0xff] %v11037_v48  ;;  %16030 = vst [vmem:[#allocation194_spill] sm:$0xff] %v11042_v1  ;;  %v1259_v1 = vsub.f32 %v11034_v34, %v11062_v8  ;;  %v11098_v53 = vand.u32 4294901760, %v1253_v60 }
 0x11e   : > { %16031 = vst [vmem:[#allocation195_spill] sm:$0xff] %v11045_v44  ;;  %16032 = vst [vmem:[#allocation196_spill] sm:$0xff] %v11050_v39  ;;  %v11091_v44 = vand.u32 4294901760, %v11067_v25  ;;  %926 = vmatpush2.msra.mxu0 %v11077_v0  ;;  %v11123_v39 = vsub.f32 %v10939_v15, %v10975_v22  ;;  %v11154_v22 = vld [vmem:[#allocation15 + $0x128] sm:$0xff] }
 0x11f   : > { %16033 = vst [vmem:[#allocation197_spill] sm:$0xff] %v11053_v47  ;;  %16034 = vst [vmem:[#allocation198_spill] sm:$0xff] %v11057_v41  ;;  %v11108_v41 = vsub.f32 %v10911_v35, %v10950_v7  ;;  %v11113_v45 = vand.u32 4294901760, %v1259_v1  ;;  %928 = vmatprep.subr.mxu0 %v11094_v21  ;;  %v11125_v35 = vld [vmem:[#allocation15 + $0x138] sm:$0xff]  ;;  %1255 = vmatpush2.msra.mxu1 %v11098_v53  ;;  %v11128_v7 = vand.u32 4294901760, %v1265_v23 }
 0x120   : > { %16035 = vst [vmem:[#allocation199_spill] sm:$0xff] %v11062_v8  ;;  %16036 = vst [vmem:[#allocation200_spill] sm:$0xff] %v11067_v25  ;;  %v11110_v8 = vld [vmem:[#allocation15 + $0x140] sm:$0xff]  ;;  %v1271_v60 = vsub.f32 %v11067_v25, %v11091_v44  ;;  %v1277_v1 = vsub.f32 %v11081_v46, %v11104_v33  ;;  %v11138_v25 = vld [vmem:[#allocation15 + $0x130] sm:$0xff]  ;;  %v11145_v23 = vand.u32 4294901760, %v11123_v39 }
 0x121   : > { %16037 = vst [vmem:[#allocation201_spill] sm:$0xff] %v11073_v30  ;;  %16038 = vst [vmem:[#allocation202_spill] sm:$0xff] %v11077_v0  ;;  %v11119_v30 = vand.u32 4294901760, %v11083_v26  ;;  %1261 = vmatprep.subr.mxu1 %v11113_v45 }
 0x122   : > { %16039 = vst [vmem:[#allocation203_spill] sm:$0xff] %v11081_v46  ;;  %16040 = vst [vmem:[#allocation204_spill] sm:$0xff] %v11086_v59  ;;  %v11133_v59 = vand.u32 4294901760, %v11108_v41  ;;  %v11141_v15 = vand.u32 4294901760, %v1271_v60  ;;  %1267 = vmatpush2.msra.mxu1 %v11128_v7  ;;  %v11157_v46 = vand.u32 4294901760, %v1277_v1 }
 0x123   : > { %16041 = vst [vmem:[#allocation205_spill] sm:$0xff] %v11091_v44  ;;  %16042 = vst [vmem:[#allocation206_spill] sm:$0xff] %v11094_v21  ;;  %v11136_v44 = vand.u32 4294901760, %v11096_v19  ;;  %930 = vmatpush2.msra.mxu0 %v11119_v30 }
 0x124   : > { %16043 = vst [vmem:[#allocation207_spill] sm:$0xff] %v11098_v53  ;;  %16044 = vst [vmem:[#allocation208_spill] sm:$0xff] %v11104_v33  ;;  %v11149_v53 = vsub.f32 %v10952_v36, %v10992_v43  ;;  %v11152_v33 = vand.u32 4294901760, %v11110_v8  ;;  %v1283_v60 = vsub.f32 %v11108_v41, %v11133_v59  ;;  %v11167_v36 = vand.u32 4294901760, %v11125_v35  ;;  %1273 = vmatprep.subr.mxu1 %v11141_v15 }
 0x125   : > { %16045 = vst [vmem:[#allocation209_spill] sm:$0xff] %v11108_v41  ;;  %16046 = vst [vmem:[#allocation210_spill] sm:$0xff] %v11113_v45  ;;  %932 = vmatprep.subr.mxu0 %v11136_v44  ;;  %v11164_v45 = vsub.f32 %v10966_v29, %v11008_v27  ;;  %v1289_v43 = vsub.f32 %v11123_v39, %v11145_v23  ;;  %v11181_v29 = vand.u32 4294901760, %v11138_v25  ;;  %1279 = vmatpush2.msra.mxu1 %v11157_v46 }
 0x126   : > { %16047 = vst [vmem:[#allocation211_spill] sm:$0xff] %v11119_v30  ;;  %16048 = vst [vmem:[#allocation212_spill] sm:$0xff] %v11123_v39  ;;  %v11173_v1 = vand.u32 4294901760, %v11149_v53  ;;  %934 = vmatpush2.msra.mxu0 %v11152_v33  ;;  %v11194_v27 = vsub.f32 %v10994_v2, %v11037_v48  ;;  %v11211_v41 = vsub.f32 %v11010_v38, %v11053_v47 }
 0x127   : > { %16049 = vst [vmem:[#allocation213_spill] sm:$0xff] %v11128_v7  ;;  %16050 = vst [vmem:[#allocation214_spill] sm:$0xff] %v11133_v59  ;;  %v11178_v7 = vsub.f32 %v10981_v20, %v11023_v40  ;;  %v11183_v59 = vld [vmem:[#allocation15 + $0x120] sm:$0xff]  ;;  %936 = vmatprep.subr.mxu0 %v11167_v36  ;;  %v11197_v20 = vand.u32 4294901760, %v11154_v22  ;;  %v11199_v40 = vld [vmem:[#allocation15 + $0x118] sm:$0xff]  ;;  %v11201_v39 = vand.u32 4294901760, %v1289_v43  ;;  %v11225_v48 = vsub.f32 %v11039_v37, %v11077_v0 }
 0x128   : > { %16051 = vst [vmem:[#allocation215_spill] sm:$0xff] %v11136_v44  ;;  %16052 = vst [vmem:[#allocation216_spill] sm:$0xff] %v11141_v15  ;;  %v11186_v15 = vand.u32 4294901760, %v1283_v60  ;;  %v1295_v60 = vsub.f32 %v11149_v53, %v11173_v1  ;;  %938 = vmatpush2.msra.mxu0 %v11181_v29  ;;  %v11217_v43 = vand.u32 4294901760, %v11194_v27  ;;  %v11238_v47 = vand.u32 4294901760, %v11199_v40 }
 0x129   : > { %16053 = vst [vmem:[#allocation217_spill] sm:$0xff] %v11145_v23  ;;  %16054 = vst [vmem:[#allocation218_spill] sm:$0xff] %v11149_v53  ;;  %v11189_v23 = vand.u32 4294901760, %v11164_v45  ;;  %940 = vmatprep.subr.mxu0 %v11197_v20  ;;  %v11227_v53 = vld [vmem:[#allocation15 + $0x110] sm:$0xff] }
 0x12a   : > { %16055 = vst [vmem:[#allocation219_spill] sm:$0xff] %v11152_v33  ;;  %16056 = vst [vmem:[#allocation220_spill] sm:$0xff] %v11157_v46  ;;  %v11206_v46 = vand.u32 4294901760, %v11178_v7  ;;  %1285 = vmatprep.subr.mxu1 %v11186_v15  ;;  %v11230_v38 = vand.u32 4294901760, %v1295_v60  ;;  %v1313_v37 = vsub.f32 %v11194_v27, %v11217_v43  ;;  %v11248_v60 = vand.u32 4294901760, %v11225_v48 }
 0x12b   : > { %16057 = vst [vmem:[#allocation221_spill] sm:$0xff] %v11164_v45  ;;  %16058 = vst [vmem:[#allocation222_spill] sm:$0xff] %v11167_v36  ;;  %v1301_v2 = vsub.f32 %v11164_v45, %v11189_v23  ;;  %1291 = vmatpush2.msra.mxu1 %v11201_v39  ;;  %v11240_v45 = vld [vmem:[#allocation15 + $0x108] sm:$0xff] }
 0x12c   : > { %16059 = vst [vmem:[#allocation223_spill] sm:$0xff] %v11173_v1  ;;  %16060 = vst [vmem:[#allocation224_spill] sm:$0xff] %v11178_v7  ;;  %v11221_v1 = vand.u32 4294901760, %v11183_v59  ;;  %1297 = vmatprep.subr.mxu1 %v11230_v38 }
 0x12d   : > { %16061 = vst [vmem:[#allocation225_spill] sm:$0xff] %v11181_v29  ;;  %16062 = vst [vmem:[#allocation226_spill] sm:$0xff] %v11186_v15  ;;  %v1307_v15 = vsub.f32 %v11178_v7, %v11206_v46  ;;  %v11242_v34 = vand.u32 4294901760, %v1301_v2 }
 0x12e   : > { %16063 = vst [vmem:[#allocation227_spill] sm:$0xff] %v11189_v23  ;;  %16064 = vst [vmem:[#allocation228_spill] sm:$0xff] %v11194_v27  ;;  %v11235_v23 = vand.u32 4294901760, %v11211_v41  ;;  %942 = vmatpush2.msra.mxu0 %v11221_v1  ;;  %v11267_v27 = vsub.f32 %v11083_v26, %v11119_v30 }
 0x12f   : > { %16065 = vst [vmem:[#allocation229_spill] sm:$0xff] %v11197_v20  ;;  %16066 = vst [vmem:[#allocation230_spill] sm:$0xff] %v11201_v39  ;;  %v11252_v39 = vsub.f32 %v11055_v16, %v11094_v21  ;;  %v11257_v0 = vand.u32 4294901760, %v1307_v15  ;;  %944 = vmatprep.subr.mxu0 %v11238_v47  ;;  %1303 = vmatpush2.msra.mxu1 %v11242_v34  ;;  %v11270_v16 = vand.u32 4294901760, %v1313_v37  ;;  %v542_v21 = vld [vmem:[#allocation3] sm:$0xff] }
 0x130   : > { %16067 = vst [vmem:[#allocation231_spill] sm:$0xff] %v11206_v46  ;;  %16068 = vst [vmem:[#allocation232_spill] sm:$0xff] %v11211_v41  ;;  %v11254_v46 = vld [vmem:[#allocation15 + $0x100] sm:$0xff]  ;;  %v1319_v2 = vsub.f32 %v11211_v41, %v11235_v23  ;;  %v1325_v15 = vsub.f32 %v11225_v48, %v11248_v60  ;;  %v11285_v26 = vand.u32 4294901760, %v11267_v27  ;;  %v11289_v37 = vsub.f32 %v11096_v19, %v11136_v44 }
 0x131   : > { %16069 = vst [vmem:[#allocation233_spill] sm:$0xff] %v11217_v43  ;;  %16070 = vst [vmem:[#allocation234_spill] sm:$0xff] %v11221_v1  ;;  %v11263_v43 = vand.u32 4294901760, %v11227_v53  ;;  %1309 = vmatprep.subr.mxu1 %v11257_v0 }
 0x132   : > { %16071 = vst [vmem:[#allocation235_spill] sm:$0xff] %v11225_v48  ;;  %16072 = vst [vmem:[#allocation236_spill] sm:$0xff] %v11230_v38  ;;  %v11275_v38 = vand.u32 4294901760, %v11252_v39  ;;  %v11281_v41 = vand.u32 4294901760, %v1319_v2  ;;  %1315 = vmatpush2.msra.mxu1 %v11270_v16  ;;  %v1337_v19 = vsub.f32 %v11267_v27, %v11285_v26  ;;  %v11308_v44 = vand.u32 4294901760, %v11289_v37 }
 0x133   : > { %16073 = vst [vmem:[#allocation237_spill] sm:$0xff] %v11235_v23  ;;  %16074 = vst [vmem:[#allocation238_spill] sm:$0xff] %v11238_v47  ;;  %v11278_v23 = vand.u32 4294901760, %v11240_v45  ;;  %946 = vmatpush2.msra.mxu0 %v11263_v43 }
 0x134   : > { %16075 = vst [vmem:[#allocation239_spill] sm:$0xff] %v11242_v34  ;;  %16076 = vst [vmem:[#allocation240_spill] sm:$0xff] %v11248_v60  ;;  %v11292_v34 = vand.u32 4294901760, %v11254_v46  ;;  %v11295_v60 = vand.u32 4294901760, %v1325_v15  ;;  %v1331_v2 = vsub.f32 %v11252_v39, %v11275_v38  ;;  %1321 = vmatprep.subr.mxu1 %v11281_v41  ;;  %v629_v15 = vrot.slane %v542_v21, 1 }
 0x135   : > { %16077 = vst [vmem:[#allocation241_spill] sm:$0xff] %v11252_v39  ;;  %16078 = vst [vmem:[#allocation242_spill] sm:$0xff] %v11257_v0  ;;  %948 = vmatprep.subr.mxu0 %v11278_v23  ;;  %v11302_v0 = vsub.f32 %v11110_v8, %v11152_v33  ;;  %v15397_v33 = vrot.slane %v10281_v13, 1  ;;  %v1343_v30 = vsub.f32 %v11289_v37, %v11308_v44 }
 0x136   : > { %16079 = vst [vmem:[#allocation243_spill] sm:$0xff] %v11263_v43  ;;  %16080 = vst [vmem:[#allocation244_spill] sm:$0xff] %v11267_v27  ;;  %950 = vmatpush2.msra.mxu0 %v11292_v34  ;;  %1327 = vmatpush2.msra.mxu1 %v11295_v60 }
 0x137   : > { %16081 = vst [vmem:[#allocation245_spill] sm:$0xff] %v11270_v16  ;;  %16082 = vst [vmem:[#allocation246_spill] sm:$0xff] %v11275_v38  ;;  %v630_v16 = vrot.slane %v10277_v9, 1  ;;  %v11313_v38 = vand.u32 4294901760, %v1331_v2  ;;  %v11316_v8 = vand.u32 4294901760, %v11302_v0  ;;  %1435 = vmatprep.subr.mxu0 %v10335_v4 }
 0x138   : > { %16083 = vst [vmem:[#allocation247_spill] sm:$0xff] %v11278_v23  ;;  %16084 = vst [vmem:[#allocation248_spill] sm:$0xff] %v11281_v41  ;;  %v634_v41 = vrot.slane %v10279_v11, 1 }
 0x139   : > { %16085 = vst [vmem:[#allocation249_spill] sm:$0xff] %v11285_v26  ;;  %16086 = vst [vmem:[#allocation250_spill] sm:$0xff] %v11289_v37  ;;  %v11321_v26 = vand.u32 4294901760, %v1337_v19  ;;  %v631_v9 = vsel %vm625_vm0, %v629_v15, %v630_v16  ;;  %1333 = vmatprep.subr.mxu1 %v11313_v38  ;;  %v1349_v2 = vsub.f32 %v11302_v0, %v11316_v8  ;;  %v11334_v19 = vand.u32 4294901760, %v1343_v30  ;;  %v11336_v15 = vld [vmem:[#allocation3 + $0x48] sm:$0xff] }
 0x13a   : > { %16087 = vst [vmem:[#allocation251_spill] sm:$0xff] %v11292_v34  ;;  %16088 = vst [vmem:[#allocation252_spill] sm:$0xff] %v11295_v60  ;;  %v635_v60 = vsel %vm625_vm0, %v630_v16, %v634_v41  ;;  %v639_v11 = vsel %vm625_vm0, %v634_v41, %v15397_v33  ;;  %v655_v4 = vadd.f32 %v631_v9, %v542_v21 }
 0x13b   : > { %16089 = vst [vmem:[#allocation253_spill] sm:$0xff] %v11302_v0  ;;  %16090 = vst [vmem:[#allocation254_spill] sm:$0xff] %v11308_v44  ;;  %1339 = vmatpush2.msra.mxu1 %v11321_v26  ;;  %v9655_v44 = vld [vmem:[#allocation3 + $0x8] sm:$0xff]  ;;  %v11341_v0 = vand.u32 4294901760, %v1349_v2  ;;  %v11350_v2 = vsub.f32 %v11125_v35, %v11167_v36  ;;  %v16098_v35 = vrot.slane %v11336_v15, 6 }
 0x13c   : > { %16091 = vst [vmem:[#allocation255_spill] sm:$0xff] %v11313_v38  ;;  %16092 = vst [vmem:[#allocation256_spill] sm:$0xff] %v11316_v8  ;;  %v657_v37 = vadd.f32 %v9655_v44, %v635_v60  ;;  %v11339_v38 = vadd.f32 %v11336_v15, %v639_v11  ;;  %v541_v8 = vld [vmem:[#allocation3 + $0x38] sm:$0xff]  ;;  %v678_v16 = vrot.slane %v655_v4, 2  ;;  %v717_v27 = vrot.slane %v655_v4, 4  ;;  %1345 = vmatprep.subr.mxu1 %v11334_v19 }
 0x13d   : > { %16093 = vst [vmem:[#allocation257_spill] sm:$0xff] %v11321_v26  ;;  %16094 = vst [vmem:[#allocation258_spill] sm:$0xff] %v11334_v19  ;;  %1351 = vmatpush2.msra.mxu1 %v11341_v0  ;;  %v754_v9 = vrot.slane %v9655_v44, 6  ;;  %v626_v33 = vrot.slane %v541_v8, 1  ;;  %v11361_v11 = vand.u32 4294901760, %v11350_v2 }
 0x13e   : > { %16095 = vst [vmem:[#allocation259_spill] sm:$0xff] %v11341_v0  ;;  %v679_v41 = vrot.slane %v657_v37, 2  ;;  %v15414_v21 = vrot.slane %v11339_v38, 2  ;;  %v718_v30 = vrot.slane %v657_v37, 4  ;;  %v15415_v60 = vrot.slane %v11339_v38, 4  ;;  %16096 = vst [vmem:[#allocation260_spill] sm:$0xff] %v11350_v2 }
 0x13f   : > { %16097 = vst [vmem:[#allocation261_spill] sm:$0xff] %v11361_v11  ;;  %v758_v36 = vsel %vm752_vm3, %v754_v9, %v16098_v35 }
 0x140   : > { %v680_v26 = vsel %vm674_vm1, %v678_v16, %v679_v41  ;;  %v684_v19 = vsel %vm674_vm1, %v679_v41, %v15414_v21  ;;  %v719_v39 = vsel %vm713_vm2, %v717_v27, %v718_v30  ;;  %v723_v0 = vsel %vm713_vm2, %v718_v30, %v15415_v60  ;;  %v9657_v16 = vld [vmem:[#allocation3 + $0x28] sm:$0xff]  ;;  %v11369_v27 = vld [vmem:[#allocation3 + $0x18] sm:$0xff] }
 0x141   : > { %v704_v44 = vadd.f32 %v680_v26, %v655_v4  ;;  %v706_v48 = vadd.f32 %v684_v19, %v657_v37  ;;  %v627_v7 = vrot.slane %v9657_v16, 1  ;;  %v632_v41 = vrot.slane %v11366_v31, 1 }
 0x142   : > { %v15424_v21 = vrot.slane %v11369_v27, 1  ;;  %v1355_v26 = vsub.f32 %v11350_v2, %v11361_v11  ;;  %v16158_v11 = vld [vmem:[#allocation91_spill] sm:$0xff] }
 0x143   : > { %v743_v30 = vadd.f32 %v719_v39, %v704_v44  ;;  %v745_v4 = vadd.f32 %v723_v0, %v706_v48  ;;  %v628_v37 = vsel %vm625_vm0, %v626_v33, %v627_v7  ;;  %v633_v19 = vsel %vm625_vm0, %v627_v7, %v632_v41 }
 0x144   : > { %v637_v35 = vsel %vm625_vm0, %v632_v41, %v15424_v21  ;;  %v11381_v24 = vand.u32 4294901760, %v1355_v26  ;;  %v654_v54 = vadd.f32 %v628_v37, %v541_v8  ;;  %v656_v17 = vadd.f32 %v9657_v16, %v633_v19 }
 0x145   : > { %v778_v60 = vadd.f32 %v754_v9, %v743_v30  ;;  %v11379_v50 = vadd.f32 %v758_v36, %v745_v4  ;;  %v11384_v39 = vadd.f32 %v11366_v31, %v637_v35  ;;  %v753_v0 = vrot.slane %v9657_v16, 6 }
 0x146   : > { %16099 = vst [vmem:[#allocation262_spill] sm:$0xff] %v11381_v24  ;;  %v15426_v48 = vrot.slane %v11366_v31, 6  ;;  %1357 = vmatprep.subr.mxu1 %v11381_v24  ;;  %v675_v44 = vrot.slane %v654_v54, 2  ;;  %v714_v41 = vrot.slane %v654_v54, 4  ;;  %v676_v9 = vrot.slane %v656_v17, 2 }
 0x147   : > { %v800_v33 = vrot.slane %v778_v60, 2  ;;  %v15425_v7 = vrot.slane %v11379_v50, 2  ;;  %v15428_v36 = vrot.slane %v11384_v39, 2  ;;  %v715_v30 = vrot.slane %v656_v17, 4 }
 0x148   : > { %v15427_v8 = vrot.slane %v11384_v39, 4  ;;  %v11396_v16 = vsub.f32 %v11138_v25, %v11181_v29  ;;  %v11400_v60 = vsub.f32 %v11154_v22, %v11197_v20  ;;  %v677_v37 = vsel %vm674_vm1, %v675_v44, %v676_v9 }
 0x149   : > { %v802_v4 = vsel %vm674_vm1, %v800_v33, %v15425_v7  ;;  %v682_v19 = vsel %vm674_vm1, %v676_v9, %v15428_v36  ;;  %v716_v35 = vsel %vm713_vm2, %v714_v41, %v715_v30  ;;  %v703_v21 = vadd.f32 %v677_v37, %v654_v54 }
 0x14a   : > { %16100 = vst [vmem:[#allocation263_spill] sm:$0xff] %v11396_v16  ;;  %16101 = vst [vmem:[#allocation264_spill] sm:$0xff] %v11400_v60  ;;  %v11402_v26 = vand.u32 4294901760, %v802_v4  ;;  %v705_v33 = vadd.f32 %v682_v19, %v656_v17  ;;  %v721_v25 = vsel %vm713_vm2, %v715_v30, %v15427_v8  ;;  %v756_v22 = vsel %vm752_vm3, %v753_v0, %v15426_v48 }
 0x14b   : > { %v11419_v44 = vand.u32 4294901760, %v11396_v16  ;;  %v11422_v9 = vand.u32 4294901760, %v11400_v60  ;;  %v11426_v17 = vsub.f32 %v11183_v59, %v11221_v1  ;;  %v742_v54 = vadd.f32 %v716_v35, %v703_v21 }
 0x14c   : > { %16102 = vst [vmem:[#allocation265_spill] sm:$0xff] %v11402_v26  ;;  %v11416_v7 = vsub.f32 %v802_v4, %v11402_v26  ;;  %1401 = vmatprep.mubr.f32.mxu1 %v11402_v26  ;;  %v744_v41 = vadd.f32 %v721_v25, %v705_v33  ;;  %v11431_v30 = vsub.f32 %v11199_v40, %v11238_v47 }
 0x14d   : > { %16103 = vst [vmem:[#allocation266_spill] sm:$0xff] %v11419_v44  ;;  %16104 = vst [vmem:[#allocation267_spill] sm:$0xff] %v11422_v9  ;;  %v11435_v4 = vsub.f32 %v11227_v53, %v11263_v43  ;;  %v1361_v19 = vsub.f32 %v11396_v16, %v11419_v44  ;;  %v1367_v59 = vsub.f32 %v11400_v60, %v11422_v9  ;;  %v11443_v48 = vand.u32 4294901760, %v11426_v17  ;;  %v16151_v44 = vld [vmem:[#allocation78_spill] sm:$0xff] }
 0x14e   : > { %16105 = vst [vmem:[#allocation268_spill] sm:$0xff] %v11426_v17  ;;  %16106 = vst [vmem:[#allocation269_spill] sm:$0xff] %v11431_v30  ;;  %v15431_v37 = vand.u32 4294901760, %v11416_v7  ;;  %v777_v21 = vadd.f32 %v753_v0, %v742_v54  ;;  %v11445_v35 = vadd.f32 %v756_v22, %v744_v41  ;;  %v11448_v40 = vand.u32 4294901760, %v11431_v30 }
 0x14f   : > { %16107 = vst [vmem:[#allocation270_spill] sm:$0xff] %v11435_v4  ;;  %16108 = vst [vmem:[#allocation271_spill] sm:$0xff] %v11443_v48  ;;  %v11451_v53 = vand.u32 4294901760, %v11435_v4  ;;  %v11456_v25 = vand.u32 4294901760, %v1361_v19  ;;  %v11458_v8 = vand.u32 4294901760, %v1367_v59  ;;  %v1373_v36 = vsub.f32 %v11426_v17, %v11443_v48 }
 0x150   : > { %16109 = vst [vmem:[#allocation272_spill] sm:$0xff] %v11448_v40  ;;  %v954_v33 = vsub.f32 %v11416_v7, %v15431_v37  ;;  %v797_v0 = vrot.slane %v777_v21, 2  ;;  %v15436_v22 = vrot.slane %v11445_v35, 2  ;;  %v1379_v54 = vsub.f32 %v11431_v30, %v11448_v40 }
 0x151   : > { %16110 = vst [vmem:[#allocation273_spill] sm:$0xff] %v11451_v53  ;;  %16111 = vst [vmem:[#allocation274_spill] sm:$0xff] %v11456_v25  ;;  %v1385_v41 = vsub.f32 %v11435_v4, %v11451_v53  ;;  %1363 = vmatpush2.msra.mxu1 %v11456_v25  ;;  %v11468_v37 = vand.u32 4294901760, %v1373_v36  ;;  %v11472_v19 = vsub.f32 %v11240_v45, %v11278_v23  ;;  %v11486_v36 = vld [vmem:[#allocation3 + $0x30] sm:$0xff] }
 0x152   : > { %16112 = vst [vmem:[#allocation275_spill] sm:$0xff] %v11458_v8  ;;  %v955_v24 = vand.u32 4294901760, %v954_v33  ;;  %v11476_v59 = vsub.f32 %v11254_v46, %v11292_v34  ;;  %v799_v21 = vsel %vm674_vm1, %v797_v0, %v15436_v22  ;;  %1369 = vmatprep.subr.mxu1 %v11458_v8  ;;  %v11482_v26 = vand.u32 4294901760, %v1379_v54  ;;  %v11502_v22 = vld [vmem:[#allocation3 + $0x40] sm:$0xff] }
 0x153   : > { %16113 = vst [vmem:[#allocation276_spill] sm:$0xff] %v11468_v37  ;;  %16114 = vst [vmem:[#allocation277_spill] sm:$0xff] %v11472_v19  ;;  %v11484_v33 = vand.u32 4294901760, %v1385_v41  ;;  %v642_v25 = vrot.slane %v11486_v36, 1  ;;  %v11489_v45 = vand.u32 4294901760, %v799_v21  ;;  %1375 = vmatpush2.msra.mxu1 %v11468_v37  ;;  %v11493_v46 = vand.u32 4294901760, %v11472_v19 }
 0x154   : > { %16115 = vst [vmem:[#allocation278_spill] sm:$0xff] %v11476_v59  ;;  %16116 = vst [vmem:[#allocation279_spill] sm:$0xff] %v11482_v26  ;;  %956 = vmatprep.mubr.f32.mxu0 %v955_v24  ;;  %v11496_v0 = vand.u32 4294901760, %v11476_v59  ;;  %1381 = vmatprep.subr.mxu1 %v11482_v26  ;;  %v16121_v54 = vrot.slane %v10281_v13, 1  ;;  %v640_v24 = vrot.slane %v11502_v22, 1  ;;  %v11513_v26 = vld [vmem:[#allocation3 + $0x10] sm:$0xff] }
 0x155   : > { %16117 = vst [vmem:[#allocation280_spill] sm:$0xff] %v11484_v33  ;;  %16118 = vst [vmem:[#allocation281_spill] sm:$0xff] %v11489_v45  ;;  %v11506_v8 = vsub.f32 %v799_v21, %v11489_v45  ;;  %1387 = vmatpush2.msra.mxu1 %v11484_v33  ;;  %v1391_v37 = vsub.f32 %v11472_v19, %v11493_v46 }
 0x156   : > { %16119 = vst [vmem:[#allocation282_spill] sm:$0xff] %v11493_v46  ;;  %16120 = vst [vmem:[#allocation283_spill] sm:$0xff] %v11496_v0  ;;  %v643_v41 = vsel %vm625_vm0, %v16121_v54, %v642_v25  ;;  %v1397_v53 = vsub.f32 %v11476_v59, %v11496_v0  ;;  %v16122_v54 = vrot.slane %v11369_v27, 1 }
 0x157   : > { %v661_v13 = vadd.f32 %v11513_v26, %v643_v41  ;;  %v15457_v48 = vand.u32 4294901760, %v11506_v8  ;;  %v11520_v21 = vand.u32 4294901760, %v1391_v37  ;;  %v11533_v41 = vadd.f32 %v11486_v36, %v642_v25 }
 0x158   : > { %v641_v40 = vsel %vm625_vm0, %v16122_v54, %v640_v24  ;;  %v11522_v9 = vand.u32 4294901760, %v1397_v53  ;;  %v11544_v25 = vadd.f32 %v11502_v22, %v640_v24  ;;  %v16127_v24 = vrot.slane %v11339_v38, 4 }
 0x159   : > { %16123 = vst [vmem:[#allocation284_spill] sm:$0xff] %v11520_v21  ;;  %v687_v33 = vrot.slane %v661_v13, 2  ;;  %v11525_v46 = vadd.f32 %v11369_v27, %v641_v40  ;;  %v960_v0 = vsub.f32 %v11506_v8, %v15457_v48  ;;  %1393 = vmatprep.subr.mxu1 %v11520_v21  ;;  %v16125_v40 = vrot.slane %v11339_v38, 2 }
 0x15a   : > { %16124 = vst [vmem:[#allocation285_spill] sm:$0xff] %v11522_v9  ;;  %1399 = vmatpush2.msra.mxu1 %v11522_v9  ;;  %v726_v48 = vrot.slane %v661_v13, 4 }
 0x15b   : > { %v961_v54 = vand.u32 4294901760, %v960_v0  ;;  %1403 = vmatmul.mubr.f32.vlgmr.msra.gmra.mxu1 %v11489_v45  ;;  %1667 = vmatprep.subr.mxu1 %v10303_v51  ;;  %v685_v37 = vrot.slane %v11525_v46, 2  ;;  %v688_v53 = vsel %vm674_vm1, %v16125_v40, %v687_v33  ;;  %v16126_v40 = vrot.slane %v11384_v39, 2  ;;  %v16142_v45 = vld [vmem:[#allocation62_spill] sm:$0xff] }
 0x15c   : > { %1669 = vmatpush1.msra.mxu1 %v10305_v52  ;;  %v708_v9 = vadd.f32 %v688_v53, %v11339_v38  ;;  %v724_v21 = vrot.slane %v11525_v46, 4  ;;  %v727_v0 = vsel %vm713_vm2, %v16127_v24, %v726_v48  ;;  %v689_v53 = vrot.slane %v11544_v25, 2 }
 0x15d   : > { %962 = vmatmul.mubr.f32.vlgmr.msra.gmra.mxu0 %v961_v54  ;;  %1671 = vmatprep.subr.mxu1 %v10311_v55  ;;  %v686_v54 = vsel %vm674_vm1, %v16126_v40, %v685_v37  ;;  %v730_v24 = vrot.slane %v11533_v41, 4 }
 0x15e   : > { %1438 = vmatpush1.msra.mxu0 %v10341_v6  ;;  %1673 = vmatpush1.msra.mxu1 %v10313_v56  ;;  %v707_v40 = vadd.f32 %v686_v54, %v11384_v39  ;;  %v16130_v54 = vrot.slane %v11336_v15, 6  ;;  %v765_v15 = vrot.slane %v11486_v36, 6 }
 0x15f   : > { %1441 = vmatprep.subr.mxu0 %v10350_v14  ;;  %1675 = vmatprep.subr.mxu1 %v10315_v57  ;;  %v761_v14 = vrot.slane %v11513_v26, 6  ;;  %v747_v26 = vadd.f32 %v727_v0, %v708_v9  ;;  %v690_v9 = vsel %vm674_vm1, %v685_v37, %v689_v53  ;;  %v731_v0 = vsel %vm713_vm2, %v726_v48, %v730_v24  ;;  %v16138_v48 = vld [vmem:[#allocation52_spill] sm:$0xff] }
 0x160   : > { %1444 = vmatpush1.msra.mxu0 %v10363_v18  ;;  %1677 = vmatpush1.msra.mxu1 %v10317_v58  ;;  %v16128_v18 = vrot.slane %v11533_v41, 2 }
 0x161   : > { %1447 = vmatprep.subr.mxu0 %v10385_v28  ;;  %1679 = vmatprep.subr.mxu1 %v10323_v62  ;;  %v16129_v28 = vrot.slane %v11384_v39, 4  ;;  %v728_v39 = vrot.slane %v11544_v25, 4 }
 0x162   : > { %1450 = vmatpush1.msra.mxu0 %v10396_v32  ;;  %1681 = vmatpush1.msra.mxu1 %v10326_v63  ;;  %v692_v38 = vsel %vm674_vm1, %v687_v33, %v16128_v18  ;;  %v759_v32 = vrot.slane %v11369_v27, 6  ;;  %v762_v18 = vsel %vm752_vm3, %v16130_v54, %v761_v14  ;;  %v16133_v54 = vld [vmem:[#allocation47_spill] sm:$0xff] }
 0x163   : > { %1453 = vmatprep.subr.mxu0 %v10423_v42  ;;  %1683 = vmatprep.subr.mxu1 %v10332_v3  ;;  %v725_v6 = vsel %vm713_vm2, %v16129_v28, %v724_v21  ;;  %v710_v33 = vadd.f32 %v692_v38, %v661_v13  ;;  %v16131_v28 = vld [vmem:[#allocation44_spill] sm:$0xff]  ;;  %v16134_v13 = vrot.slane %v11366_v31, 6  ;;  %v16135_v38 = vld [vmem:[#allocation75_spill] sm:$0xff]  ;;  %v16136_v42 = vld [vmem:[#allocation50_spill] sm:$0xff] }
 0x164   : > { %1456 = vmatpush1.msra.mxu0 %v10438_v49  ;;  %1685 = vmatpush1.msra.mxu1 %v10338_v5  ;;  %v746_v27 = vadd.f32 %v725_v6, %v707_v40  ;;  %v16132_v49 = vld [vmem:[#allocation72_spill] sm:$0xff]  ;;  %v16137_v6 = vld [vmem:[#allocation81_spill] sm:$0xff]  ;;  %v729_v40 = vsel %vm713_vm2, %v724_v21, %v728_v39  ;;  %v16140_v31 = vld [vmem:[#allocation59_spill] sm:$0xff] }
 0x165   : > { %1459 = vmatprep.subr.mxu0 %v10452_v61  ;;  %1687 = vmatprep.subr.mxu1 %v10347_v12  ;;  %v782_v61 = vadd.f32 %v762_v18, %v747_v26  ;;  %v760_v37 = vsel %vm752_vm3, %v16134_v13, %v759_v32  ;;  %v749_v36 = vadd.f32 %v731_v0, %v710_v33  ;;  %v16139_v26 = vld [vmem:[#allocation84_spill] sm:$0xff] }
 0x166   : > { %1462 = vmatpush1.msra.mxu0 %v10468_v10  ;;  %1689 = vmatpush1.msra.mxu1 %v16131_v28  ;;  %v709_v10 = vadd.f32 %v690_v9, %v11525_v46  ;;  %v781_v18 = vadd.f32 %v760_v37, %v746_v27  ;;  %v766_v13 = vsel %vm752_vm3, %v761_v14, %v765_v15  ;;  %v16143_v9 = vld [vmem:[#allocation93_spill] sm:$0xff]  ;;  %v16145_v21 = vld [vmem:[#allocation96_spill] sm:$0xff]  ;;  %v16147_v14 = vrot.slane %v11533_v41, 2 }
 0x167   : > { %1465 = vmatprep.subr.mxu0 %v16132_v49  ;;  %1691 = vmatprep.subr.mxu1 %v16133_v54  ;;  %v763_v49 = vrot.slane %v11502_v22, 6  ;;  %v805_v46 = vrot.slane %v782_v61, 2  ;;  %v16146_v22 = vld [vmem:[#allocation69_spill] sm:$0xff]  ;;  %v784_v0 = vadd.f32 %v766_v13, %v749_v36  ;;  %v16148_v37 = vld [vmem:[#allocation100_spill] sm:$0xff]  ;;  %v16153_v36 = vld [vmem:[#allocation107_spill] sm:$0xff] }
 0x168   : > { %1468 = vmatpush1.msra.mxu0 %v16135_v38  ;;  %1693 = vmatpush1.msra.mxu1 %v16136_v42  ;;  %v16141_v38 = vld [vmem:[#allocation90_spill] sm:$0xff]  ;;  %v748_v33 = vadd.f32 %v729_v40, %v709_v10  ;;  %v712_v27 = vadd.f32 %v16147_v14, %v11533_v41  ;;  %v803_v61 = vrot.slane %v781_v18, 2  ;;  %v16152_v10 = vrot.slane %v11379_v50, 2  ;;  %v16155_v14 = vld [vmem:[#allocation113_spill] sm:$0xff] }
 0x169   : > { %1471 = vmatprep.subr.mxu0 %v16137_v6  ;;  %1695 = vmatprep.subr.mxu1 %v16138_v48  ;;  %v16144_v6 = vld [vmem:[#allocation65_spill] sm:$0xff]  ;;  %v711_v41 = vadd.f32 %v689_v53, %v11544_v25  ;;  %v809_v18 = vrot.slane %v784_v0, 2  ;;  %v16165_v0 = vld [vmem:[#allocation128_spill] sm:$0xff] }
 0x16a   : > { %1474 = vmatpush1.msra.mxu0 %v16139_v26  ;;  %1697 = vmatpush1.msra.mxu1 %v16140_v31  ;;  %v764_v26 = vsel %vm752_vm3, %v759_v32, %v763_v49  ;;  %v806_v40 = vsel %vm674_vm1, %v16152_v10, %v805_v46  ;;  %v16154_v32 = vld [vmem:[#allocation83_spill] sm:$0xff]  ;;  %v16160_v10 = vrot.slane %v11445_v35, 2  ;;  %v16163_v25 = vld [vmem:[#allocation125_spill] sm:$0xff] }
 0x16b   : > { %1477 = vmatprep.subr.mxu0 %v16141_v38  ;;  %1699 = vmatprep.subr.mxu1 %v16142_v45  ;;  %v16149_v38 = vld [vmem:[#allocation74_spill] sm:$0xff]  ;;  %v783_v13 = vadd.f32 %v764_v26, %v748_v33  ;;  %v11630_v50 = vand.u32 4294901760, %v806_v40  ;;  %v16164_v53 = vld [vmem:[#allocation97_spill] sm:$0xff]  ;;  %v810_v35 = vsel %vm674_vm1, %v805_v46, %v809_v18 }
 0x16c   : > { %1480 = vmatpush1.msra.mxu0 %v16143_v9  ;;  %1701 = vmatpush1.msra.mxu1 %v16144_v6  ;;  %v16150_v9 = vld [vmem:[#allocation104_spill] sm:$0xff]  ;;  %v16162_v26 = vld [vmem:[#allocation94_spill] sm:$0xff] }
 0x16d   : > { %1483 = vmatprep.subr.mxu0 %v16145_v21  ;;  %1703 = vmatprep.subr.mxu1 %v16146_v22  ;;  %v751_v21 = vadd.f32 %v730_v24, %v712_v27  ;;  %16159 = vst [vmem:[#allocation286_spill] sm:$0xff] %v11630_v50  ;;  %v807_v33 = vrot.slane %v783_v13, 2  ;;  %v750_v24 = vadd.f32 %v728_v39, %v711_v41  ;;  %v16166_v27 = vld [vmem:[#allocation101_spill] sm:$0xff]  ;;  %v16170_v13 = vld [vmem:[#allocation110_spill] sm:$0xff]  ;;  %v16171_v39 = vld [vmem:[#allocation139_spill] sm:$0xff] }
 0x16e   : > { %1486 = vmatpush1.msra.mxu0 %v16148_v37  ;;  %1705 = vmatpush1.msra.mxu1 %v16149_v38  ;;  %v16156_v37 = vld [vmem:[#allocation87_spill] sm:$0xff] }
 0x16f   : > { %1489 = vmatprep.subr.mxu0 %v16150_v9  ;;  %1707 = vmatprep.subr.mxu1 %v16151_v44  ;;  %v16157_v9 = vld [vmem:[#allocation116_spill] sm:$0xff]  ;;  %v16172_v41 = vld [vmem:[#allocation115_spill] sm:$0xff]  ;;  %v808_v46 = vsel %vm674_vm1, %v803_v61, %v807_v33 }
 0x170   : > { %1492 = vmatpush1.msra.mxu0 %v16153_v36  ;;  %1709 = vmatpush1.msra.mxu1 %v16154_v32  ;;  %v804_v36 = vsel %vm674_vm1, %v16160_v10, %v803_v61  ;;  %v16161_v32 = vld [vmem:[#allocation122_spill] sm:$0xff]  ;;  %v16167_v10 = vld [vmem:[#allocation132_spill] sm:$0xff]  ;;  %v11666_v61 = vand.u32 4294901760, %v808_v46 }
 0x171   : > { %1495 = vmatprep.subr.mxu0 %v16155_v14  ;;  %1711 = vmatprep.subr.mxu1 %v16156_v37  ;;  %v786_v14 = vadd.f32 %v765_v15, %v751_v21  ;;  %v785_v15 = vadd.f32 %v763_v49, %v750_v24  ;;  %v16173_v21 = vld [vmem:[#allocation145_spill] sm:$0xff] }
 0x172   : > { %1498 = vmatpush1.msra.mxu0 %v16157_v9  ;;  %1713 = vmatpush1.msra.mxu1 %v16158_v11  ;;  %v11641_v9 = vand.u32 4294901760, %v804_v36  ;;  %v16179_v49 = vld [vmem:[#allocation157_spill] sm:$0xff] }
 0x173   : > { %1501 = vmatprep.subr.mxu0 %v16161_v32  ;;  %1715 = vmatprep.subr.mxu1 %v16162_v26  ;;  %v16168_v32 = vld [vmem:[#allocation106_spill] sm:$0xff]  ;;  %v11647_v26 = vsub.f32 %v806_v40, %v11630_v50  ;;  %v16180_v24 = vld [vmem:[#allocation129_spill] sm:$0xff] }
 0x174   : > { %1504 = vmatpush1.msra.mxu0 %v16163_v25  ;;  %1717 = vmatpush1.msra.mxu1 %v16164_v53  ;;  %v16169_v25 = vld [vmem:[#allocation136_spill] sm:$0xff]  ;;  %v11659_v40 = vsub.f32 %v804_v36, %v11641_v9 }
 0x175   : > { %1507 = vmatprep.subr.mxu0 %v16165_v0  ;;  %1719 = vmatprep.subr.mxu1 %v16166_v27  ;;  %v11653_v0 = vand.u32 4294901760, %v810_v35  ;;  %v16178_v27 = vld [vmem:[#allocation126_spill] sm:$0xff]  ;;  %v16203_v53 = vld [vmem:[#allocation200_spill] sm:$0xff] }
 0x176   : > { %1510 = vmatpush1.msra.mxu0 %v16167_v10  ;;  %1721 = vmatpush1.msra.mxu1 %v16168_v32  ;;  %v16174_v10 = vld [vmem:[#allocation119_spill] sm:$0xff]  ;;  %v813_v32 = vrot.slane %v786_v14, 2  ;;  %v811_v14 = vrot.slane %v785_v15, 2  ;;  %v11685_v15 = vsub.f32 %v808_v46, %v11666_v61  ;;  %v16193_v46 = vld [vmem:[#allocation180_spill] sm:$0xff] }
 0x177   : > { %1513 = vmatprep.subr.mxu0 %v16169_v25  ;;  %1723 = vmatprep.subr.mxu1 %v16170_v13  ;;  %v16175_v25 = vld [vmem:[#allocation148_spill] sm:$0xff]  ;;  %v16176_v13 = vld [vmem:[#allocation123_spill] sm:$0xff]  ;;  %v11671_v36 = vsub.f32 %v810_v35, %v11653_v0  ;;  %v16187_v35 = vld [vmem:[#allocation142_spill] sm:$0xff] }
 0x178   : > { %1516 = vmatpush1.msra.mxu0 %v16171_v39  ;;  %1725 = vmatpush1.msra.mxu1 %v16172_v41  ;;  %v16177_v41 = vld [vmem:[#allocation154_spill] sm:$0xff]  ;;  %v16189_v39 = vld [vmem:[#allocation147_spill] sm:$0xff] }
 0x179   : > { %1519 = vmatprep.subr.mxu0 %v16173_v21  ;;  %1727 = vmatprep.subr.mxu1 %v16174_v10  ;;  %v16181_v21 = vld [vmem:[#allocation160_spill] sm:$0xff] }
 0x17a   : > { %1522 = vmatpush1.msra.mxu0 %v16175_v25  ;;  %1729 = vmatpush1.msra.mxu1 %v16176_v13  ;;  %v16182_v25 = vld [vmem:[#allocation133_spill] sm:$0xff]  ;;  %v16183_v13 = vld [vmem:[#allocation164_spill] sm:$0xff] }
 0x17b   : > { %1525 = vmatprep.subr.mxu0 %v16177_v41  ;;  %1731 = vmatprep.subr.mxu1 %v16178_v27  ;;  %v814_v41 = vsel %vm674_vm1, %v809_v18, %v813_v32  ;;  %v16184_v27 = vld [vmem:[#allocation138_spill] sm:$0xff]  ;;  %v16186_v10 = vld [vmem:[#allocation168_spill] sm:$0xff] }
 0x17c   : > { %1528 = vmatpush1.msra.mxu0 %v16179_v49  ;;  %1733 = vmatpush2.msra.mxu1 %v16180_v24  ;;  %v16185_v49 = vand.u32 4294901760, %v11647_v26  ;;  %v11690_v18 = vand.u32 4294901760, %v814_v41  ;;  %v16196_v32 = vld [vmem:[#allocation158_spill] sm:$0xff] }
 0x17d   : > { %1531 = vmatprep.subr.mxu0 %v16181_v21  ;;  %1735 = vmatprep.subr.mxu1 %v16182_v25  ;;  %v16188_v21 = vld [vmem:[#allocation171_spill] sm:$0xff] }
 0x17e   : > { %1534 = vmatpush2.msra.mxu0 %v16183_v13  ;;  %1737 = vmatpush2.msra.mxu1 %v16184_v27  ;;  %v970_v24 = vsub.f32 %v11647_v26, %v16185_v49  ;;  %v812_v13 = vsel %vm674_vm1, %v807_v33, %v811_v14  ;;  %v16190_v27 = vld [vmem:[#allocation177_spill] sm:$0xff]  ;;  %v16191_v49 = vld [vmem:[#allocation151_spill] sm:$0xff] }
 0x17f   : > { %1537 = vmatprep.subr.mxu0 %v16186_v10  ;;  %1739 = vmatprep.subr.mxu1 %v16187_v35  ;;  %v16192_v10 = vand.u32 4294901760, %v11659_v40  ;;  %v16194_v25 = vld [vmem:[#allocation155_spill] sm:$0xff]  ;;  %v11703_v33 = vand.u32 4294901760, %v812_v13  ;;  %v16197_v14 = vld [vmem:[#allocation189_spill] sm:$0xff] }
 0x180   : > { %1540 = vmatpush2.msra.mxu0 %v16188_v21  ;;  %1741 = vmatpush2.msra.mxu1 %v16189_v39  ;;  %v971_v21 = vand.u32 4294901760, %v970_v24  ;;  %v16195_v39 = vld [vmem:[#allocation186_spill] sm:$0xff]  ;;  %v16200_v24 = vld [vmem:[#allocation192_spill] sm:$0xff] }
 0x181   : > { %1543 = vmatprep.subr.mxu0 %v16190_v27  ;;  %1743 = vmatprep.subr.mxu1 %v16191_v49  ;;  %v976_v35 = vsub.f32 %v11659_v40, %v16192_v10  ;;  %v16198_v27 = vld [vmem:[#allocation161_spill] sm:$0xff]  ;;  %v16199_v49 = vand.u32 4294901760, %v11671_v36 }
 0x182   : > { %1546 = vmatpush2.msra.mxu0 %v16193_v46  ;;  %1745 = vmatpush2.msra.mxu1 %v16194_v25  ;;  %v11711_v46 = vsub.f32 %v814_v41, %v11690_v18  ;;  %v16202_v25 = vld [vmem:[#allocation196_spill] sm:$0xff]  ;;  %v16206_v41 = vld [vmem:[#allocation203_spill] sm:$0xff] }
 0x183   : > { %1549 = vmatprep.subr.mxu0 %v16195_v39  ;;  %1747 = vmatprep.subr.mxu1 %v16196_v32  ;;  %v986_v10 = vsub.f32 %v11671_v36, %v16199_v49  ;;  %v16201_v39 = vld [vmem:[#allocation165_spill] sm:$0xff]  ;;  %v977_v32 = vand.u32 4294901760, %v976_v35  ;;  %v11722_v49 = vsub.f32 %v812_v13, %v11703_v33 }
 0x184   : > { %1552 = vmatpush2.msra.mxu0 %v16197_v14  ;;  %1749 = vmatpush2.msra.mxu1 %v16198_v27  ;;  %v16204_v14 = vld [vmem:[#allocation170_spill] sm:$0xff]  ;;  %v16205_v27 = vand.u32 4294901760, %v11685_v15  ;;  %v15486_v35 = vand.u32 4294901760, %v11711_v46 }
 0x185   : > { %1555 = vmatprep.subr.mxu0 %v16200_v24  ;;  %1751 = vmatprep.subr.mxu1 %v16201_v39  ;;  %v16207_v24 = vld [vmem:[#allocation174_spill] sm:$0xff]  ;;  %v987_v39 = vand.u32 4294901760, %v986_v10  ;;  %v15489_v37 = vand.u32 4294901760, %v11722_v49 }
 0x186   : > { %1558 = vmatpush2.msra.mxu0 %v16202_v25  ;;  %972 = vmatprep.mubr.f32.mxu0 %v971_v21  ;;  %v992_v11 = vsub.f32 %v11685_v15, %v16205_v27  ;;  %v16208_v25 = vld [vmem:[#allocation209_spill] sm:$0xff]  ;;  %v16209_v21 = vld [vmem:[#allocation212_spill] sm:$0xff]  ;;  %v16212_v27 = vld [vmem:[#allocation183_spill] sm:$0xff]  ;;  %v1002_v10 = vsub.f32 %v11711_v46, %v15486_v35 }
 0x187   : > { %1561 = vmatprep.subr.mxu0 %v16203_v53  ;;  %1753 = vmatpush2.msra.mxu1 %v16204_v14  ;;  %v16210_v53 = vld [vmem:[#allocation179_spill] sm:$0xff]  ;;  %v16211_v14 = vld [vmem:[#allocation218_spill] sm:$0xff] }
 0x188   : > { %1564 = vmatpush2.msra.mxu0 %v16206_v41  ;;  %1755 = vmatprep.subr.mxu1 %v16207_v24  ;;  %v993_v13 = vand.u32 4294901760, %v992_v11  ;;  %v16213_v41 = vld [vmem:[#allocation221_spill] sm:$0xff]  ;;  %v1008_v11 = vsub.f32 %v11722_v49, %v15489_v37  ;;  %v1003_v35 = vand.u32 4294901760, %v1002_v10  ;;  %v16226_v37 = vld [vmem:[#allocation202_spill] sm:$0xff] }
 0x189   : > { %1567 = vmatprep.subr.mxu0 %v16208_v25  ;;  %978 = vmatmul.mubr.f32.gmra.mxu0 %v977_v32  ;;  %v16214_v25 = vld [vmem:[#allocation224_spill] sm:$0xff]  ;;  %v16215_v32 = vld [vmem:[#allocation187_spill] sm:$0xff]  ;;  %v16227_v10 = vld [vmem:[#allocation206_spill] sm:$0xff] }
 0x18a   : > { %1570 = vmatpush2.msra.mxu0 %v16209_v21  ;;  %1757 = vmatpush2.msra.mxu1 %v16210_v53  ;;  %v16216_v21 = vld [vmem:[#allocation228_spill] sm:$0xff] }
 0x18b   : > { %1573 = vmatprep.subr.mxu0 %v16211_v14  ;;  %1759 = vmatprep.subr.mxu1 %v16212_v27  ;;  %v16217_v14 = vld [vmem:[#allocation232_spill] sm:$0xff]  ;;  %v16220_v27 = vld [vmem:[#allocation241_spill] sm:$0xff] }
 0x18c   : > { %1576 = vmatpush2.msra.mxu0 %v16213_v41  ;;  %988 = vmatprep.mubr.f32.mxu0 %v987_v39  ;;  %v16218_v39 = vld [vmem:[#allocation235_spill] sm:$0xff]  ;;  %v16219_v41 = vld [vmem:[#allocation190_spill] sm:$0xff] }
 0x18d   : > { %1579 = vmatprep.subr.mxu0 %v16214_v25  ;;  %1761 = vmatpush2.msra.mxu1 %v16215_v32  ;;  %v16221_v25 = vld [vmem:[#allocation244_spill] sm:$0xff]  ;;  %v16225_v32 = vld [vmem:[#allocation253_spill] sm:$0xff] }
 0x18e   : > { %1582 = vmatpush2.msra.mxu0 %v16216_v21  ;;  %1409 = vmatprep.mubr.f32.mxu1 %v11630_v50  ;;  %v16222_v21 = vld [vmem:[#allocation193_spill] sm:$0xff]  ;;  %v16223_v50 = vld [vmem:[#allocation250_spill] sm:$0xff] }
 0x18f   : > { %1585 = vmatprep.subr.mxu0 %v16217_v14  ;;  %994 = vmatmul.mubr.f32.gmra.mxu0 %v993_v13  ;;  %v16224_v13 = vld [vmem:[#allocation197_spill] sm:$0xff]  ;;  %v1009_v14 = vand.u32 4294901760, %v1008_v11  ;;  %v16229_v11 = vld [vmem:[#allocation215_spill] sm:$0xff] }
 0x190   : > { %1588 = vmatpush2.msra.mxu0 %v16218_v39  ;;  %1763 = vmatprep.subr.mxu1 %v16219_v41  ;;  %v16297_v39 = vld [vmem:[#allocation208_spill] sm:$0xff] }
 0x191   : > { %1591 = vmatprep.subr.mxu0 %v16220_v27  ;;  %1411 = vmatmul.mubr.f32.gmra.mxu1 %v11641_v9  ;;  %v16295_v27 = vld [vmem:[#allocation205_spill] sm:$0xff] }
 0x192   : > { %1594 = vmatpush2.msra.mxu0 %v16221_v25  ;;  %1765 = vmatpush2.msra.mxu1 %v16222_v21  ;;  %v16293_v25 = vld [vmem:[#allocation201_spill] sm:$0xff] }
 0x193   : > { %1597 = vmatprep.subr.mxu0 %v16223_v50  ;;  %1767 = vmatprep.subr.mxu1 %v16224_v13  ;;  %v16291_v50 = vld [vmem:[#allocation199_spill] sm:$0xff] }
 0x194   : > { %1600 = vmatpush2.msra.mxu0 %v16225_v32  ;;  %1004 = vmatprep.mubr.f32.mxu0 %v1003_v35  ;;  %v16228_v35 = vld [vmem:[#allocation211_spill] sm:$0xff] }
 0x195   : > { %1603 = vmatprep.subr.mxu0 %v11350_v2  ;;  %1769 = vmatpush2.msra.mxu1 %v16226_v37  ;;  %v16287_v2 = vld [vmem:[#allocation191_spill] sm:$0xff] }
 0x196   : > { %1606 = vmatpush2.msra.mxu0 %v11396_v16  ;;  %1417 = vmatprep.mubr.f32.mxu1 %v11653_v0  ;;  %v16242_v16 = vld [vmem:[#allocation71_spill] sm:$0xff] }
 0x197   : > { %1609 = vmatprep.subr.mxu0 %v11400_v60  ;;  %1010 = vmatmul.mubr.f32.gmra.mxu0 %v1009_v14  ;;  %v16230_v14 = vld [vmem:[#allocation219_spill] sm:$0xff]  ;;  %v16237_v60 = vld [vmem:[#allocation57_spill] sm:$0xff] }
 0x198   : > { %1612 = vmatpush2.msra.mxu0 %v11426_v17  ;;  %1771 = vmatprep.subr.mxu1 %v16227_v10  ;;  %v16232_v17 = vld [vmem:[#allocation42_spill] sm:$0xff]  ;;  %v16289_v32 = vld [vmem:[#allocation195_spill] sm:$0xff] }
 0x199   : > { %1615 = vmatprep.subr.mxu0 %v11431_v30  ;;  %1419 = vmatmul.mubr.f32.gmra.mxu1 %v11666_v61  ;;  %v16231_v30 = vld [vmem:[#allocation222_spill] sm:$0xff] }
 0x19a   : > { %1618 = vmatpush2.msra.mxu0 %v11435_v4  ;;  %1773 = vmatpush2.msra.mxu1 %v16228_v35  ;;  %v16235_v4 = vld [vmem:[#allocation48_spill] sm:$0xff] }
 0x19b   : > { %1621 = vmatprep.subr.mxu0 %v11472_v19  ;;  %1775 = vmatprep.subr.mxu1 %v16229_v11  ;;  %v16233_v19 = vld [vmem:[#allocation43_spill] sm:$0xff] }
 0x19c   : > { %1624 = vmatpush2.msra.mxu0 %v11476_v59  ;;  %1627 = vmatprep.mubr.f32.mxu0 %v11416_v7  ;;  %v16234_v59 = vld [vmem:[#allocation46_spill] sm:$0xff] }
 0x19d   : > { %1777 = vmatpush2.msra.mxu1 %v16230_v14  ;;  %1425 = vmatprep.mubr.f32.mxu1 %v11690_v18 }
 0x19e   : > { %1630 = vmatmul.mubr.f32.vlgmr.msra.gmra.mxu0 %v11506_v8  ;;  %1779 = vmatprep.subr.mxu1 %v16231_v30 }
 0x19f   : > { %1846 = vmatprep.subr.mxu0 %v16232_v17  ;;  %1427 = vmatmul.mubr.f32.gmra.mxu1 %v11703_v33  ;;  %v16236_v17 = vld [vmem:[#allocation55_spill] sm:$0xff] }
 0x1a0   : > { %1781 = vmatpush2.msra.mxu1 %v11181_v29  ;;  %1850 = vmatpush1.msra.mxu0 %v16233_v19  ;;  %v16238_v19 = vld [vmem:[#allocation63_spill] sm:$0xff] }
 0x1a1   : > { %1783 = vmatprep.subr.mxu1 %v11197_v20  ;;  %1854 = vmatprep.subr.mxu0 %v16234_v59  ;;  %v16240_v59 = vld [vmem:[#allocation67_spill] sm:$0xff] }
 0x1a2   : > { %1637 = vmatprep.mubr.f32.mxu0 %v11647_v26  ;;  %1785 = vmatpush2.msra.mxu1 %v11221_v1 }
 0x1a3   : > { %1858 = vmatpush1.msra.mxu0 %v16235_v4  ;;  %1787 = vmatprep.subr.mxu1 %v11238_v47  ;;  %v16239_v4 = vand.u32 4294901760, %v11416_v7  ;;  %v16245_v7 = vand.u32 4294901760, %v11647_v26  ;;  %v16251_v26 = vand.u32 4294901760, %v11671_v36 }
 0x1a4   : > { %1640 = vmatmul.mubr.f32.gmra.mxu0 %v11659_v40  ;;  %1862 = vmatprep.subr.mxu0 %v16236_v17  ;;  %v16241_v17 = vand.u32 4294901760, %v11506_v8  ;;  %v16247_v8 = vand.u32 4294901760, %v11659_v40  ;;  %v16253_v40 = vld [vmem:[#allocation103_spill] sm:$0xff] }
 0x1a5   : > { %1789 = vmatpush2.msra.mxu1 %v11263_v43  ;;  %1866 = vmatpush1.msra.mxu0 %v16237_v60  ;;  %v16243_v60 = vld [vmem:[#allocation73_spill] sm:$0xff] }
 0x1a6   : > { %1791 = vmatprep.subr.mxu1 %v11278_v23  ;;  %1870 = vmatprep.subr.mxu0 %v16238_v19  ;;  %v16244_v19 = vld [vmem:[#allocation77_spill] sm:$0xff] }
 0x1a7   : > { %1647 = vmatprep.mubr.f32.mxu0 %v11671_v36  ;;  %1793 = vmatpush2.msra.mxu1 %v11292_v34  ;;  %v16257_v36 = vand.u32 4294901760, %v11711_v46 }
 0x1a8   : > { %1797 = vmatprep.mubr.f32.mxu1 %v16239_v4  ;;  %1874 = vmatpush1.msra.mxu0 %v16240_v59  ;;  %v16246_v4 = vld [vmem:[#allocation80_spill] sm:$0xff]  ;;  %v16285_v59 = vld [vmem:[#allocation185_spill] sm:$0xff] }
 0x1a9   : > { %1650 = vmatmul.mubr.f32.gmra.mxu0 %v11685_v15  ;;  %1801 = vmatmul.mubr.f32.vlgmr.msra.gmra.mxu1 %v16241_v17  ;;  %v16248_v17 = vld [vmem:[#allocation86_spill] sm:$0xff] }
 0x1aa   : > { %1878 = vmatprep.subr.mxu0 %v16242_v16  ;;  %2133 = vmatprep.subr.mxu1 %v10303_v51  ;;  %v16283_v16 = vld [vmem:[#allocation182_spill] sm:$0xff] }
 0x1ab   : > { %1882 = vmatpush1.msra.mxu0 %v16243_v60  ;;  %2135 = vmatpush1.msra.mxu1 %v10305_v52  ;;  %v16250_v60 = vld [vmem:[#allocation95_spill] sm:$0xff] }
 0x1ac   : > { %1886 = vmatprep.subr.mxu0 %v16244_v19  ;;  %2137 = vmatprep.subr.mxu1 %v10311_v55  ;;  %v16249_v19 = vld [vmem:[#allocation89_spill] sm:$0xff] }
 0x1ad   : > { %1657 = vmatprep.mubr.f32.mxu0 %v11711_v46  ;;  %1809 = vmatprep.mubr.f32.mxu1 %v16245_v7  ;;  %v16252_v7 = vld [vmem:[#allocation99_spill] sm:$0xff] }
 0x1ae   : > { %1890 = vmatpush1.msra.mxu0 %v16246_v4  ;;  %2139 = vmatpush1.msra.mxu1 %v10313_v56  ;;  %v16263_v46 = vld [vmem:[#allocation131_spill] sm:$0xff]  ;;  %v16281_v4 = vld [vmem:[#allocation176_spill] sm:$0xff] }
 0x1af   : > { %1660 = vmatmul.mubr.f32.gmra.mxu0 %v11722_v49  ;;  %1813 = vmatmul.mubr.f32.gmra.mxu1 %v16247_v8  ;;  %v16254_v8 = vand.u32 4294901760, %v11685_v15  ;;  %v16260_v15 = vand.u32 4294901760, %v11722_v49  ;;  %v16265_v49 = vld [vmem:[#allocation137_spill] sm:$0xff] }
 0x1b0   : > { %1894 = vmatprep.subr.mxu0 %v16248_v17  ;;  %2141 = vmatprep.subr.mxu1 %v10315_v57  ;;  %v16279_v17 = vld [vmem:[#allocation173_spill] sm:$0xff] }
 0x1b1   : > { %1898 = vmatpush1.msra.mxu0 %v16249_v19  ;;  %2143 = vmatpush1.msra.mxu1 %v10317_v58  ;;  %v16255_v19 = vld [vmem:[#allocation105_spill] sm:$0xff] }
 0x1b2   : > { %1902 = vmatprep.subr.mxu0 %v16250_v60  ;;  %2145 = vmatprep.subr.mxu1 %v10323_v62  ;;  %v16256_v60 = vld [vmem:[#allocation109_spill] sm:$0xff] }
 0x1b3   : > { %1821 = vmatprep.mubr.f32.mxu1 %v16251_v26  ;;  %1906 = vmatpush1.msra.mxu0 %v16252_v7  ;;  %v16258_v26 = vld [vmem:[#allocation112_spill] sm:$0xff]  ;;  %v16277_v7 = vld [vmem:[#allocation169_spill] sm:$0xff] }
 0x1b4   : > { %2147 = vmatpush1.msra.mxu1 %v10326_v63  ;;  %1910 = vmatprep.subr.mxu0 %v16253_v40  ;;  %v16259_v40 = vld [vmem:[#allocation118_spill] sm:$0xff] }
 0x1b5   : > { %1825 = vmatmul.mubr.f32.gmra.mxu1 %v16254_v8  ;;  %2149 = vmatprep.subr.mxu1 %v10332_v3  ;;  %v16261_v8 = vld [vmem:[#allocation121_spill] sm:$0xff] }
 0x1b6   : > { %1914 = vmatpush1.msra.mxu0 %v16255_v19  ;;  %2151 = vmatpush1.msra.mxu1 %v10338_v5  ;;  %v16275_v19 = vld [vmem:[#allocation167_spill] sm:$0xff] }
 0x1b7   : > { %1918 = vmatprep.subr.mxu0 %v16256_v60  ;;  %2153 = vmatprep.subr.mxu1 %v10347_v12  ;;  %v16262_v60 = vld [vmem:[#allocation127_spill] sm:$0xff] }
 0x1b8   : > { %1833 = vmatprep.mubr.f32.mxu1 %v16257_v36  ;;  %1922 = vmatpush1.msra.mxu0 %v16258_v26  ;;  %v16264_v36 = vld [vmem:[#allocation135_spill] sm:$0xff] }
 0x1b9   : > { %2155 = vmatpush1.msra.mxu1 %v16131_v28  ;;  %1926 = vmatprep.subr.mxu0 %v16259_v40  ;;  %v16271_v40 = vld [vmem:[#allocation159_spill] sm:$0xff] }
 0x1ba   : > { %1837 = vmatmul.mubr.f32.gmra.mxu1 %v16260_v15  ;;  %2157 = vmatprep.subr.mxu1 %v16133_v54  ;;  %v16266_v15 = vld [vmem:[#allocation141_spill] sm:$0xff]  ;;  %v16273_v26 = vld [vmem:[#allocation163_spill] sm:$0xff] }
 0x1bb   : > { %1930 = vmatpush1.msra.mxu0 %v16261_v8  ;;  %2159 = vmatpush1.msra.mxu1 %v16136_v42  ;;  %v16267_v8 = vld [vmem:[#allocation144_spill] sm:$0xff] }
 0x1bc   : > { %1934 = vmatprep.subr.mxu0 %v16262_v60  ;;  %2161 = vmatprep.subr.mxu1 %v16138_v48  ;;  %v16268_v60 = vld [vmem:[#allocation150_spill] sm:$0xff] }
 0x1bd   : > { %1938 = vmatpush1.msra.mxu0 %v16263_v46  ;;  %2163 = vmatpush1.msra.mxu1 %v16140_v31  ;;  %v16269_v46 = vld [vmem:[#allocation153_spill] sm:$0xff] }
 0x1be   : > { %1942 = vmatprep.subr.mxu0 %v16264_v36  ;;  %2165 = vmatprep.subr.mxu1 %v16142_v45  ;;  %v16270_v36 = vld [vmem:[#allocation83_spill] sm:$0xff] }
 0x1bf   : > { %1946 = vmatpush1.msra.mxu0 %v16265_v49  ;;  %2167 = vmatpush1.msra.mxu1 %v16144_v6  ;;  %v16272_v49 = vld [vmem:[#allocation87_spill] sm:$0xff] }
 0x1c0   : > { %1950 = vmatprep.subr.mxu0 %v16266_v15  ;;  %2169 = vmatprep.subr.mxu1 %v16146_v22  ;;  %v16274_v15 = vld [vmem:[#allocation91_spill] sm:$0xff] }
 0x1c1   : > { %1954 = vmatpush1.msra.mxu0 %v16267_v8  ;;  %2171 = vmatpush1.msra.mxu1 %v16149_v38  ;;  %v16276_v8 = vld [vmem:[#allocation94_spill] sm:$0xff] }
 0x1c2   : > { %1958 = vmatprep.subr.mxu0 %v16268_v60  ;;  %2173 = vmatprep.subr.mxu1 %v16151_v44  ;;  %v16278_v60 = vld [vmem:[#allocation97_spill] sm:$0xff] }
 0x1c3   : > { %1962 = vmatpush1.msra.mxu0 %v16269_v46  ;;  %2175 = vmatpush1.msra.mxu1 %v16270_v36  ;;  %v16280_v46 = vld [vmem:[#allocation101_spill] sm:$0xff] }
 0x1c4   : > { %1966 = vmatprep.subr.mxu0 %v16271_v40  ;;  %2177 = vmatprep.subr.mxu1 %v16272_v49  ;;  %v16282_v40 = vld [vmem:[#allocation106_spill] sm:$0xff] }
 0x1c5   : > { %1970 = vmatpush1.msra.mxu0 %v16273_v26  ;;  %2179 = vmatpush1.msra.mxu1 %v16274_v15  ;;  %v16284_v26 = vld [vmem:[#allocation110_spill] sm:$0xff] }
 0x1c6   : > { %1974 = vmatprep.subr.mxu0 %v16275_v19  ;;  %2181 = vmatprep.subr.mxu1 %v16276_v8  ;;  %v16286_v19 = vld [vmem:[#allocation115_spill] sm:$0xff] }
 0x1c7   : > { %1978 = vmatpush2.msra.mxu0 %v16277_v7  ;;  %2183 = vmatpush1.msra.mxu1 %v16278_v60  ;;  %v16288_v7 = vld [vmem:[#allocation119_spill] sm:$0xff] }
 0x1c8   : > { %1982 = vmatprep.subr.mxu0 %v16279_v17  ;;  %2185 = vmatprep.subr.mxu1 %v16280_v46  ;;  %v16290_v17 = vld [vmem:[#allocation123_spill] sm:$0xff] }
 0x1c9   : > { %1986 = vmatpush2.msra.mxu0 %v16281_v4  ;;  %2187 = vmatpush1.msra.mxu1 %v16282_v40  ;;  %v16292_v4 = vld [vmem:[#allocation126_spill] sm:$0xff] }
 0x1ca   : > { %1990 = vmatprep.subr.mxu0 %v16283_v16  ;;  %2189 = vmatprep.subr.mxu1 %v16284_v26  ;;  %v16294_v16 = vld [vmem:[#allocation129_spill] sm:$0xff] }
 0x1cb   : > { %1994 = vmatpush2.msra.mxu0 %v16285_v59  ;;  %2191 = vmatpush1.msra.mxu1 %v16286_v19  ;;  %v16296_v59 = vld [vmem:[#allocation133_spill] sm:$0xff] }
 0x1cc   : > { %1998 = vmatprep.subr.mxu0 %v16287_v2  ;;  %2193 = vmatprep.subr.mxu1 %v16288_v7  ;;  %v16298_v2 = vld [vmem:[#allocation138_spill] sm:$0xff] }
 0x1cd   : > { %2002 = vmatpush2.msra.mxu0 %v16289_v32  ;;  %2195 = vmatpush1.msra.mxu1 %v16290_v17  ;;  %v16299_v7 = vld [vmem:[#allocation214_spill] sm:$0xff]  ;;  %v16301_v17 = vld [vmem:[#allocation217_spill] sm:$0xff] }
 0x1ce   : > { %2006 = vmatprep.subr.mxu0 %v16291_v50  ;;  %2197 = vmatprep.subr.mxu1 %v16292_v4  ;;  %v16300_v32 = vld [vmem:[#allocation142_spill] sm:$0xff]  ;;  %v16302_v50 = vld [vmem:[#allocation147_spill] sm:$0xff] }
 0x1cf   : > { %2010 = vmatpush2.msra.mxu0 %v16293_v25  ;;  %2199 = vmatpush2.msra.mxu1 %v16294_v16  ;;  %v16303_v4 = vld [vmem:[#allocation223_spill] sm:$0xff] }
 0x1d0   : > { %2014 = vmatprep.subr.mxu0 %v16295_v27  ;;  %2201 = vmatprep.subr.mxu1 %v16296_v59  ;;  %v16304_v25 = vld [vmem:[#allocation151_spill] sm:$0xff] }
 0x1d1   : > { %2018 = vmatpush2.msra.mxu0 %v16297_v39  ;;  %2203 = vmatpush2.msra.mxu1 %v16298_v2  ;;  %v16305_v16 = vld [vmem:[#allocation227_spill] sm:$0xff]  ;;  %v16308_v39 = vld [vmem:[#allocation158_spill] sm:$0xff]  ;;  %v16309_v2 = vld [vmem:[#allocation233_spill] sm:$0xff] }
 0x1d2   : > { %2022 = vmatprep.subr.mxu0 %v16299_v7  ;;  %2205 = vmatprep.subr.mxu1 %v16300_v32  ;;  %v16306_v27 = vld [vmem:[#allocation155_spill] sm:$0xff]  ;;  %v16310_v7 = vld [vmem:[#allocation161_spill] sm:$0xff] }
 0x1d3   : > { %2026 = vmatpush2.msra.mxu0 %v16301_v17  ;;  %2207 = vmatpush2.msra.mxu1 %v16302_v50  ;;  %v16307_v59 = vld [vmem:[#allocation231_spill] sm:$0xff]  ;;  %v16311_v32 = vld [vmem:[#allocation237_spill] sm:$0xff]  ;;  %v16313_v50 = vld [vmem:[#allocation240_spill] sm:$0xff] }
 0x1d4   : > { %2030 = vmatprep.subr.mxu0 %v16303_v4  ;;  %2209 = vmatprep.subr.mxu1 %v16304_v25  ;;  %v16312_v17 = vld [vmem:[#allocation165_spill] sm:$0xff]  ;;  %v16314_v4 = vld [vmem:[#allocation170_spill] sm:$0xff] }
 0x1d5   : > { %2034 = vmatpush2.msra.mxu0 %v16305_v16  ;;  %2211 = vmatpush2.msra.mxu1 %v16306_v27  ;;  %v16315_v25 = vld [vmem:[#allocation246_spill] sm:$0xff]  ;;  %v16316_v16 = vld [vmem:[#allocation249_spill] sm:$0xff] }
 0x1d6   : > { %2038 = vmatprep.subr.mxu0 %v16307_v59  ;;  %2213 = vmatprep.subr.mxu1 %v16308_v39  ;;  %v16317_v59 = vld [vmem:[#allocation254_spill] sm:$0xff] }
 0x1d7   : > { %2042 = vmatpush2.msra.mxu0 %v16309_v2  ;;  %2215 = vmatpush2.msra.mxu1 %v16310_v7  ;;  %v16318_v2 = vld [vmem:[#allocation183_spill] sm:$0xff]  ;;  %v16319_v7 = vld [vmem:[#allocation256_spill] sm:$0xff] }
 0x1d8   : > { %2046 = vmatprep.subr.mxu0 %v16311_v32  ;;  %2217 = vmatprep.subr.mxu1 %v16312_v17  ;;  %v16320_v32 = vld [vmem:[#allocation187_spill] sm:$0xff]  ;;  %v16321_v17 = vld [vmem:[#allocation261_spill] sm:$0xff] }
 0x1d9   : > { %2050 = vmatpush2.msra.mxu0 %v16313_v50  ;;  %2219 = vmatpush2.msra.mxu1 %v16314_v4  ;;  %v16322_v50 = vld [vmem:[#allocation266_spill] sm:$0xff] }
 0x1da   : > { %2054 = vmatprep.subr.mxu0 %v16315_v25  ;;  %2221 = vmatprep.subr.mxu1 %v16207_v24  ;;  %v16323_v25 = vld [vmem:[#allocation267_spill] sm:$0xff] }
 0x1db   : > { %2058 = vmatpush2.msra.mxu0 %v16316_v16  ;;  %2223 = vmatpush2.msra.mxu1 %v16210_v53  ;;  %v16324_v16 = vld [vmem:[#allocation271_spill] sm:$0xff] }
 0x1dc   : > { %2062 = vmatprep.subr.mxu0 %v16317_v59  ;;  %2225 = vmatprep.subr.mxu1 %v16318_v2  ;;  %v16325_v59 = vld [vmem:[#allocation272_spill] sm:$0xff] }
 0x1dd   : > { %2066 = vmatpush2.msra.mxu0 %v16319_v7  ;;  %2227 = vmatpush2.msra.mxu1 %v16320_v32  ;;  %v16326_v7 = vld [vmem:[#allocation273_spill] sm:$0xff] }
 0x1de   : > { %2070 = vmatprep.subr.mxu0 %v16321_v17  ;;  %2229 = vmatprep.subr.mxu1 %v16219_v41  ;;  %v16327_v17 = vld [vmem:[#allocation282_spill] sm:$0xff] }
 0x1df   : > { %2074 = vmatpush2.msra.mxu0 %v16322_v50  ;;  %2231 = vmatpush2.msra.mxu1 %v16222_v21  ;;  %v16328_v50 = vld [vmem:[#allocation283_spill] sm:$0xff] }
 0x1e0   : > { %2078 = vmatprep.subr.mxu0 %v16323_v25  ;;  %2233 = vmatprep.subr.mxu1 %v16224_v13  ;;  %v16329_v25 = vld [vmem:[#allocation265_spill] sm:$0xff] }
 0x1e1   : > { %2082 = vmatpush2.msra.mxu0 %v16324_v16  ;;  %2235 = vmatpush2.msra.mxu1 %v16226_v37  ;;  %v16330_v16 = vld [vmem:[#allocation281_spill] sm:$0xff] }
 0x1e2   : > { %2086 = vmatprep.subr.mxu0 %v16325_v59  ;;  %2237 = vmatprep.subr.mxu1 %v16227_v10  ;;  %v531_v59 = vld [vmem:[#allocation2 + $0x20] sm:$0xff] }
 0x1e3   : > { %2090 = vmatpush2.msra.mxu0 %v16326_v7  ;;  %2239 = vmatpush2.msra.mxu1 %v16228_v35  ;;  %v532_v7 = vld [vmem:[#allocation2] sm:$0xff] }
 0x1e4   : > { %2094 = vmatprep.subr.mxu0 %v16327_v17  ;;  %2241 = vmatprep.subr.mxu1 %v16229_v11  ;;  %v16331_v17 = vld [vmem:[#allocation286_spill] sm:$0xff] }
 0x1e5   : > { %2098 = vmatpush2.msra.mxu0 %v16328_v50  ;;  %2100 = vmatprep.mubr.f32.mxu0 %v16329_v25  ;;  %v16332_v50 = vld [vmem:[#allocation53_spill] sm:$0xff] }
 0x1e6   : > { %2243 = vmatpush2.msra.mxu1 %v16230_v14  ;;  %2102 = vmatmul.mubr.f32.vlgmr.msra.gmra.mxu0 %v16330_v16 }
 0x1e7   : > { %2245 = vmatprep.subr.mxu1 %v16231_v30  ;;  %2498 = vmatprep.subr.mxu0 %v10303_v51 }
 0x1e8   : > { %2247 = vmatpush2.msra.mxu1 %v11181_v29  ;;  %2500 = vmatpush1.msra.mxu0 %v10305_v52  ;;  %v11972_v52 = vld [vmem:[#allocation2 + $0x30] sm:$0xff] }
 0x1e9   : > { %2249 = vmatprep.subr.mxu1 %v11197_v20  ;;  %2502 = vmatprep.subr.mxu0 %v10311_v55 }
 0x1ea   : > { %2108 = vmatprep.mubr.f32.mxu0 %v16331_v17  ;;  %2251 = vmatpush2.msra.mxu1 %v11221_v1 }
 0x1eb   : > { %2504 = vmatpush1.msra.mxu0 %v10313_v56  ;;  %2253 = vmatprep.subr.mxu1 %v11238_v47  ;;  %v11969_v56 = vld [vmem:[#allocation2 + $0x8] sm:$0xff] }
 0x1ec   : > { %2110 = vmatmul.mubr.f32.gmra.mxu0 %v11641_v9  ;;  %2506 = vmatprep.subr.mxu0 %v10315_v57  ;;  %v11966_v57 = vld [vmem:[#allocation2 + $0x38] sm:$0xff]  ;;  %v2309_v55 = vrot.slane %v11969_v56, 1 }
 0x1ed   : > { %2255 = vmatpush2.msra.mxu1 %v11263_v43  ;;  %2508 = vmatpush1.msra.mxu0 %v10317_v58  ;;  %v16334_v58 = vld [vmem:[#allocation56_spill] sm:$0xff] }
 0x1ee   : > { %2257 = vmatprep.subr.mxu1 %v11278_v23  ;;  %2510 = vmatprep.subr.mxu0 %v10323_v62  ;;  %v16333_v62 = vld [vmem:[#allocation54_spill] sm:$0xff]  ;;  %v16339_v43 = vld [vmem:[#allocation76_spill] sm:$0xff] }
 0x1ef   : > { %2116 = vmatprep.mubr.f32.mxu0 %v11653_v0  ;;  %2259 = vmatpush2.msra.mxu1 %v11292_v34 }
 0x1f0   : > { %2261 = vmatprep.mubr.f32.mxu1 %v16329_v25  ;;  %2512 = vmatpush1.msra.mxu0 %v10326_v63  ;;  %v2306_v25 = vrot.slane %v532_v7, 1 }
 0x1f1   : > { %2118 = vmatmul.mubr.f32.gmra.mxu0 %v11666_v61  ;;  %2263 = vmatmul.mubr.f32.vlgmr.msra.gmra.mxu1 %v16330_v16  ;;  %v11955_v16 = vld [vmem:[#allocation2 + $0x18] sm:$0xff] }
 0x1f2   : > { %2514 = vmatprep.subr.mxu0 %v10332_v3  ;;  %2695 = vmatprep.subr.mxu1 %v16332_v50  ;;  %v2307_v3 = vrot.slane %v11955_v16, 1  ;;  %v11958_v50 = vld [vmem:[#allocation2 + $0x10] sm:$0xff] }
 0x1f3   : > { %2516 = vmatpush1.msra.mxu0 %v10338_v5  ;;  %2701 = vmatpush1.msra.mxu1 %v16333_v62  ;;  %v2311_v63 = vrot.slane %v11958_v50, 1  ;;  %v11961_v5 = vld [vmem:[#allocation2 + $0x28] sm:$0xff]  ;;  %v16336_v62 = vld [vmem:[#allocation66_spill] sm:$0xff] }
 0x1f4   : > { %2518 = vmatprep.subr.mxu0 %v10347_v12  ;;  %2707 = vmatprep.subr.mxu1 %v16334_v58  ;;  %v16335_v58 = vld [vmem:[#allocation60_spill] sm:$0xff]  ;;  %v2303_v12 = vrot.slane %v531_v59, 1  ;;  %v16338_v23 = vrot.slane %v11961_v5, 1 }
 0x1f5   : > { %2124 = vmatprep.mubr.f32.mxu0 %v11690_v18  ;;  %2269 = vmatprep.mubr.f32.mxu1 %v16331_v17  ;;  %v2304_v17 = vrot.slane %v11966_v57, 1  ;;  %v2312_v34 = vsel %vm625_vm0, %v2307_v3, %v2311_v63 }
 0x1f6   : > { %2520 = vmatpush1.msra.mxu0 %v16131_v28  ;;  %2713 = vmatpush1.msra.mxu1 %v16335_v58  ;;  %v16337_v58 = vld [vmem:[#allocation70_spill] sm:$0xff]  ;;  %v2308_v28 = vsel %vm625_vm0, %v2306_v25, %v2307_v3  ;;  %v2316_v51 = vsel %vm625_vm0, %v2311_v63, %v16338_v23  ;;  %v16341_v3 = vld [vmem:[#allocation79_spill] sm:$0xff]  ;;  %v2334_v23 = vadd.f32 %v11955_v16, %v2312_v34  ;;  %v16344_v34 = vld [vmem:[#allocation88_spill] sm:$0xff] }
 0x1f7   : > { %2126 = vmatmul.mubr.f32.gmra.mxu0 %v11703_v33  ;;  %2271 = vmatmul.mubr.f32.gmra.mxu1 %v11641_v9  ;;  %v2305_v9 = vsel %vm625_vm0, %v2303_v12, %v2304_v17  ;;  %v2332_v63 = vadd.f32 %v2308_v28, %v532_v7  ;;  %v11999_v25 = vadd.f32 %v11958_v50, %v2316_v51  ;;  %v16342_v12 = vld [vmem:[#allocation82_spill] sm:$0xff] }
 0x1f8   : > { %2522 = vmatprep.subr.mxu0 %v16133_v54  ;;  %2719 = vmatprep.subr.mxu1 %v16336_v62  ;;  %v2310_v62 = vsel %vm625_vm0, %v2304_v17, %v2309_v55  ;;  %v2331_v17 = vadd.f32 %v2305_v9, %v531_v59  ;;  %v2355_v28 = vrot.slane %v2334_v23, 2  ;;  %v16346_v9 = vld [vmem:[#allocation98_spill] sm:$0xff]  ;;  %v16348_v59 = vld [vmem:[#allocation108_spill] sm:$0xff] }
 0x1f9   : > { %2524 = vmatpush1.msra.mxu0 %v16136_v42  ;;  %2725 = vmatpush1.msra.mxu1 %v16337_v58  ;;  %v16340_v42 = vrot.slane %v11972_v52, 1  ;;  %v2354_v51 = vrot.slane %v2332_v63, 2 }
 0x1fa   : > { %2526 = vmatprep.subr.mxu0 %v16138_v48  ;;  %2731 = vmatprep.subr.mxu1 %v16339_v43 }
 0x1fb   : > { %v2314_v58 = vsel %vm625_vm0, %v2309_v55, %v16340_v42  ;;  %2277 = vmatprep.mubr.f32.mxu1 %v11653_v0  ;;  %2528 = vmatpush1.msra.mxu0 %v16140_v31  ;;  %v2333_v55 = vadd.f32 %v11966_v57, %v2310_v62  ;;  %v16343_v0 = vld [vmem:[#allocation85_spill] sm:$0xff]  ;;  %v16345_v62 = vld [vmem:[#allocation92_spill] sm:$0xff] }
 0x1fc   : > { %2737 = vmatpush1.msra.mxu1 %v16341_v3  ;;  %2530 = vmatprep.subr.mxu0 %v16142_v45  ;;  %v12005_v42 = vadd.f32 %v11969_v56, %v2314_v58  ;;  %v2351_v58 = vrot.slane %v2331_v17, 2  ;;  %v2389_v3 = vrot.slane %v2331_v17, 4 }
 0x1fd   : > { %2279 = vmatmul.mubr.f32.gmra.mxu1 %v11666_v61  ;;  %2743 = vmatprep.subr.mxu1 %v16342_v12  ;;  %v2352_v61 = vrot.slane %v2333_v55, 2  ;;  %v16349_v12 = vrot.slane %v11999_v25, 2 }
 0x1fe   : > { %2532 = vmatpush1.msra.mxu0 %v16144_v6  ;;  %2749 = vmatpush1.msra.mxu1 %v16343_v0  ;;  %v2393_v0 = vrot.slane %v2334_v23, 4  ;;  %v16351_v43 = vrot.slane %v12005_v42, 2 }
 0x1ff   : > { %2534 = vmatprep.subr.mxu0 %v16146_v22  ;;  %2755 = vmatprep.subr.mxu1 %v16344_v34  ;;  %v2392_v34 = vrot.slane %v2332_v63, 4  ;;  %v2360_v7 = vsel %vm674_vm1, %v2355_v28, %v16349_v12  ;;  %v16353_v12 = vld [vmem:[#allocation117_spill] sm:$0xff] }
 0x200   : > { %2285 = vmatprep.mubr.f32.mxu1 %v11690_v18  ;;  %2536 = vmatpush1.msra.mxu0 %v16149_v38  ;;  %v16347_v18 = vld [vmem:[#allocation102_spill] sm:$0xff] }
 0x201   : > { %2761 = vmatpush1.msra.mxu1 %v16345_v62  ;;  %2538 = vmatprep.subr.mxu0 %v16151_v44  ;;  %v2356_v62 = vsel %vm674_vm1, %v2354_v51, %v2355_v28 }
 0x202   : > { %2287 = vmatmul.mubr.f32.gmra.mxu1 %v11703_v33  ;;  %2767 = vmatprep.subr.mxu1 %v16346_v9  ;;  %v16350_v9 = vld [vmem:[#allocation111_spill] sm:$0xff]  ;;  %v2380_v28 = vadd.f32 %v2356_v62, %v2332_v63  ;;  %v2382_v33 = vadd.f32 %v2360_v7, %v2334_v23  ;;  %v16356_v63 = vld [vmem:[#allocation124_spill] sm:$0xff]  ;;  %v2427_v62 = vrot.slane %v11966_v57, 6 }
 0x203   : > { %2540 = vmatpush1.msra.mxu0 %v16270_v36  ;;  %2773 = vmatpush1.msra.mxu1 %v16347_v18  ;;  %v2353_v18 = vsel %vm674_vm1, %v2351_v58, %v2352_v61  ;;  %v16352_v36 = vld [vmem:[#allocation114_spill] sm:$0xff]  ;;  %v2428_v58 = vrot.slane %v11955_v16, 6  ;;  %v16357_v16 = vrot.slane %v12005_v42, 4  ;;  %v16363_v7 = vld [vmem:[#allocation143_spill] sm:$0xff] }
 0x204   : > { %2542 = vmatprep.subr.mxu0 %v16272_v49  ;;  %2779 = vmatprep.subr.mxu1 %v16348_v59  ;;  %v2358_v49 = vsel %vm674_vm1, %v2352_v61, %v16351_v43  ;;  %v2390_v59 = vrot.slane %v2333_v55, 4  ;;  %v16354_v43 = vld [vmem:[#allocation120_spill] sm:$0xff]  ;;  %v16355_v61 = vrot.slane %v11999_v25, 4 }
 0x205   : > { %2544 = vmatpush1.msra.mxu0 %v16274_v15  ;;  %2785 = vmatpush1.msra.mxu1 %v16350_v9  ;;  %v2394_v9 = vsel %vm713_vm2, %v2392_v34, %v2393_v0 }
 0x206   : > { %2546 = vmatprep.subr.mxu0 %v16276_v8  ;;  %2791 = vmatprep.subr.mxu1 %v16352_v36  ;;  %v2398_v51 = vsel %vm713_vm2, %v2393_v0, %v16355_v61  ;;  %v15540_v36 = vrot.slane %v11958_v50, 6  ;;  %v2379_v8 = vadd.f32 %v2353_v18, %v2331_v17  ;;  %v2391_v23 = vsel %vm713_vm2, %v2389_v3, %v2390_v59  ;;  %v16358_v0 = vld [vmem:[#allocation130_spill] sm:$0xff]  ;;  %v16360_v18 = vld [vmem:[#allocation119_spill] sm:$0xff]  ;;  %v16361_v3 = vld [vmem:[#allocation140_spill] sm:$0xff] }
 0x207   : > { %2548 = vmatpush1.msra.mxu0 %v16278_v60  ;;  %2797 = vmatpush1.msra.mxu1 %v16353_v12  ;;  %v2381_v60 = vadd.f32 %v2358_v49, %v2333_v55  ;;  %v2396_v34 = vsel %vm713_vm2, %v2390_v59, %v16357_v16  ;;  %v16359_v49 = vld [vmem:[#allocation134_spill] sm:$0xff]  ;;  %v2418_v17 = vadd.f32 %v2394_v9, %v2380_v28  ;;  %v16362_v16 = vld [vmem:[#allocation123_spill] sm:$0xff]  ;;  %v16368_v28 = vld [vmem:[#allocation149_spill] sm:$0xff] }
 0x208   : > { %2550 = vmatprep.subr.mxu0 %v16280_v46  ;;  %2803 = vmatprep.subr.mxu1 %v16354_v43  ;;  %v2420_v55 = vadd.f32 %v2398_v51, %v2382_v33  ;;  %v2432_v57 = vsel %vm752_vm3, %v2428_v58, %v15540_v36  ;;  %v2417_v59 = vadd.f32 %v2391_v23, %v2379_v8  ;;  %v16365_v9 = vld [vmem:[#allocation126_spill] sm:$0xff]  ;;  %v16367_v51 = vld [vmem:[#allocation129_spill] sm:$0xff]  ;;  %v16370_v8 = vld [vmem:[#allocation152_spill] sm:$0xff] }
 0x209   : > { %2552 = vmatpush1.msra.mxu0 %v16282_v40  ;;  %2809 = vmatpush1.msra.mxu1 %v16356_v63  ;;  %v2419_v61 = vadd.f32 %v2396_v34, %v2381_v60  ;;  %v16366_v33 = vld [vmem:[#allocation146_spill] sm:$0xff]  ;;  %v16369_v60 = vld [vmem:[#allocation133_spill] sm:$0xff]  ;;  %v16375_v43 = vld [vmem:[#allocation147_spill] sm:$0xff] }
 0x20a   : > { %2554 = vmatprep.subr.mxu0 %v16284_v26  ;;  %2815 = vmatprep.subr.mxu1 %v16358_v0  ;;  %v16364_v0 = vrot.slane %v11969_v56, 6  ;;  %v12073_v36 = vadd.f32 %v2432_v57, %v2420_v55  ;;  %v2451_v23 = vadd.f32 %v2427_v62, %v2417_v59  ;;  %v16373_v63 = vld [vmem:[#allocation142_spill] sm:$0xff]  ;;  %v16377_v57 = vld [vmem:[#allocation151_spill] sm:$0xff]  ;;  %v16394_v12 = vld [vmem:[#allocation213_spill] sm:$0xff] }
 0x20b   : > { %2556 = vmatpush1.msra.mxu0 %v16286_v19  ;;  %2821 = vmatpush1.msra.mxu1 %v16359_v49 }
 0x20c   : > { %2558 = vmatprep.subr.mxu0 %v16360_v18  ;;  %2827 = vmatprep.subr.mxu1 %v16361_v3  ;;  %v2430_v49 = vsel %vm752_vm3, %v2427_v62, %v16364_v0  ;;  %v2452_v3 = vadd.f32 %v2428_v58, %v2418_v17  ;;  %v16372_v0 = vld [vmem:[#allocation156_spill] sm:$0xff]  ;;  %v16376_v58 = vld [vmem:[#allocation166_spill] sm:$0xff]  ;;  %v15541_v55 = vrot.slane %v12073_v36, 2 }
 0x20d   : > { %2560 = vmatpush1.msra.mxu0 %v16362_v16  ;;  %2833 = vmatpush1.msra.mxu1 %v16363_v7  ;;  %v12077_v34 = vadd.f32 %v2430_v49, %v2419_v61  ;;  %v16371_v7 = vld [vmem:[#allocation138_spill] sm:$0xff]  ;;  %v16378_v62 = vld [vmem:[#allocation172_spill] sm:$0xff]  ;;  %v2471_v49 = vrot.slane %v2451_v23, 2  ;;  %v16379_v61 = vld [vmem:[#allocation175_spill] sm:$0xff] }
 0x20e   : > { %2562 = vmatprep.subr.mxu0 %v16365_v9  ;;  %2839 = vmatprep.subr.mxu1 %v16366_v33  ;;  %v16374_v33 = vld [vmem:[#allocation162_spill] sm:$0xff]  ;;  %v2474_v17 = vrot.slane %v2452_v3, 2  ;;  %v16382_v3 = vld [vmem:[#allocation181_spill] sm:$0xff]  ;;  %v16384_v23 = vld [vmem:[#allocation184_spill] sm:$0xff] }
 0x20f   : > { %2564 = vmatpush2.msra.mxu0 %v16367_v51  ;;  %2845 = vmatpush1.msra.mxu1 %v16368_v28  ;;  %v15542_v59 = vrot.slane %v12077_v34, 2 }
 0x210   : > { %2566 = vmatprep.subr.mxu0 %v16369_v60  ;;  %2851 = vmatprep.subr.mxu1 %v16370_v8  ;;  %v16385_v8 = vld [vmem:[#allocation188_spill] sm:$0xff] }
 0x211   : > { %2568 = vmatpush2.msra.mxu0 %v16371_v7  ;;  %2857 = vmatpush1.msra.mxu1 %v16372_v0  ;;  %v16381_v0 = vld [vmem:[#allocation161_spill] sm:$0xff] }
 0x212   : > { %2570 = vmatprep.subr.mxu0 %v16373_v63  ;;  %2863 = vmatprep.subr.mxu1 %v16374_v33  ;;  %v16380_v33 = vld [vmem:[#allocation178_spill] sm:$0xff] }
 0x213   : > { %2572 = vmatpush2.msra.mxu0 %v16375_v43  ;;  %2869 = vmatpush1.msra.mxu1 %v16376_v58  ;;  %v2476_v58 = vsel %vm674_vm1, %v2474_v17, %v15541_v55  ;;  %v16388_v17 = vld [vmem:[#allocation198_spill] sm:$0xff] }
 0x214   : > { %2574 = vmatprep.subr.mxu0 %v16377_v57  ;;  %2875 = vmatprep.subr.mxu1 %v16378_v62  ;;  %v16383_v62 = vld [vmem:[#allocation165_spill] sm:$0xff] }
 0x215   : > { %2576 = vmatpush2.msra.mxu0 %v16306_v27  ;;  %2881 = vmatpush1.msra.mxu1 %v16379_v61  ;;  %v2473_v61 = vsel %vm674_vm1, %v2471_v49, %v15542_v59  ;;  %v16390_v49 = vld [vmem:[#allocation204_spill] sm:$0xff]  ;;  %v16391_v59 = vld [vmem:[#allocation207_spill] sm:$0xff] }
 0x216   : > { %2578 = vmatprep.subr.mxu0 %v16308_v39  ;;  %2887 = vmatprep.subr.mxu1 %v16380_v33  ;;  %v16386_v33 = vld [vmem:[#allocation194_spill] sm:$0xff]  ;;  %v12111_v55 = vand.u32 4294901760, %v2473_v61 }
 0x217   : > { %2580 = vmatpush2.msra.mxu0 %v16381_v0  ;;  %2893 = vmatpush2.msra.mxu1 %v16382_v3  ;;  %v12107_v3 = vand.u32 4294901760, %v2476_v58 }
 0x218   : > { %2582 = vmatprep.subr.mxu0 %v16383_v62  ;;  %2899 = vmatprep.subr.mxu1 %v16384_v23  ;;  %16389 = vst [vmem:[#allocation101_spill] sm:$0xff] %v12111_v55 }
 0x219   : > { %2584 = vmatpush2.msra.mxu0 %v16314_v4  ;;  %2905 = vmatpush2.msra.mxu1 %v16385_v8  ;;  %16387 = vst [vmem:[#allocation91_spill] sm:$0xff] %v12107_v3  ;;  %v12120_v28 = vsub.f32 %v2476_v58, %v12107_v3  ;;  %v16398_v58 = vld [vmem:[#allocation226_spill] sm:$0xff] }
 0x21a   : > { %2586 = vmatprep.subr.mxu0 %v16207_v24  ;;  %2911 = vmatprep.subr.mxu1 %v16386_v33  ;;  %v16392_v33 = vld [vmem:[#allocation210_spill] sm:$0xff] }
 0x21b   : > { %2588 = vmatpush2.msra.mxu0 %v16210_v53  ;;  %2917 = vmatpush2.msra.mxu1 %v16388_v17  ;;  %v1404_v23 = vpop.f32.mrf.mxu1  ;;  %16393 = vst [vmem:[#allocation265_spill] sm:$0xff] %v12120_v28  ;;  %v16456_v53 = vld [vmem:[#allocation104_spill] sm:$0xff] }
 0x21c   : > { %2590 = vmatprep.subr.mxu0 %v16318_v2  ;;  %2923 = vmatprep.subr.mxu1 %v16390_v49  ;;  %v12127_v49 = vsub.f32 %v2473_v61, %v12111_v55 }
 0x21d   : > { %2592 = vmatpush2.msra.mxu0 %v16320_v32  ;;  %2929 = vmatpush2.msra.mxu1 %v16391_v59  ;;  %v963_v8 = vpop.f32.mrf.mxu0  ;;  %v16396_v59 = vld [vmem:[#allocation216_spill] sm:$0xff]  ;;  %v16447_v32 = vld [vmem:[#allocation34_spill] sm:$0xff] }
 0x21e   : > { %2594 = vmatprep.subr.mxu0 %v16219_v41  ;;  %2935 = vmatprep.subr.mxu1 %v16392_v33  ;;  %v12122_v17 = vadd.f32 %v1404_v23, %v963_v8  ;;  %16395 = vst [vmem:[#allocation281_spill] sm:$0xff] %v12127_v49  ;;  %v16397_v41 = vld [vmem:[#allocation220_spill] sm:$0xff]  ;;  %v15544_v8 = vand.u32 4294901760, %v12120_v28  ;;  %v16399_v23 = vld [vmem:[#allocation230_spill] sm:$0xff]  ;;  %v15548_v61 = vand.u32 4294901760, %v12127_v49 }
 0x21f   : > { %2596 = vmatpush2.msra.mxu0 %v16222_v21  ;;  %2941 = vmatpush2.msra.mxu1 %v16394_v12  ;;  %v16400_v12 = vld [vmem:[#allocation236_spill] sm:$0xff]  ;;  %v16446_v21 = vld [vmem:[#allocation90_spill] sm:$0xff] }
 0x220   : > { %2598 = vmatprep.subr.mxu0 %v16224_v13  ;;  %2947 = vmatprep.subr.mxu1 %v16396_v59  ;;  %v16401_v59 = vld [vmem:[#allocation239_spill] sm:$0xff]  ;;  %v16404_v33 = vld [vmem:[#allocation248_spill] sm:$0xff] }
 0x221   : > { %2600 = vmatpush2.msra.mxu0 %v16226_v37  ;;  %2953 = vmatpush2.msra.mxu1 %v16397_v41  ;;  %v16402_v41 = vld [vmem:[#allocation242_spill] sm:$0xff]  ;;  %v16444_v37 = vld [vmem:[#allocation33_spill] sm:$0xff] }
 0x222   : > { %2602 = vmatprep.subr.mxu0 %v16227_v10  ;;  %2959 = vmatprep.subr.mxu1 %v16398_v58  ;;  %v2628_v58 = vsub.f32 %v12120_v28, %v15544_v8  ;;  %v16417_v28 = vld [vmem:[#allocation274_spill] sm:$0xff]  ;;  %v16442_v10 = vld [vmem:[#allocation32_spill] sm:$0xff] }
 0x223   : > { %2604 = vmatpush2.msra.mxu0 %v16228_v35  ;;  %2965 = vmatpush2.msra.mxu1 %v16399_v23  ;;  %v16403_v23 = vld [vmem:[#allocation245_spill] sm:$0xff] }
 0x224   : > { %2606 = vmatprep.subr.mxu0 %v16229_v11  ;;  %2971 = vmatprep.subr.mxu1 %v16400_v12  ;;  %v2634_v12 = vsub.f32 %v12127_v49, %v15548_v61  ;;  %v2629_v8 = vand.u32 4294901760, %v2628_v58  ;;  %v16408_v61 = vld [vmem:[#allocation257_spill] sm:$0xff]  ;;  %v16412_v58 = vld [vmem:[#allocation259_spill] sm:$0xff] }
 0x225   : > { %2608 = vmatpush2.msra.mxu0 %v16230_v14  ;;  %2977 = vmatpush2.msra.mxu1 %v16401_v59  ;;  %v16405_v59 = vld [vmem:[#allocation252_spill] sm:$0xff]  ;;  %v12164_v49 = vld [vmem:[#allocation2 + $0x48] sm:$0xff]  ;;  %v16416_v14 = vrot.slane %v11972_v52, 1  ;;  %v16439_v11 = vld [vmem:[#allocation75_spill] sm:$0xff] }
 0x226   : > { %2610 = vmatprep.subr.mxu0 %v16231_v30  ;;  %2983 = vmatprep.subr.mxu1 %v16402_v41  ;;  %v16406_v41 = vld [vmem:[#allocation255_spill] sm:$0xff]  ;;  %v16441_v35 = vld [vmem:[#allocation81_spill] sm:$0xff] }
 0x227   : > { %2612 = vmatpush2.msra.mxu0 %v11181_v29  ;;  %2989 = vmatpush2.msra.mxu1 %v16403_v23  ;;  %v12159_v29 = vld [vmem:[#allocation2 + $0x40] sm:$0xff]  ;;  %v16407_v30 = vld [vmem:[#allocation243_spill] sm:$0xff] }
 0x228   : > { %2614 = vmatprep.subr.mxu0 %v11197_v20  ;;  %2995 = vmatprep.subr.mxu1 %v16404_v33  ;;  %v2319_v23 = vrot.slane %v12159_v29, 1  ;;  %v2635_v20 = vand.u32 4294901760, %v2634_v12  ;;  %v2317_v33 = vrot.slane %v12164_v49, 1  ;;  %v16415_v12 = vld [vmem:[#allocation37_spill] sm:$0xff] }
 0x229   : > { %2616 = vmatpush2.msra.mxu0 %v11221_v1  ;;  %3001 = vmatpush2.msra.mxu1 %v16405_v59  ;;  %v16409_v1 = vld [vmem:[#allocation247_spill] sm:$0xff]  ;;  %v16410_v59 = vld [vmem:[#allocation258_spill] sm:$0xff] }
 0x22a   : > { %2618 = vmatprep.subr.mxu0 %v11238_v47  ;;  %3007 = vmatprep.subr.mxu1 %v16406_v41  ;;  %v16411_v47 = vld [vmem:[#allocation251_spill] sm:$0xff]  ;;  %v16413_v41 = vld [vmem:[#allocation262_spill] sm:$0xff] }
 0x22b   : > { %2620 = vmatpush2.msra.mxu0 %v16407_v30  ;;  %3013 = vmatpush2.msra.mxu1 %v16408_v61  ;;  %v16414_v30 = vrot.slane %v11961_v5, 1 }
 0x22c   : > { %2622 = vmatprep.subr.mxu0 %v16409_v1  ;;  %3019 = vmatprep.subr.mxu1 %v16410_v59  ;;  %v2318_v1 = vsel %vm625_vm0, %v16416_v14, %v2317_v33  ;;  %v16418_v59 = vld [vmem:[#allocation39_spill] sm:$0xff]  ;;  %v16424_v14 = vld [vmem:[#allocation49_spill] sm:$0xff] }
 0x22d   : > { %2624 = vmatpush2.msra.mxu0 %v16411_v47  ;;  %3025 = vmatpush2.msra.mxu1 %v16412_v58  ;;  %v2320_v61 = vsel %vm625_vm0, %v16414_v30, %v2319_v23  ;;  %v16419_v47 = vld [vmem:[#allocation275_spill] sm:$0xff]  ;;  %v16421_v58 = vld [vmem:[#allocation276_spill] sm:$0xff]  ;;  %v16422_v30 = vld [vmem:[#allocation45_spill] sm:$0xff] }
 0x22e   : > { %2630 = vmatprep.mubr.f32.mxu0 %v2629_v8  ;;  %3031 = vmatprep.subr.mxu1 %v16413_v41  ;;  %v16420_v8 = vld [vmem:[#allocation41_spill] sm:$0xff]  ;;  %v12184_v41 = vadd.f32 %v11961_v5, %v2320_v61 }
 0x22f   : > { %3109 = vmatprep.subr.mxu0 %v16415_v12  ;;  %2636 = vmatmul.mubr.f32.vlgmr.msra.gmra.mxu0 %v2635_v20  ;;  %v12189_v20 = vadd.f32 %v11972_v52, %v2318_v1  ;;  %v16423_v12 = vld [vmem:[#allocation279_spill] sm:$0xff] }
 0x230   : > { %3037 = vmatpush2.msra.mxu1 %v16417_v28  ;;  %3112 = vmatpush1.msra.mxu0 %v16418_v59  ;;  %v16425_v28 = vld [vmem:[#allocation280_spill] sm:$0xff]  ;;  %v16426_v59 = vld [vmem:[#allocation51_spill] sm:$0xff]  ;;  %v2363_v61 = vrot.slane %v12184_v41, 2 }
 0x231   : > { %3043 = vmatprep.subr.mxu1 %v16419_v47  ;;  %3115 = vmatprep.subr.mxu0 %v16420_v8  ;;  %v16427_v47 = vld [vmem:[#allocation284_spill] sm:$0xff]  ;;  %v16428_v8 = vld [vmem:[#allocation58_spill] sm:$0xff]  ;;  %v2361_v1 = vrot.slane %v12189_v20, 2 }
 0x232   : > { %3049 = vmatpush2.msra.mxu1 %v16421_v58  ;;  %3118 = vmatpush1.msra.mxu0 %v16422_v30  ;;  %v16429_v58 = vld [vmem:[#allocation285_spill] sm:$0xff]  ;;  %v16435_v30 = vrot.slane %v11999_v25, 2 }
 0x233   : > { %3055 = vmatprep.subr.mxu1 %v16423_v12  ;;  %3121 = vmatprep.subr.mxu0 %v16424_v14  ;;  %v12202_v12 = vadd.f32 %v12159_v29, %v2319_v23  ;;  %v16430_v14 = vld [vmem:[#allocation61_spill] sm:$0xff] }
 0x234   : > { %3061 = vmatpush2.msra.mxu1 %v16425_v28  ;;  %3124 = vmatpush1.msra.mxu0 %v16426_v59  ;;  %v12207_v59 = vadd.f32 %v12164_v49, %v2317_v33  ;;  %v16433_v28 = vld [vmem:[#allocation68_spill] sm:$0xff]  ;;  %v2364_v23 = vsel %vm674_vm1, %v16435_v30, %v2363_v61  ;;  %v16438_v33 = vrot.slane %v12005_v42, 2 }
 0x235   : > { %3067 = vmatprep.subr.mxu1 %v16427_v47  ;;  %3127 = vmatprep.subr.mxu0 %v16428_v8  ;;  %v16431_v47 = vld [vmem:[#allocation64_spill] sm:$0xff] }
 0x236   : > { %3073 = vmatpush2.msra.mxu1 %v16429_v58  ;;  %3075 = vmatprep.mubr.f32.mxu1 %v12107_v3  ;;  %v16432_v8 = vld [vmem:[#allocation28_spill] sm:$0xff]  ;;  %v16434_v58 = vld [vmem:[#allocation29_spill] sm:$0xff]  ;;  %v2401_v3 = vrot.slane %v12184_v41, 4  ;;  %v2365_v30 = vrot.slane %v12207_v59, 2 }
 0x237   : > { %3130 = vmatpush1.msra.mxu0 %v16430_v14  ;;  %3077 = vmatmul.mubr.f32.vlgmr.msra.gmra.mxu1 %v12111_v55  ;;  %v16436_v14 = vld [vmem:[#allocation72_spill] sm:$0xff]  ;;  %v16437_v55 = vld [vmem:[#allocation30_spill] sm:$0xff] }
 0x238   : > { %3133 = vmatprep.subr.mxu0 %v16431_v47  ;;  %3341 = vmatprep.subr.mxu1 %v16432_v8  ;;  %v2362_v47 = vsel %vm674_vm1, %v16438_v33, %v2361_v1  ;;  %v2399_v8 = vrot.slane %v12189_v20, 4  ;;  %v16445_v33 = vrot.slane %v11999_v25, 4 }
 0x239   : > { %3136 = vmatpush1.msra.mxu0 %v16433_v28  ;;  %3343 = vmatpush1.msra.mxu1 %v16434_v58  ;;  %v2367_v28 = vrot.slane %v12202_v12, 2  ;;  %v16440_v58 = vld [vmem:[#allocation31_spill] sm:$0xff] }
 0x23a   : > { %3139 = vmatprep.subr.mxu0 %v16436_v14  ;;  %3345 = vmatprep.subr.mxu1 %v16437_v55  ;;  %v2384_v14 = vadd.f32 %v2364_v23, %v11999_v25  ;;  %v16443_v55 = vld [vmem:[#allocation84_spill] sm:$0xff]  ;;  %v2402_v13 = vsel %vm713_vm2, %v16445_v33, %v2401_v3  ;;  %v2405_v25 = vrot.slane %v12202_v12, 4  ;;  %v16450_v33 = vld [vmem:[#allocation35_spill] sm:$0xff] }
 0x23b   : > { %3142 = vmatpush1.msra.mxu0 %v16439_v11  ;;  %3347 = vmatpush1.msra.mxu1 %v16440_v58  ;;  %v2435_v11 = vrot.slane %v11961_v5, 6  ;;  %v2383_v58 = vadd.f32 %v2362_v47, %v12005_v42  ;;  %v2366_v5 = vsel %vm674_vm1, %v2361_v1, %v2365_v30  ;;  %v2403_v47 = vrot.slane %v12207_v59, 4  ;;  %v16457_v1 = vld [vmem:[#allocation40_spill] sm:$0xff] }
 0x23c   : > { %3145 = vmatprep.subr.mxu0 %v16441_v35  ;;  %3349 = vmatprep.subr.mxu1 %v16442_v10  ;;  %v16448_v35 = vrot.slane %v12005_v42, 4  ;;  %v16449_v10 = vld [vmem:[#allocation93_spill] sm:$0xff]  ;;  %v2422_v42 = vadd.f32 %v2402_v13, %v2384_v14  ;;  %v2406_v13 = vsel %vm713_vm2, %v2401_v3, %v2405_v25  ;;  %v2439_v14 = vrot.slane %v12159_v29, 6  ;;  %v16463_v3 = vld [vmem:[#allocation50_spill] sm:$0xff] }
 0x23d   : > { %3148 = vmatpush1.msra.mxu0 %v16443_v55  ;;  %3351 = vmatpush1.msra.mxu1 %v16444_v37  ;;  %v2433_v55 = vrot.slane %v11972_v52, 6  ;;  %v2368_v37 = vsel %vm674_vm1, %v2363_v61, %v2367_v28  ;;  %v16454_v52 = vld [vmem:[#allocation38_spill] sm:$0xff]  ;;  %v16455_v61 = vrot.slane %v11958_v50, 6  ;;  %v16459_v50 = vld [vmem:[#allocation107_spill] sm:$0xff] }
 0x23e   : > { %3151 = vmatprep.subr.mxu0 %v16446_v21  ;;  %3353 = vmatprep.subr.mxu1 %v16447_v32  ;;  %v2400_v23 = vsel %vm713_vm2, %v16448_v35, %v2399_v8  ;;  %v16451_v21 = vld [vmem:[#allocation96_spill] sm:$0xff] }
 0x23f   : > { %3154 = vmatpush1.msra.mxu0 %v16449_v10  ;;  %3355 = vmatpush1.msra.mxu1 %v16450_v33  ;;  %v16452_v32 = vld [vmem:[#allocation36_spill] sm:$0xff]  ;;  %v2436_v2 = vsel %vm752_vm3, %v16455_v61, %v2435_v11  ;;  %v2421_v10 = vadd.f32 %v2400_v23, %v2383_v58  ;;  %v2386_v33 = vadd.f32 %v2368_v37, %v12184_v41  ;;  %v2437_v41 = vrot.slane %v12164_v49, 6  ;;  %v16461_v58 = vld [vmem:[#allocation113_spill] sm:$0xff] }
 0x240   : > { %3157 = vmatprep.subr.mxu0 %v16451_v21  ;;  %3357 = vmatprep.subr.mxu1 %v16452_v32  ;;  %v16453_v35 = vld [vmem:[#allocation100_spill] sm:$0xff]  ;;  %v16458_v21 = vrot.slane %v11969_v56, 6  ;;  %v2404_v37 = vsel %vm713_vm2, %v2399_v8, %v2403_v47  ;;  %v2456_v56 = vadd.f32 %v2436_v2, %v2422_v42  ;;  %v16465_v49 = vld [vmem:[#allocation125_spill] sm:$0xff]  ;;  %v2388_v42 = vadd.f32 %v2367_v28, %v12202_v12  ;;  %v16469_v28 = vld [vmem:[#allocation139_spill] sm:$0xff] }
 0x241   : > { %3160 = vmatpush1.msra.mxu0 %v16453_v35  ;;  %3359 = vmatpush1.msra.mxu1 %v16454_v52  ;;  %v2385_v35 = vadd.f32 %v2366_v5, %v12189_v20  ;;  %v16460_v61 = vld [vmem:[#allocation44_spill] sm:$0xff]  ;;  %v2424_v23 = vadd.f32 %v2406_v13, %v2386_v33  ;;  %v16464_v20 = vld [vmem:[#allocation122_spill] sm:$0xff]  ;;  %v2440_v5 = vsel %vm752_vm3, %v2435_v11, %v2439_v14 }
 0x242   : > { %3163 = vmatprep.subr.mxu0 %v16456_v53  ;;  %3361 = vmatprep.subr.mxu1 %v16457_v1  ;;  %v2434_v32 = vsel %vm752_vm3, %v16458_v21, %v2433_v55  ;;  %v16462_v21 = vld [vmem:[#allocation116_spill] sm:$0xff]  ;;  %v2438_v2 = vsel %vm752_vm3, %v2433_v55, %v2437_v41 }
 0x243   : > { %3166 = vmatpush1.msra.mxu0 %v16459_v50  ;;  %3363 = vmatpush1.msra.mxu1 %v16460_v61  ;;  %v2455_v29 = vadd.f32 %v2434_v32, %v2421_v10  ;;  %v2423_v8 = vadd.f32 %v2404_v37, %v2385_v35  ;;  %v12276_v50 = vpop.f32.mrf.mxu0  ;;  %v2479_v32 = vrot.slane %v2456_v56, 2  ;;  %v2387_v10 = vadd.f32 %v2365_v30, %v12207_v59  ;;  %v16467_v33 = vld [vmem:[#allocation132_spill] sm:$0xff]  ;;  %v16470_v59 = vld [vmem:[#allocation145_spill] sm:$0xff] }
 0x244   : > { %3169 = vmatprep.subr.mxu0 %v16461_v58  ;;  %3365 = vmatprep.subr.mxu1 %v16133_v54  ;;  %v2458_v13 = vadd.f32 %v2440_v5, %v2424_v23  ;;  %v16468_v37 = vld [vmem:[#allocation136_spill] sm:$0xff]  ;;  %v2426_v56 = vadd.f32 %v2405_v25, %v2388_v42  ;;  %v16471_v30 = vrot.slane %v12073_v36, 2  ;;  %v16476_v25 = vld [vmem:[#allocation87_spill] sm:$0xff]  ;;  %v16477_v36 = vld [vmem:[#allocation157_spill] sm:$0xff] }
 0x245   : > { %3172 = vmatpush1.msra.mxu0 %v16462_v21  ;;  %3367 = vmatpush1.msra.mxu1 %v16463_v3  ;;  %v16466_v21 = vld [vmem:[#allocation128_spill] sm:$0xff]  ;;  %v2477_v35 = vrot.slane %v2455_v29, 2  ;;  %v2457_v55 = vadd.f32 %v2438_v2, %v2423_v8  ;;  %v2425_v23 = vadd.f32 %v2403_v47, %v2387_v10  ;;  %v16474_v8 = vrot.slane %v12077_v34, 2  ;;  %v16480_v34 = vld [vmem:[#allocation94_spill] sm:$0xff] }
 0x246   : > { %3175 = vmatprep.subr.mxu0 %v16464_v20  ;;  %3369 = vmatprep.subr.mxu1 %v16138_v48  ;;  %v2480_v29 = vsel %vm674_vm1, %v16471_v30, %v2479_v32  ;;  %v16472_v5 = vld [vmem:[#allocation148_spill] sm:$0xff]  ;;  %v2460_v30 = vadd.f32 %v2439_v14, %v2426_v56  ;;  %v16490_v20 = vld [vmem:[#allocation186_spill] sm:$0xff] }
 0x247   : > { %3178 = vmatpush1.msra.mxu0 %v16465_v49  ;;  %3371 = vmatpush1.msra.mxu1 %v16140_v31  ;;  %v2478_v2 = vsel %vm674_vm1, %v16474_v8, %v2477_v35  ;;  %v2481_v42 = vrot.slane %v2457_v55, 2  ;;  %v12309_v47 = vand.u32 4294901760, %v2480_v29  ;;  %v2459_v8 = vadd.f32 %v2437_v41, %v2425_v23  ;;  %v16483_v55 = vld [vmem:[#allocation97_spill] sm:$0xff]  ;;  %v16484_v49 = vld [vmem:[#allocation168_spill] sm:$0xff] }
 0x248   : > { %3181 = vmatprep.subr.mxu0 %v16466_v21  ;;  %3373 = vmatprep.subr.mxu1 %v16142_v45 }
 0x249   : > { %3184 = vmatpush1.msra.mxu0 %v16467_v33  ;;  %3375 = vmatpush1.msra.mxu1 %v16144_v6  ;;  %v979_v11 = vpop.f32.mrf.mxu0  ;;  %v16475_v33 = vld [vmem:[#allocation154_spill] sm:$0xff]  ;;  %16478 = vst [vmem:[#allocation286_spill] sm:$0xff] %v12309_v47  ;;  %v2482_v14 = vsel %vm674_vm1, %v2477_v35, %v2481_v42  ;;  %v12326_v41 = vsub.f32 %v2480_v29, %v12309_v47 }
 0x24a   : > { %3187 = vmatprep.subr.mxu0 %v16468_v37  ;;  %3377 = vmatprep.subr.mxu1 %v16146_v22  ;;  %v16473_v37 = vld [vmem:[#allocation83_spill] sm:$0xff] }
 0x24b   : > { %3190 = vmatpush1.msra.mxu0 %v16469_v28  ;;  %3379 = vmatpush1.msra.mxu1 %v16149_v38  ;;  %v12291_v12 = vpop.f32.mrf.mxu0  ;;  %v2483_v28 = vrot.slane %v2458_v13, 2  ;;  %v12313_v13 = vand.u32 4294901760, %v2478_v2 }
 0x24c   : > { %3193 = vmatprep.subr.mxu0 %v16470_v59  ;;  %3381 = vmatprep.subr.mxu1 %v16151_v44  ;;  %v12305_v59 = vpop.f32.mrf.mxu1 }
 0x24d   : > { %3196 = vmatpush1.msra.mxu0 %v16472_v5  ;;  %3383 = vmatpush1.msra.mxu1 %v16473_v37  ;;  %v16479_v5 = vld [vmem:[#allocation160_spill] sm:$0xff]  ;;  %16481 = vst [vmem:[#allocation287_spill] sm:$0xff] %v12313_v13  ;;  %v2484_v21 = vsel %vm674_vm1, %v2479_v32, %v2483_v28  ;;  %v16486_v32 = vld [vmem:[#allocation177_spill] sm:$0xff] }
 0x24e   : > { %3199 = vmatprep.subr.mxu0 %v16475_v33  ;;  %3385 = vmatprep.subr.mxu1 %v16476_v25  ;;  %v16482_v33 = vld [vmem:[#allocation164_spill] sm:$0xff]  ;;  %v12335_v35 = vand.u32 4294901760, %v2484_v21 }
 0x24f   : > { %3202 = vmatpush1.msra.mxu0 %v16477_v36  ;;  %3387 = vmatpush1.msra.mxu1 %v16274_v15  ;;  %v995_v10 = vpop.f32.mrf.mxu0 }
 0x250   : > { %3205 = vmatprep.subr.mxu0 %v16479_v5  ;;  %3389 = vmatprep.subr.mxu1 %v16480_v34  ;;  %v16485_v5 = vld [vmem:[#allocation171_spill] sm:$0xff]  ;;  %16487 = vst [vmem:[#allocation288_spill] sm:$0xff] %v12335_v35  ;;  %v12353_v53 = vsub.f32 %v2484_v21, %v12335_v35 }
 0x251   : > { %3208 = vmatpush2.msra.mxu0 %v16482_v33  ;;  %3391 = vmatpush1.msra.mxu1 %v16483_v55  ;;  %v1412_v36 = vpop.f32.mrf.mxu1  ;;  %v12328_v23 = vpop.f32.mrf.mxu0  ;;  %v2487_v33 = vrot.slane %v2460_v30, 2  ;;  %v16491_v30 = vld [vmem:[#allocation189_spill] sm:$0xff] }
 0x252   : > { %3211 = vmatprep.subr.mxu0 %v16484_v49  ;;  %3393 = vmatprep.subr.mxu1 %v16280_v46  ;;  %v12321_v56 = vadd.f32 %v1412_v36, %v979_v11  ;;  %v12333_v49 = vsub.f32 %v2478_v2, %v12313_v13  ;;  %v2485_v11 = vrot.slane %v2459_v8, 2  ;;  %v16488_v36 = vld [vmem:[#allocation180_spill] sm:$0xff] }
 0x253   : > { %3214 = vmatpush2.msra.mxu0 %v16485_v5  ;;  %3395 = vmatpush1.msra.mxu1 %v16282_v40  ;;  %v12339_v5 = vand.u32 4294901760, %v2482_v14  ;;  %v12341_v29 = vpop.f32.mrf.mxu1  ;;  %v2488_v8 = vsel %vm674_vm1, %v2483_v28, %v2487_v33  ;;  %v16494_v28 = vld [vmem:[#allocation200_spill] sm:$0xff] }
 0x254   : > { %3217 = vmatprep.subr.mxu0 %v16486_v32  ;;  %3397 = vmatprep.subr.mxu1 %v16284_v26 }
 0x255   : > { %3220 = vmatpush2.msra.mxu0 %v16488_v36  ;;  %3399 = vmatpush1.msra.mxu1 %v16286_v19  ;;  %16489 = vst [vmem:[#allocation289_spill] sm:$0xff] %v12339_v5  ;;  %v16492_v36 = vld [vmem:[#allocation192_spill] sm:$0xff]  ;;  %v12359_v2 = vsub.f32 %v2482_v14, %v12339_v5 }
 0x256   : > { %3223 = vmatprep.subr.mxu0 %v16490_v20  ;;  %3401 = vmatprep.subr.mxu1 %v16360_v18  ;;  %v2486_v20 = vsel %vm674_vm1, %v2481_v42, %v2485_v11  ;;  %v16493_v18 = vld [vmem:[#allocation196_spill] sm:$0xff]  ;;  %v16497_v42 = vand.u32 4294901760, %v12326_v41 }
 0x257   : > { %3226 = vmatpush2.msra.mxu0 %v16491_v30  ;;  %3403 = vmatpush1.msra.mxu1 %v16362_v16  ;;  %v1011_v32 = vpop.f32.mrf.mxu0  ;;  %v16496_v30 = vld [vmem:[#allocation203_spill] sm:$0xff]  ;;  %v12374_v11 = vand.u32 4294901760, %v2486_v20  ;;  %v16506_v16 = vld [vmem:[#allocation228_spill] sm:$0xff] }
 0x258   : > { %3229 = vmatprep.subr.mxu0 %v16492_v36  ;;  %3405 = vmatprep.subr.mxu1 %v16365_v9  ;;  %v12363_v36 = vand.u32 4294901760, %v2488_v8  ;;  %v2644_v14 = vsub.f32 %v12326_v41, %v16497_v42  ;;  %v16504_v42 = vld [vmem:[#allocation224_spill] sm:$0xff] }
 0x259   : > { %3232 = vmatpush2.msra.mxu0 %v16493_v18  ;;  %3407 = vmatpush2.msra.mxu1 %v16367_v51  ;;  %v1420_v33 = vpop.f32.mrf.mxu1  ;;  %v12367_v21 = vpop.f32.mrf.mxu0  ;;  %16498 = vst [vmem:[#allocation291_spill] sm:$0xff] %v12374_v11  ;;  %v16503_v51 = vld [vmem:[#allocation221_spill] sm:$0xff] }
 0x25a   : > { %3235 = vmatprep.subr.mxu0 %v16494_v28  ;;  %3409 = vmatprep.subr.mxu1 %v16369_v60  ;;  %16495 = vst [vmem:[#allocation290_spill] sm:$0xff] %v12363_v36  ;;  %v12365_v58 = vadd.f32 %v1420_v33, %v995_v10  ;;  %v16499_v28 = vld [vmem:[#allocation209_spill] sm:$0xff]  ;;  %v16500_v10 = vand.u32 4294901760, %v12333_v49  ;;  %v16501_v60 = vld [vmem:[#allocation212_spill] sm:$0xff] }
 0x25b   : > { %3238 = vmatpush2.msra.mxu0 %v16496_v30  ;;  %3411 = vmatpush2.msra.mxu1 %v16371_v7  ;;  %v12376_v18 = vpop.f32.mrf.mxu1  ;;  %v16502_v7 = vld [vmem:[#allocation218_spill] sm:$0xff]  ;;  %v12395_v30 = vsub.f32 %v2486_v20, %v12374_v11  ;;  %v16507_v20 = vand.u32 4294901760, %v12359_v2 }
 0x25c   : > { %3241 = vmatprep.subr.mxu0 %v16499_v28  ;;  %3413 = vmatprep.subr.mxu1 %v16373_v63  ;;  %v2650_v33 = vsub.f32 %v12333_v49, %v16500_v10  ;;  %v12390_v28 = vsub.f32 %v2488_v8, %v12363_v36  ;;  %v2645_v10 = vand.u32 4294901760, %v2644_v14  ;;  %v16505_v8 = vand.u32 4294901760, %v12353_v53  ;;  %v16512_v14 = vld [vmem:[#allocation179_spill] sm:$0xff] }
 0x25d   : > { %3244 = vmatpush2.msra.mxu0 %v16501_v60  ;;  %3415 = vmatpush2.msra.mxu1 %v16375_v43 }
 0x25e   : > { %3247 = vmatprep.subr.mxu0 %v16502_v7  ;;  %3417 = vmatprep.subr.mxu1 %v16377_v57  ;;  %v1631_v63 = vpop.f32.mrf.mxu0  ;;  %v2651_v7 = vand.u32 4294901760, %v2650_v33  ;;  %v2660_v57 = vsub.f32 %v12353_v53, %v16505_v8  ;;  %v16509_v33 = vld [vmem:[#allocation235_spill] sm:$0xff] }
 0x25f   : > { %3250 = vmatpush2.msra.mxu0 %v16503_v51  ;;  %3419 = vmatpush2.msra.mxu1 %v16306_v27  ;;  %v1632_v60 = vadd.f32 %v1631_v63, %v12122_v17  ;;  %v1428_v43 = vpop.f32.mrf.mxu1  ;;  %v2666_v63 = vsub.f32 %v12359_v2, %v16507_v20  ;;  %v16508_v17 = vld [vmem:[#allocation232_spill] sm:$0xff] }
 0x260   : > { %3253 = vmatprep.subr.mxu0 %v16504_v42  ;;  %3421 = vmatprep.subr.mxu1 %v16308_v39  ;;  %v1429_v9 = vadd.f32 %v1428_v43, %v1011_v32  ;;  %v1633_v51 = vpop.f32.mrf.mxu0  ;;  %v2661_v32 = vand.u32 4294901760, %v2660_v57  ;;  %v16511_v42 = vld [vmem:[#allocation244_spill] sm:$0xff]  ;;  %v16516_v57 = vand.u32 4294901760, %v12395_v30 }
 0x261   : > { %3256 = vmatpush2.msra.mxu0 %v16506_v16  ;;  %3423 = vmatpush2.msra.mxu1 %v16381_v0  ;;  %v16510_v16 = vld [vmem:[#allocation241_spill] sm:$0xff]  ;;  %v2667_v20 = vand.u32 4294901760, %v2666_v63  ;;  %v12427_v63 = vpop.f32.mrf.mxu1  ;;  %v16520_v0 = vld [vmem:[#allocation190_spill] sm:$0xff] }
 0x262   : > { %3259 = vmatprep.subr.mxu0 %v16508_v17  ;;  %3425 = vmatprep.subr.mxu1 %v16383_v62 }
 0x263   : > { %2646 = vmatprep.mubr.f32.mxu0 %v2645_v10  ;;  %3262 = vmatpush2.msra.mxu0 %v16509_v33  ;;  %v16513_v10 = vand.u32 4294901760, %v12390_v28 }
 0x264   : > { %3427 = vmatpush2.msra.mxu1 %v16314_v4  ;;  %2652 = vmatmul.mubr.f32.gmra.mxu0 %v2651_v7  ;;  %v1641_v8 = vpop.f32.mrf.mxu0  ;;  %v16514_v4 = vld [vmem:[#allocation250_spill] sm:$0xff]  ;;  %v16515_v7 = vld [vmem:[#allocation183_spill] sm:$0xff] }
 0x265   : > { %3265 = vmatprep.subr.mxu0 %v16510_v16  ;;  %3429 = vmatprep.subr.mxu1 %v16207_v24  ;;  %v1642_v17 = vadd.f32 %v1641_v8, %v12321_v56  ;;  %v2676_v43 = vsub.f32 %v12390_v28, %v16513_v10  ;;  %v2682_v16 = vsub.f32 %v12395_v30, %v16516_v57  ;;  %v16517_v8 = vld [vmem:[#allocation253_spill] sm:$0xff] }
 0x266   : > { %3268 = vmatpush2.msra.mxu0 %v16511_v42  ;;  %3431 = vmatpush2.msra.mxu1 %v16512_v14  ;;  %v1643_v33 = vpop.f32.mrf.mxu0  ;;  %v1407_v56 = vadd.f32 %v12305_v59, %v12276_v50  ;;  %v16518_v42 = vld [vmem:[#allocation187_spill] sm:$0xff] }
 0x267   : > { %3271 = vmatprep.subr.mxu0 %v16514_v4  ;;  %3433 = vmatprep.subr.mxu1 %v16515_v7  ;;  %v16519_v4 = vld [vmem:[#allocation260_spill] sm:$0xff]  ;;  %v2677_v7 = vand.u32 4294901760, %v2676_v43  ;;  %v2683_v50 = vand.u32 4294901760, %v2682_v16 }
 0x268   : > { %2662 = vmatprep.mubr.f32.mxu0 %v2661_v32  ;;  %3274 = vmatpush2.msra.mxu0 %v16517_v8  ;;  %v1634_v24 = vadd.f32 %v1633_v51, %v1407_v56  ;;  %v16522_v8 = vld [vmem:[#allocation193_spill] sm:$0xff] }
 0x269   : > { %3435 = vmatpush2.msra.mxu1 %v16518_v42  ;;  %2668 = vmatmul.mubr.f32.gmra.mxu0 %v2667_v20  ;;  %v1651_v10 = vpop.f32.mrf.mxu0  ;;  %v1802_v14 = vpop.f32.mrf.mxu1  ;;  %v16521_v20 = vld [vmem:[#allocation263_spill] sm:$0xff]  ;;  %v16524_v51 = vld [vmem:[#allocation197_spill] sm:$0xff] }
 0x26a   : > { %3083 = vmatprep.mubr.f32.mxu1 %v12309_v47  ;;  %3277 = vmatprep.subr.mxu0 %v16519_v4  ;;  %v1652_v57 = vadd.f32 %v1651_v10, %v12365_v58  ;;  %v12436_v62 = vadd.f32 %v1802_v14, %v1632_v60  ;;  %v16523_v4 = vld [vmem:[#allocation264_spill] sm:$0xff]  ;;  %v1415_v60 = vadd.f32 %v12341_v29, %v12291_v12  ;;  %v16526_v14 = vld [vmem:[#allocation202_spill] sm:$0xff]  ;;  %v16527_v56 = vld [vmem:[#allocation269_spill] sm:$0xff] }
 0x26b   : > { %3437 = vmatprep.subr.mxu1 %v16520_v0  ;;  %3085 = vmatmul.mubr.f32.gmra.mxu1 %v12313_v13  ;;  %v1653_v59 = vpop.f32.mrf.mxu0  ;;  %v1804_v32 = vpop.f32.mrf.mxu1  ;;  %v16525_v58 = vld [vmem:[#allocation268_spill] sm:$0xff]  ;;  %v16529_v29 = vld [vmem:[#allocation270_spill] sm:$0xff]  ;;  %v16549_v13 = vld [vmem:[#allocation247_spill] sm:$0xff] }
 0x26c   : > { %3280 = vmatpush2.msra.mxu0 %v16521_v20  ;;  %3439 = vmatpush2.msra.mxu1 %v16522_v8  ;;  %v12442_v47 = vadd.f32 %v1804_v32, %v1634_v24  ;;  %v1644_v24 = vadd.f32 %v1643_v33, %v1415_v60  ;;  %v16532_v20 = vld [vmem:[#allocation215_spill] sm:$0xff]  ;;  %v16534_v33 = vld [vmem:[#allocation265_spill] sm:$0xff] }
 0x26d   : > { %3283 = vmatprep.subr.mxu0 %v16523_v4  ;;  %3441 = vmatprep.subr.mxu1 %v16524_v51  ;;  %v16528_v4 = vld [vmem:[#allocation206_spill] sm:$0xff]  ;;  %v16535_v60 = vld [vmem:[#allocation219_spill] sm:$0xff] }
 0x26e   : > { %2678 = vmatprep.mubr.f32.mxu0 %v2677_v7  ;;  %3286 = vmatpush2.msra.mxu0 %v16525_v58  ;;  %v16530_v7 = vld [vmem:[#allocation211_spill] sm:$0xff]  ;;  %v16531_v58 = vld [vmem:[#allocation277_spill] sm:$0xff] }
 0x26f   : > { %3443 = vmatpush2.msra.mxu1 %v16526_v14  ;;  %2684 = vmatmul.mubr.f32.gmra.mxu0 %v2683_v50  ;;  %v1661_v16 = vpop.f32.mrf.mxu0  ;;  %v1814_v43 = vpop.f32.mrf.mxu1 }
 0x270   : > { %3091 = vmatprep.mubr.f32.mxu1 %v12335_v35  ;;  %3289 = vmatprep.subr.mxu0 %v16527_v56  ;;  %v1662_v10 = vadd.f32 %v1661_v16, %v1429_v9  ;;  %v12452_v32 = vadd.f32 %v1814_v43, %v1642_v17  ;;  %v1423_v9 = vadd.f32 %v12376_v18, %v12328_v23  ;;  %v16533_v17 = vld [vmem:[#allocation278_spill] sm:$0xff]  ;;  %v16536_v43 = vld [vmem:[#allocation281_spill] sm:$0xff] }
 0x271   : > { %3445 = vmatprep.subr.mxu1 %v16528_v4  ;;  %3093 = vmatmul.mubr.f32.gmra.mxu1 %v12339_v5  ;;  %v1816_v12 = vpop.f32.mrf.mxu1  ;;  %v16539_v23 = vld [vmem:[#allocation225_spill] sm:$0xff]  ;;  %v1663_v56 = vpop.f32.mrf.mxu0  ;;  %v16542_v35 = vld [vmem:[#allocation46_spill] sm:$0xff] }
 0x272   : > { %3292 = vmatpush2.msra.mxu0 %v16529_v29  ;;  %3447 = vmatpush2.msra.mxu1 %v16530_v7  ;;  %v12458_v50 = vadd.f32 %v1816_v12, %v1644_v24  ;;  %v16537_v24 = vld [vmem:[#allocation222_spill] sm:$0xff]  ;;  %v1654_v12 = vadd.f32 %v1653_v59, %v1423_v9 }
 0x273   : > { %3295 = vmatprep.subr.mxu0 %v16531_v58  ;;  %3449 = vmatprep.subr.mxu1 %v16532_v20  ;;  %v16538_v29 = vld [vmem:[#allocation42_spill] sm:$0xff] }
 0x274   : > { %3298 = vmatpush2.msra.mxu0 %v16533_v17  ;;  %3301 = vmatprep.mubr.f32.mxu0 %v16534_v33  ;;  %v16540_v17 = vld [vmem:[#allocation43_spill] sm:$0xff]  ;;  %v16543_v59 = vld [vmem:[#allocation234_spill] sm:$0xff] }
 0x275   : > { %3451 = vmatpush2.msra.mxu1 %v16535_v60  ;;  %3099 = vmatprep.mubr.f32.mxu1 %v12363_v36  ;;  %v1826_v16 = vpop.f32.mrf.mxu1  ;;  %v16541_v36 = vld [vmem:[#allocation229_spill] sm:$0xff] }
 0x276   : > { %3304 = vmatmul.mubr.f32.vlgmr.msra.gmra.mxu0 %v16536_v43  ;;  %3453 = vmatprep.subr.mxu1 %v16537_v24  ;;  %v12470_v58 = vadd.f32 %v1826_v16, %v1652_v57  ;;  %v1431_v57 = vadd.f32 %v12427_v63, %v12367_v21  ;;  %v16544_v16 = vld [vmem:[#allocation48_spill] sm:$0xff]  ;;  %v16548_v21 = vld [vmem:[#allocation57_spill] sm:$0xff] }
 0x277   : > { %3520 = vmatprep.subr.mxu0 %v16538_v29  ;;  %3101 = vmatmul.mubr.f32.gmra.mxu1 %v12374_v11  ;;  %v1828_v18 = vpop.f32.mrf.mxu1  ;;  %v16545_v29 = vld [vmem:[#allocation238_spill] sm:$0xff] }
 0x278   : > { %3455 = vmatpush2.msra.mxu1 %v16539_v23  ;;  %3524 = vmatpush1.msra.mxu0 %v16540_v17  ;;  %v12476_v5 = vadd.f32 %v1828_v18, %v1654_v12  ;;  %v1664_v17 = vadd.f32 %v1663_v56, %v1431_v57  ;;  %v16546_v12 = vld [vmem:[#allocation55_spill] sm:$0xff] }
 0x279   : > { %3457 = vmatprep.subr.mxu1 %v16541_v36  ;;  %3528 = vmatprep.subr.mxu0 %v16542_v35  ;;  %v16547_v35 = vld [vmem:[#allocation243_spill] sm:$0xff] }
 0x27a   : > { %3311 = vmatprep.mubr.f32.mxu0 %v12326_v41  ;;  %3459 = vmatpush2.msra.mxu1 %v16543_v59  ;;  %v1838_v9 = vpop.f32.mrf.mxu1  ;;  %v16550_v59 = vld [vmem:[#allocation63_spill] sm:$0xff] }
 0x27b   : > { %3532 = vmatpush1.msra.mxu0 %v16544_v16  ;;  %3461 = vmatprep.subr.mxu1 %v16545_v29  ;;  %v12486_v11 = vadd.f32 %v1838_v9, %v1662_v10  ;;  %v16551_v56 = vld [vmem:[#allocation251_spill] sm:$0xff]  ;;  %v16552_v10 = vand.u32 4294901760, %v16534_v33  ;;  %v16554_v9 = vand.u32 4294901760, %v16536_v43  ;;  %v16560_v16 = vld [vmem:[#allocation30_spill] sm:$0xff]  ;;  %v16561_v33 = vand.u32 4294901760, %v12326_v41 }
 0x27c   : > { %3314 = vmatmul.mubr.f32.gmra.mxu0 %v12333_v49  ;;  %3536 = vmatprep.subr.mxu0 %v16546_v12  ;;  %v1840_v18 = vpop.f32.mrf.mxu1  ;;  %v16553_v57 = vld [vmem:[#allocation67_spill] sm:$0xff]  ;;  %v16559_v12 = vld [vmem:[#allocation77_spill] sm:$0xff]  ;;  %v16570_v41 = vld [vmem:[#allocation34_spill] sm:$0xff] }
 0x27d   : > { %3463 = vmatpush2.msra.mxu1 %v16547_v35  ;;  %3540 = vmatpush1.msra.mxu0 %v16548_v21  ;;  %v12492_v63 = vadd.f32 %v1840_v18, %v1664_v17  ;;  %v16555_v17 = vld [vmem:[#allocation71_spill] sm:$0xff]  ;;  %v16556_v18 = vld [vmem:[#allocation28_spill] sm:$0xff]  ;;  %v16557_v21 = vld [vmem:[#allocation73_spill] sm:$0xff] }
 0x27e   : > { %3465 = vmatprep.subr.mxu1 %v16549_v13  ;;  %3544 = vmatprep.subr.mxu0 %v16550_v59  ;;  %v16558_v59 = vld [vmem:[#allocation29_spill] sm:$0xff]  ;;  %v16563_v43 = vld [vmem:[#allocation31_spill] sm:$0xff] }
 0x27f   : > { %3321 = vmatprep.mubr.f32.mxu0 %v12353_v53  ;;  %3467 = vmatpush2.msra.mxu1 %v16551_v56  ;;  %v16569_v56 = vld [vmem:[#allocation95_spill] sm:$0xff] }
 0x280   : > { %3471 = vmatprep.mubr.f32.mxu1 %v16552_v10  ;;  %3548 = vmatpush1.msra.mxu0 %v16553_v57  ;;  %v16562_v10 = vld [vmem:[#allocation80_spill] sm:$0xff]  ;;  %v16568_v57 = vld [vmem:[#allocation33_spill] sm:$0xff]  ;;  %v16573_v13 = vld [vmem:[#allocation35_spill] sm:$0xff] }
 0x281   : > { %3324 = vmatmul.mubr.f32.gmra.mxu0 %v12359_v2  ;;  %3475 = vmatmul.mubr.f32.vlgmr.msra.gmra.mxu1 %v16554_v9  ;;  %v16564_v9 = vand.u32 4294901760, %v12333_v49  ;;  %v16574_v49 = vld [vmem:[#allocation103_spill] sm:$0xff] }
 0x282   : > { %3552 = vmatprep.subr.mxu0 %v16555_v17  ;;  %3807 = vmatprep.subr.mxu1 %v16556_v18  ;;  %v16566_v17 = vld [vmem:[#allocation32_spill] sm:$0xff] }
 0x283   : > { %3556 = vmatpush1.msra.mxu0 %v16557_v21  ;;  %3809 = vmatpush1.msra.mxu1 %v16558_v59  ;;  %v16565_v21 = vld [vmem:[#allocation86_spill] sm:$0xff] }
 0x284   : > { %3560 = vmatprep.subr.mxu0 %v16559_v12  ;;  %3811 = vmatprep.subr.mxu1 %v16560_v16  ;;  %v16567_v12 = vld [vmem:[#allocation89_spill] sm:$0xff] }
 0x285   : > { %3331 = vmatprep.mubr.f32.mxu0 %v12390_v28  ;;  %3483 = vmatprep.mubr.f32.mxu1 %v16561_v33  ;;  %v16571_v33 = vand.u32 4294901760, %v12353_v53  ;;  %v16579_v53 = vand.u32 4294901760, %v12390_v28  ;;  %v16585_v28 = vld [vmem:[#allocation131_spill] sm:$0xff] }
 0x286   : > { %3564 = vmatpush1.msra.mxu0 %v16562_v10  ;;  %3813 = vmatpush1.msra.mxu1 %v16563_v43  ;;  %v16572_v10 = vld [vmem:[#allocation99_spill] sm:$0xff] }
 0x287   : > { %3334 = vmatmul.mubr.f32.gmra.mxu0 %v12395_v30  ;;  %3487 = vmatmul.mubr.f32.gmra.mxu1 %v16564_v9  ;;  %v16575_v9 = vand.u32 4294901760, %v12359_v2  ;;  %v16582_v2 = vand.u32 4294901760, %v12395_v30  ;;  %v16587_v30 = vld [vmem:[#allocation137_spill] sm:$0xff] }
 0x288   : > { %3568 = vmatprep.subr.mxu0 %v16565_v21  ;;  %3815 = vmatprep.subr.mxu1 %v16566_v17  ;;  %v16576_v21 = vld [vmem:[#allocation36_spill] sm:$0xff] }
 0x289   : > { %3572 = vmatpush1.msra.mxu0 %v16567_v12  ;;  %3817 = vmatpush1.msra.mxu1 %v16568_v57  ;;  %v16577_v12 = vld [vmem:[#allocation105_spill] sm:$0xff] }
 0x28a   : > { %3576 = vmatprep.subr.mxu0 %v16569_v56  ;;  %3819 = vmatprep.subr.mxu1 %v16570_v41  ;;  %v16578_v56 = vld [vmem:[#allocation109_spill] sm:$0xff] }
 0x28b   : > { %3495 = vmatprep.mubr.f32.mxu1 %v16571_v33  ;;  %3580 = vmatpush1.msra.mxu0 %v16572_v10  ;;  %v16580_v33 = vld [vmem:[#allocation112_spill] sm:$0xff]  ;;  %v16607_v10 = vld [vmem:[#allocation129_spill] sm:$0xff] }
 0x28c   : > { %3821 = vmatpush1.msra.mxu1 %v16573_v13  ;;  %3584 = vmatprep.subr.mxu0 %v16574_v49  ;;  %v16581_v49 = vld [vmem:[#allocation118_spill] sm:$0xff] }
 0x28d   : > { %3499 = vmatmul.mubr.f32.gmra.mxu1 %v16575_v9  ;;  %3823 = vmatprep.subr.mxu1 %v16576_v21  ;;  %v16583_v9 = vld [vmem:[#allocation121_spill] sm:$0xff] }
 0x28e   : > { %3588 = vmatpush1.msra.mxu0 %v16577_v12  ;;  %3825 = vmatpush1.msra.mxu1 %v16454_v52 }
 0x28f   : > { %3592 = vmatprep.subr.mxu0 %v16578_v56  ;;  %3827 = vmatprep.subr.mxu1 %v16457_v1  ;;  %v16584_v56 = vld [vmem:[#allocation127_spill] sm:$0xff] }
 0x290   : > { %3507 = vmatprep.mubr.f32.mxu1 %v16579_v53  ;;  %3596 = vmatpush1.msra.mxu0 %v16580_v33  ;;  %v16586_v53 = vld [vmem:[#allocation135_spill] sm:$0xff] }
 0x291   : > { %3829 = vmatpush1.msra.mxu1 %v16460_v61  ;;  %3600 = vmatprep.subr.mxu0 %v16581_v49  ;;  %v16602_v49 = vld [vmem:[#allocation195_spill] sm:$0xff] }
 0x292   : > { %3511 = vmatmul.mubr.f32.gmra.mxu1 %v16582_v2  ;;  %3831 = vmatprep.subr.mxu1 %v16133_v54  ;;  %v16588_v2 = vld [vmem:[#allocation141_spill] sm:$0xff]  ;;  %v16604_v33 = vld [vmem:[#allocation199_spill] sm:$0xff] }
 0x293   : > { %3604 = vmatpush1.msra.mxu0 %v16583_v9  ;;  %3833 = vmatpush1.msra.mxu1 %v16463_v3  ;;  %v16589_v9 = vld [vmem:[#allocation144_spill] sm:$0xff] }
 0x294   : > { %3608 = vmatprep.subr.mxu0 %v16584_v56  ;;  %3835 = vmatprep.subr.mxu1 %v16138_v48  ;;  %v16590_v56 = vld [vmem:[#allocation150_spill] sm:$0xff] }
 0x295   : > { %3612 = vmatpush1.msra.mxu0 %v16585_v28  ;;  %3837 = vmatpush1.msra.mxu1 %v16140_v31  ;;  %v16591_v28 = vld [vmem:[#allocation153_spill] sm:$0xff] }
 0x296   : > { %3616 = vmatprep.subr.mxu0 %v16586_v53  ;;  %3839 = vmatprep.subr.mxu1 %v16142_v45  ;;  %v16592_v53 = vld [vmem:[#allocation159_spill] sm:$0xff] }
 0x297   : > { %3620 = vmatpush1.msra.mxu0 %v16587_v30  ;;  %3841 = vmatpush1.msra.mxu1 %v16144_v6  ;;  %v16593_v30 = vld [vmem:[#allocation163_spill] sm:$0xff] }
 0x298   : > { %3624 = vmatprep.subr.mxu0 %v16588_v2  ;;  %3843 = vmatprep.subr.mxu1 %v16146_v22  ;;  %v16594_v2 = vld [vmem:[#allocation167_spill] sm:$0xff] }
 0x299   : > { %3628 = vmatpush1.msra.mxu0 %v16589_v9  ;;  %3845 = vmatpush1.msra.mxu1 %v16149_v38  ;;  %v16595_v9 = vld [vmem:[#allocation169_spill] sm:$0xff] }
 0x29a   : > { %3632 = vmatprep.subr.mxu0 %v16590_v56  ;;  %3847 = vmatprep.subr.mxu1 %v16151_v44  ;;  %v16596_v56 = vld [vmem:[#allocation173_spill] sm:$0xff] }
 0x29b   : > { %3636 = vmatpush1.msra.mxu0 %v16591_v28  ;;  %3849 = vmatpush1.msra.mxu1 %v16473_v37  ;;  %v16597_v28 = vld [vmem:[#allocation176_spill] sm:$0xff] }
 0x29c   : > { %3640 = vmatprep.subr.mxu0 %v16592_v53  ;;  %3851 = vmatprep.subr.mxu1 %v16476_v25  ;;  %v16598_v53 = vld [vmem:[#allocation182_spill] sm:$0xff] }
 0x29d   : > { %3644 = vmatpush1.msra.mxu0 %v16593_v30  ;;  %3853 = vmatpush1.msra.mxu1 %v16274_v15  ;;  %v16599_v30 = vld [vmem:[#allocation185_spill] sm:$0xff] }
 0x29e   : > { %3648 = vmatprep.subr.mxu0 %v16594_v2  ;;  %3855 = vmatprep.subr.mxu1 %v16480_v34  ;;  %v16600_v2 = vld [vmem:[#allocation191_spill] sm:$0xff] }
 0x29f   : > { %3652 = vmatpush2.msra.mxu0 %v16595_v9  ;;  %3857 = vmatpush1.msra.mxu1 %v16483_v55  ;;  %v16601_v9 = vld [vmem:[#allocation119_spill] sm:$0xff] }
 0x2a0   : > { %3656 = vmatprep.subr.mxu0 %v16596_v56  ;;  %3859 = vmatprep.subr.mxu1 %v16280_v46  ;;  %v16603_v56 = vld [vmem:[#allocation123_spill] sm:$0xff] }
 0x2a1   : > { %3660 = vmatpush2.msra.mxu0 %v16597_v28  ;;  %3861 = vmatpush1.msra.mxu1 %v16282_v40  ;;  %v16605_v28 = vld [vmem:[#allocation126_spill] sm:$0xff] }
 0x2a2   : > { %3664 = vmatprep.subr.mxu0 %v16598_v53  ;;  %3863 = vmatprep.subr.mxu1 %v16284_v26  ;;  %v16606_v53 = vld [vmem:[#allocation201_spill] sm:$0xff]  ;;  %v16610_v26 = vld [vmem:[#allocation208_spill] sm:$0xff] }
 0x2a3   : > { %3668 = vmatpush2.msra.mxu0 %v16599_v30  ;;  %3865 = vmatpush1.msra.mxu1 %v16286_v19  ;;  %v16608_v19 = vld [vmem:[#allocation205_spill] sm:$0xff] }
 0x2a4   : > { %3672 = vmatprep.subr.mxu0 %v16600_v2  ;;  %3867 = vmatprep.subr.mxu1 %v16601_v9  ;;  %v16609_v2 = vld [vmem:[#allocation133_spill] sm:$0xff] }
 0x2a5   : > { %3676 = vmatpush2.msra.mxu0 %v16602_v49  ;;  %3869 = vmatpush1.msra.mxu1 %v16603_v56  ;;  %v16611_v49 = vld [vmem:[#allocation138_spill] sm:$0xff] }
 0x2a6   : > { %3680 = vmatprep.subr.mxu0 %v16604_v33  ;;  %3871 = vmatprep.subr.mxu1 %v16605_v28  ;;  %v2103_v12 = vpop.f32.mrf.mxu0  ;;  %v16612_v56 = vld [vmem:[#allocation214_spill] sm:$0xff] }
 0x2a7   : > { %3684 = vmatpush2.msra.mxu0 %v16606_v53  ;;  %3873 = vmatpush2.msra.mxu1 %v16607_v10  ;;  %v2104_v30 = vadd.f32 %v2103_v12, %v12436_v62  ;;  %v16613_v28 = vld [vmem:[#allocation142_spill] sm:$0xff]  ;;  %v16614_v53 = vld [vmem:[#allocation217_spill] sm:$0xff]  ;;  %v16615_v10 = vld [vmem:[#allocation147_spill] sm:$0xff] }
 0x2a8   : > { %3688 = vmatprep.subr.mxu0 %v16608_v19  ;;  %3875 = vmatprep.subr.mxu1 %v16609_v2  ;;  %v2105_v9 = vpop.f32.mrf.mxu0  ;;  %v16616_v62 = vld [vmem:[#allocation223_spill] sm:$0xff] }
 0x2a9   : > { %3692 = vmatpush2.msra.mxu0 %v16610_v26  ;;  %3877 = vmatpush2.msra.mxu1 %v16611_v49  ;;  %v2106_v33 = vadd.f32 %v2105_v9, %v12442_v47  ;;  %v16617_v12 = vld [vmem:[#allocation151_spill] sm:$0xff] }
 0x2aa   : > { %3696 = vmatprep.subr.mxu0 %v16612_v56  ;;  %3879 = vmatprep.subr.mxu1 %v16613_v28  ;;  %v16618_v2 = vld [vmem:[#allocation227_spill] sm:$0xff]  ;;  %v16620_v56 = vld [vmem:[#allocation233_spill] sm:$0xff] }
 0x2ab   : > { %3700 = vmatpush2.msra.mxu0 %v16614_v53  ;;  %3881 = vmatpush2.msra.mxu1 %v16615_v10  ;;  %v16619_v47 = vld [vmem:[#allocation231_spill] sm:$0xff]  ;;  %v16621_v53 = vld [vmem:[#allocation161_spill] sm:$0xff] }
 0x2ac   : > { %3704 = vmatprep.subr.mxu0 %v16616_v62  ;;  %3883 = vmatprep.subr.mxu1 %v16617_v12  ;;  %v2111_v19 = vpop.f32.mrf.mxu0  ;;  %v16622_v10 = vld [vmem:[#allocation237_spill] sm:$0xff] }
 0x2ad   : > { %3708 = vmatpush2.msra.mxu0 %v16618_v2  ;;  %3885 = vmatpush2.msra.mxu1 %v16306_v27  ;;  %v2112_v26 = vadd.f32 %v2111_v19, %v12452_v32  ;;  %v16623_v12 = vld [vmem:[#allocation165_spill] sm:$0xff]  ;;  %v16624_v2 = vld [vmem:[#allocation240_spill] sm:$0xff]  ;;  %v16625_v27 = vld [vmem:[#allocation170_spill] sm:$0xff] }
 0x2ae   : > { %3712 = vmatprep.subr.mxu0 %v16619_v47  ;;  %3887 = vmatprep.subr.mxu1 %v16308_v39  ;;  %v2113_v9 = vpop.f32.mrf.mxu0  ;;  %v16626_v47 = vld [vmem:[#allocation246_spill] sm:$0xff] }
 0x2af   : > { %3716 = vmatpush2.msra.mxu0 %v16620_v56  ;;  %3889 = vmatpush2.msra.mxu1 %v16621_v53  ;;  %v2114_v62 = vadd.f32 %v2113_v9, %v12458_v50  ;;  %v16627_v39 = vld [vmem:[#allocation174_spill] sm:$0xff]  ;;  %v16629_v53 = vld [vmem:[#allocation249_spill] sm:$0xff]  ;;  %v16630_v50 = vld [vmem:[#allocation179_spill] sm:$0xff] }
 0x2b0   : > { %3720 = vmatprep.subr.mxu0 %v16622_v10  ;;  %3891 = vmatprep.subr.mxu1 %v16623_v12  ;;  %v16631_v12 = vld [vmem:[#allocation254_spill] sm:$0xff] }
 0x2b1   : > { %3724 = vmatpush2.msra.mxu0 %v16624_v2  ;;  %3893 = vmatpush2.msra.mxu1 %v16625_v27  ;;  %v2119_v19 = vpop.f32.mrf.mxu0  ;;  %v2264_v32 = vpop.f32.mrf.mxu1  ;;  %v16632_v2 = vld [vmem:[#allocation183_spill] sm:$0xff] }
 0x2b2   : > { %3728 = vmatprep.subr.mxu0 %v16626_v47  ;;  %3895 = vmatprep.subr.mxu1 %v16627_v39  ;;  %v2120_v56 = vadd.f32 %v2119_v19, %v12470_v58  ;;  %v12613_v28 = vadd.f32 %v2264_v32, %v2104_v30  ;;  %v16634_v47 = vld [vmem:[#allocation256_spill] sm:$0xff]  ;;  %v16635_v58 = vld [vmem:[#allocation261_spill] sm:$0xff]  ;;  %v16636_v30 = vld [vmem:[#allocation266_spill] sm:$0xff] }
 0x2b3   : > { %3732 = vmatpush2.msra.mxu0 %v16629_v53  ;;  %3897 = vmatpush2.msra.mxu1 %v16630_v50  ;;  %v2121_v9 = vpop.f32.mrf.mxu0  ;;  %v2266_v10 = vpop.f32.mrf.mxu1  ;;  %v9675_v53 = vld [vmem:[#allocation2 + $0x20] sm:$0xff] }
 0x2b4   : > { %16628 = vst [vmem:[#allocation265_spill] sm:$0xff] %v12613_v28  ;;  %3736 = vmatprep.subr.mxu0 %v16631_v12  ;;  %3899 = vmatprep.subr.mxu1 %v16632_v2  ;;  %v2122_v27 = vadd.f32 %v2121_v9, %v12476_v5  ;;  %v12620_v49 = vadd.f32 %v2266_v10, %v2106_v33  ;;  %v16637_v12 = vld [vmem:[#allocation267_spill] sm:$0xff] }
 0x2b5   : > { %3740 = vmatpush2.msra.mxu0 %v16634_v47  ;;  %3901 = vmatpush2.msra.mxu1 %v16518_v42  ;;  %v16639_v33 = vld [vmem:[#allocation271_spill] sm:$0xff]  ;;  %v4145_v28 = vmul.f32 %v9675_v53, %v9675_v53  ;;  %v16660_v53 = vld [vmem:[#allocation56_spill] sm:$0xff] }
 0x2b6   : > { %16633 = vst [vmem:[#allocation281_spill] sm:$0xff] %v12620_v49  ;;  %3744 = vmatprep.subr.mxu0 %v16635_v58  ;;  %3903 = vmatprep.subr.mxu1 %v16520_v0  ;;  %v16640_v58 = vld [vmem:[#allocation272_spill] sm:$0xff] }
 0x2b7   : > { %3748 = vmatpush2.msra.mxu0 %v16636_v30  ;;  %3905 = vmatpush2.msra.mxu1 %v16522_v8  ;;  %v2127_v19 = vpop.f32.mrf.mxu0  ;;  %v2272_v32 = vpop.f32.mrf.mxu1 }
 0x2b8   : > { %3752 = vmatprep.subr.mxu0 %v16637_v12  ;;  %3907 = vmatprep.subr.mxu1 %v16524_v51  ;;  %v2128_v5 = vadd.f32 %v2127_v19, %v12486_v11  ;;  %v12631_v10 = vadd.f32 %v2272_v32, %v2112_v26  ;;  %v16642_v12 = vld [vmem:[#allocation273_spill] sm:$0xff]  ;;  %v16643_v26 = vld [vmem:[#allocation282_spill] sm:$0xff]  ;;  %v16644_v11 = vld [vmem:[#allocation283_spill] sm:$0xff] }
 0x2b9   : > { %3756 = vmatpush2.msra.mxu0 %v16639_v33  ;;  %3909 = vmatpush2.msra.mxu1 %v16526_v14  ;;  %v2129_v9 = vpop.f32.mrf.mxu0  ;;  %v2274_v49 = vpop.f32.mrf.mxu1  ;;  %v16645_v19 = vld [vmem:[#allocation91_spill] sm:$0xff] }
 0x2ba   : > { %16638 = vst [vmem:[#allocation292_spill] sm:$0xff] %v12631_v10  ;;  %3760 = vmatprep.subr.mxu0 %v16640_v58  ;;  %3911 = vmatprep.subr.mxu1 %v16528_v4  ;;  %v2130_v30 = vadd.f32 %v2129_v9, %v12492_v63  ;;  %v12638_v47 = vadd.f32 %v2274_v49, %v2114_v62  ;;  %v16646_v10 = vld [vmem:[#allocation101_spill] sm:$0xff]  ;;  %v16649_v9 = vld [vmem:[#allocation286_spill] sm:$0xff] }
 0x2bb   : > { %3764 = vmatpush2.msra.mxu0 %v16642_v12  ;;  %3913 = vmatpush2.msra.mxu1 %v16530_v7  ;;  %v16656_v12 = vld [vmem:[#allocation251_spill] sm:$0xff]  ;;  %v16657_v58 = vld [vmem:[#allocation289_spill] sm:$0xff] }
 0x2bc   : > { %16641 = vst [vmem:[#allocation293_spill] sm:$0xff] %v12638_v47  ;;  %3768 = vmatprep.subr.mxu0 %v16643_v26  ;;  %3915 = vmatprep.subr.mxu1 %v16532_v20  ;;  %v16655_v26 = vld [vmem:[#allocation288_spill] sm:$0xff] }
 0x2bd   : > { %3772 = vmatpush2.msra.mxu0 %v16644_v11  ;;  %3774 = vmatprep.mubr.f32.mxu0 %v16645_v19  ;;  %v2280_v32 = vpop.f32.mrf.mxu1  ;;  %v16650_v11 = vld [vmem:[#allocation234_spill] sm:$0xff] }
 0x2be   : > { %3917 = vmatpush2.msra.mxu1 %v16535_v60  ;;  %3776 = vmatmul.mubr.f32.vlgmr.msra.gmra.mxu0 %v16646_v10  ;;  %v12648_v63 = vadd.f32 %v2280_v32, %v2120_v56 }
 0x2bf   : > { %3919 = vmatprep.subr.mxu1 %v16537_v24  ;;  %4360 = vmatprep.subr.mxu0 %v16556_v18  ;;  %v2282_v49 = vpop.f32.mrf.mxu1 }
 0x2c0   : > { %16647 = vst [vmem:[#allocation91_spill] sm:$0xff] %v12648_v63  ;;  %3921 = vmatpush2.msra.mxu1 %v16539_v23  ;;  %4362 = vmatpush1.msra.mxu0 %v16558_v59  ;;  %v12654_v62 = vadd.f32 %v2282_v49, %v2122_v27  ;;  %v16652_v63 = vld [vmem:[#allocation287_spill] sm:$0xff] }
 0x2c1   : > { %3923 = vmatprep.subr.mxu1 %v16541_v36  ;;  %4364 = vmatprep.subr.mxu0 %v16560_v16  ;;  %v16667_v16 = vld [vmem:[#allocation76_spill] sm:$0xff] }
 0x2c2   : > { %16648 = vst [vmem:[#allocation101_spill] sm:$0xff] %v12654_v62  ;;  %3782 = vmatprep.mubr.f32.mxu0 %v16649_v9  ;;  %3925 = vmatpush2.msra.mxu1 %v16650_v11  ;;  %v2288_v56 = vpop.f32.mrf.mxu1  ;;  %v16654_v62 = vld [vmem:[#allocation247_spill] sm:$0xff] }
 0x2c3   : > { %4366 = vmatpush1.msra.mxu0 %v16563_v43  ;;  %3927 = vmatprep.subr.mxu1 %v16545_v29  ;;  %v12662_v32 = vadd.f32 %v2288_v56, %v2128_v5  ;;  %v9671_v5 = vld [vmem:[#allocation2] sm:$0xff] }
 0x2c4   : > { %3784 = vmatmul.mubr.f32.gmra.mxu0 %v16652_v63  ;;  %4368 = vmatprep.subr.mxu0 %v16566_v17  ;;  %v2290_v27 = vpop.f32.mrf.mxu1  ;;  %v4146_v56 = vmul.f32 %v9671_v5, %v9671_v5  ;;  %v9676_v5 = vld [vmem:[#allocation2 + $0x38] sm:$0xff] }
 0x2c5   : > { %16651 = vst [vmem:[#allocation286_spill] sm:$0xff] %v12662_v32  ;;  %3929 = vmatpush2.msra.mxu1 %v16547_v35  ;;  %4370 = vmatpush1.msra.mxu0 %v16568_v57  ;;  %v12668_v49 = vadd.f32 %v2290_v27, %v2130_v30  ;;  %v9672_v32 = vld [vmem:[#allocation2 + $0x18] sm:$0xff]  ;;  %v9673_v30 = vld [vmem:[#allocation2 + $0x10] sm:$0xff] }
 0x2c6   : > { %3931 = vmatprep.subr.mxu1 %v16654_v62  ;;  %4372 = vmatprep.subr.mxu0 %v16570_v41  ;;  %v12676_v47 = vmul.f32 %v9672_v32, %v9672_v32  ;;  %v12680_v27 = vmul.f32 %v9673_v30, %v9673_v30  ;;  %v9677_v32 = vld [vmem:[#allocation2 + $0x8] sm:$0xff]  ;;  %v9678_v57 = vld [vmem:[#allocation2 + $0x30] sm:$0xff]  ;;  %v16663_v17 = vld [vmem:[#allocation291_spill] sm:$0xff] }
 0x2c7   : > { %16653 = vst [vmem:[#allocation287_spill] sm:$0xff] %v12668_v49  ;;  %3790 = vmatprep.mubr.f32.mxu0 %v16655_v26  ;;  %3933 = vmatpush2.msra.mxu1 %v16656_v12  ;;  %v9674_v49 = vld [vmem:[#allocation2 + $0x28] sm:$0xff]  ;;  %v12688_v41 = vmul.f32 %v9677_v32, %v9677_v32  ;;  %v16659_v30 = vld [vmem:[#allocation54_spill] sm:$0xff] }
 0x2c8   : > { %3935 = vmatprep.mubr.f32.mxu1 %v16645_v19  ;;  %4374 = vmatpush1.msra.mxu0 %v16573_v13  ;;  %v12682_v33 = vmul.f32 %v9674_v49, %v9674_v49  ;;  %v16658_v19 = vld [vmem:[#allocation53_spill] sm:$0xff]  ;;  %v12686_v13 = vmul.f32 %v9676_v5, %v9676_v5  ;;  %v16661_v49 = vld [vmem:[#allocation290_spill] sm:$0xff]  ;;  %v4168_v5 = vrot.slane %v4146_v56, 1  ;;  %v4173_v32 = vrot.slane %v12680_v27, 1 }
 0x2c9   : > { %3792 = vmatmul.mubr.f32.gmra.mxu0 %v16657_v58  ;;  %3937 = vmatmul.mubr.f32.vlgmr.msra.gmra.mxu1 %v16646_v10  ;;  %v12690_v10 = vmul.f32 %v9678_v57, %v9678_v57  ;;  %v16665_v57 = vld [vmem:[#allocation70_spill] sm:$0xff] }
 0x2ca   : > { %4376 = vmatprep.subr.mxu0 %v16576_v21  ;;  %4557 = vmatprep.subr.mxu1 %v16658_v19  ;;  %v4169_v19 = vrot.slane %v12676_v47, 1  ;;  %v16666_v43 = vrot.slane %v12682_v33, 1 }
 0x2cb   : > { %4378 = vmatpush1.msra.mxu0 %v16454_v52  ;;  %4563 = vmatpush1.msra.mxu1 %v16659_v30  ;;  %v16662_v52 = vld [vmem:[#allocation60_spill] sm:$0xff]  ;;  %v4165_v30 = vrot.slane %v4145_v28, 1 }
 0x2cc   : > { %4380 = vmatprep.subr.mxu0 %v16457_v1  ;;  %4569 = vmatprep.subr.mxu1 %v16660_v53  ;;  %v4166_v1 = vrot.slane %v12686_v13, 1  ;;  %v4171_v53 = vrot.slane %v12688_v41, 1  ;;  %v4178_v21 = vsel %vm625_vm0, %v4173_v32, %v16666_v43 }
 0x2cd   : > { %3798 = vmatprep.mubr.f32.mxu0 %v16661_v49  ;;  %3943 = vmatprep.mubr.f32.mxu1 %v16649_v9  ;;  %v16664_v9 = vld [vmem:[#allocation66_spill] sm:$0xff] }
 0x2ce   : > { %4382 = vmatpush1.msra.mxu0 %v16460_v61  ;;  %4575 = vmatpush1.msra.mxu1 %v16662_v52  ;;  %v4170_v52 = vsel %vm625_vm0, %v4168_v5, %v4169_v19  ;;  %v4174_v61 = vsel %vm625_vm0, %v4169_v19, %v4173_v32  ;;  %v16669_v19 = vld [vmem:[#allocation79_spill] sm:$0xff]  ;;  %v12730_v32 = vadd.f32 %v4178_v21, %v12680_v27 }
 0x2cf   : > { %3800 = vmatmul.mubr.f32.gmra.mxu0 %v16663_v17  ;;  %3945 = vmatmul.mubr.f32.gmra.mxu1 %v16652_v63  ;;  %v4167_v63 = vsel %vm625_vm0, %v4165_v30, %v4166_v1  ;;  %v4194_v43 = vadd.f32 %v4170_v52, %v4146_v56  ;;  %v4196_v5 = vadd.f32 %v4174_v61, %v12676_v47  ;;  %v16672_v52 = vld [vmem:[#allocation88_spill] sm:$0xff] }
 0x2d0   : > { %4384 = vmatprep.subr.mxu0 %v16133_v54  ;;  %4581 = vmatprep.subr.mxu1 %v16664_v9  ;;  %v4172_v9 = vsel %vm625_vm0, %v4166_v1, %v4171_v53  ;;  %v16670_v1 = vld [vmem:[#allocation82_spill] sm:$0xff]  ;;  %v4193_v30 = vadd.f32 %v4167_v63, %v4145_v28  ;;  %v16676_v28 = vld [vmem:[#allocation108_spill] sm:$0xff] }
 0x2d1   : > { %4386 = vmatpush1.msra.mxu0 %v16463_v3  ;;  %4587 = vmatpush1.msra.mxu1 %v16665_v57  ;;  %v16668_v3 = vrot.slane %v12690_v10, 1  ;;  %v4216_v61 = vrot.slane %v4194_v43, 2  ;;  %v4217_v21 = vrot.slane %v4196_v5, 2  ;;  %v16674_v63 = vld [vmem:[#allocation98_spill] sm:$0xff] }
 0x2d2   : > { %4388 = vmatprep.subr.mxu0 %v16138_v48  ;;  %4593 = vmatprep.subr.mxu1 %v16667_v16  ;;  %v4213_v56 = vrot.slane %v4193_v30, 2 }
 0x2d3   : > { %v4176_v57 = vsel %vm625_vm0, %v4171_v53, %v16668_v3  ;;  %3951 = vmatprep.mubr.f32.mxu1 %v16655_v26  ;;  %4390 = vmatpush1.msra.mxu0 %v16140_v31  ;;  %v4195_v3 = vadd.f32 %v4172_v9, %v12686_v13  ;;  %v16671_v53 = vld [vmem:[#allocation85_spill] sm:$0xff] }
 0x2d4   : > { %4599 = vmatpush1.msra.mxu1 %v16669_v19  ;;  %4392 = vmatprep.subr.mxu0 %v16142_v45  ;;  %v12736_v26 = vadd.f32 %v4176_v57, %v12688_v41  ;;  %v4251_v19 = vrot.slane %v4193_v30, 4 }
 0x2d5   : > { %3953 = vmatmul.mubr.f32.gmra.mxu1 %v16657_v58  ;;  %4605 = vmatprep.subr.mxu1 %v16670_v1  ;;  %v16673_v58 = vld [vmem:[#allocation92_spill] sm:$0xff]  ;;  %v4214_v57 = vrot.slane %v4195_v3, 2  ;;  %v16677_v1 = vrot.slane %v12730_v32, 2 }
 0x2d6   : > { %4394 = vmatpush1.msra.mxu0 %v16144_v6  ;;  %4611 = vmatpush1.msra.mxu1 %v16671_v53  ;;  %v4255_v53 = vrot.slane %v4196_v5, 4  ;;  %v16679_v16 = vrot.slane %v12736_v26, 2 }
 0x2d7   : > { %4396 = vmatprep.subr.mxu0 %v16146_v22  ;;  %4617 = vmatprep.subr.mxu1 %v16672_v52  ;;  %v4254_v52 = vrot.slane %v4194_v43, 4  ;;  %v4222_v9 = vsel %vm674_vm1, %v4217_v21, %v16677_v1  ;;  %v16681_v1 = vld [vmem:[#allocation117_spill] sm:$0xff] }
 0x2d8   : > { %3959 = vmatprep.mubr.f32.mxu1 %v16661_v49  ;;  %4398 = vmatpush1.msra.mxu0 %v16149_v38  ;;  %v16675_v49 = vld [vmem:[#allocation102_spill] sm:$0xff] }
 0x2d9   : > { %4623 = vmatpush1.msra.mxu1 %v16673_v58  ;;  %4400 = vmatprep.subr.mxu0 %v16151_v44  ;;  %v4218_v58 = vsel %vm674_vm1, %v4216_v61, %v4217_v21 }
 0x2da   : > { %3961 = vmatmul.mubr.f32.gmra.mxu1 %v16663_v17  ;;  %4629 = vmatprep.subr.mxu1 %v16674_v63  ;;  %v16678_v63 = vld [vmem:[#allocation111_spill] sm:$0xff]  ;;  %v4242_v21 = vadd.f32 %v4218_v58, %v4194_v43  ;;  %v4244_v17 = vadd.f32 %v4222_v9, %v4196_v5  ;;  %v16684_v43 = vld [vmem:[#allocation124_spill] sm:$0xff]  ;;  %v4289_v58 = vrot.slane %v12686_v13, 6 }
 0x2db   : > { %4402 = vmatpush1.msra.mxu0 %v16473_v37  ;;  %4635 = vmatpush1.msra.mxu1 %v16675_v49  ;;  %v4215_v49 = vsel %vm674_vm1, %v4213_v56, %v4214_v57  ;;  %v16680_v37 = vld [vmem:[#allocation114_spill] sm:$0xff]  ;;  %v4290_v56 = vrot.slane %v12676_v47, 6  ;;  %v16685_v47 = vrot.slane %v12736_v26, 4  ;;  %v16692_v9 = vld [vmem:[#allocation123_spill] sm:$0xff] }
 0x2dc   : > { %4404 = vmatprep.subr.mxu0 %v16476_v25  ;;  %4641 = vmatprep.subr.mxu1 %v16676_v28  ;;  %v4220_v25 = vsel %vm674_vm1, %v4214_v57, %v16679_v16  ;;  %v4252_v28 = vrot.slane %v4195_v3, 4  ;;  %v16682_v16 = vld [vmem:[#allocation120_spill] sm:$0xff]  ;;  %v16683_v57 = vrot.slane %v12730_v32, 4 }
 0x2dd   : > { %4406 = vmatpush1.msra.mxu0 %v16274_v15  ;;  %4647 = vmatpush1.msra.mxu1 %v16678_v63  ;;  %v4256_v63 = vsel %vm713_vm2, %v4254_v52, %v4255_v53 }
 0x2de   : > { %4408 = vmatprep.subr.mxu0 %v16480_v34  ;;  %4653 = vmatprep.subr.mxu1 %v16680_v37  ;;  %v4260_v61 = vsel %vm713_vm2, %v4255_v53, %v16683_v57  ;;  %v15625_v37 = vrot.slane %v12680_v27, 6  ;;  %v4241_v34 = vadd.f32 %v4215_v49, %v4193_v30  ;;  %v4253_v5 = vsel %vm713_vm2, %v4251_v19, %v4252_v28  ;;  %v16687_v53 = vld [vmem:[#allocation130_spill] sm:$0xff]  ;;  %v16688_v30 = vld [vmem:[#allocation115_spill] sm:$0xff]  ;;  %v16691_v19 = vld [vmem:[#allocation140_spill] sm:$0xff] }
 0x2df   : > { %4410 = vmatpush1.msra.mxu0 %v16483_v55  ;;  %4659 = vmatpush1.msra.mxu1 %v16681_v1  ;;  %v4243_v55 = vadd.f32 %v4220_v25, %v4195_v3  ;;  %v4258_v52 = vsel %vm713_vm2, %v4252_v28, %v16685_v47  ;;  %v16689_v25 = vld [vmem:[#allocation134_spill] sm:$0xff]  ;;  %v4280_v3 = vadd.f32 %v4256_v63, %v4242_v21  ;;  %v16690_v57 = vld [vmem:[#allocation119_spill] sm:$0xff]  ;;  %v16698_v21 = vld [vmem:[#allocation149_spill] sm:$0xff] }
 0x2e0   : > { %4412 = vmatprep.subr.mxu0 %v16280_v46  ;;  %4665 = vmatprep.subr.mxu1 %v16682_v16  ;;  %v16686_v16 = vld [vmem:[#allocation110_spill] sm:$0xff]  ;;  %v4282_v49 = vadd.f32 %v4260_v61, %v4244_v17  ;;  %v4294_v13 = vsel %vm752_vm3, %v4290_v56, %v15625_v37  ;;  %v4279_v28 = vadd.f32 %v4253_v5, %v4241_v34  ;;  %v16697_v61 = vld [vmem:[#allocation129_spill] sm:$0xff] }
 0x2e1   : > { %4414 = vmatpush1.msra.mxu0 %v16282_v40  ;;  %4671 = vmatpush1.msra.mxu1 %v16684_v43  ;;  %v4281_v47 = vadd.f32 %v4258_v52, %v4243_v55  ;;  %v16693_v43 = vld [vmem:[#allocation143_spill] sm:$0xff]  ;;  %v16695_v63 = vld [vmem:[#allocation126_spill] sm:$0xff]  ;;  %v16699_v34 = vld [vmem:[#allocation133_spill] sm:$0xff] }
 0x2e2   : > { %4416 = vmatprep.subr.mxu0 %v16686_v16  ;;  %4677 = vmatprep.subr.mxu1 %v16687_v53  ;;  %v16694_v53 = vrot.slane %v12688_v41, 6  ;;  %v16696_v17 = vld [vmem:[#allocation146_spill] sm:$0xff]  ;;  %v12804_v37 = vadd.f32 %v4294_v13, %v4282_v49  ;;  %v16700_v55 = vld [vmem:[#allocation152_spill] sm:$0xff]  ;;  %v4313_v5 = vadd.f32 %v4289_v58, %v4279_v28  ;;  %v16707_v13 = vld [vmem:[#allocation151_spill] sm:$0xff] }
 0x2e3   : > { %4418 = vmatpush1.msra.mxu0 %v16688_v30  ;;  %4683 = vmatpush1.msra.mxu1 %v16689_v25  ;;  %v16703_v1 = vld [vmem:[#allocation142_spill] sm:$0xff] }
 0x2e4   : > { %4420 = vmatprep.subr.mxu0 %v16690_v57  ;;  %4689 = vmatprep.subr.mxu1 %v16691_v19  ;;  %v4292_v25 = vsel %vm752_vm3, %v4289_v58, %v16694_v53  ;;  %v4314_v19 = vadd.f32 %v4290_v56, %v4280_v3  ;;  %v16702_v53 = vld [vmem:[#allocation156_spill] sm:$0xff]  ;;  %v16706_v56 = vld [vmem:[#allocation166_spill] sm:$0xff]  ;;  %v15626_v49 = vrot.slane %v12804_v37, 2 }
 0x2e5   : > { %4422 = vmatpush1.msra.mxu0 %v16692_v9  ;;  %4695 = vmatpush1.msra.mxu1 %v16693_v43  ;;  %v12808_v52 = vadd.f32 %v4292_v25, %v4281_v47  ;;  %v16701_v43 = vld [vmem:[#allocation138_spill] sm:$0xff]  ;;  %v16708_v58 = vld [vmem:[#allocation172_spill] sm:$0xff]  ;;  %v4333_v25 = vrot.slane %v4313_v5, 2  ;;  %v16709_v47 = vld [vmem:[#allocation155_spill] sm:$0xff] }
 0x2e6   : > { %4424 = vmatprep.subr.mxu0 %v16695_v63  ;;  %4701 = vmatprep.subr.mxu1 %v16696_v17  ;;  %v16704_v17 = vld [vmem:[#allocation162_spill] sm:$0xff]  ;;  %v4336_v3 = vrot.slane %v4314_v19, 2  ;;  %v16714_v19 = vld [vmem:[#allocation181_spill] sm:$0xff]  ;;  %v16716_v5 = vld [vmem:[#allocation184_spill] sm:$0xff] }
 0x2e7   : > { %4426 = vmatpush2.msra.mxu0 %v16697_v61  ;;  %4707 = vmatpush1.msra.mxu1 %v16698_v21  ;;  %v16705_v61 = vld [vmem:[#allocation147_spill] sm:$0xff]  ;;  %v15627_v28 = vrot.slane %v12808_v52, 2  ;;  %v16713_v21 = vld [vmem:[#allocation161_spill] sm:$0xff] }
 0x2e8   : > { %4428 = vmatprep.subr.mxu0 %v16699_v34  ;;  %4713 = vmatprep.subr.mxu1 %v16700_v55  ;;  %v16711_v55 = vld [vmem:[#allocation158_spill] sm:$0xff] }
 0x2e9   : > { %4430 = vmatpush2.msra.mxu0 %v16701_v43  ;;  %4719 = vmatpush1.msra.mxu1 %v16702_v53  ;;  %v16710_v53 = vld [vmem:[#allocation175_spill] sm:$0xff] }
 0x2ea   : > { %4432 = vmatprep.subr.mxu0 %v16703_v1  ;;  %4725 = vmatprep.subr.mxu1 %v16704_v17  ;;  %v16712_v17 = vld [vmem:[#allocation178_spill] sm:$0xff] }
 0x2eb   : > { %4434 = vmatpush2.msra.mxu0 %v16705_v61  ;;  %4731 = vmatpush1.msra.mxu1 %v16706_v56  ;;  %v4338_v56 = vsel %vm674_vm1, %v4336_v3, %v15626_v49  ;;  %v16721_v3 = vld [vmem:[#allocation198_spill] sm:$0xff] }
 0x2ec   : > { %4436 = vmatprep.subr.mxu0 %v16707_v13  ;;  %4737 = vmatprep.subr.mxu1 %v16708_v58  ;;  %v16715_v58 = vld [vmem:[#allocation165_spill] sm:$0xff] }
 0x2ed   : > { %4438 = vmatpush2.msra.mxu0 %v16709_v47  ;;  %4743 = vmatpush1.msra.mxu1 %v16710_v53  ;;  %v4335_v53 = vsel %vm674_vm1, %v4333_v25, %v15627_v28  ;;  %v16717_v47 = vld [vmem:[#allocation170_spill] sm:$0xff]  ;;  %v16724_v25 = vld [vmem:[#allocation207_spill] sm:$0xff] }
 0x2ee   : > { %4440 = vmatprep.subr.mxu0 %v16711_v55  ;;  %4749 = vmatprep.subr.mxu1 %v16712_v17  ;;  %v16718_v55 = vld [vmem:[#allocation188_spill] sm:$0xff]  ;;  %v16719_v17 = vld [vmem:[#allocation194_spill] sm:$0xff]  ;;  %v12842_v49 = vand.u32 4294901760, %v4335_v53 }
 0x2ef   : > { %4442 = vmatpush2.msra.mxu0 %v16713_v21  ;;  %4755 = vmatpush2.msra.mxu1 %v16714_v19  ;;  %v12838_v19 = vand.u32 4294901760, %v4338_v56  ;;  %v2637_v28 = vpop.f32.mrf.mxu0 }
 0x2f0   : > { %4444 = vmatprep.subr.mxu0 %v16715_v58  ;;  %4761 = vmatprep.subr.mxu1 %v16716_v5  ;;  %16722 = vst [vmem:[#allocation289_spill] sm:$0xff] %v12842_v49  ;;  %v16723_v5 = vld [vmem:[#allocation204_spill] sm:$0xff] }
 0x2f1   : > { %4446 = vmatpush2.msra.mxu0 %v16717_v47  ;;  %4767 = vmatpush2.msra.mxu1 %v16718_v55  ;;  %16720 = vst [vmem:[#allocation288_spill] sm:$0xff] %v12838_v19  ;;  %v12851_v55 = vsub.f32 %v4338_v56, %v12838_v19  ;;  %v2639_v56 = vpop.f32.mrf.mxu0 }
 0x2f2   : > { %4448 = vmatprep.subr.mxu0 %v16627_v39  ;;  %4773 = vmatprep.subr.mxu1 %v16719_v17  ;;  %v16725_v17 = vld [vmem:[#allocation210_spill] sm:$0xff] }
 0x2f3   : > { %4450 = vmatpush2.msra.mxu0 %v16630_v50  ;;  %4779 = vmatpush2.msra.mxu1 %v16721_v3  ;;  %16726 = vst [vmem:[#allocation290_spill] sm:$0xff] %v12851_v55  ;;  %v16727_v3 = vld [vmem:[#allocation213_spill] sm:$0xff] }
 0x2f4   : > { %4452 = vmatprep.subr.mxu0 %v16632_v2  ;;  %4785 = vmatprep.subr.mxu1 %v16723_v5  ;;  %v12856_v2 = vsub.f32 %v4335_v53, %v12842_v49  ;;  %v15634_v53 = vand.u32 4294901760, %v12851_v55 }
 0x2f5   : > { %4454 = vmatpush2.msra.mxu0 %v16518_v42  ;;  %4791 = vmatpush2.msra.mxu1 %v16724_v25  ;;  %v16729_v42 = vld [vmem:[#allocation216_spill] sm:$0xff] }
 0x2f6   : > { %4456 = vmatprep.subr.mxu0 %v16520_v0  ;;  %4797 = vmatprep.subr.mxu1 %v16725_v17  ;;  %16728 = vst [vmem:[#allocation291_spill] sm:$0xff] %v12856_v2  ;;  %v16730_v17 = vld [vmem:[#allocation220_spill] sm:$0xff] }
 0x2f7   : > { %4458 = vmatpush2.msra.mxu0 %v16522_v8  ;;  %4803 = vmatpush2.msra.mxu1 %v16727_v3  ;;  %v3078_v5 = vpop.f32.mrf.mxu1  ;;  %v16731_v8 = vld [vmem:[#allocation226_spill] sm:$0xff] }
 0x2f8   : > { %4460 = vmatprep.subr.mxu0 %v16524_v51  ;;  %4809 = vmatprep.subr.mxu1 %v16729_v42  ;;  %v12860_v25 = vadd.f32 %v3078_v5, %v2637_v28  ;;  %v16732_v51 = vld [vmem:[#allocation230_spill] sm:$0xff]  ;;  %v16733_v5 = vld [vmem:[#allocation236_spill] sm:$0xff]  ;;  %v16736_v28 = vld [vmem:[#allocation245_spill] sm:$0xff] }
 0x2f9   : > { %4462 = vmatpush2.msra.mxu0 %v16526_v14  ;;  %4815 = vmatpush2.msra.mxu1 %v16730_v17  ;;  %v3080_v0 = vpop.f32.mrf.mxu1  ;;  %v16734_v17 = vld [vmem:[#allocation239_spill] sm:$0xff] }
 0x2fa   : > { %4464 = vmatprep.subr.mxu0 %v16528_v4  ;;  %4821 = vmatprep.subr.mxu1 %v16731_v8  ;;  %v12867_v3 = vadd.f32 %v3080_v0, %v2639_v56  ;;  %v16735_v8 = vld [vmem:[#allocation242_spill] sm:$0xff]  ;;  %v4490_v0 = vsub.f32 %v12851_v55, %v15634_v53  ;;  %v9679_v56 = vld [vmem:[#allocation2 + $0x40] sm:$0xff] }
 0x2fb   : > { %4466 = vmatpush2.msra.mxu0 %v16530_v7  ;;  %4827 = vmatpush2.msra.mxu1 %v16732_v51  ;;  %v12881_v51 = vmul.f32 %v9679_v56, %v9679_v56  ;;  %v16739_v53 = vld [vmem:[#allocation252_spill] sm:$0xff]  ;;  %v16740_v56 = vld [vmem:[#allocation255_spill] sm:$0xff]  ;;  %v16775_v55 = vld [vmem:[#allocation90_spill] sm:$0xff] }
 0x2fc   : > { %4468 = vmatprep.subr.mxu0 %v16532_v20  ;;  %4833 = vmatprep.subr.mxu1 %v16733_v5  ;;  %v16737_v5 = vand.u32 4294901760, %v12856_v2  ;;  %v16776_v20 = vld [vmem:[#allocation34_spill] sm:$0xff]  ;;  %v16785_v4 = vld [vmem:[#allocation104_spill] sm:$0xff] }
 0x2fd   : > { %4470 = vmatpush2.msra.mxu0 %v16535_v60  ;;  %4839 = vmatpush2.msra.mxu1 %v16734_v17  ;;  %v9680_v17 = vld [vmem:[#allocation2 + $0x48] sm:$0xff] }
 0x2fe   : > { %4472 = vmatprep.subr.mxu0 %v16537_v24  ;;  %4845 = vmatprep.subr.mxu1 %v16735_v8  ;;  %v4496_v42 = vsub.f32 %v12856_v2, %v16737_v5  ;;  %v12888_v60 = vmul.f32 %v9680_v17, %v9680_v17  ;;  %v16738_v8 = vld [vmem:[#allocation248_spill] sm:$0xff]  ;;  %v16741_v5 = vld [vmem:[#allocation257_spill] sm:$0xff] }
 0x2ff   : > { %4474 = vmatpush2.msra.mxu0 %v16539_v23  ;;  %4851 = vmatpush2.msra.mxu1 %v16736_v28  ;;  %v4491_v28 = vand.u32 4294901760, %v4490_v0  ;;  %v4181_v23 = vrot.slane %v12881_v51, 1  ;;  %v16745_v0 = vrot.slane %v12682_v33, 1  ;;  %v16773_v24 = vld [vmem:[#allocation33_spill] sm:$0xff] }
 0x300   : > { %4476 = vmatprep.subr.mxu0 %v16541_v36  ;;  %4857 = vmatprep.subr.mxu1 %v16738_v8  ;;  %v4497_v17 = vand.u32 4294901760, %v4496_v42  ;;  %v4179_v36 = vrot.slane %v12888_v60, 1  ;;  %v16742_v8 = vld [vmem:[#allocation258_spill] sm:$0xff]  ;;  %v16747_v42 = vrot.slane %v12690_v10, 1 }
 0x301   : > { %4478 = vmatpush2.msra.mxu0 %v16650_v11  ;;  %4863 = vmatpush2.msra.mxu1 %v16739_v53  ;;  %v16743_v53 = vld [vmem:[#allocation259_spill] sm:$0xff]  ;;  %v16771_v11 = vld [vmem:[#allocation32_spill] sm:$0xff] }
 0x302   : > { %4480 = vmatprep.subr.mxu0 %v16545_v29  ;;  %4869 = vmatprep.subr.mxu1 %v16740_v56  ;;  %v16744_v56 = vld [vmem:[#allocation262_spill] sm:$0xff]  ;;  %v16746_v29 = vld [vmem:[#allocation37_spill] sm:$0xff] }
 0x303   : > { %4482 = vmatpush2.msra.mxu0 %v16547_v35  ;;  %4875 = vmatpush2.msra.mxu1 %v16741_v5  ;;  %v4182_v35 = vsel %vm625_vm0, %v16745_v0, %v4181_v23  ;;  %v4180_v5 = vsel %vm625_vm0, %v16747_v42, %v4179_v36  ;;  %v16753_v0 = vld [vmem:[#allocation45_spill] sm:$0xff] }
 0x304   : > { %4484 = vmatprep.subr.mxu0 %v16654_v62  ;;  %4881 = vmatprep.subr.mxu1 %v16742_v8  ;;  %v16748_v62 = vld [vmem:[#allocation274_spill] sm:$0xff]  ;;  %v16749_v8 = vld [vmem:[#allocation39_spill] sm:$0xff]  ;;  %v16755_v42 = vld [vmem:[#allocation49_spill] sm:$0xff] }
 0x305   : > { %4486 = vmatpush2.msra.mxu0 %v16656_v12  ;;  %4887 = vmatpush2.msra.mxu1 %v16743_v53  ;;  %v16750_v12 = vld [vmem:[#allocation275_spill] sm:$0xff]  ;;  %v16752_v53 = vld [vmem:[#allocation276_spill] sm:$0xff] }
 0x306   : > { %4492 = vmatprep.mubr.f32.mxu0 %v4491_v28  ;;  %4893 = vmatprep.subr.mxu1 %v16744_v56  ;;  %v16751_v28 = vld [vmem:[#allocation41_spill] sm:$0xff]  ;;  %v12917_v56 = vadd.f32 %v4182_v35, %v12682_v33 }
 0x307   : > { %4971 = vmatprep.subr.mxu0 %v16746_v29  ;;  %4498 = vmatmul.mubr.f32.vlgmr.msra.gmra.mxu0 %v4497_v17  ;;  %v12922_v17 = vadd.f32 %v4180_v5, %v12690_v10  ;;  %v16754_v29 = vld [vmem:[#allocation279_spill] sm:$0xff] }
 0x308   : > { %4899 = vmatpush2.msra.mxu1 %v16748_v62  ;;  %4974 = vmatpush1.msra.mxu0 %v16749_v8  ;;  %v16756_v62 = vld [vmem:[#allocation280_spill] sm:$0xff]  ;;  %v16757_v8 = vld [vmem:[#allocation51_spill] sm:$0xff]  ;;  %v4225_v35 = vrot.slane %v12917_v56, 2 }
 0x309   : > { %4905 = vmatprep.subr.mxu1 %v16750_v12  ;;  %4977 = vmatprep.subr.mxu0 %v16751_v28  ;;  %v16758_v12 = vld [vmem:[#allocation284_spill] sm:$0xff]  ;;  %v16759_v28 = vld [vmem:[#allocation58_spill] sm:$0xff]  ;;  %v4223_v5 = vrot.slane %v12922_v17, 2 }
 0x30a   : > { %4911 = vmatpush2.msra.mxu1 %v16752_v53  ;;  %4980 = vmatpush1.msra.mxu0 %v16753_v0  ;;  %v16760_v53 = vld [vmem:[#allocation285_spill] sm:$0xff]  ;;  %v16766_v0 = vld [vmem:[#allocation30_spill] sm:$0xff] }
 0x30b   : > { %4917 = vmatprep.subr.mxu1 %v16754_v29  ;;  %4983 = vmatprep.subr.mxu0 %v16755_v42  ;;  %v12935_v29 = vadd.f32 %v4181_v23, %v12881_v51  ;;  %v16761_v42 = vld [vmem:[#allocation61_spill] sm:$0xff] }
 0x30c   : > { %4923 = vmatpush2.msra.mxu1 %v16756_v62  ;;  %4986 = vmatpush1.msra.mxu0 %v16757_v8  ;;  %v12940_v8 = vadd.f32 %v4179_v36, %v12888_v60  ;;  %v4263_v62 = vrot.slane %v12917_v56, 4  ;;  %v16767_v36 = vrot.slane %v12736_v26, 2 }
 0x30d   : > { %4929 = vmatprep.subr.mxu1 %v16758_v12  ;;  %4989 = vmatprep.subr.mxu0 %v16759_v28  ;;  %v16762_v12 = vld [vmem:[#allocation64_spill] sm:$0xff] }
 0x30e   : > { %4935 = vmatpush2.msra.mxu1 %v16760_v53  ;;  %4937 = vmatprep.mubr.f32.mxu1 %v12838_v19  ;;  %v16763_v28 = vld [vmem:[#allocation68_spill] sm:$0xff]  ;;  %v16764_v53 = vrot.slane %v12730_v32, 2  ;;  %v16768_v19 = vld [vmem:[#allocation75_spill] sm:$0xff] }
 0x30f   : > { %4992 = vmatpush1.msra.mxu0 %v16761_v42  ;;  %4939 = vmatmul.mubr.f32.vlgmr.msra.gmra.mxu1 %v12842_v49  ;;  %v16765_v42 = vld [vmem:[#allocation72_spill] sm:$0xff]  ;;  %v4261_v49 = vrot.slane %v12922_v17, 4 }
 0x310   : > { %4995 = vmatprep.subr.mxu0 %v16762_v12  ;;  %5203 = vmatprep.subr.mxu1 %v16556_v18  ;;  %v4226_v23 = vsel %vm674_vm1, %v16764_v53, %v4225_v35  ;;  %v4224_v12 = vsel %vm674_vm1, %v16767_v36, %v4223_v5  ;;  %v4227_v53 = vrot.slane %v12940_v8, 2  ;;  %v16770_v18 = vld [vmem:[#allocation81_spill] sm:$0xff]  ;;  %v16774_v36 = vrot.slane %v12730_v32, 4 }
 0x311   : > { %4998 = vmatpush1.msra.mxu0 %v16763_v28  ;;  %5205 = vmatpush1.msra.mxu1 %v16558_v59  ;;  %v4229_v28 = vrot.slane %v12935_v29, 2  ;;  %v16769_v59 = vld [vmem:[#allocation31_spill] sm:$0xff] }
 0x312   : > { %5001 = vmatprep.subr.mxu0 %v16765_v42  ;;  %5207 = vmatprep.subr.mxu1 %v16766_v0  ;;  %v4246_v42 = vadd.f32 %v4226_v23, %v12730_v32  ;;  %v16772_v0 = vld [vmem:[#allocation84_spill] sm:$0xff]  ;;  %v4264_v2 = vsel %vm713_vm2, %v16774_v36, %v4263_v62  ;;  %v4267_v32 = vrot.slane %v12935_v29, 4  ;;  %v16779_v36 = vld [vmem:[#allocation35_spill] sm:$0xff] }
 0x313   : > { %5004 = vmatpush1.msra.mxu0 %v16768_v19  ;;  %5209 = vmatpush1.msra.mxu1 %v16769_v59  ;;  %v4297_v19 = vrot.slane %v12682_v33, 6  ;;  %v4245_v59 = vadd.f32 %v4224_v12, %v12736_v26  ;;  %v4228_v12 = vsel %vm674_vm1, %v4223_v5, %v4227_v53  ;;  %v4265_v33 = vrot.slane %v12940_v8, 4  ;;  %v16786_v5 = vld [vmem:[#allocation40_spill] sm:$0xff] }
 0x314   : > { %5007 = vmatprep.subr.mxu0 %v16770_v18  ;;  %5211 = vmatprep.subr.mxu1 %v16771_v11  ;;  %v16777_v18 = vrot.slane %v12736_v26, 4  ;;  %v16778_v11 = vld [vmem:[#allocation93_spill] sm:$0xff]  ;;  %v4284_v26 = vadd.f32 %v4264_v2, %v4246_v42  ;;  %v4268_v2 = vsel %vm713_vm2, %v4263_v62, %v4267_v32  ;;  %v4301_v42 = vrot.slane %v12881_v51, 6  ;;  %v16792_v62 = vld [vmem:[#allocation50_spill] sm:$0xff] }
 0x315   : > { %5010 = vmatpush1.msra.mxu0 %v16772_v0  ;;  %5213 = vmatpush1.msra.mxu1 %v16773_v24  ;;  %v4295_v0 = vrot.slane %v12690_v10, 6  ;;  %v4230_v24 = vsel %vm674_vm1, %v4225_v35, %v4229_v28  ;;  %v16783_v10 = vld [vmem:[#allocation38_spill] sm:$0xff]  ;;  %v16784_v35 = vrot.slane %v12680_v27, 6  ;;  %v16788_v27 = vld [vmem:[#allocation107_spill] sm:$0xff] }
 0x316   : > { %5013 = vmatprep.subr.mxu0 %v16775_v55  ;;  %5215 = vmatprep.subr.mxu1 %v16776_v20  ;;  %v4262_v23 = vsel %vm713_vm2, %v16777_v18, %v4261_v49  ;;  %v16780_v55 = vld [vmem:[#allocation96_spill] sm:$0xff] }
 0x317   : > { %5016 = vmatpush1.msra.mxu0 %v16778_v11  ;;  %5217 = vmatpush1.msra.mxu1 %v16779_v36  ;;  %v16781_v20 = vld [vmem:[#allocation36_spill] sm:$0xff]  ;;  %v4298_v7 = vsel %vm752_vm3, %v16784_v35, %v4297_v19  ;;  %v4283_v11 = vadd.f32 %v4262_v23, %v4245_v59  ;;  %v4248_v36 = vadd.f32 %v4230_v24, %v12917_v56  ;;  %v4299_v59 = vrot.slane %v12888_v60, 6  ;;  %v16790_v56 = vld [vmem:[#allocation113_spill] sm:$0xff] }
 0x318   : > { %5019 = vmatprep.subr.mxu0 %v16780_v55  ;;  %5219 = vmatprep.subr.mxu1 %v16781_v20  ;;  %v16782_v18 = vld [vmem:[#allocation100_spill] sm:$0xff]  ;;  %v16787_v55 = vrot.slane %v12688_v41, 6  ;;  %v4266_v24 = vsel %vm713_vm2, %v4261_v49, %v4265_v33  ;;  %v4318_v41 = vadd.f32 %v4298_v7, %v4284_v26  ;;  %v4250_v7 = vadd.f32 %v4229_v28, %v12935_v29  ;;  %v16799_v28 = vld [vmem:[#allocation145_spill] sm:$0xff] }
 0x319   : > { %5022 = vmatpush1.msra.mxu0 %v16782_v18  ;;  %5221 = vmatpush1.msra.mxu1 %v16783_v10  ;;  %v4247_v18 = vadd.f32 %v4228_v12, %v12922_v17  ;;  %v16789_v35 = vld [vmem:[#allocation44_spill] sm:$0xff]  ;;  %v4286_v23 = vadd.f32 %v4268_v2, %v4248_v36  ;;  %v16793_v17 = vld [vmem:[#allocation122_spill] sm:$0xff]  ;;  %v4302_v12 = vsel %vm752_vm3, %v4297_v19, %v4301_v42 }
 0x31a   : > { %5025 = vmatprep.subr.mxu0 %v16785_v4  ;;  %5223 = vmatprep.subr.mxu1 %v16786_v5  ;;  %v4296_v20 = vsel %vm752_vm3, %v16787_v55, %v4295_v0  ;;  %v16791_v55 = vld [vmem:[#allocation116_spill] sm:$0xff]  ;;  %v4300_v60 = vsel %vm752_vm3, %v4295_v0, %v4299_v59  ;;  %v4288_v29 = vadd.f32 %v4267_v32, %v4250_v7  ;;  %v16804_v32 = vld [vmem:[#allocation154_spill] sm:$0xff]  ;;  %v16805_v7 = vld [vmem:[#allocation87_spill] sm:$0xff] }
 0x31b   : > { %5028 = vmatpush1.msra.mxu0 %v16788_v27  ;;  %5225 = vmatpush1.msra.mxu1 %v16789_v35  ;;  %v4317_v51 = vadd.f32 %v4296_v20, %v4283_v11  ;;  %v4285_v49 = vadd.f32 %v4266_v24, %v4247_v18  ;;  %v16794_v27 = vld [vmem:[#allocation125_spill] sm:$0xff]  ;;  %v16795_v26 = vld [vmem:[#allocation128_spill] sm:$0xff]  ;;  %v4341_v20 = vrot.slane %v4318_v41, 2  ;;  %v4249_v11 = vadd.f32 %v4227_v53, %v12940_v8  ;;  %v16798_v24 = vld [vmem:[#allocation139_spill] sm:$0xff] }
 0x31c   : > { %5031 = vmatprep.subr.mxu0 %v16790_v56  ;;  %5227 = vmatprep.subr.mxu1 %v16133_v54  ;;  %v16796_v36 = vld [vmem:[#allocation132_spill] sm:$0xff]  ;;  %v4320_v18 = vadd.f32 %v4302_v12, %v4286_v23  ;;  %v16800_v8 = vrot.slane %v12804_v37, 2  ;;  %v16802_v12 = vld [vmem:[#allocation83_spill] sm:$0xff]  ;;  %v16806_v37 = vld [vmem:[#allocation157_spill] sm:$0xff] }
 0x31d   : > { %5034 = vmatpush1.msra.mxu0 %v16791_v55  ;;  %5229 = vmatpush1.msra.mxu1 %v16792_v62  ;;  %v4339_v19 = vrot.slane %v4317_v51, 2  ;;  %v16797_v2 = vld [vmem:[#allocation136_spill] sm:$0xff]  ;;  %v4319_v0 = vadd.f32 %v4300_v60, %v4285_v49  ;;  %v4287_v51 = vadd.f32 %v4265_v33, %v4249_v11  ;;  %v16803_v49 = vrot.slane %v12808_v52, 2  ;;  %v16826_v56 = vld [vmem:[#allocation203_spill] sm:$0xff]  ;;  %v16829_v4 = vld [vmem:[#allocation209_spill] sm:$0xff] }
 0x31e   : > { %5037 = vmatprep.subr.mxu0 %v16793_v17  ;;  %5231 = vmatprep.subr.mxu1 %v16138_v48  ;;  %v4342_v53 = vsel %vm674_vm1, %v16800_v8, %v4341_v20  ;;  %v16801_v23 = vld [vmem:[#allocation148_spill] sm:$0xff]  ;;  %v4322_v11 = vadd.f32 %v4301_v42, %v4288_v29  ;;  %v16814_v29 = vld [vmem:[#allocation171_spill] sm:$0xff] }
 0x31f   : > { %5040 = vmatpush1.msra.mxu0 %v16794_v27  ;;  %5233 = vmatpush1.msra.mxu1 %v16140_v31  ;;  %v4340_v60 = vsel %vm674_vm1, %v16803_v49, %v4339_v19  ;;  %v13036_v33 = vand.u32 4294901760, %v4342_v53  ;;  %v16808_v8 = vld [vmem:[#allocation160_spill] sm:$0xff] }
 0x320   : > { %5043 = vmatprep.subr.mxu0 %v16795_v26  ;;  %5235 = vmatprep.subr.mxu1 %v16142_v45  ;;  %v13040_v52 = vand.u32 4294901760, %v4340_v60  ;;  %v16811_v49 = vld [vmem:[#allocation164_spill] sm:$0xff]  ;;  %v16815_v26 = vld [vmem:[#allocation177_spill] sm:$0xff] }
 0x321   : > { %5046 = vmatpush1.msra.mxu0 %v16796_v36  ;;  %5237 = vmatpush1.msra.mxu1 %v16144_v6  ;;  %16807 = vst [vmem:[#allocation110_spill] sm:$0xff] %v13036_v33  ;;  %v16817_v27 = vld [vmem:[#allocation180_spill] sm:$0xff] }
 0x322   : > { %5049 = vmatprep.subr.mxu0 %v16797_v2  ;;  %5239 = vmatprep.subr.mxu1 %v16146_v22  ;;  %v4343_v2 = vrot.slane %v4319_v0, 2  ;;  %16810 = vst [vmem:[#allocation294_spill] sm:$0xff] %v13040_v52 }
 0x323   : > { %5052 = vmatpush1.msra.mxu0 %v16798_v24  ;;  %5241 = vmatpush1.msra.mxu1 %v16149_v38  ;;  %v4345_v24 = vrot.slane %v4320_v18, 2  ;;  %v4321_v18 = vadd.f32 %v4299_v59, %v4287_v51 }
 0x324   : > { %5055 = vmatprep.subr.mxu0 %v16799_v28  ;;  %5243 = vmatprep.subr.mxu1 %v16151_v44  ;;  %v2653_v41 = vpop.f32.mrf.mxu0  ;;  %v4344_v42 = vsel %vm674_vm1, %v4339_v19, %v4343_v2 }
 0x325   : > { %5058 = vmatpush1.msra.mxu0 %v16801_v23  ;;  %5245 = vmatpush1.msra.mxu1 %v16802_v12  ;;  %v16809_v23 = vld [vmem:[#allocation94_spill] sm:$0xff]  ;;  %v4346_v0 = vsel %vm674_vm1, %v4341_v20, %v4345_v24  ;;  %v13056_v20 = vsub.f32 %v4340_v60, %v13040_v52  ;;  %v16820_v60 = vld [vmem:[#allocation189_spill] sm:$0xff] }
 0x326   : > { %5061 = vmatprep.subr.mxu0 %v16804_v32  ;;  %5247 = vmatprep.subr.mxu1 %v16805_v7  ;;  %v2655_v28 = vpop.f32.mrf.mxu0  ;;  %v16812_v32 = vld [vmem:[#allocation97_spill] sm:$0xff] }
 0x327   : > { %5064 = vmatpush1.msra.mxu0 %v16806_v37  ;;  %5249 = vmatpush1.msra.mxu1 %v16274_v15  ;;  %v16813_v37 = vld [vmem:[#allocation168_spill] sm:$0xff] }
 0x328   : > { %5067 = vmatprep.subr.mxu0 %v16808_v8  ;;  %5251 = vmatprep.subr.mxu1 %v16809_v23  ;;  %v13051_v8 = vsub.f32 %v4342_v53, %v13036_v33  ;;  %v13064_v53 = vand.u32 4294901760, %v4344_v42 }
 0x329   : > { %5070 = vmatpush2.msra.mxu0 %v16811_v49  ;;  %5253 = vmatpush1.msra.mxu1 %v16812_v32  ;;  %v2669_v36 = vpop.f32.mrf.mxu0  ;;  %v4349_v49 = vrot.slane %v4322_v11, 2  ;;  %v16819_v11 = vld [vmem:[#allocation186_spill] sm:$0xff] }
 0x32a   : > { %5073 = vmatprep.subr.mxu0 %v16813_v37  ;;  %5255 = vmatprep.subr.mxu1 %v16280_v46  ;;  %v13058_v37 = vand.u32 4294901760, %v4346_v0  ;;  %16818 = vst [vmem:[#allocation296_spill] sm:$0xff] %v13064_v53 }
 0x32b   : > { %5076 = vmatpush2.msra.mxu0 %v16814_v29  ;;  %5257 = vmatpush1.msra.mxu1 %v16282_v40  ;;  %v3086_v59 = vpop.f32.mrf.mxu1  ;;  %v2671_v51 = vpop.f32.mrf.mxu0  ;;  %v4347_v29 = vrot.slane %v4321_v18, 2  ;;  %v4350_v18 = vsel %vm674_vm1, %v4345_v24, %v4349_v49  ;;  %v16824_v49 = vld [vmem:[#allocation200_spill] sm:$0xff] }
 0x32c   : > { %5079 = vmatprep.subr.mxu0 %v16815_v26  ;;  %5259 = vmatprep.subr.mxu1 %v16686_v16  ;;  %16816 = vst [vmem:[#allocation295_spill] sm:$0xff] %v13058_v37  ;;  %v13060_v19 = vadd.f32 %v3086_v59, %v2653_v41  ;;  %v13084_v41 = vsub.f32 %v4344_v42, %v13064_v53 }
 0x32d   : > { %5082 = vmatpush2.msra.mxu0 %v16817_v27  ;;  %5261 = vmatpush1.msra.mxu1 %v16688_v30  ;;  %v3088_v17 = vpop.f32.mrf.mxu1  ;;  %v16821_v27 = vld [vmem:[#allocation192_spill] sm:$0xff] }
 0x32e   : > { %5085 = vmatprep.subr.mxu0 %v16819_v11  ;;  %5263 = vmatprep.subr.mxu1 %v16690_v57  ;;  %v13068_v26 = vadd.f32 %v3088_v17, %v2655_v28  ;;  %v13078_v11 = vsub.f32 %v4346_v0, %v13058_v37  ;;  %v4348_v17 = vsel %vm674_vm1, %v4343_v2, %v4347_v29  ;;  %v16822_v28 = vld [vmem:[#allocation196_spill] sm:$0xff]  ;;  %v16827_v2 = vand.u32 4294901760, %v13051_v8 }
 0x32f   : > { %5088 = vmatpush2.msra.mxu0 %v16820_v60  ;;  %5265 = vmatpush1.msra.mxu1 %v16692_v9  ;;  %v2685_v59 = vpop.f32.mrf.mxu0  ;;  %v16823_v60 = vld [vmem:[#allocation129_spill] sm:$0xff]  ;;  %v13097_v42 = vand.u32 4294901760, %v4348_v17  ;;  %v16838_v9 = vld [vmem:[#allocation228_spill] sm:$0xff] }
 0x330   : > { %5091 = vmatprep.subr.mxu0 %v16821_v27  ;;  %5267 = vmatprep.subr.mxu1 %v16695_v63  ;;  %v13088_v27 = vand.u32 4294901760, %v4350_v18  ;;  %v4506_v29 = vsub.f32 %v13051_v8, %v16827_v2  ;;  %v16835_v2 = vld [vmem:[#allocation224_spill] sm:$0xff] }
 0x331   : > { %5094 = vmatpush2.msra.mxu0 %v16822_v28  ;;  %5269 = vmatpush2.msra.mxu1 %v16823_v60  ;;  %v3094_v24 = vpop.f32.mrf.mxu1  ;;  %v2687_v0 = vpop.f32.mrf.mxu0  ;;  %16828 = vst [vmem:[#allocation298_spill] sm:$0xff] %v13097_v42  ;;  %v16833_v60 = vld [vmem:[#allocation221_spill] sm:$0xff] }
 0x332   : > { %5097 = vmatprep.subr.mxu0 %v16824_v49  ;;  %5271 = vmatprep.subr.mxu1 %v16699_v34  ;;  %16825 = vst [vmem:[#allocation297_spill] sm:$0xff] %v13088_v27  ;;  %v13090_v55 = vadd.f32 %v3094_v24, %v2669_v36  ;;  %v16830_v49 = vand.u32 4294901760, %v13056_v20  ;;  %v16832_v34 = vld [vmem:[#allocation218_spill] sm:$0xff] }
 0x333   : > { %5100 = vmatpush2.msra.mxu0 %v16826_v56  ;;  %5273 = vmatpush2.msra.mxu1 %v16701_v43  ;;  %v3096_v28 = vpop.f32.mrf.mxu1  ;;  %v16831_v43 = vld [vmem:[#allocation212_spill] sm:$0xff] }
 0x334   : > { %5103 = vmatprep.subr.mxu0 %v16829_v4  ;;  %5275 = vmatprep.subr.mxu1 %v16703_v1  ;;  %v4512_v36 = vsub.f32 %v13056_v20, %v16830_v49  ;;  %v13105_v56 = vadd.f32 %v3096_v28, %v2671_v51  ;;  %v13113_v4 = vsub.f32 %v4350_v18, %v13088_v27  ;;  %v16834_v49 = vld [vmem:[#allocation155_spill] sm:$0xff]  ;;  %v4507_v51 = vand.u32 4294901760, %v4506_v29 }
 0x335   : > { %5106 = vmatpush2.msra.mxu0 %v16831_v43  ;;  %5277 = vmatpush2.msra.mxu1 %v16705_v61  ;;  %v13118_v28 = vsub.f32 %v4348_v17, %v13097_v42  ;;  %v16837_v18 = vand.u32 4294901760, %v13078_v11  ;;  %v16839_v17 = vand.u32 4294901760, %v13084_v41 }
 0x336   : > { %5109 = vmatprep.subr.mxu0 %v16832_v34  ;;  %5279 = vmatprep.subr.mxu1 %v16707_v13  ;;  %v3305_v1 = vpop.f32.mrf.mxu0  ;;  %v16836_v34 = vld [vmem:[#allocation158_spill] sm:$0xff]  ;;  %v4513_v13 = vand.u32 4294901760, %v4512_v36  ;;  %v15664_v36 = vand.u32 4294901760, %v13113_v4 }
 0x337   : > { %5112 = vmatpush2.msra.mxu0 %v16833_v60  ;;  %5281 = vmatpush2.msra.mxu1 %v16834_v49  ;;  %v3306_v24 = vadd.f32 %v3305_v1, %v12860_v25  ;;  %v3102_v43 = vpop.f32.mrf.mxu1  ;;  %v4522_v61 = vsub.f32 %v13078_v11, %v16837_v18  ;;  %v4528_v1 = vsub.f32 %v13084_v41, %v16839_v17 }
 0x338   : > { %5115 = vmatprep.subr.mxu0 %v16835_v2  ;;  %5283 = vmatprep.subr.mxu1 %v16836_v34  ;;  %v3103_v63 = vadd.f32 %v3102_v43, %v2685_v59  ;;  %v3307_v60 = vpop.f32.mrf.mxu0  ;;  %v16840_v2 = vld [vmem:[#allocation232_spill] sm:$0xff]  ;;  %v16841_v43 = vld [vmem:[#allocation235_spill] sm:$0xff]  ;;  %v15665_v59 = vand.u32 4294901760, %v13118_v28 }
 0x339   : > { %5118 = vmatpush2.msra.mxu0 %v16838_v9  ;;  %5285 = vmatpush2.msra.mxu1 %v16713_v21  ;;  %v3308_v25 = vadd.f32 %v3307_v60, %v12867_v3  ;;  %v3104_v29 = vpop.f32.mrf.mxu1  ;;  %v4523_v9 = vand.u32 4294901760, %v4522_v61  ;;  %v16842_v21 = vld [vmem:[#allocation241_spill] sm:$0xff]  ;;  %v4529_v3 = vand.u32 4294901760, %v4528_v1  ;;  %v16845_v61 = vld [vmem:[#allocation183_spill] sm:$0xff] }
 0x33a   : > { %5121 = vmatprep.subr.mxu0 %v16840_v2  ;;  %5287 = vmatprep.subr.mxu1 %v16715_v58  ;;  %v3105_v18 = vadd.f32 %v3104_v29, %v2687_v0  ;;  %v16843_v2 = vld [vmem:[#allocation244_spill] sm:$0xff]  ;;  %v4538_v0 = vsub.f32 %v13113_v4, %v15664_v36  ;;  %v16844_v29 = vld [vmem:[#allocation250_spill] sm:$0xff] }
 0x33b   : > { %4508 = vmatprep.mubr.f32.mxu0 %v4507_v51  ;;  %5124 = vmatpush2.msra.mxu0 %v16841_v43  ;;  %v16848_v36 = vld [vmem:[#allocation260_spill] sm:$0xff] }
 0x33c   : > { %5289 = vmatpush2.msra.mxu1 %v16717_v47  ;;  %4514 = vmatmul.mubr.f32.gmra.mxu0 %v4513_v13  ;;  %v3315_v17 = vpop.f32.mrf.mxu0  ;;  %v4544_v13 = vsub.f32 %v13118_v28, %v15665_v59  ;;  %v16849_v59 = vld [vmem:[#allocation190_spill] sm:$0xff] }
 0x33d   : > { %5127 = vmatprep.subr.mxu0 %v16842_v21  ;;  %5291 = vmatprep.subr.mxu1 %v16627_v39  ;;  %v3316_v60 = vadd.f32 %v3315_v17, %v13060_v19  ;;  %v16846_v19 = vld [vmem:[#allocation253_spill] sm:$0xff]  ;;  %v16847_v17 = vld [vmem:[#allocation187_spill] sm:$0xff] }
 0x33e   : > { %5130 = vmatpush2.msra.mxu0 %v16843_v2  ;;  %5293 = vmatpush2.msra.mxu1 %v16630_v50  ;;  %v3317_v51 = vpop.f32.mrf.mxu0 }
 0x33f   : > { %5133 = vmatprep.subr.mxu0 %v16844_v29  ;;  %5295 = vmatprep.subr.mxu1 %v16845_v61  ;;  %v3318_v1 = vadd.f32 %v3317_v51, %v13068_v26  ;;  %v4539_v29 = vand.u32 4294901760, %v4538_v0  ;;  %v16852_v0 = vld [vmem:[#allocation264_spill] sm:$0xff] }
 0x340   : > { %4524 = vmatprep.mubr.f32.mxu0 %v4523_v9  ;;  %5136 = vmatpush2.msra.mxu0 %v16846_v19  ;;  %v4545_v9 = vand.u32 4294901760, %v4544_v13  ;;  %v16850_v19 = vld [vmem:[#allocation263_spill] sm:$0xff]  ;;  %v16855_v13 = vld [vmem:[#allocation269_spill] sm:$0xff] }
 0x341   : > { %5297 = vmatpush2.msra.mxu1 %v16847_v17  ;;  %4530 = vmatmul.mubr.f32.gmra.mxu0 %v4529_v3  ;;  %v3325_v2 = vpop.f32.mrf.mxu0  ;;  %v3476_v21 = vpop.f32.mrf.mxu1  ;;  %v16851_v3 = vld [vmem:[#allocation193_spill] sm:$0xff] }
 0x342   : > { %4945 = vmatprep.mubr.f32.mxu1 %v13036_v33  ;;  %5139 = vmatprep.subr.mxu0 %v16848_v36  ;;  %v3326_v43 = vadd.f32 %v3325_v2, %v13090_v55  ;;  %v13157_v61 = vadd.f32 %v3476_v21, %v3306_v24  ;;  %v16853_v55 = vld [vmem:[#allocation197_spill] sm:$0xff]  ;;  %v16854_v21 = vld [vmem:[#allocation268_spill] sm:$0xff] }
 0x343   : > { %5299 = vmatprep.subr.mxu1 %v16849_v59  ;;  %4947 = vmatmul.mubr.f32.gmra.mxu1 %v13040_v52  ;;  %v3327_v26 = vpop.f32.mrf.mxu0  ;;  %v3478_v51 = vpop.f32.mrf.mxu1  ;;  %v16859_v36 = vld [vmem:[#allocation277_spill] sm:$0xff]  ;;  %v16871_v52 = vld [vmem:[#allocation234_spill] sm:$0xff] }
 0x344   : > { %5142 = vmatpush2.msra.mxu0 %v16850_v19  ;;  %5301 = vmatpush2.msra.mxu1 %v16851_v3  ;;  %v3328_v33 = vadd.f32 %v3327_v26, %v13105_v56  ;;  %v13164_v17 = vadd.f32 %v3478_v51, %v3308_v25  ;;  %v16856_v25 = vld [vmem:[#allocation206_spill] sm:$0xff] }
 0x345   : > { %5145 = vmatprep.subr.mxu0 %v16852_v0  ;;  %5303 = vmatprep.subr.mxu1 %v16853_v55  ;;  %v16857_v51 = vld [vmem:[#allocation270_spill] sm:$0xff] }
 0x346   : > { %4540 = vmatprep.mubr.f32.mxu0 %v4539_v29  ;;  %5148 = vmatpush2.msra.mxu0 %v16854_v21  ;;  %v16858_v21 = vld [vmem:[#allocation211_spill] sm:$0xff] }
 0x347   : > { %5305 = vmatpush2.msra.mxu1 %v16526_v14  ;;  %4546 = vmatmul.mubr.f32.gmra.mxu0 %v4545_v9  ;;  %v3335_v24 = vpop.f32.mrf.mxu0  ;;  %v3488_v2 = vpop.f32.mrf.mxu1 }
 0x348   : > { %4953 = vmatprep.mubr.f32.mxu1 %v13058_v37  ;;  %5151 = vmatprep.subr.mxu0 %v16855_v13  ;;  %v3336_v19 = vadd.f32 %v3335_v24, %v3103_v63  ;;  %v13172_v56 = vadd.f32 %v3488_v2, %v3316_v60  ;;  %v16860_v37 = vld [vmem:[#allocation215_spill] sm:$0xff]  ;;  %v16861_v63 = vld [vmem:[#allocation278_spill] sm:$0xff] }
 0x349   : > { %5307 = vmatprep.subr.mxu1 %v16856_v25  ;;  %4955 = vmatmul.mubr.f32.gmra.mxu1 %v13064_v53  ;;  %v3337_v26 = vpop.f32.mrf.mxu0  ;;  %v3490_v29 = vpop.f32.mrf.mxu1  ;;  %v16862_v60 = vld [vmem:[#allocation290_spill] sm:$0xff]  ;;  %v16863_v24 = vld [vmem:[#allocation219_spill] sm:$0xff]  ;;  %v16869_v53 = vld [vmem:[#allocation229_spill] sm:$0xff] }
 0x34a   : > { %5154 = vmatpush2.msra.mxu0 %v16857_v51  ;;  %5309 = vmatpush2.msra.mxu1 %v16858_v21  ;;  %v3338_v9 = vadd.f32 %v3337_v26, %v3105_v18  ;;  %v13178_v0 = vadd.f32 %v3490_v29, %v3318_v1  ;;  %v16864_v13 = vld [vmem:[#allocation291_spill] sm:$0xff]  ;;  %v16865_v51 = vld [vmem:[#allocation222_spill] sm:$0xff]  ;;  %v16867_v29 = vld [vmem:[#allocation225_spill] sm:$0xff] }
 0x34b   : > { %5157 = vmatprep.subr.mxu0 %v16859_v36  ;;  %5311 = vmatprep.subr.mxu1 %v16860_v37  ;;  %v16866_v1 = vld [vmem:[#allocation42_spill] sm:$0xff] }
 0x34c   : > { %5160 = vmatpush2.msra.mxu0 %v16861_v63  ;;  %5163 = vmatprep.mubr.f32.mxu0 %v16862_v60  ;;  %v16868_v63 = vld [vmem:[#allocation43_spill] sm:$0xff] }
 0x34d   : > { %5313 = vmatpush2.msra.mxu1 %v16863_v24  ;;  %4961 = vmatprep.mubr.f32.mxu1 %v13088_v27  ;;  %v3500_v2 = vpop.f32.mrf.mxu1  ;;  %v16870_v27 = vld [vmem:[#allocation46_spill] sm:$0xff] }
 0x34e   : > { %5166 = vmatmul.mubr.f32.vlgmr.msra.gmra.mxu0 %v16864_v13  ;;  %5315 = vmatprep.subr.mxu1 %v16865_v51  ;;  %v13188_v18 = vadd.f32 %v3500_v2, %v3326_v43  ;;  %v16872_v2 = vld [vmem:[#allocation48_spill] sm:$0xff] }
 0x34f   : > { %5382 = vmatprep.subr.mxu0 %v16866_v1  ;;  %4963 = vmatmul.mubr.f32.gmra.mxu1 %v13097_v42  ;;  %v3502_v26 = vpop.f32.mrf.mxu1  ;;  %v16873_v1 = vld [vmem:[#allocation238_spill] sm:$0xff] }
 0x350   : > { %5317 = vmatpush2.msra.mxu1 %v16867_v29  ;;  %5386 = vmatpush1.msra.mxu0 %v16868_v63  ;;  %v13194_v36 = vadd.f32 %v3502_v26, %v3328_v33  ;;  %v16874_v63 = vld [vmem:[#allocation55_spill] sm:$0xff] }
 0x351   : > { %5319 = vmatprep.subr.mxu1 %v16869_v53  ;;  %5390 = vmatprep.subr.mxu0 %v16870_v27  ;;  %v16875_v26 = vld [vmem:[#allocation243_spill] sm:$0xff]  ;;  %v16876_v53 = vld [vmem:[#allocation57_spill] sm:$0xff] }
 0x352   : > { %5173 = vmatprep.mubr.f32.mxu0 %v13051_v8  ;;  %5321 = vmatpush2.msra.mxu1 %v16871_v52  ;;  %v3512_v43 = vpop.f32.mrf.mxu1  ;;  %v16877_v29 = vld [vmem:[#allocation247_spill] sm:$0xff] }
 0x353   : > { %5394 = vmatpush1.msra.mxu0 %v16872_v2  ;;  %5323 = vmatprep.subr.mxu1 %v16873_v1  ;;  %v13202_v42 = vadd.f32 %v3512_v43, %v3336_v19  ;;  %v16878_v52 = vld [vmem:[#allocation63_spill] sm:$0xff]  ;;  %v16880_v19 = vand.u32 4294901760, %v16862_v60  ;;  %v16889_v60 = vand.u32 4294901760, %v13051_v8  ;;  %v16898_v8 = vld [vmem:[#allocation34_spill] sm:$0xff] }
 0x354   : > { %5176 = vmatmul.mubr.f32.gmra.mxu0 %v13056_v20  ;;  %5398 = vmatprep.subr.mxu0 %v16874_v63  ;;  %v3514_v33 = vpop.f32.mrf.mxu1  ;;  %v16879_v2 = vld [vmem:[#allocation251_spill] sm:$0xff]  ;;  %v16882_v63 = vand.u32 4294901760, %v16864_v13 }
 0x355   : > { %5325 = vmatpush2.msra.mxu1 %v16875_v26  ;;  %5402 = vmatpush1.msra.mxu0 %v16876_v53  ;;  %v13208_v27 = vadd.f32 %v3514_v33, %v3338_v9  ;;  %v16881_v43 = vld [vmem:[#allocation67_spill] sm:$0xff]  ;;  %v16884_v33 = vld [vmem:[#allocation28_spill] sm:$0xff]  ;;  %v16885_v53 = vld [vmem:[#allocation73_spill] sm:$0xff] }
 0x356   : > { %5327 = vmatprep.subr.mxu1 %v16877_v29  ;;  %5406 = vmatprep.subr.mxu0 %v16878_v52  ;;  %v16883_v9 = vld [vmem:[#allocation71_spill] sm:$0xff]  ;;  %v16886_v52 = vld [vmem:[#allocation29_spill] sm:$0xff] }
 0x357   : > { %5183 = vmatprep.mubr.f32.mxu0 %v13078_v11  ;;  %5329 = vmatpush2.msra.mxu1 %v16879_v2  ;;  %v16887_v29 = vld [vmem:[#allocation77_spill] sm:$0xff]  ;;  %v16888_v2 = vld [vmem:[#allocation30_spill] sm:$0xff]  ;;  %v16891_v13 = vld [vmem:[#allocation31_spill] sm:$0xff] }
 0x358   : > { %5333 = vmatprep.mubr.f32.mxu1 %v16880_v19  ;;  %5410 = vmatpush1.msra.mxu0 %v16881_v43  ;;  %v16890_v19 = vld [vmem:[#allocation80_spill] sm:$0xff]  ;;  %v16896_v43 = vld [vmem:[#allocation33_spill] sm:$0xff]  ;;  %v16897_v26 = vld [vmem:[#allocation95_spill] sm:$0xff] }
 0x359   : > { %5186 = vmatmul.mubr.f32.gmra.mxu0 %v13084_v41  ;;  %5337 = vmatmul.mubr.f32.vlgmr.msra.gmra.mxu1 %v16882_v63  ;;  %v16892_v63 = vand.u32 4294901760, %v13056_v20  ;;  %v16901_v1 = vld [vmem:[#allocation35_spill] sm:$0xff] }
 0x35a   : > { %5414 = vmatprep.subr.mxu0 %v16883_v9  ;;  %5669 = vmatprep.subr.mxu1 %v16884_v33  ;;  %v16894_v9 = vld [vmem:[#allocation32_spill] sm:$0xff]  ;;  %v16902_v20 = vld [vmem:[#allocation103_spill] sm:$0xff] }
 0x35b   : > { %5418 = vmatpush1.msra.mxu0 %v16885_v53  ;;  %5671 = vmatpush1.msra.mxu1 %v16886_v52  ;;  %v16893_v53 = vld [vmem:[#allocation86_spill] sm:$0xff] }
 0x35c   : > { %5422 = vmatprep.subr.mxu0 %v16887_v29  ;;  %5673 = vmatprep.subr.mxu1 %v16888_v2  ;;  %v16895_v29 = vld [vmem:[#allocation89_spill] sm:$0xff] }
 0x35d   : > { %5193 = vmatprep.mubr.f32.mxu0 %v13113_v4  ;;  %5345 = vmatprep.mubr.f32.mxu1 %v16889_v60  ;;  %v16899_v60 = vand.u32 4294901760, %v13078_v11  ;;  %v16907_v11 = vand.u32 4294901760, %v13113_v4  ;;  %v16913_v4 = vld [vmem:[#allocation131_spill] sm:$0xff] }
 0x35e   : > { %5426 = vmatpush1.msra.mxu0 %v16890_v19  ;;  %5675 = vmatpush1.msra.mxu1 %v16891_v13  ;;  %v16900_v19 = vld [vmem:[#allocation99_spill] sm:$0xff] }
 0x35f   : > { %5196 = vmatmul.mubr.f32.gmra.mxu0 %v13118_v28  ;;  %5349 = vmatmul.mubr.f32.gmra.mxu1 %v16892_v63  ;;  %v16903_v63 = vand.u32 4294901760, %v13084_v41  ;;  %v16910_v41 = vand.u32 4294901760, %v13118_v28  ;;  %v16915_v28 = vld [vmem:[#allocation137_spill] sm:$0xff] }
 0x360   : > { %5430 = vmatprep.subr.mxu0 %v16893_v53  ;;  %5677 = vmatprep.subr.mxu1 %v16894_v9  ;;  %v16904_v53 = vld [vmem:[#allocation36_spill] sm:$0xff] }
 0x361   : > { %5434 = vmatpush1.msra.mxu0 %v16895_v29  ;;  %5679 = vmatpush1.msra.mxu1 %v16896_v43  ;;  %v16905_v29 = vld [vmem:[#allocation105_spill] sm:$0xff] }
 0x362   : > { %5438 = vmatprep.subr.mxu0 %v16897_v26  ;;  %5681 = vmatprep.subr.mxu1 %v16898_v8  ;;  %v16906_v26 = vld [vmem:[#allocation109_spill] sm:$0xff] }
 0x363   : > { %5357 = vmatprep.mubr.f32.mxu1 %v16899_v60  ;;  %5442 = vmatpush1.msra.mxu0 %v16900_v19  ;;  %v16908_v60 = vld [vmem:[#allocation112_spill] sm:$0xff]  ;;  %v16935_v19 = vld [vmem:[#allocation205_spill] sm:$0xff] }
 0x364   : > { %5683 = vmatpush1.msra.mxu1 %v16901_v1  ;;  %5446 = vmatprep.subr.mxu0 %v16902_v20  ;;  %v16909_v20 = vld [vmem:[#allocation118_spill] sm:$0xff] }
 0x365   : > { %5361 = vmatmul.mubr.f32.gmra.mxu1 %v16903_v63  ;;  %5685 = vmatprep.subr.mxu1 %v16904_v53  ;;  %v16911_v63 = vld [vmem:[#allocation121_spill] sm:$0xff] }
 0x366   : > { %5450 = vmatpush1.msra.mxu0 %v16905_v29  ;;  %5687 = vmatpush1.msra.mxu1 %v16783_v10  ;;  %v16934_v29 = vld [vmem:[#allocation129_spill] sm:$0xff] }
 0x367   : > { %5454 = vmatprep.subr.mxu0 %v16906_v26  ;;  %5689 = vmatprep.subr.mxu1 %v16786_v5  ;;  %v16912_v26 = vld [vmem:[#allocation127_spill] sm:$0xff] }
 0x368   : > { %5369 = vmatprep.mubr.f32.mxu1 %v16907_v11  ;;  %5458 = vmatpush1.msra.mxu0 %v16908_v60  ;;  %v16914_v11 = vld [vmem:[#allocation135_spill] sm:$0xff] }
 0x369   : > { %5691 = vmatpush1.msra.mxu1 %v16789_v35  ;;  %5462 = vmatprep.subr.mxu0 %v16909_v20  ;;  %v16931_v20 = vld [vmem:[#allocation199_spill] sm:$0xff] }
 0x36a   : > { %5373 = vmatmul.mubr.f32.gmra.mxu1 %v16910_v41  ;;  %5693 = vmatprep.subr.mxu1 %v16133_v54  ;;  %v16916_v41 = vld [vmem:[#allocation141_spill] sm:$0xff] }
 0x36b   : > { %5466 = vmatpush1.msra.mxu0 %v16911_v63  ;;  %5695 = vmatpush1.msra.mxu1 %v16792_v62  ;;  %v16917_v63 = vld [vmem:[#allocation144_spill] sm:$0xff] }
 0x36c   : > { %5470 = vmatprep.subr.mxu0 %v16912_v26  ;;  %5697 = vmatprep.subr.mxu1 %v16138_v48  ;;  %v16918_v26 = vld [vmem:[#allocation150_spill] sm:$0xff] }
 0x36d   : > { %5474 = vmatpush1.msra.mxu0 %v16913_v4  ;;  %5699 = vmatpush1.msra.mxu1 %v16140_v31  ;;  %v16919_v4 = vld [vmem:[#allocation153_spill] sm:$0xff] }
 0x36e   : > { %5478 = vmatprep.subr.mxu0 %v16914_v11  ;;  %5701 = vmatprep.subr.mxu1 %v16142_v45  ;;  %v16920_v11 = vld [vmem:[#allocation159_spill] sm:$0xff] }
 0x36f   : > { %5482 = vmatpush1.msra.mxu0 %v16915_v28  ;;  %5703 = vmatpush1.msra.mxu1 %v16144_v6  ;;  %v16921_v28 = vld [vmem:[#allocation163_spill] sm:$0xff] }
 0x370   : > { %5486 = vmatprep.subr.mxu0 %v16916_v41  ;;  %5705 = vmatprep.subr.mxu1 %v16146_v22  ;;  %v16922_v41 = vld [vmem:[#allocation167_spill] sm:$0xff] }
 0x371   : > { %5490 = vmatpush1.msra.mxu0 %v16917_v63  ;;  %5707 = vmatpush1.msra.mxu1 %v16149_v38  ;;  %v16923_v63 = vld [vmem:[#allocation169_spill] sm:$0xff] }
 0x372   : > { %5494 = vmatprep.subr.mxu0 %v16918_v26  ;;  %5709 = vmatprep.subr.mxu1 %v16151_v44  ;;  %v16924_v26 = vld [vmem:[#allocation173_spill] sm:$0xff] }
 0x373   : > { %5498 = vmatpush1.msra.mxu0 %v16919_v4  ;;  %5711 = vmatpush1.msra.mxu1 %v16802_v12  ;;  %v16925_v4 = vld [vmem:[#allocation176_spill] sm:$0xff] }
 0x374   : > { %5502 = vmatprep.subr.mxu0 %v16920_v11  ;;  %5713 = vmatprep.subr.mxu1 %v16805_v7  ;;  %v16926_v11 = vld [vmem:[#allocation182_spill] sm:$0xff] }
 0x375   : > { %5506 = vmatpush1.msra.mxu0 %v16921_v28  ;;  %5715 = vmatpush1.msra.mxu1 %v16274_v15  ;;  %v16927_v28 = vld [vmem:[#allocation185_spill] sm:$0xff] }
 0x376   : > { %5510 = vmatprep.subr.mxu0 %v16922_v41  ;;  %5717 = vmatprep.subr.mxu1 %v16809_v23  ;;  %v16928_v41 = vld [vmem:[#allocation191_spill] sm:$0xff] }
 0x377   : > { %5514 = vmatpush2.msra.mxu0 %v16923_v63  ;;  %5719 = vmatpush1.msra.mxu1 %v16812_v32  ;;  %v16929_v63 = vld [vmem:[#allocation195_spill] sm:$0xff] }
 0x378   : > { %5518 = vmatprep.subr.mxu0 %v16924_v26  ;;  %5721 = vmatprep.subr.mxu1 %v16280_v46  ;;  %v16930_v26 = vld [vmem:[#allocation123_spill] sm:$0xff] }
 0x379   : > { %5522 = vmatpush2.msra.mxu0 %v16925_v4  ;;  %5723 = vmatpush1.msra.mxu1 %v16282_v40  ;;  %v16932_v4 = vld [vmem:[#allocation126_spill] sm:$0xff] }
 0x37a   : > { %5526 = vmatprep.subr.mxu0 %v16926_v11  ;;  %5725 = vmatprep.subr.mxu1 %v16686_v16  ;;  %v16933_v11 = vld [vmem:[#allocation201_spill] sm:$0xff] }
 0x37b   : > { %5530 = vmatpush2.msra.mxu0 %v16927_v28  ;;  %5727 = vmatpush1.msra.mxu1 %v16688_v30  ;;  %v16937_v30 = vld [vmem:[#allocation208_spill] sm:$0xff] }
 0x37c   : > { %5534 = vmatprep.subr.mxu0 %v16928_v41  ;;  %5729 = vmatprep.subr.mxu1 %v16690_v57  ;;  %v16936_v41 = vld [vmem:[#allocation133_spill] sm:$0xff] }
 0x37d   : > { %5538 = vmatpush2.msra.mxu0 %v16929_v63  ;;  %5731 = vmatpush1.msra.mxu1 %v16930_v26  ;;  %v16938_v63 = vld [vmem:[#allocation138_spill] sm:$0xff] }
 0x37e   : > { %5542 = vmatprep.subr.mxu0 %v16931_v20  ;;  %5733 = vmatprep.subr.mxu1 %v16932_v4  ;;  %v3777_v60 = vpop.f32.mrf.mxu0  ;;  %v16939_v26 = vld [vmem:[#allocation214_spill] sm:$0xff] }
 0x37f   : > { %5546 = vmatpush2.msra.mxu0 %v16933_v11  ;;  %5735 = vmatpush2.msra.mxu1 %v16934_v29  ;;  %v3778_v28 = vadd.f32 %v3777_v60, %v13157_v61  ;;  %v16940_v4 = vld [vmem:[#allocation142_spill] sm:$0xff]  ;;  %v16941_v11 = vld [vmem:[#allocation217_spill] sm:$0xff]  ;;  %v16942_v29 = vld [vmem:[#allocation147_spill] sm:$0xff] }
 0x380   : > { %5550 = vmatprep.subr.mxu0 %v16935_v19  ;;  %5737 = vmatprep.subr.mxu1 %v16936_v41  ;;  %v3779_v57 = vpop.f32.mrf.mxu0  ;;  %v16943_v61 = vld [vmem:[#allocation223_spill] sm:$0xff] }
 0x381   : > { %5554 = vmatpush2.msra.mxu0 %v16937_v30  ;;  %5739 = vmatpush2.msra.mxu1 %v16938_v63  ;;  %v3780_v20 = vadd.f32 %v3779_v57, %v13164_v17  ;;  %v16944_v60 = vld [vmem:[#allocation151_spill] sm:$0xff] }
 0x382   : > { %5558 = vmatprep.subr.mxu0 %v16939_v26  ;;  %5741 = vmatprep.subr.mxu1 %v16940_v4  ;;  %v16945_v41 = vld [vmem:[#allocation227_spill] sm:$0xff]  ;;  %v16947_v26 = vld [vmem:[#allocation233_spill] sm:$0xff] }
 0x383   : > { %5562 = vmatpush2.msra.mxu0 %v16941_v11  ;;  %5743 = vmatpush2.msra.mxu1 %v16942_v29  ;;  %v16946_v57 = vld [vmem:[#allocation231_spill] sm:$0xff]  ;;  %v16948_v11 = vld [vmem:[#allocation161_spill] sm:$0xff] }
 0x384   : > { %5566 = vmatprep.subr.mxu0 %v16943_v61  ;;  %5745 = vmatprep.subr.mxu1 %v16944_v60  ;;  %v3785_v19 = vpop.f32.mrf.mxu0  ;;  %v16949_v29 = vld [vmem:[#allocation237_spill] sm:$0xff] }
 0x385   : > { %5570 = vmatpush2.msra.mxu0 %v16945_v41  ;;  %5747 = vmatpush2.msra.mxu1 %v16834_v49  ;;  %v3786_v30 = vadd.f32 %v3785_v19, %v13172_v56  ;;  %v16950_v41 = vld [vmem:[#allocation240_spill] sm:$0xff]  ;;  %v16962_v49 = vld [vmem:[#allocation266_spill] sm:$0xff] }
 0x386   : > { %5574 = vmatprep.subr.mxu0 %v16946_v57  ;;  %5749 = vmatprep.subr.mxu1 %v16836_v34  ;;  %v3787_v17 = vpop.f32.mrf.mxu0  ;;  %v16951_v57 = vld [vmem:[#allocation246_spill] sm:$0xff] }
 0x387   : > { %5578 = vmatpush2.msra.mxu0 %v16947_v26  ;;  %5751 = vmatpush2.msra.mxu1 %v16948_v11  ;;  %v3788_v61 = vadd.f32 %v3787_v17, %v13178_v0  ;;  %v16952_v11 = vld [vmem:[#allocation265_spill] sm:$0xff] }
 0x388   : > { %5582 = vmatprep.subr.mxu0 %v16949_v29  ;;  %5753 = vmatprep.subr.mxu1 %v16715_v58  ;;  %v7521_v0 = vmul.f32 %v16952_v11, %v16952_v11  ;;  %v16953_v17 = vld [vmem:[#allocation249_spill] sm:$0xff]  ;;  %v16954_v58 = vld [vmem:[#allocation254_spill] sm:$0xff] }
 0x389   : > { %5586 = vmatpush2.msra.mxu0 %v16950_v41  ;;  %5755 = vmatpush2.msra.mxu1 %v16717_v47  ;;  %v3793_v56 = vpop.f32.mrf.mxu0  ;;  %v3938_v19 = vpop.f32.mrf.mxu1  ;;  %v16955_v47 = vld [vmem:[#allocation183_spill] sm:$0xff] }
 0x38a   : > { %5590 = vmatprep.subr.mxu0 %v16951_v57  ;;  %5757 = vmatprep.subr.mxu1 %v16627_v39  ;;  %v3794_v26 = vadd.f32 %v3793_v56, %v13188_v18  ;;  %v3939_v34 = vadd.f32 %v3938_v19, %v3778_v28  ;;  %v16957_v28 = vld [vmem:[#allocation256_spill] sm:$0xff]  ;;  %v16958_v56 = vld [vmem:[#allocation187_spill] sm:$0xff] }
 0x38b   : > { %5594 = vmatpush2.msra.mxu0 %v16953_v17  ;;  %5759 = vmatpush2.msra.mxu1 %v16630_v50  ;;  %v3795_v29 = vpop.f32.mrf.mxu0  ;;  %v3940_v41 = vpop.f32.mrf.mxu1  ;;  %v16959_v17 = vld [vmem:[#allocation261_spill] sm:$0xff] }
 0x38c   : > { %5598 = vmatprep.subr.mxu0 %v16954_v58  ;;  %5761 = vmatprep.subr.mxu1 %v16955_v47  ;;  %v13336_v57 = vmul.f32 %v3939_v34, %v16952_v11  ;;  %v7529_v39 = vmul.f32 %v3939_v34, %v3939_v34  ;;  %v3796_v18 = vadd.f32 %v3795_v29, %v13194_v36  ;;  %v16961_v58 = vld [vmem:[#allocation281_spill] sm:$0xff] }
 0x38d   : > { %5602 = vmatpush2.msra.mxu0 %v16957_v28  ;;  %5763 = vmatpush2.msra.mxu1 %v16958_v56  ;;  %v3941_v19 = vadd.f32 %v3940_v41, %v3780_v20  ;;  %v7522_v47 = vmul.f32 %v16961_v58, %v16961_v58  ;;  %v16964_v20 = vld [vmem:[#allocation267_spill] sm:$0xff] }
 0x38e   : > { %16956 = vst [vmem:[#allocation290_spill] sm:$0xff] %v13336_v57  ;;  %5606 = vmatprep.subr.mxu0 %v16959_v17  ;;  %5765 = vmatprep.subr.mxu1 %v16849_v59  ;;  %v13343_v50 = vadd.f32 %v7529_v39, %v7521_v0  ;;  %v16965_v41 = vld [vmem:[#allocation271_spill] sm:$0xff] }
 0x38f   : > { %5610 = vmatpush2.msra.mxu0 %v16962_v49  ;;  %5767 = vmatpush2.msra.mxu1 %v16851_v3  ;;  %v13350_v34 = vmul.f32 %v3941_v19, %v16961_v58  ;;  %v7530_v36 = vmul.f32 %v3941_v19, %v3941_v19  ;;  %v3801_v29 = vpop.f32.mrf.mxu0  ;;  %v3946_v11 = vpop.f32.mrf.mxu1  ;;  %v16967_v58 = vld [vmem:[#allocation272_spill] sm:$0xff] }
 0x390   : > { %16960 = vst [vmem:[#allocation291_spill] sm:$0xff] %v13343_v50  ;;  %5614 = vmatprep.subr.mxu0 %v16964_v20  ;;  %5769 = vmatprep.subr.mxu1 %v16853_v55  ;;  %v3802_v39 = vadd.f32 %v3801_v29, %v13202_v42  ;;  %v3947_v50 = vadd.f32 %v3946_v11, %v3786_v30  ;;  %v16968_v20 = vld [vmem:[#allocation292_spill] sm:$0xff]  ;;  %v16969_v42 = vld [vmem:[#allocation293_spill] sm:$0xff] }
 0x391   : > { %16963 = vst [vmem:[#allocation265_spill] sm:$0xff] %v13350_v34  ;;  %5618 = vmatpush2.msra.mxu0 %v16965_v41  ;;  %5771 = vmatpush2.msra.mxu1 %v16526_v14  ;;  %v13357_v0 = vadd.f32 %v7530_v36, %v7522_v47  ;;  %v3803_v57 = vpop.f32.mrf.mxu0  ;;  %v3948_v49 = vpop.f32.mrf.mxu1  ;;  %v7523_v17 = vmul.f32 %v16968_v20, %v16968_v20  ;;  %v16970_v41 = vld [vmem:[#allocation273_spill] sm:$0xff]  ;;  %v16972_v47 = vld [vmem:[#allocation282_spill] sm:$0xff] }
 0x392   : > { %5622 = vmatprep.subr.mxu0 %v16967_v58  ;;  %5773 = vmatprep.subr.mxu1 %v16856_v25  ;;  %v3804_v19 = vadd.f32 %v3803_v57, %v13208_v27  ;;  %v3949_v34 = vadd.f32 %v3948_v49, %v3788_v61  ;;  %v7524_v29 = vmul.f32 %v16969_v42, %v16969_v42  ;;  %v16974_v61 = vld [vmem:[#allocation283_spill] sm:$0xff]  ;;  %v16975_v57 = vld [vmem:[#allocation288_spill] sm:$0xff] }
 0x393   : > { %16966 = vst [vmem:[#allocation281_spill] sm:$0xff] %v13357_v0  ;;  %5626 = vmatpush2.msra.mxu0 %v16970_v41  ;;  %5775 = vmatpush2.msra.mxu1 %v16858_v21  ;;  %v13369_v30 = vmul.f32 %v3947_v50, %v16968_v20  ;;  %v7531_v36 = vmul.f32 %v3947_v50, %v3947_v50  ;;  %v16976_v0 = vld [vmem:[#allocation289_spill] sm:$0xff]  ;;  %v16986_v41 = vld [vmem:[#allocation238_spill] sm:$0xff] }
 0x394   : > { %5630 = vmatprep.subr.mxu0 %v16972_v47  ;;  %5777 = vmatprep.subr.mxu1 %v16860_v37  ;;  %v13374_v27 = vmul.f32 %v3949_v34, %v16969_v42  ;;  %v7532_v49 = vmul.f32 %v3949_v34, %v3949_v34  ;;  %v16979_v34 = vld [vmem:[#allocation91_spill] sm:$0xff] }
 0x395   : > { %16971 = vst [vmem:[#allocation292_spill] sm:$0xff] %v13369_v30  ;;  %5634 = vmatpush2.msra.mxu0 %v16974_v61  ;;  %5636 = vmatprep.mubr.f32.mxu0 %v16975_v57  ;;  %v3954_v11 = vpop.f32.mrf.mxu1  ;;  %v13380_v20 = vadd.f32 %v7531_v36, %v7523_v17  ;;  %v7525_v42 = vmul.f32 %v16979_v34, %v16979_v34  ;;  %v16981_v61 = vld [vmem:[#allocation229_spill] sm:$0xff] }
 0x396   : > { %16973 = vst [vmem:[#allocation293_spill] sm:$0xff] %v13374_v27  ;;  %5779 = vmatpush2.msra.mxu1 %v16863_v24  ;;  %5638 = vmatmul.mubr.f32.vlgmr.msra.gmra.mxu0 %v16976_v0  ;;  %v13382_v30 = vadd.f32 %v7532_v49, %v7524_v29  ;;  %v3955_v47 = vadd.f32 %v3954_v11, %v3794_v26  ;;  %v16980_v27 = vld [vmem:[#allocation225_spill] sm:$0xff]  ;;  %v16984_v11 = vld [vmem:[#allocation110_spill] sm:$0xff] }
 0x397   : > { %16977 = vst [vmem:[#allocation288_spill] sm:$0xff] %v13380_v20  ;;  %5781 = vmatprep.subr.mxu1 %v16865_v51  ;;  %6044 = vmatprep.subr.mxu0 %v16884_v33  ;;  %v3956_v50 = vpop.f32.mrf.mxu1  ;;  %v16983_v36 = vld [vmem:[#allocation101_spill] sm:$0xff]  ;;  %v16990_v33 = vld [vmem:[#allocation286_spill] sm:$0xff] }
 0x398   : > { %16978 = vst [vmem:[#allocation289_spill] sm:$0xff] %v13382_v30  ;;  %5783 = vmatpush2.msra.mxu1 %v16980_v27  ;;  %6046 = vmatpush1.msra.mxu0 %v16886_v52  ;;  %v13393_v17 = vmul.f32 %v3955_v47, %v16979_v34  ;;  %v7533_v26 = vmul.f32 %v3955_v47, %v3955_v47  ;;  %v16985_v30 = vld [vmem:[#allocation234_spill] sm:$0xff] }
 0x399   : > { %5785 = vmatprep.subr.mxu1 %v16981_v61  ;;  %6048 = vmatprep.subr.mxu0 %v16888_v2  ;;  %v3957_v29 = vadd.f32 %v3956_v50, %v3796_v18  ;;  %v7526_v49 = vmul.f32 %v16983_v36, %v16983_v36  ;;  %v16989_v47 = vld [vmem:[#allocation294_spill] sm:$0xff]  ;;  %v9682_v2 = vld [vmem:[#allocation2 + $0x20] sm:$0xff] }
 0x39a   : > { %16982 = vst [vmem:[#allocation91_spill] sm:$0xff] %v13393_v17  ;;  %5644 = vmatprep.mubr.f32.mxu0 %v16984_v11  ;;  %5787 = vmatpush2.msra.mxu1 %v16985_v30  ;;  %v3962_v20 = vpop.f32.mrf.mxu1  ;;  %v13401_v58 = vadd.f32 %v7533_v26, %v7525_v42  ;;  %v9681_v17 = vld [vmem:[#allocation3 + $0x38] sm:$0xff]  ;;  %v16993_v26 = vld [vmem:[#allocation247_spill] sm:$0xff] }
 0x39b   : > { %6050 = vmatpush1.msra.mxu0 %v16891_v13  ;;  %5789 = vmatprep.subr.mxu1 %v16986_v41  ;;  %v13404_v28 = vmul.f32 %v3957_v29, %v16983_v36  ;;  %v7534_v34 = vmul.f32 %v3957_v29, %v3957_v29  ;;  %v3963_v18 = vadd.f32 %v3962_v20, %v3802_v39  ;;  %v16991_v41 = vld [vmem:[#allocation243_spill] sm:$0xff] }
 0x39c   : > { %16987 = vst [vmem:[#allocation101_spill] sm:$0xff] %v13401_v58  ;;  %5646 = vmatmul.mubr.f32.gmra.mxu0 %v16989_v47  ;;  %6052 = vmatprep.subr.mxu0 %v16894_v9  ;;  %v3964_v50 = vpop.f32.mrf.mxu1  ;;  %v13408_v52 = vmul.f32 %v9682_v2, %v9681_v17  ;;  %v7527_v13 = vmul.f32 %v16990_v33, %v16990_v33  ;;  %v16995_v2 = vld [vmem:[#allocation287_spill] sm:$0xff] }
 0x39d   : > { %16988 = vst [vmem:[#allocation110_spill] sm:$0xff] %v13404_v28  ;;  %5791 = vmatpush2.msra.mxu1 %v16991_v41  ;;  %6054 = vmatpush1.msra.mxu0 %v16896_v43  ;;  %v13414_v42 = vadd.f32 %v7534_v34, %v7526_v49  ;;  %v13419_v39 = vmul.f32 %v3963_v18, %v16990_v33  ;;  %v16996_v36 = vld [vmem:[#allocation295_spill] sm:$0xff]  ;;  %v9683_v28 = vld [vmem:[#allocation3] sm:$0xff]  ;;  %v9684_v43 = vld [vmem:[#allocation2] sm:$0xff] }
 0x39e   : > { %5793 = vmatprep.subr.mxu1 %v16993_v26  ;;  %6056 = vmatprep.subr.mxu0 %v16898_v8  ;;  %v7535_v20 = vmul.f32 %v3963_v18, %v3963_v18  ;;  %v3965_v29 = vadd.f32 %v3964_v50, %v3804_v19  ;;  %v7528_v17 = vmul.f32 %v16995_v2, %v16995_v2  ;;  %v16997_v58 = vld [vmem:[#allocation251_spill] sm:$0xff]  ;;  %v17000_v50 = vld [vmem:[#allocation296_spill] sm:$0xff] }
 0x39f   : > { %16992 = vst [vmem:[#allocation294_spill] sm:$0xff] %v13414_v42  ;;  %16994 = vst [vmem:[#allocation286_spill] sm:$0xff] %v13419_v39  ;;  %5652 = vmatprep.mubr.f32.mxu0 %v16996_v36  ;;  %5795 = vmatpush2.msra.mxu1 %v16997_v58  ;;  %v13425_v49 = vmul.f32 %v9684_v43, %v9683_v28  ;;  %v9685_v34 = vld [vmem:[#allocation3 + $0x8] sm:$0xff]  ;;  %v9688_v28 = vld [vmem:[#allocation2 + $0x10] sm:$0xff] }
 0x3a0   : > { %v9686_v42 = vld [vmem:[#allocation2 + $0x18] sm:$0xff]  ;;  %5797 = vmatprep.mubr.f32.mxu1 %v16975_v57  ;;  %6058 = vmatpush1.msra.mxu0 %v16901_v1  ;;  %v13431_v33 = vadd.f32 %v7535_v20, %v7527_v13  ;;  %v13434_v19 = vmul.f32 %v3965_v29, %v16995_v2  ;;  %v7536_v18 = vmul.f32 %v3965_v29, %v3965_v29  ;;  %v17001_v20 = vld [vmem:[#allocation53_spill] sm:$0xff]  ;;  %v9693_v2 = vld [vmem:[#allocation3 + $0x20] sm:$0xff] }
 0x3a1   : > { %v13427_v9 = vmul.f32 %v9686_v42, %v9685_v34  ;;  %5654 = vmatmul.mubr.f32.gmra.mxu0 %v17000_v50  ;;  %5799 = vmatmul.mubr.f32.vlgmr.msra.gmra.mxu1 %v16976_v0  ;;  %v9687_v43 = vld [vmem:[#allocation3 + $0x48] sm:$0xff]  ;;  %v9689_v42 = vld [vmem:[#allocation3 + $0x10] sm:$0xff]  ;;  %v9690_v34 = vld [vmem:[#allocation2 + $0x28] sm:$0xff] }
 0x3a2   : > { %16998 = vst [vmem:[#allocation287_spill] sm:$0xff] %v13431_v33  ;;  %16999 = vst [vmem:[#allocation295_spill] sm:$0xff] %v13434_v19  ;;  %v13438_v39 = vmul.f32 %v9688_v28, %v9687_v43  ;;  %v13440_v8 = vmul.f32 %v9690_v34, %v9689_v42  ;;  %v9691_v57 = vld [vmem:[#allocation3 + $0x28] sm:$0xff]  ;;  %6060 = vmatprep.subr.mxu0 %v16904_v53  ;;  %6241 = vmatprep.subr.mxu1 %v17001_v20  ;;  %v9694_v0 = vld [vmem:[#allocation2 + $0x8] sm:$0xff] }
 0x3a3   : > { %v9692_v1 = vld [vmem:[#allocation2 + $0x38] sm:$0xff]  ;;  %v13446_v29 = vadd.f32 %v7536_v18, %v7528_v17  ;;  %v13448_v33 = vmul.f32 %v9694_v0, %v9693_v2  ;;  %v9695_v43 = vld [vmem:[#allocation3 + $0x18] sm:$0xff]  ;;  %v9696_v28 = vld [vmem:[#allocation2 + $0x30] sm:$0xff]  ;;  %6062 = vmatpush1.msra.mxu0 %v16783_v10  ;;  %5805 = vmatprep.mubr.f32.mxu1 %v16984_v11  ;;  %v5852_v17 = vrot.slane %v13425_v49, 1  ;;  %v5853_v18 = vrot.slane %v13427_v9, 1 }
 0x3a4   : > { %v13442_v13 = vmul.f32 %v9692_v1, %v9691_v57  ;;  %v13450_v19 = vmul.f32 %v9696_v28, %v9695_v43  ;;  %v17003_v42 = vld [vmem:[#allocation54_spill] sm:$0xff]  ;;  %6064 = vmatprep.subr.mxu0 %v16786_v5  ;;  %v17004_v1 = vld [vmem:[#allocation56_spill] sm:$0xff]  ;;  %v17005_v34 = vld [vmem:[#allocation297_spill] sm:$0xff]  ;;  %v5857_v57 = vrot.slane %v13438_v39, 1  ;;  %v5849_v0 = vrot.slane %v13408_v52, 1 }
 0x3a5   : > { %17002 = vst [vmem:[#allocation296_spill] sm:$0xff] %v13446_v29  ;;  %6247 = vmatpush1.msra.mxu1 %v17003_v42  ;;  %5660 = vmatprep.mubr.f32.mxu0 %v17005_v34  ;;  %v17006_v43 = vld [vmem:[#allocation60_spill] sm:$0xff]  ;;  %v5855_v29 = vrot.slane %v13448_v33, 1  ;;  %v17008_v42 = vld [vmem:[#allocation66_spill] sm:$0xff] }
 0x3a6   : > { %6253 = vmatprep.subr.mxu1 %v17004_v1  ;;  %6066 = vmatpush1.msra.mxu0 %v16789_v35  ;;  %v5850_v28 = vrot.slane %v13442_v13, 1  ;;  %v17007_v1 = vld [vmem:[#allocation298_spill] sm:$0xff]  ;;  %v5858_v20 = vsel %vm625_vm0, %v5853_v18, %v5857_v57  ;;  %v17010_v35 = vrot.slane %v13440_v8, 1  ;;  %v17011_v5 = vld [vmem:[#allocation76_spill] sm:$0xff] }
 0x3a7   : > { %6259 = vmatpush1.msra.mxu1 %v17006_v43  ;;  %5662 = vmatmul.mubr.f32.gmra.mxu0 %v17007_v1  ;;  %v17009_v2 = vld [vmem:[#allocation70_spill] sm:$0xff]  ;;  %v5854_v43 = vsel %vm625_vm0, %v5852_v17, %v5853_v18  ;;  %v17013_v17 = vld [vmem:[#allocation79_spill] sm:$0xff]  ;;  %v5880_v18 = vadd.f32 %v5858_v20, %v13427_v9 }
 0x3a8   : > { %5807 = vmatmul.mubr.f32.gmra.mxu1 %v16989_v47  ;;  %6068 = vmatprep.subr.mxu0 %v16133_v54  ;;  %v5862_v11 = vsel %vm625_vm0, %v5857_v57, %v17010_v35  ;;  %v5851_v47 = vsel %vm625_vm0, %v5849_v0, %v5850_v28  ;;  %v5878_v35 = vadd.f32 %v5854_v43, %v13425_v49  ;;  %v17014_v0 = vld [vmem:[#allocation82_spill] sm:$0xff]  ;;  %v17016_v49 = vld [vmem:[#allocation88_spill] sm:$0xff] }
 0x3a9   : > { %6265 = vmatprep.subr.mxu1 %v17008_v42  ;;  %6070 = vmatpush1.msra.mxu0 %v16792_v62  ;;  %v5856_v42 = vsel %vm625_vm0, %v5850_v28, %v5855_v29  ;;  %v17012_v62 = vrot.slane %v13450_v19, 1  ;;  %v13493_v57 = vadd.f32 %v5862_v11, %v13438_v39  ;;  %v17015_v28 = vld [vmem:[#allocation85_spill] sm:$0xff]  ;;  %v5901_v20 = vrot.slane %v5880_v18, 2 }
 0x3aa   : > { %6271 = vmatpush1.msra.mxu1 %v17009_v2  ;;  %6072 = vmatprep.subr.mxu0 %v16138_v48 }
 0x3ab   : > { %6277 = vmatprep.subr.mxu1 %v17011_v5  ;;  %v5860_v2 = vsel %vm625_vm0, %v5855_v29, %v17012_v62  ;;  %5813 = vmatprep.mubr.f32.mxu1 %v16996_v36  ;;  %v5877_v62 = vadd.f32 %v5851_v47, %v13408_v52  ;;  %v5879_v36 = vadd.f32 %v5856_v42, %v13442_v13  ;;  %v17017_v42 = vld [vmem:[#allocation92_spill] sm:$0xff]  ;;  %v17018_v47 = vld [vmem:[#allocation98_spill] sm:$0xff] }
 0x3ac   : > { %6074 = vmatpush1.msra.mxu0 %v16140_v31  ;;  %6283 = vmatpush1.msra.mxu1 %v17013_v17  ;;  %v13500_v29 = vadd.f32 %v5860_v2, %v13448_v33  ;;  %v17020_v52 = vld [vmem:[#allocation108_spill] sm:$0xff] }
 0x3ad   : > { %6076 = vmatprep.subr.mxu0 %v16142_v45  ;;  %5815 = vmatmul.mubr.f32.gmra.mxu1 %v17000_v50  ;;  %v5900_v50 = vrot.slane %v5878_v35, 2  ;;  %v5897_v2 = vrot.slane %v5877_v62, 2  ;;  %v5898_v43 = vrot.slane %v5879_v36, 2  ;;  %v5935_v17 = vrot.slane %v5877_v62, 4 }
 0x3ae   : > { %6289 = vmatprep.subr.mxu1 %v17014_v0  ;;  %6078 = vmatpush1.msra.mxu0 %v16144_v6  ;;  %v17021_v0 = vrot.slane %v13493_v57, 2  ;;  %v17023_v5 = vrot.slane %v13500_v29, 2 }
 0x3af   : > { %6295 = vmatpush1.msra.mxu1 %v17015_v28  ;;  %6080 = vmatprep.subr.mxu0 %v16146_v22  ;;  %v5939_v28 = vrot.slane %v5880_v18, 4 }
 0x3b0   : > { %6301 = vmatprep.subr.mxu1 %v17016_v49  ;;  %5821 = vmatprep.mubr.f32.mxu1 %v17005_v34  ;;  %v17019_v34 = vld [vmem:[#allocation102_spill] sm:$0xff]  ;;  %v5938_v49 = vrot.slane %v5878_v35, 4  ;;  %v5906_v11 = vsel %vm674_vm1, %v5901_v20, %v17021_v0  ;;  %v17025_v0 = vld [vmem:[#allocation117_spill] sm:$0xff] }
 0x3b1   : > { %6082 = vmatpush1.msra.mxu0 %v16149_v38  ;;  %6307 = vmatpush1.msra.mxu1 %v17017_v42  ;;  %v5902_v42 = vsel %vm674_vm1, %v5900_v50, %v5901_v20 }
 0x3b2   : > { %6084 = vmatprep.subr.mxu0 %v16151_v44  ;;  %5823 = vmatmul.mubr.f32.gmra.mxu1 %v17007_v1  ;;  %v5926_v20 = vadd.f32 %v5902_v42, %v5878_v35  ;;  %v5928_v1 = vadd.f32 %v5906_v11, %v5880_v18  ;;  %v17028_v35 = vld [vmem:[#allocation124_spill] sm:$0xff]  ;;  %v5973_v42 = vrot.slane %v13442_v13, 6  ;;  %v17035_v11 = vld [vmem:[#allocation123_spill] sm:$0xff] }
 0x3b3   : > { %6313 = vmatprep.subr.mxu1 %v17018_v47  ;;  %6086 = vmatpush1.msra.mxu0 %v16802_v12  ;;  %v17022_v47 = vld [vmem:[#allocation111_spill] sm:$0xff]  ;;  %v17024_v12 = vld [vmem:[#allocation114_spill] sm:$0xff] }
 0x3b4   : > { %6319 = vmatpush1.msra.mxu1 %v17019_v34  ;;  %6088 = vmatprep.subr.mxu0 %v16805_v7  ;;  %v5899_v34 = vsel %vm674_vm1, %v5897_v2, %v5898_v43  ;;  %v5904_v7 = vsel %vm674_vm1, %v5898_v43, %v17023_v5  ;;  %v5974_v2 = vrot.slane %v13427_v9, 6  ;;  %v17026_v5 = vld [vmem:[#allocation120_spill] sm:$0xff]  ;;  %v17027_v43 = vrot.slane %v13493_v57, 4 }
 0x3b5   : > { %6325 = vmatprep.subr.mxu1 %v17020_v52  ;;  %6090 = vmatpush1.msra.mxu0 %v16274_v15  ;;  %v5936_v52 = vrot.slane %v5879_v36, 4  ;;  %v17029_v9 = vrot.slane %v13500_v29, 4 }
 0x3b6   : > { %6331 = vmatpush1.msra.mxu1 %v17022_v47  ;;  %6092 = vmatprep.subr.mxu0 %v16809_v23  ;;  %v5940_v47 = vsel %vm713_vm2, %v5938_v49, %v5939_v28  ;;  %v5944_v50 = vsel %vm713_vm2, %v5939_v28, %v17027_v43  ;;  %v5925_v23 = vadd.f32 %v5899_v34, %v5877_v62  ;;  %v17030_v28 = vld [vmem:[#allocation130_spill] sm:$0xff]  ;;  %v17031_v62 = vld [vmem:[#allocation115_spill] sm:$0xff] }
 0x3b7   : > { %6337 = vmatprep.subr.mxu1 %v17024_v12  ;;  %6094 = vmatpush1.msra.mxu0 %v16812_v32  ;;  %v15717_v12 = vrot.slane %v13438_v39, 6  ;;  %v5927_v32 = vadd.f32 %v5904_v7, %v5879_v36  ;;  %v5937_v18 = vsel %vm713_vm2, %v5935_v17, %v5936_v52  ;;  %v5942_v49 = vsel %vm713_vm2, %v5936_v52, %v17029_v9  ;;  %v17032_v7 = vld [vmem:[#allocation134_spill] sm:$0xff]  ;;  %v17033_v43 = vld [vmem:[#allocation119_spill] sm:$0xff]  ;;  %v17034_v17 = vld [vmem:[#allocation140_spill] sm:$0xff] }
 0x3b8   : > { %6343 = vmatpush1.msra.mxu1 %v17025_v0  ;;  %6096 = vmatprep.subr.mxu0 %v16280_v46  ;;  %v5964_v36 = vadd.f32 %v5940_v47, %v5926_v20  ;;  %v5966_v34 = vadd.f32 %v5944_v50, %v5928_v1  ;;  %v5963_v52 = vadd.f32 %v5937_v18, %v5925_v23  ;;  %v17038_v47 = vld [vmem:[#allocation126_spill] sm:$0xff]  ;;  %v17040_v50 = vld [vmem:[#allocation129_spill] sm:$0xff] }
 0x3b9   : > { %6349 = vmatprep.subr.mxu1 %v17026_v5  ;;  %6098 = vmatpush1.msra.mxu0 %v16282_v40  ;;  %v5978_v13 = vsel %vm752_vm3, %v5974_v2, %v15717_v12  ;;  %v5965_v9 = vadd.f32 %v5942_v49, %v5927_v32  ;;  %v17039_v1 = vld [vmem:[#allocation146_spill] sm:$0xff]  ;;  %v17041_v20 = vld [vmem:[#allocation149_spill] sm:$0xff]  ;;  %v17043_v32 = vld [vmem:[#allocation152_spill] sm:$0xff] }
 0x3ba   : > { %6355 = vmatpush1.msra.mxu1 %v17028_v35  ;;  %6100 = vmatprep.subr.mxu0 %v16686_v16  ;;  %v17036_v35 = vld [vmem:[#allocation143_spill] sm:$0xff]  ;;  %v13568_v12 = vadd.f32 %v5978_v13, %v5966_v34  ;;  %v17042_v23 = vld [vmem:[#allocation133_spill] sm:$0xff]  ;;  %v5997_v18 = vadd.f32 %v5973_v42, %v5963_v52  ;;  %v17058_v5 = vld [vmem:[#allocation188_spill] sm:$0xff] }
 0x3bb   : > { %6361 = vmatprep.subr.mxu1 %v17030_v28  ;;  %6102 = vmatpush1.msra.mxu0 %v17031_v62  ;;  %v17037_v28 = vrot.slane %v13448_v33, 6  ;;  %v17049_v52 = vld [vmem:[#allocation155_spill] sm:$0xff]  ;;  %v17060_v0 = vld [vmem:[#allocation194_spill] sm:$0xff] }
 0x3bc   : > { %6367 = vmatpush1.msra.mxu1 %v17032_v7  ;;  %6104 = vmatprep.subr.mxu0 %v17033_v43  ;;  %v15718_v34 = vrot.slane %v13568_v12, 2 }
 0x3bd   : > { %6373 = vmatprep.subr.mxu1 %v17034_v17  ;;  %6106 = vmatpush1.msra.mxu0 %v17035_v11  ;;  %v5976_v7 = vsel %vm752_vm3, %v5973_v42, %v17037_v28  ;;  %v5998_v17 = vadd.f32 %v5974_v2, %v5964_v36  ;;  %v17044_v28 = vld [vmem:[#allocation156_spill] sm:$0xff]  ;;  %v17047_v2 = vld [vmem:[#allocation166_spill] sm:$0xff] }
 0x3be   : > { %6379 = vmatpush1.msra.mxu1 %v17036_v35  ;;  %6108 = vmatprep.subr.mxu0 %v17038_v47  ;;  %v13572_v49 = vadd.f32 %v5976_v7, %v5965_v9  ;;  %v17046_v35 = vld [vmem:[#allocation147_spill] sm:$0xff]  ;;  %v17048_v42 = vld [vmem:[#allocation172_spill] sm:$0xff]  ;;  %v6017_v7 = vrot.slane %v5997_v18, 2 }
 0x3bf   : > { %6385 = vmatprep.subr.mxu1 %v17039_v1  ;;  %6110 = vmatpush2.msra.mxu0 %v17040_v50  ;;  %v17045_v1 = vld [vmem:[#allocation162_spill] sm:$0xff]  ;;  %v6020_v36 = vrot.slane %v5998_v17, 2  ;;  %v17050_v9 = vld [vmem:[#allocation175_spill] sm:$0xff]  ;;  %v17054_v17 = vld [vmem:[#allocation181_spill] sm:$0xff] }
 0x3c0   : > { %6391 = vmatpush1.msra.mxu1 %v17041_v20  ;;  %6112 = vmatprep.subr.mxu0 %v17042_v23  ;;  %v15719_v13 = vrot.slane %v13572_v49, 2  ;;  %v17056_v18 = vld [vmem:[#allocation184_spill] sm:$0xff]  ;;  %v17057_v20 = vld [vmem:[#allocation170_spill] sm:$0xff] }
 0x3c1   : > { %6397 = vmatprep.subr.mxu1 %v17043_v32  ;;  %6114 = vmatpush2.msra.mxu0 %v16938_v63  ;;  %v17053_v32 = vld [vmem:[#allocation161_spill] sm:$0xff] }
 0x3c2   : > { %6403 = vmatpush1.msra.mxu1 %v17044_v28  ;;  %6116 = vmatprep.subr.mxu0 %v16940_v4  ;;  %v17051_v28 = vld [vmem:[#allocation158_spill] sm:$0xff] }
 0x3c3   : > { %6409 = vmatprep.subr.mxu1 %v17045_v1  ;;  %6118 = vmatpush2.msra.mxu0 %v17046_v35  ;;  %v17052_v1 = vld [vmem:[#allocation178_spill] sm:$0xff] }
 0x3c4   : > { %6415 = vmatpush1.msra.mxu1 %v17047_v2  ;;  %6120 = vmatprep.subr.mxu0 %v16944_v60  ;;  %v6022_v2 = vsel %vm674_vm1, %v6020_v36, %v15718_v34  ;;  %v17063_v36 = vld [vmem:[#allocation198_spill] sm:$0xff] }
 0x3c5   : > { %6421 = vmatprep.subr.mxu1 %v17048_v42  ;;  %6122 = vmatpush2.msra.mxu0 %v17049_v52  ;;  %v17055_v42 = vld [vmem:[#allocation165_spill] sm:$0xff] }
 0x3c6   : > { %6427 = vmatpush1.msra.mxu1 %v17050_v9  ;;  %6124 = vmatprep.subr.mxu0 %v17051_v28  ;;  %v6019_v9 = vsel %vm674_vm1, %v6017_v7, %v15719_v13  ;;  %v17067_v7 = vld [vmem:[#allocation207_spill] sm:$0xff] }
 0x3c7   : > { %6433 = vmatprep.subr.mxu1 %v17052_v1  ;;  %6126 = vmatpush2.msra.mxu0 %v17053_v32  ;;  %v17059_v1 = vld [vmem:[#allocation174_spill] sm:$0xff]  ;;  %v17062_v32 = vld [vmem:[#allocation179_spill] sm:$0xff]  ;;  %v13606_v34 = vand.u32 4294901760, %v6019_v9  ;;  %v4499_v13 = vpop.f32.mrf.mxu0 }
 0x3c8   : > { %6439 = vmatpush2.msra.mxu1 %v17054_v17  ;;  %6128 = vmatprep.subr.mxu0 %v17055_v42  ;;  %v13602_v17 = vand.u32 4294901760, %v6022_v2  ;;  %v17066_v42 = vld [vmem:[#allocation204_spill] sm:$0xff] }
 0x3c9   : > { %6445 = vmatprep.subr.mxu1 %v17056_v18  ;;  %6130 = vmatpush2.msra.mxu0 %v17057_v20  ;;  %17064 = vst [vmem:[#allocation298_spill] sm:$0xff] %v13606_v34  ;;  %v17065_v18 = vld [vmem:[#allocation183_spill] sm:$0xff] }
 0x3ca   : > { %6451 = vmatpush2.msra.mxu1 %v17058_v5  ;;  %6132 = vmatprep.subr.mxu0 %v17059_v1  ;;  %17061 = vst [vmem:[#allocation297_spill] sm:$0xff] %v13602_v17  ;;  %v13615_v5 = vsub.f32 %v6022_v2, %v13602_v17  ;;  %v4501_v2 = vpop.f32.mrf.mxu0 }
 0x3cb   : > { %6457 = vmatprep.subr.mxu1 %v17060_v0  ;;  %6134 = vmatpush2.msra.mxu0 %v17062_v32  ;;  %v17068_v0 = vld [vmem:[#allocation210_spill] sm:$0xff] }
 0x3cc   : > { %6463 = vmatpush2.msra.mxu1 %v17063_v36  ;;  %6136 = vmatprep.subr.mxu0 %v17065_v18  ;;  %17069 = vst [vmem:[#allocation115_spill] sm:$0xff] %v13615_v5  ;;  %v17070_v36 = vld [vmem:[#allocation213_spill] sm:$0xff]  ;;  %v13620_v18 = vsub.f32 %v6019_v9, %v13606_v34  ;;  %v15727_v9 = vand.u32 4294901760, %v13615_v5 }
 0x3cd   : > { %6469 = vmatprep.subr.mxu1 %v17066_v42  ;;  %6138 = vmatpush2.msra.mxu0 %v16958_v56  ;;  %v17072_v56 = vld [vmem:[#allocation216_spill] sm:$0xff] }
 0x3ce   : > { %6475 = vmatpush2.msra.mxu1 %v17067_v7  ;;  %6140 = vmatprep.subr.mxu0 %v16849_v59  ;;  %17071 = vst [vmem:[#allocation119_spill] sm:$0xff] %v13620_v18 }
 0x3cf   : > { %6481 = vmatprep.subr.mxu1 %v17068_v0  ;;  %6142 = vmatpush2.msra.mxu0 %v16851_v3  ;;  %v4940_v42 = vpop.f32.mrf.mxu1  ;;  %v17073_v0 = vld [vmem:[#allocation220_spill] sm:$0xff]  ;;  %v17074_v3 = vld [vmem:[#allocation226_spill] sm:$0xff] }
 0x3d0   : > { %6487 = vmatpush2.msra.mxu1 %v17070_v36  ;;  %6144 = vmatprep.subr.mxu0 %v16853_v55  ;;  %v13624_v7 = vadd.f32 %v4940_v42, %v4499_v13  ;;  %v17075_v55 = vld [vmem:[#allocation230_spill] sm:$0xff]  ;;  %v17076_v13 = vld [vmem:[#allocation236_spill] sm:$0xff]  ;;  %v17079_v42 = vld [vmem:[#allocation245_spill] sm:$0xff] }
 0x3d1   : > { %6493 = vmatprep.subr.mxu1 %v17072_v56  ;;  %6146 = vmatpush2.msra.mxu0 %v16526_v14  ;;  %v4942_v59 = vpop.f32.mrf.mxu1  ;;  %v17122_v14 = vld [vmem:[#allocation34_spill] sm:$0xff] }
 0x3d2   : > { %6499 = vmatpush2.msra.mxu1 %v17073_v0  ;;  %6148 = vmatprep.subr.mxu0 %v16856_v25  ;;  %v13631_v36 = vadd.f32 %v4942_v59, %v4501_v2  ;;  %v17077_v0 = vld [vmem:[#allocation239_spill] sm:$0xff]  ;;  %v6174_v59 = vsub.f32 %v13615_v5, %v15727_v9  ;;  %v9697_v2 = vld [vmem:[#allocation3 + $0x30] sm:$0xff]  ;;  %v17119_v5 = vld [vmem:[#allocation33_spill] sm:$0xff] }
 0x3d3   : > { %6505 = vmatprep.subr.mxu1 %v17074_v3  ;;  %6150 = vmatpush2.msra.mxu0 %v16858_v21  ;;  %v17078_v3 = vld [vmem:[#allocation242_spill] sm:$0xff]  ;;  %v17084_v9 = vld [vmem:[#allocation255_spill] sm:$0xff] }
 0x3d4   : > { %6511 = vmatpush2.msra.mxu1 %v17075_v55  ;;  %6152 = vmatprep.subr.mxu0 %v16860_v37  ;;  %v9698_v55 = vld [vmem:[#allocation2 + $0x40] sm:$0xff]  ;;  %v17121_v25 = vld [vmem:[#allocation90_spill] sm:$0xff] }
 0x3d5   : > { %6517 = vmatprep.subr.mxu1 %v17076_v13  ;;  %6154 = vmatpush2.msra.mxu0 %v16863_v24  ;;  %v13645_v56 = vmul.f32 %v9698_v55, %v9697_v2  ;;  %v17080_v13 = vand.u32 4294901760, %v13620_v18  ;;  %v9699_v24 = vld [vmem:[#allocation3 + $0x40] sm:$0xff]  ;;  %v17082_v55 = vld [vmem:[#allocation252_spill] sm:$0xff] }
 0x3d6   : > { %6523 = vmatpush2.msra.mxu1 %v17077_v0  ;;  %6156 = vmatprep.subr.mxu0 %v16865_v51  ;;  %v9700_v51 = vld [vmem:[#allocation2 + $0x48] sm:$0xff]  ;;  %v17083_v2 = vld [vmem:[#allocation238_spill] sm:$0xff] }
 0x3d7   : > { %6529 = vmatprep.subr.mxu1 %v17078_v3  ;;  %6158 = vmatpush2.msra.mxu0 %v16980_v27  ;;  %v6180_v0 = vsub.f32 %v13620_v18, %v17080_v13  ;;  %v13652_v37 = vmul.f32 %v9700_v51, %v9699_v24  ;;  %v17081_v3 = vld [vmem:[#allocation248_spill] sm:$0xff]  ;;  %v5865_v27 = vrot.slane %v13645_v56, 1  ;;  %v17085_v13 = vld [vmem:[#allocation257_spill] sm:$0xff] }
 0x3d8   : > { %6535 = vmatpush2.msra.mxu1 %v17079_v42  ;;  %6160 = vmatprep.subr.mxu0 %v16981_v61  ;;  %v6175_v42 = vand.u32 4294901760, %v6174_v59  ;;  %v17089_v59 = vrot.slane %v13440_v8, 1  ;;  %v17116_v61 = vld [vmem:[#allocation81_spill] sm:$0xff]  ;;  %v17117_v18 = vld [vmem:[#allocation32_spill] sm:$0xff] }
 0x3d9   : > { %6541 = vmatprep.subr.mxu1 %v17081_v3  ;;  %6162 = vmatpush2.msra.mxu0 %v16985_v30  ;;  %v6181_v51 = vand.u32 4294901760, %v6180_v0  ;;  %v5863_v24 = vrot.slane %v13652_v37, 1  ;;  %v17086_v3 = vld [vmem:[#allocation258_spill] sm:$0xff]  ;;  %v17091_v0 = vrot.slane %v13450_v19, 1  ;;  %v17114_v30 = vld [vmem:[#allocation75_spill] sm:$0xff] }
 0x3da   : > { %6547 = vmatpush2.msra.mxu1 %v17082_v55  ;;  %6164 = vmatprep.subr.mxu0 %v17083_v2  ;;  %v17087_v55 = vld [vmem:[#allocation259_spill] sm:$0xff]  ;;  %v17090_v2 = vld [vmem:[#allocation37_spill] sm:$0xff] }
 0x3db   : > { %6553 = vmatprep.subr.mxu1 %v17084_v9  ;;  %6166 = vmatpush2.msra.mxu0 %v16991_v41  ;;  %v17088_v9 = vld [vmem:[#allocation262_spill] sm:$0xff]  ;;  %v5866_v41 = vsel %vm625_vm0, %v17089_v59, %v5865_v27  ;;  %v17097_v59 = vld [vmem:[#allocation45_spill] sm:$0xff] }
 0x3dc   : > { %6559 = vmatpush2.msra.mxu1 %v17085_v13  ;;  %6168 = vmatprep.subr.mxu0 %v16993_v26  ;;  %v5864_v13 = vsel %vm625_vm0, %v17091_v0, %v5863_v24  ;;  %v17092_v26 = vld [vmem:[#allocation274_spill] sm:$0xff]  ;;  %v17099_v0 = vld [vmem:[#allocation49_spill] sm:$0xff] }
 0x3dd   : > { %6565 = vmatprep.subr.mxu1 %v17086_v3  ;;  %6170 = vmatpush2.msra.mxu0 %v16997_v58  ;;  %v17093_v3 = vld [vmem:[#allocation39_spill] sm:$0xff] }
 0x3de   : > { %6571 = vmatpush2.msra.mxu1 %v17087_v55  ;;  %6176 = vmatprep.mubr.f32.mxu0 %v6175_v42  ;;  %v17094_v58 = vld [vmem:[#allocation275_spill] sm:$0xff]  ;;  %v17095_v42 = vld [vmem:[#allocation41_spill] sm:$0xff]  ;;  %v17096_v55 = vld [vmem:[#allocation276_spill] sm:$0xff] }
 0x3df   : > { %6577 = vmatprep.subr.mxu1 %v17088_v9  ;;  %6655 = vmatprep.subr.mxu0 %v17090_v2  ;;  %v13681_v9 = vadd.f32 %v5866_v41, %v13440_v8  ;;  %v17098_v2 = vld [vmem:[#allocation279_spill] sm:$0xff] }
 0x3e0   : > { %6182 = vmatmul.mubr.f32.vlgmr.msra.gmra.mxu0 %v6181_v51  ;;  %6583 = vmatpush2.msra.mxu1 %v17092_v26  ;;  %v13686_v51 = vadd.f32 %v5864_v13, %v13450_v19  ;;  %v17100_v26 = vld [vmem:[#allocation280_spill] sm:$0xff] }
 0x3e1   : > { %6658 = vmatpush1.msra.mxu0 %v17093_v3  ;;  %6589 = vmatprep.subr.mxu1 %v17094_v58  ;;  %v17101_v3 = vld [vmem:[#allocation51_spill] sm:$0xff]  ;;  %v17102_v58 = vld [vmem:[#allocation284_spill] sm:$0xff]  ;;  %v5909_v41 = vrot.slane %v13681_v9, 2 }
 0x3e2   : > { %6661 = vmatprep.subr.mxu0 %v17095_v42  ;;  %6595 = vmatpush2.msra.mxu1 %v17096_v55  ;;  %v17103_v42 = vld [vmem:[#allocation58_spill] sm:$0xff]  ;;  %v17104_v55 = vld [vmem:[#allocation285_spill] sm:$0xff]  ;;  %v5907_v13 = vrot.slane %v13686_v51, 2 }
 0x3e3   : > { %6664 = vmatpush1.msra.mxu0 %v17097_v59  ;;  %6601 = vmatprep.subr.mxu1 %v17098_v2  ;;  %v13699_v2 = vadd.f32 %v5865_v27, %v13645_v56  ;;  %v17110_v59 = vrot.slane %v13493_v57, 2 }
 0x3e4   : > { %6667 = vmatprep.subr.mxu0 %v17099_v0  ;;  %6607 = vmatpush2.msra.mxu1 %v17100_v26  ;;  %v17105_v0 = vld [vmem:[#allocation61_spill] sm:$0xff]  ;;  %v17108_v26 = vld [vmem:[#allocation68_spill] sm:$0xff] }
 0x3e5   : > { %6670 = vmatpush1.msra.mxu0 %v17101_v3  ;;  %6613 = vmatprep.subr.mxu1 %v17102_v58  ;;  %v13704_v3 = vadd.f32 %v5863_v24, %v13652_v37  ;;  %v17106_v58 = vld [vmem:[#allocation64_spill] sm:$0xff]  ;;  %v5910_v27 = vsel %vm674_vm1, %v17110_v59, %v5909_v41  ;;  %v17113_v24 = vrot.slane %v13500_v29, 2 }
 0x3e6   : > { %6673 = vmatprep.subr.mxu0 %v17103_v42  ;;  %6619 = vmatpush2.msra.mxu1 %v17104_v55  ;;  %v17107_v42 = vld [vmem:[#allocation28_spill] sm:$0xff]  ;;  %v17109_v55 = vld [vmem:[#allocation29_spill] sm:$0xff] }
 0x3e7   : > { %6621 = vmatprep.mubr.f32.mxu1 %v13602_v17  ;;  %6676 = vmatpush1.msra.mxu0 %v17105_v0  ;;  %v5947_v17 = vrot.slane %v13681_v9, 4  ;;  %v17111_v0 = vld [vmem:[#allocation72_spill] sm:$0xff]  ;;  %v5911_v59 = vrot.slane %v13704_v3, 2 }
 0x3e8   : > { %6623 = vmatmul.mubr.f32.vlgmr.msra.gmra.mxu1 %v13606_v34  ;;  %6679 = vmatprep.subr.mxu0 %v17106_v58  ;;  %v17112_v34 = vld [vmem:[#allocation30_spill] sm:$0xff]  ;;  %v5908_v58 = vsel %vm674_vm1, %v17113_v24, %v5907_v13  ;;  %v17120_v24 = vrot.slane %v13493_v57, 4 }
 0x3e9   : > { %6887 = vmatprep.subr.mxu1 %v17107_v42  ;;  %6682 = vmatpush1.msra.mxu0 %v17108_v26  ;;  %v5945_v42 = vrot.slane %v13686_v51, 4  ;;  %v5913_v26 = vrot.slane %v13699_v2, 2 }
 0x3ea   : > { %6889 = vmatpush1.msra.mxu1 %v17109_v55  ;;  %6685 = vmatprep.subr.mxu0 %v17111_v0  ;;  %v17115_v55 = vld [vmem:[#allocation31_spill] sm:$0xff]  ;;  %v5930_v0 = vadd.f32 %v5910_v27, %v13493_v57  ;;  %v5948_v21 = vsel %vm713_vm2, %v17120_v24, %v5947_v17  ;;  %v5951_v57 = vrot.slane %v13699_v2, 4 }
 0x3eb   : > { %6891 = vmatprep.subr.mxu1 %v17112_v34  ;;  %6688 = vmatpush1.msra.mxu0 %v17114_v30  ;;  %v17118_v34 = vld [vmem:[#allocation84_spill] sm:$0xff]  ;;  %v5981_v30 = vrot.slane %v13440_v8, 6  ;;  %v17125_v24 = vld [vmem:[#allocation35_spill] sm:$0xff]  ;;  %v5912_v8 = vsel %vm674_vm1, %v5907_v13, %v5911_v59 }
 0x3ec   : > { %6893 = vmatpush1.msra.mxu1 %v17115_v55  ;;  %6691 = vmatprep.subr.mxu0 %v17116_v61  ;;  %v5929_v55 = vadd.f32 %v5908_v58, %v13500_v29  ;;  %v17123_v61 = vrot.slane %v13500_v29, 4  ;;  %v5949_v58 = vrot.slane %v13704_v3, 4  ;;  %v5968_v29 = vadd.f32 %v5948_v21, %v5930_v0  ;;  %v17130_v13 = vld [vmem:[#allocation40_spill] sm:$0xff] }
 0x3ed   : > { %6895 = vmatprep.subr.mxu1 %v17117_v18  ;;  %6694 = vmatpush1.msra.mxu0 %v17118_v34  ;;  %v5979_v34 = vrot.slane %v13450_v19, 6  ;;  %v17124_v18 = vld [vmem:[#allocation93_spill] sm:$0xff]  ;;  %v17128_v19 = vrot.slane %v13438_v39, 6  ;;  %v5952_v21 = vsel %vm713_vm2, %v5947_v17, %v5951_v57  ;;  %v5985_v0 = vrot.slane %v13645_v56, 6  ;;  %v17132_v39 = vld [vmem:[#allocation107_spill] sm:$0xff]  ;;  %v17136_v17 = vld [vmem:[#allocation50_spill] sm:$0xff] }
 0x3ee   : > { %6897 = vmatpush1.msra.mxu1 %v17119_v5  ;;  %6697 = vmatprep.subr.mxu0 %v17121_v25  ;;  %v5946_v27 = vsel %vm713_vm2, %v17123_v61, %v5945_v42  ;;  %v5914_v5 = vsel %vm674_vm1, %v5909_v41, %v5913_v26  ;;  %v17126_v25 = vld [vmem:[#allocation96_spill] sm:$0xff] }
 0x3ef   : > { %6899 = vmatprep.subr.mxu1 %v17122_v14  ;;  %6700 = vmatpush1.msra.mxu0 %v17124_v18  ;;  %v17127_v61 = vld [vmem:[#allocation100_spill] sm:$0xff]  ;;  %v5982_v41 = vsel %vm752_vm3, %v17128_v19, %v5981_v30  ;;  %v5967_v18 = vadd.f32 %v5946_v27, %v5929_v55  ;;  %v17134_v55 = vld [vmem:[#allocation113_spill] sm:$0xff] }
 0x3f0   : > { %6901 = vmatpush1.msra.mxu1 %v17125_v24  ;;  %6703 = vmatprep.subr.mxu0 %v17126_v25  ;;  %v5932_v24 = vadd.f32 %v5914_v5, %v13681_v9  ;;  %v17129_v14 = vld [vmem:[#allocation104_spill] sm:$0xff]  ;;  %v17131_v25 = vrot.slane %v13448_v33, 6  ;;  %v5950_v5 = vsel %vm713_vm2, %v5945_v42, %v5949_v58  ;;  %v5983_v9 = vrot.slane %v13652_v37, 6 }
 0x3f1   : > { %6903 = vmatprep.subr.mxu1 %v16904_v53  ;;  %6706 = vmatpush1.msra.mxu0 %v17127_v61  ;;  %v5931_v61 = vadd.f32 %v5912_v8, %v13686_v51  ;;  %v17133_v19 = vld [vmem:[#allocation44_spill] sm:$0xff]  ;;  %v6002_v33 = vadd.f32 %v5982_v41, %v5968_v29  ;;  %v17137_v51 = vld [vmem:[#allocation122_spill] sm:$0xff]  ;;  %v5986_v8 = vsel %vm752_vm3, %v5981_v30, %v5985_v0 }
 0x3f2   : > { %6905 = vmatpush1.msra.mxu1 %v16783_v10  ;;  %6709 = vmatprep.subr.mxu0 %v17129_v14  ;;  %v5980_v53 = vsel %vm752_vm3, %v17131_v25, %v5979_v34  ;;  %v17135_v25 = vld [vmem:[#allocation116_spill] sm:$0xff]  ;;  %v5970_v27 = vadd.f32 %v5952_v21, %v5932_v24  ;;  %v5984_v37 = vsel %vm752_vm3, %v5979_v34, %v5983_v9 }
 0x3f3   : > { %6907 = vmatprep.subr.mxu1 %v17130_v13  ;;  %6712 = vmatpush1.msra.mxu0 %v17132_v39  ;;  %v6001_v56 = vadd.f32 %v5980_v53, %v5967_v18  ;;  %v5969_v42 = vadd.f32 %v5950_v5, %v5931_v61  ;;  %v17138_v39 = vld [vmem:[#allocation125_spill] sm:$0xff]  ;;  %v5934_v29 = vadd.f32 %v5913_v26, %v13699_v2  ;;  %v17139_v41 = vld [vmem:[#allocation128_spill] sm:$0xff]  ;;  %v6025_v53 = vrot.slane %v6002_v33, 2  ;;  %v17142_v5 = vld [vmem:[#allocation139_spill] sm:$0xff] }
 0x3f4   : > { %6909 = vmatpush1.msra.mxu1 %v17133_v19  ;;  %6715 = vmatprep.subr.mxu0 %v17134_v55  ;;  %v5933_v18 = vadd.f32 %v5911_v59, %v13704_v3  ;;  %v17140_v24 = vld [vmem:[#allocation132_spill] sm:$0xff]  ;;  %v6004_v61 = vadd.f32 %v5986_v8, %v5970_v27  ;;  %v17143_v2 = vld [vmem:[#allocation145_spill] sm:$0xff]  ;;  %v17144_v3 = vrot.slane %v13568_v12, 2  ;;  %v17146_v8 = vld [vmem:[#allocation83_spill] sm:$0xff] }
 0x3f5   : > { %6911 = vmatprep.subr.mxu1 %v16133_v54  ;;  %6718 = vmatpush1.msra.mxu0 %v17135_v25  ;;  %v6023_v30 = vrot.slane %v6001_v56, 2  ;;  %v17141_v21 = vld [vmem:[#allocation136_spill] sm:$0xff]  ;;  %v6003_v34 = vadd.f32 %v5984_v37, %v5969_v42  ;;  %v5972_v26 = vadd.f32 %v5951_v57, %v5934_v29  ;;  %v17147_v42 = vrot.slane %v13572_v49, 2  ;;  %v17148_v57 = vld [vmem:[#allocation154_spill] sm:$0xff]  ;;  %v17149_v29 = vld [vmem:[#allocation87_spill] sm:$0xff] }
 0x3f6   : > { %6913 = vmatpush1.msra.mxu1 %v17136_v17  ;;  %6721 = vmatprep.subr.mxu0 %v17137_v51  ;;  %v6026_v59 = vsel %vm674_vm1, %v17144_v3, %v6025_v53  ;;  %v5971_v56 = vadd.f32 %v5949_v58, %v5933_v18  ;;  %v17145_v27 = vld [vmem:[#allocation148_spill] sm:$0xff]  ;;  %v17150_v12 = vld [vmem:[#allocation157_spill] sm:$0xff] }
 0x3f7   : > { %6915 = vmatprep.subr.mxu1 %v16138_v48  ;;  %6724 = vmatpush1.msra.mxu0 %v17138_v39  ;;  %v6024_v37 = vsel %vm674_vm1, %v17147_v42, %v6023_v30  ;;  %v13800_v58 = vand.u32 4294901760, %v6026_v59  ;;  %v6006_v18 = vadd.f32 %v5985_v0, %v5972_v26  ;;  %v17152_v3 = vld [vmem:[#allocation160_spill] sm:$0xff]  ;;  %v17158_v26 = vld [vmem:[#allocation171_spill] sm:$0xff]  ;;  %v17172_v55 = vld [vmem:[#allocation209_spill] sm:$0xff] }
 0x3f8   : > { %6917 = vmatpush1.msra.mxu1 %v16140_v31  ;;  %6727 = vmatprep.subr.mxu0 %v17139_v41  ;;  %v13804_v49 = vand.u32 4294901760, %v6024_v37  ;;  %v17155_v42 = vld [vmem:[#allocation164_spill] sm:$0xff]  ;;  %v17159_v41 = vld [vmem:[#allocation177_spill] sm:$0xff] }
 0x3f9   : > { %6919 = vmatprep.subr.mxu1 %v16142_v45  ;;  %6730 = vmatpush1.msra.mxu0 %v17140_v24  ;;  %17151 = vst [vmem:[#allocation179_spill] sm:$0xff] %v13800_v58  ;;  %v17161_v39 = vld [vmem:[#allocation180_spill] sm:$0xff] }
 0x3fa   : > { %6921 = vmatpush1.msra.mxu1 %v16144_v6  ;;  %6733 = vmatprep.subr.mxu0 %v17141_v21  ;;  %v6027_v21 = vrot.slane %v6003_v34, 2  ;;  %v17174_v14 = vld [vmem:[#allocation212_spill] sm:$0xff] }
 0x3fb   : > { %6923 = vmatprep.subr.mxu1 %v16146_v22  ;;  %6736 = vmatpush1.msra.mxu0 %v17142_v5  ;;  %v6029_v5 = vrot.slane %v6004_v61, 2  ;;  %v6005_v61 = vadd.f32 %v5983_v9, %v5971_v56 }
 0x3fc   : > { %6925 = vmatpush1.msra.mxu1 %v16149_v38  ;;  %6739 = vmatprep.subr.mxu0 %v17143_v2  ;;  %v4515_v33 = vpop.f32.mrf.mxu0  ;;  %v6028_v0 = vsel %vm674_vm1, %v6023_v30, %v6027_v21 }
 0x3fd   : > { %6927 = vmatprep.subr.mxu1 %v16151_v44  ;;  %6742 = vmatpush1.msra.mxu0 %v17145_v27  ;;  %v17153_v27 = vld [vmem:[#allocation94_spill] sm:$0xff]  ;;  %v6030_v34 = vsel %vm674_vm1, %v6025_v53, %v6029_v5  ;;  %v13820_v53 = vsub.f32 %v6024_v37, %v13804_v49  ;;  %v17164_v37 = vld [vmem:[#allocation189_spill] sm:$0xff] }
 0x3fe   : > { %6929 = vmatpush1.msra.mxu1 %v17146_v8  ;;  %6745 = vmatprep.subr.mxu0 %v17148_v57  ;;  %v4517_v2 = vpop.f32.mrf.mxu0  ;;  %17154 = vst [vmem:[#allocation94_spill] sm:$0xff] %v13804_v49  ;;  %v17156_v57 = vld [vmem:[#allocation97_spill] sm:$0xff] }
 0x3ff   : > { %6931 = vmatprep.subr.mxu1 %v17149_v29  ;;  %6748 = vmatpush1.msra.mxu0 %v17150_v12  ;;  %v17157_v12 = vld [vmem:[#allocation168_spill] sm:$0xff] }
 0x400   : > { %6933 = vmatpush1.msra.mxu1 %v16274_v15  ;;  %6751 = vmatprep.subr.mxu0 %v17152_v3  ;;  %v13815_v3 = vsub.f32 %v6026_v59, %v13800_v58  ;;  %v13828_v59 = vand.u32 4294901760, %v6028_v0 }
 0x401   : > { %6935 = vmatprep.subr.mxu1 %v17153_v27  ;;  %6754 = vmatpush2.msra.mxu0 %v17155_v42  ;;  %v4531_v24 = vpop.f32.mrf.mxu0  ;;  %v6033_v42 = vrot.slane %v6006_v18, 2  ;;  %v17163_v18 = vld [vmem:[#allocation186_spill] sm:$0xff] }
 0x402   : > { %6937 = vmatpush1.msra.mxu1 %v17156_v57  ;;  %6757 = vmatprep.subr.mxu0 %v17157_v12  ;;  %v13822_v12 = vand.u32 4294901760, %v6030_v34  ;;  %17162 = vst [vmem:[#allocation299_spill] sm:$0xff] %v13828_v59 }
 0x403   : > { %6939 = vmatprep.subr.mxu1 %v16280_v46  ;;  %6760 = vmatpush2.msra.mxu0 %v17158_v26  ;;  %v4948_v9 = vpop.f32.mrf.mxu1  ;;  %v4533_v56 = vpop.f32.mrf.mxu0  ;;  %v6031_v26 = vrot.slane %v6005_v61, 2  ;;  %v6034_v61 = vsel %vm674_vm1, %v6029_v5, %v6033_v42  ;;  %v17167_v42 = vld [vmem:[#allocation200_spill] sm:$0xff] }
 0x404   : > { %6941 = vmatpush1.msra.mxu1 %v16282_v40  ;;  %6763 = vmatprep.subr.mxu0 %v17159_v41  ;;  %17160 = vst [vmem:[#allocation97_spill] sm:$0xff] %v13822_v12  ;;  %v13824_v30 = vadd.f32 %v4948_v9, %v4515_v33  ;;  %v13848_v33 = vsub.f32 %v6028_v0, %v13828_v59 }
 0x405   : > { %6943 = vmatprep.subr.mxu1 %v16686_v16  ;;  %6766 = vmatpush2.msra.mxu0 %v17161_v39  ;;  %v4950_v51 = vpop.f32.mrf.mxu1  ;;  %v17165_v39 = vld [vmem:[#allocation192_spill] sm:$0xff] }
 0x406   : > { %6945 = vmatpush1.msra.mxu1 %v17031_v62  ;;  %6769 = vmatprep.subr.mxu0 %v17163_v18  ;;  %v13832_v41 = vadd.f32 %v4950_v51, %v4517_v2  ;;  %v13842_v18 = vsub.f32 %v6030_v34, %v13822_v12  ;;  %v6032_v51 = vsel %vm674_vm1, %v6027_v21, %v6031_v26  ;;  %v17166_v2 = vld [vmem:[#allocation196_spill] sm:$0xff]  ;;  %v17170_v21 = vand.u32 4294901760, %v13815_v3 }
 0x407   : > { %6947 = vmatprep.subr.mxu1 %v17033_v43  ;;  %6772 = vmatpush2.msra.mxu0 %v17164_v37  ;;  %v4547_v9 = vpop.f32.mrf.mxu0  ;;  %v17169_v37 = vld [vmem:[#allocation203_spill] sm:$0xff]  ;;  %v13861_v0 = vand.u32 4294901760, %v6032_v51 }
 0x408   : > { %6949 = vmatpush1.msra.mxu1 %v17035_v11  ;;  %6775 = vmatprep.subr.mxu0 %v17165_v39  ;;  %v13852_v39 = vand.u32 4294901760, %v6034_v61  ;;  %v6190_v26 = vsub.f32 %v13815_v3, %v17170_v21  ;;  %v17177_v21 = vld [vmem:[#allocation224_spill] sm:$0xff] }
 0x409   : > { %6951 = vmatprep.subr.mxu1 %v17038_v47  ;;  %6778 = vmatpush2.msra.mxu0 %v17166_v2  ;;  %v4956_v5 = vpop.f32.mrf.mxu1  ;;  %v4549_v34 = vpop.f32.mrf.mxu0  ;;  %17171 = vst [vmem:[#allocation301_spill] sm:$0xff] %v13861_v0 }
 0x40a   : > { %6953 = vmatpush2.msra.mxu1 %v17040_v50  ;;  %6781 = vmatprep.subr.mxu0 %v17167_v42  ;;  %17168 = vst [vmem:[#allocation300_spill] sm:$0xff] %v13852_v39  ;;  %v13854_v25 = vadd.f32 %v4956_v5, %v4531_v24  ;;  %v17173_v42 = vand.u32 4294901760, %v13820_v53 }
 0x40b   : > { %6955 = vmatprep.subr.mxu1 %v17042_v23  ;;  %6784 = vmatpush2.msra.mxu0 %v17169_v37  ;;  %v4958_v2 = vpop.f32.mrf.mxu1  ;;  %v17176_v23 = vld [vmem:[#allocation221_spill] sm:$0xff] }
 0x40c   : > { %6957 = vmatpush2.msra.mxu1 %v16938_v63  ;;  %6787 = vmatprep.subr.mxu0 %v17172_v55  ;;  %v6196_v24 = vsub.f32 %v13820_v53, %v17173_v42  ;;  %v13869_v37 = vadd.f32 %v4958_v2, %v4533_v56  ;;  %v17175_v63 = vld [vmem:[#allocation218_spill] sm:$0xff]  ;;  %v13877_v55 = vsub.f32 %v6034_v61, %v13852_v39  ;;  %v6191_v56 = vand.u32 4294901760, %v6190_v26  ;;  %v17180_v26 = vld [vmem:[#allocation161_spill] sm:$0xff] }
 0x40d   : > { %6959 = vmatprep.subr.mxu1 %v16940_v4  ;;  %6790 = vmatpush2.msra.mxu0 %v17174_v14  ;;  %v13882_v2 = vsub.f32 %v6032_v51, %v13861_v0  ;;  %v17178_v61 = vand.u32 4294901760, %v13842_v18  ;;  %v17181_v51 = vand.u32 4294901760, %v13848_v33 }
 0x40e   : > { %6961 = vmatpush2.msra.mxu1 %v17046_v35  ;;  %6793 = vmatprep.subr.mxu0 %v17175_v63  ;;  %v5167_v4 = vpop.f32.mrf.mxu0  ;;  %v6197_v63 = vand.u32 4294901760, %v6196_v24  ;;  %v17179_v35 = vld [vmem:[#allocation228_spill] sm:$0xff]  ;;  %v17183_v24 = vld [vmem:[#allocation165_spill] sm:$0xff] }
 0x40f   : > { %6963 = vmatprep.subr.mxu1 %v16944_v60  ;;  %6796 = vmatpush2.msra.mxu0 %v17176_v23  ;;  %v5168_v42 = vadd.f32 %v5167_v4, %v13624_v7  ;;  %v4964_v5 = vpop.f32.mrf.mxu1  ;;  %v6206_v14 = vsub.f32 %v13842_v18, %v17178_v61  ;;  %v6212_v4 = vsub.f32 %v13848_v33, %v17181_v51 }
 0x410   : > { %6965 = vmatpush2.msra.mxu1 %v17049_v52  ;;  %6799 = vmatprep.subr.mxu0 %v17177_v21  ;;  %v4965_v60 = vadd.f32 %v4964_v5, %v4547_v9  ;;  %v5169_v23 = vpop.f32.mrf.mxu0  ;;  %v17182_v52 = vld [vmem:[#allocation232_spill] sm:$0xff]  ;;  %v17184_v9 = vld [vmem:[#allocation235_spill] sm:$0xff]  ;;  %v15754_v5 = vand.u32 4294901760, %v13882_v2 }
 0x411   : > { %6967 = vmatprep.subr.mxu1 %v17051_v28  ;;  %6802 = vmatpush2.msra.mxu0 %v17179_v35  ;;  %v5170_v7 = vadd.f32 %v5169_v23, %v13631_v36  ;;  %v4966_v21 = vpop.f32.mrf.mxu1  ;;  %v15753_v28 = vand.u32 4294901760, %v13877_v55  ;;  %v6207_v35 = vand.u32 4294901760, %v6206_v14  ;;  %v6213_v23 = vand.u32 4294901760, %v6212_v4  ;;  %v17188_v14 = vld [vmem:[#allocation183_spill] sm:$0xff] }
 0x412   : > { %6969 = vmatpush2.msra.mxu1 %v17180_v26  ;;  %6805 = vmatprep.subr.mxu0 %v17182_v52  ;;  %v4967_v61 = vadd.f32 %v4966_v21, %v4549_v34  ;;  %v17185_v26 = vld [vmem:[#allocation241_spill] sm:$0xff]  ;;  %v17186_v52 = vld [vmem:[#allocation244_spill] sm:$0xff] }
 0x413   : > { %6971 = vmatprep.subr.mxu1 %v17183_v24  ;;  %6192 = vmatprep.mubr.f32.mxu0 %v6191_v56  ;;  %v6222_v34 = vsub.f32 %v13877_v55, %v15753_v28  ;;  %v17187_v56 = vld [vmem:[#allocation250_spill] sm:$0xff]  ;;  %v17191_v28 = vld [vmem:[#allocation260_spill] sm:$0xff] }
 0x414   : > { %6808 = vmatpush2.msra.mxu0 %v17184_v9  ;;  %6973 = vmatpush2.msra.mxu1 %v17057_v20  ;;  %v5177_v51 = vpop.f32.mrf.mxu0 }
 0x415   : > { %6198 = vmatmul.mubr.f32.gmra.mxu0 %v6197_v63  ;;  %6811 = vmatprep.subr.mxu0 %v17185_v26  ;;  %v5178_v36 = vadd.f32 %v5177_v51, %v13824_v30  ;;  %v6228_v63 = vsub.f32 %v13882_v2, %v15754_v5  ;;  %v17189_v30 = vld [vmem:[#allocation253_spill] sm:$0xff]  ;;  %v17190_v51 = vld [vmem:[#allocation187_spill] sm:$0xff]  ;;  %v17192_v5 = vld [vmem:[#allocation190_spill] sm:$0xff] }
 0x416   : > { %6975 = vmatprep.subr.mxu1 %v17059_v1  ;;  %6814 = vmatpush2.msra.mxu0 %v17186_v52  ;;  %v5179_v21 = vpop.f32.mrf.mxu0 }
 0x417   : > { %6977 = vmatpush2.msra.mxu1 %v17062_v32  ;;  %6817 = vmatprep.subr.mxu0 %v17187_v56  ;;  %v5180_v4 = vadd.f32 %v5179_v21, %v13832_v41  ;;  %v6223_v56 = vand.u32 4294901760, %v6222_v34  ;;  %v17195_v34 = vld [vmem:[#allocation264_spill] sm:$0xff] }
 0x418   : > { %6979 = vmatprep.subr.mxu1 %v17188_v14  ;;  %6208 = vmatprep.mubr.f32.mxu0 %v6207_v35  ;;  %v6229_v35 = vand.u32 4294901760, %v6228_v63 }
 0x419   : > { %6820 = vmatpush2.msra.mxu0 %v17189_v30  ;;  %6981 = vmatpush2.msra.mxu1 %v17190_v51  ;;  %v5187_v52 = vpop.f32.mrf.mxu0  ;;  %v5338_v26 = vpop.f32.mrf.mxu1  ;;  %v17193_v30 = vld [vmem:[#allocation263_spill] sm:$0xff] }
 0x41a   : > { %6214 = vmatmul.mubr.f32.gmra.mxu0 %v6213_v23  ;;  %6629 = vmatprep.mubr.f32.mxu1 %v13800_v58  ;;  %v5188_v9 = vadd.f32 %v5187_v52, %v13854_v25  ;;  %v13921_v14 = vadd.f32 %v5338_v26, %v5168_v42  ;;  %v17194_v23 = vld [vmem:[#allocation193_spill] sm:$0xff]  ;;  %v17197_v25 = vld [vmem:[#allocation268_spill] sm:$0xff]  ;;  %v17198_v42 = vld [vmem:[#allocation202_spill] sm:$0xff] }
 0x41b   : > { %6823 = vmatprep.subr.mxu0 %v17191_v28  ;;  %6983 = vmatprep.subr.mxu1 %v17192_v5  ;;  %v5189_v41 = vpop.f32.mrf.mxu0  ;;  %v5340_v21 = vpop.f32.mrf.mxu1  ;;  %v17196_v52 = vld [vmem:[#allocation197_spill] sm:$0xff] }
 0x41c   : > { %6631 = vmatmul.mubr.f32.gmra.mxu1 %v13804_v49  ;;  %6826 = vmatpush2.msra.mxu0 %v17193_v30  ;;  %v5190_v58 = vadd.f32 %v5189_v41, %v13869_v37  ;;  %v13928_v51 = vadd.f32 %v5340_v21, %v5170_v7  ;;  %v17199_v30 = vld [vmem:[#allocation269_spill] sm:$0xff]  ;;  %v17200_v7 = vld [vmem:[#allocation206_spill] sm:$0xff] }
 0x41d   : > { %6985 = vmatpush2.msra.mxu1 %v17194_v23  ;;  %6829 = vmatprep.subr.mxu0 %v17195_v34  ;;  %v17201_v21 = vld [vmem:[#allocation270_spill] sm:$0xff]  ;;  %v17203_v49 = vld [vmem:[#allocation277_spill] sm:$0xff] }
 0x41e   : > { %6987 = vmatprep.subr.mxu1 %v17196_v52  ;;  %6224 = vmatprep.mubr.f32.mxu0 %v6223_v56 }
 0x41f   : > { %6832 = vmatpush2.msra.mxu0 %v17197_v25  ;;  %6989 = vmatpush2.msra.mxu1 %v17198_v42  ;;  %v5197_v26 = vpop.f32.mrf.mxu0  ;;  %v5350_v63 = vpop.f32.mrf.mxu1  ;;  %v17202_v25 = vld [vmem:[#allocation211_spill] sm:$0xff] }
 0x420   : > { %6230 = vmatmul.mubr.f32.gmra.mxu0 %v6229_v35  ;;  %6637 = vmatprep.mubr.f32.mxu1 %v13822_v12  ;;  %v5198_v28 = vadd.f32 %v5197_v26, %v4965_v60  ;;  %v13936_v37 = vadd.f32 %v5350_v63, %v5178_v36  ;;  %v17204_v12 = vld [vmem:[#allocation215_spill] sm:$0xff]  ;;  %v17205_v60 = vld [vmem:[#allocation278_spill] sm:$0xff] }
 0x421   : > { %6835 = vmatprep.subr.mxu0 %v17199_v30  ;;  %6991 = vmatprep.subr.mxu1 %v17200_v7  ;;  %v5199_v41 = vpop.f32.mrf.mxu0  ;;  %v5352_v56 = vpop.f32.mrf.mxu1  ;;  %v17206_v36 = vld [vmem:[#allocation115_spill] sm:$0xff] }
 0x422   : > { %6639 = vmatmul.mubr.f32.gmra.mxu1 %v13828_v59  ;;  %6838 = vmatpush2.msra.mxu0 %v17201_v21  ;;  %v5200_v35 = vadd.f32 %v5199_v41, %v4967_v61  ;;  %v13942_v34 = vadd.f32 %v5352_v56, %v5180_v4  ;;  %v17207_v26 = vld [vmem:[#allocation219_spill] sm:$0xff]  ;;  %v17209_v21 = vld [vmem:[#allocation222_spill] sm:$0xff]  ;;  %v17211_v56 = vld [vmem:[#allocation225_spill] sm:$0xff] }
 0x423   : > { %6993 = vmatpush2.msra.mxu1 %v17202_v25  ;;  %6841 = vmatprep.subr.mxu0 %v17203_v49  ;;  %v17208_v30 = vld [vmem:[#allocation119_spill] sm:$0xff]  ;;  %v17210_v4 = vld [vmem:[#allocation42_spill] sm:$0xff]  ;;  %v17213_v59 = vld [vmem:[#allocation229_spill] sm:$0xff] }
 0x424   : > { %6995 = vmatprep.subr.mxu1 %v17204_v12  ;;  %6844 = vmatpush2.msra.mxu0 %v17205_v60  ;;  %v17212_v60 = vld [vmem:[#allocation43_spill] sm:$0xff] }
 0x425   : > { %6847 = vmatprep.mubr.f32.mxu0 %v17206_v36  ;;  %6997 = vmatpush2.msra.mxu1 %v17207_v26  ;;  %v5362_v63 = vpop.f32.mrf.mxu1 }
 0x426   : > { %6645 = vmatprep.mubr.f32.mxu1 %v13852_v39  ;;  %6850 = vmatmul.mubr.f32.vlgmr.msra.gmra.mxu0 %v17208_v30  ;;  %v13952_v61 = vadd.f32 %v5362_v63, %v5188_v9  ;;  %v17214_v39 = vld [vmem:[#allocation46_spill] sm:$0xff]  ;;  %v17216_v63 = vld [vmem:[#allocation48_spill] sm:$0xff] }
 0x427   : > { %6999 = vmatprep.subr.mxu1 %v17209_v21  ;;  %7066 = vmatprep.subr.mxu0 %v17210_v4  ;;  %v5364_v41 = vpop.f32.mrf.mxu1  ;;  %v17215_v21 = vld [vmem:[#allocation234_spill] sm:$0xff] }
 0x428   : > { %6647 = vmatmul.mubr.f32.gmra.mxu1 %v13861_v0  ;;  %7070 = vmatpush1.msra.mxu0 %v17212_v60  ;;  %v13958_v49 = vadd.f32 %v5364_v41, %v5190_v58  ;;  %v17217_v4 = vld [vmem:[#allocation238_spill] sm:$0xff]  ;;  %v17218_v60 = vld [vmem:[#allocation55_spill] sm:$0xff] }
 0x429   : > { %7001 = vmatpush2.msra.mxu1 %v17211_v56  ;;  %7074 = vmatprep.subr.mxu0 %v17214_v39  ;;  %v17219_v41 = vld [vmem:[#allocation243_spill] sm:$0xff] }
 0x42a   : > { %7003 = vmatprep.subr.mxu1 %v17213_v59  ;;  %6857 = vmatprep.mubr.f32.mxu0 %v13815_v3  ;;  %v5374_v9 = vpop.f32.mrf.mxu1  ;;  %v17220_v59 = vld [vmem:[#allocation57_spill] sm:$0xff]  ;;  %v17221_v56 = vld [vmem:[#allocation247_spill] sm:$0xff] }
 0x42b   : > { %7005 = vmatpush2.msra.mxu1 %v17215_v21  ;;  %7078 = vmatpush1.msra.mxu0 %v17216_v63  ;;  %v13966_v0 = vadd.f32 %v5374_v9, %v5198_v28  ;;  %v17222_v21 = vld [vmem:[#allocation63_spill] sm:$0xff]  ;;  %v17224_v28 = vand.u32 4294901760, %v17206_v36  ;;  %v17233_v36 = vand.u32 4294901760, %v13815_v3  ;;  %v17242_v3 = vld [vmem:[#allocation34_spill] sm:$0xff] }
 0x42c   : > { %7007 = vmatprep.subr.mxu1 %v17217_v4  ;;  %6860 = vmatmul.mubr.f32.gmra.mxu0 %v13820_v53  ;;  %v5376_v58 = vpop.f32.mrf.mxu1  ;;  %v17223_v63 = vld [vmem:[#allocation251_spill] sm:$0xff] }
 0x42d   : > { %7082 = vmatprep.subr.mxu0 %v17218_v60  ;;  %7009 = vmatpush2.msra.mxu1 %v17219_v41  ;;  %v13972_v39 = vadd.f32 %v5376_v58, %v5200_v35  ;;  %v17225_v9 = vld [vmem:[#allocation67_spill] sm:$0xff]  ;;  %v17226_v60 = vand.u32 4294901760, %v17208_v30  ;;  %v17228_v58 = vld [vmem:[#allocation28_spill] sm:$0xff] }
 0x42e   : > { %7086 = vmatpush1.msra.mxu0 %v17220_v59  ;;  %7011 = vmatprep.subr.mxu1 %v17221_v56  ;;  %v17227_v35 = vld [vmem:[#allocation71_spill] sm:$0xff]  ;;  %v17229_v59 = vld [vmem:[#allocation73_spill] sm:$0xff] }
 0x42f   : > { %7090 = vmatprep.subr.mxu0 %v17222_v21  ;;  %6867 = vmatprep.mubr.f32.mxu0 %v13842_v18  ;;  %v17230_v21 = vld [vmem:[#allocation29_spill] sm:$0xff]  ;;  %v17235_v30 = vld [vmem:[#allocation31_spill] sm:$0xff] }
 0x430   : > { %7013 = vmatpush2.msra.mxu1 %v17223_v63  ;;  %7017 = vmatprep.mubr.f32.mxu1 %v17224_v28  ;;  %v17231_v56 = vld [vmem:[#allocation77_spill] sm:$0xff]  ;;  %v17232_v63 = vld [vmem:[#allocation30_spill] sm:$0xff]  ;;  %v17234_v28 = vld [vmem:[#allocation80_spill] sm:$0xff] }
 0x431   : > { %7094 = vmatpush1.msra.mxu0 %v17225_v9  ;;  %7021 = vmatmul.mubr.f32.vlgmr.msra.gmra.mxu1 %v17226_v60  ;;  %v17236_v60 = vand.u32 4294901760, %v13820_v53  ;;  %v17240_v9 = vld [vmem:[#allocation33_spill] sm:$0xff]  ;;  %v17241_v41 = vld [vmem:[#allocation95_spill] sm:$0xff] }
 0x432   : > { %6870 = vmatmul.mubr.f32.gmra.mxu0 %v13848_v33  ;;  %7098 = vmatprep.subr.mxu0 %v17227_v35  ;;  %v17238_v35 = vld [vmem:[#allocation32_spill] sm:$0xff]  ;;  %v17245_v4 = vld [vmem:[#allocation35_spill] sm:$0xff] }
 0x433   : > { %7353 = vmatprep.subr.mxu1 %v17228_v58  ;;  %7102 = vmatpush1.msra.mxu0 %v17229_v59  ;;  %v17237_v59 = vld [vmem:[#allocation86_spill] sm:$0xff]  ;;  %v17246_v53 = vld [vmem:[#allocation103_spill] sm:$0xff] }
 0x434   : > { %7355 = vmatpush1.msra.mxu1 %v17230_v21  ;;  %7106 = vmatprep.subr.mxu0 %v17231_v56  ;;  %v17239_v56 = vld [vmem:[#allocation89_spill] sm:$0xff] }
 0x435   : > { %7357 = vmatprep.subr.mxu1 %v17232_v63  ;;  %6877 = vmatprep.mubr.f32.mxu0 %v13877_v55 }
 0x436   : > { %7029 = vmatprep.mubr.f32.mxu1 %v17233_v36  ;;  %7110 = vmatpush1.msra.mxu0 %v17234_v28  ;;  %v17243_v36 = vand.u32 4294901760, %v13842_v18  ;;  %v17244_v28 = vld [vmem:[#allocation99_spill] sm:$0xff]  ;;  %v17251_v18 = vand.u32 4294901760, %v13877_v55 }
 0x437   : > { %7359 = vmatpush1.msra.mxu1 %v17235_v30  ;;  %6880 = vmatmul.mubr.f32.gmra.mxu0 %v13882_v2  ;;  %v17257_v55 = vld [vmem:[#allocation131_spill] sm:$0xff] }
 0x438   : > { %7033 = vmatmul.mubr.f32.gmra.mxu1 %v17236_v60  ;;  %7114 = vmatprep.subr.mxu0 %v17237_v59  ;;  %v17247_v60 = vand.u32 4294901760, %v13848_v33  ;;  %v17248_v59 = vld [vmem:[#allocation36_spill] sm:$0xff]  ;;  %v17254_v33 = vand.u32 4294901760, %v13882_v2  ;;  %v17259_v2 = vld [vmem:[#allocation137_spill] sm:$0xff] }
 0x439   : > { %7361 = vmatprep.subr.mxu1 %v17238_v35  ;;  %7118 = vmatpush1.msra.mxu0 %v17239_v56  ;;  %v17249_v56 = vld [vmem:[#allocation105_spill] sm:$0xff] }
 0x43a   : > { %7363 = vmatpush1.msra.mxu1 %v17240_v9  ;;  %7122 = vmatprep.subr.mxu0 %v17241_v41  ;;  %v17250_v41 = vld [vmem:[#allocation109_spill] sm:$0xff] }
 0x43b   : > { %7365 = vmatprep.subr.mxu1 %v17242_v3  ;;  %7041 = vmatprep.mubr.f32.mxu1 %v17243_v36  ;;  %v17252_v36 = vld [vmem:[#allocation112_spill] sm:$0xff] }
 0x43c   : > { %7126 = vmatpush1.msra.mxu0 %v17244_v28  ;;  %7367 = vmatpush1.msra.mxu1 %v17245_v4  ;;  %v17280_v28 = vld [vmem:[#allocation214_spill] sm:$0xff] }
 0x43d   : > { %7130 = vmatprep.subr.mxu0 %v17246_v53  ;;  %7045 = vmatmul.mubr.f32.gmra.mxu1 %v17247_v60  ;;  %v17253_v53 = vld [vmem:[#allocation118_spill] sm:$0xff]  ;;  %v17255_v60 = vld [vmem:[#allocation121_spill] sm:$0xff] }
 0x43e   : > { %7369 = vmatprep.subr.mxu1 %v17248_v59  ;;  %7134 = vmatpush1.msra.mxu0 %v17249_v56  ;;  %v17278_v56 = vld [vmem:[#allocation208_spill] sm:$0xff] }
 0x43f   : > { %7371 = vmatpush1.msra.mxu1 %v16783_v10  ;;  %7138 = vmatprep.subr.mxu0 %v17250_v41  ;;  %v17256_v41 = vld [vmem:[#allocation127_spill] sm:$0xff] }
 0x440   : > { %7373 = vmatprep.subr.mxu1 %v17130_v13  ;;  %7053 = vmatprep.mubr.f32.mxu1 %v17251_v18  ;;  %v17258_v18 = vld [vmem:[#allocation135_spill] sm:$0xff] }
 0x441   : > { %7142 = vmatpush1.msra.mxu0 %v17252_v36  ;;  %7375 = vmatpush1.msra.mxu1 %v17133_v19 }
 0x442   : > { %7146 = vmatprep.subr.mxu0 %v17253_v53  ;;  %7057 = vmatmul.mubr.f32.gmra.mxu1 %v17254_v33  ;;  %v17260_v33 = vld [vmem:[#allocation141_spill] sm:$0xff] }
 0x443   : > { %7377 = vmatprep.subr.mxu1 %v16133_v54  ;;  %7150 = vmatpush1.msra.mxu0 %v17255_v60  ;;  %v17261_v60 = vld [vmem:[#allocation144_spill] sm:$0xff]  ;;  %v17276_v53 = vld [vmem:[#allocation205_spill] sm:$0xff] }
 0x444   : > { %7379 = vmatpush1.msra.mxu1 %v17136_v17  ;;  %7154 = vmatprep.subr.mxu0 %v17256_v41  ;;  %v17262_v41 = vld [vmem:[#allocation150_spill] sm:$0xff] }
 0x445   : > { %7381 = vmatprep.subr.mxu1 %v16138_v48  ;;  %7158 = vmatpush1.msra.mxu0 %v17257_v55  ;;  %v17263_v55 = vld [vmem:[#allocation153_spill] sm:$0xff] }
 0x446   : > { %7383 = vmatpush1.msra.mxu1 %v16140_v31  ;;  %7162 = vmatprep.subr.mxu0 %v17258_v18  ;;  %v17264_v18 = vld [vmem:[#allocation159_spill] sm:$0xff] }
 0x447   : > { %7385 = vmatprep.subr.mxu1 %v16142_v45  ;;  %7166 = vmatpush1.msra.mxu0 %v17259_v2  ;;  %v17265_v2 = vld [vmem:[#allocation163_spill] sm:$0xff] }
 0x448   : > { %7387 = vmatpush1.msra.mxu1 %v16144_v6  ;;  %7170 = vmatprep.subr.mxu0 %v17260_v33  ;;  %v17266_v33 = vld [vmem:[#allocation167_spill] sm:$0xff] }
 0x449   : > { %7389 = vmatprep.subr.mxu1 %v16146_v22  ;;  %7174 = vmatpush1.msra.mxu0 %v17261_v60  ;;  %v17267_v60 = vld [vmem:[#allocation169_spill] sm:$0xff] }
 0x44a   : > { %7391 = vmatpush1.msra.mxu1 %v16149_v38  ;;  %7178 = vmatprep.subr.mxu0 %v17262_v41  ;;  %v17268_v41 = vld [vmem:[#allocation173_spill] sm:$0xff] }
 0x44b   : > { %7393 = vmatprep.subr.mxu1 %v16151_v44  ;;  %7182 = vmatpush1.msra.mxu0 %v17263_v55  ;;  %v17269_v55 = vld [vmem:[#allocation176_spill] sm:$0xff] }
 0x44c   : > { %7395 = vmatpush1.msra.mxu1 %v17146_v8  ;;  %7186 = vmatprep.subr.mxu0 %v17264_v18  ;;  %v17270_v18 = vld [vmem:[#allocation182_spill] sm:$0xff] }
 0x44d   : > { %7397 = vmatprep.subr.mxu1 %v17149_v29  ;;  %7190 = vmatpush1.msra.mxu0 %v17265_v2  ;;  %v17271_v2 = vld [vmem:[#allocation185_spill] sm:$0xff] }
 0x44e   : > { %7399 = vmatpush1.msra.mxu1 %v16274_v15  ;;  %7194 = vmatprep.subr.mxu0 %v17266_v33  ;;  %v17272_v33 = vld [vmem:[#allocation191_spill] sm:$0xff] }
 0x44f   : > { %7401 = vmatprep.subr.mxu1 %v17153_v27  ;;  %7198 = vmatpush2.msra.mxu0 %v17267_v60  ;;  %v17273_v60 = vld [vmem:[#allocation195_spill] sm:$0xff] }
 0x450   : > { %7403 = vmatpush1.msra.mxu1 %v17156_v57  ;;  %7202 = vmatprep.subr.mxu0 %v17268_v41  ;;  %v17274_v41 = vld [vmem:[#allocation199_spill] sm:$0xff] }
 0x451   : > { %7405 = vmatprep.subr.mxu1 %v16280_v46  ;;  %7206 = vmatpush2.msra.mxu0 %v17269_v55 }
 0x452   : > { %7407 = vmatpush1.msra.mxu1 %v16282_v40  ;;  %7210 = vmatprep.subr.mxu0 %v17270_v18  ;;  %v17275_v18 = vld [vmem:[#allocation201_spill] sm:$0xff] }
 0x453   : > { %7409 = vmatprep.subr.mxu1 %v16686_v16  ;;  %7214 = vmatpush2.msra.mxu0 %v17271_v2 }
 0x454   : > { %7411 = vmatpush1.msra.mxu1 %v17031_v62  ;;  %7218 = vmatprep.subr.mxu0 %v17272_v33  ;;  %v17277_v33 = vld [vmem:[#allocation133_spill] sm:$0xff] }
 0x455   : > { %7413 = vmatprep.subr.mxu1 %v17033_v43  ;;  %7222 = vmatpush2.msra.mxu0 %v17273_v60  ;;  %v17279_v60 = vld [vmem:[#allocation138_spill] sm:$0xff] }
 0x456   : > { %7415 = vmatpush1.msra.mxu1 %v17035_v11  ;;  %7226 = vmatprep.subr.mxu0 %v17274_v41  ;;  %v5639_v55 = vpop.f32.mrf.mxu0 }
 0x457   : > { %7417 = vmatprep.subr.mxu1 %v17038_v47  ;;  %7230 = vmatpush2.msra.mxu0 %v17275_v18  ;;  %v5640_v2 = vadd.f32 %v5639_v55, %v13921_v14  ;;  %v17281_v47 = vld [vmem:[#allocation142_spill] sm:$0xff]  ;;  %v17282_v18 = vld [vmem:[#allocation217_spill] sm:$0xff]  ;;  %v17284_v14 = vld [vmem:[#allocation223_spill] sm:$0xff] }
 0x458   : > { %7419 = vmatpush2.msra.mxu1 %v17040_v50  ;;  %7234 = vmatprep.subr.mxu0 %v17276_v53  ;;  %v5641_v36 = vpop.f32.mrf.mxu0  ;;  %v17283_v50 = vld [vmem:[#allocation147_spill] sm:$0xff] }
 0x459   : > { %7421 = vmatprep.subr.mxu1 %v17277_v33  ;;  %7238 = vmatpush2.msra.mxu0 %v17278_v56  ;;  %v5642_v41 = vadd.f32 %v5641_v36, %v13928_v51  ;;  %v17285_v55 = vld [vmem:[#allocation151_spill] sm:$0xff]  ;;  %v17289_v36 = vld [vmem:[#allocation158_spill] sm:$0xff] }
 0x45a   : > { %7423 = vmatpush2.msra.mxu1 %v17279_v60  ;;  %7242 = vmatprep.subr.mxu0 %v17280_v28  ;;  %v17286_v33 = vld [vmem:[#allocation227_spill] sm:$0xff] }
 0x45b   : > { %7425 = vmatprep.subr.mxu1 %v17281_v47  ;;  %7246 = vmatpush2.msra.mxu0 %v17282_v18  ;;  %v17287_v56 = vld [vmem:[#allocation155_spill] sm:$0xff]  ;;  %v17290_v47 = vld [vmem:[#allocation233_spill] sm:$0xff] }
 0x45c   : > { %7427 = vmatpush2.msra.mxu1 %v17283_v50  ;;  %7250 = vmatprep.subr.mxu0 %v17284_v14  ;;  %v5647_v53 = vpop.f32.mrf.mxu0  ;;  %v17288_v51 = vld [vmem:[#allocation231_spill] sm:$0xff]  ;;  %v17291_v18 = vld [vmem:[#allocation161_spill] sm:$0xff] }
 0x45d   : > { %7429 = vmatprep.subr.mxu1 %v17285_v55  ;;  %7254 = vmatpush2.msra.mxu0 %v17286_v33  ;;  %v5648_v60 = vadd.f32 %v5647_v53, %v13936_v37  ;;  %v17292_v50 = vld [vmem:[#allocation237_spill] sm:$0xff]  ;;  %v17293_v33 = vld [vmem:[#allocation240_spill] sm:$0xff] }
 0x45e   : > { %7431 = vmatpush2.msra.mxu1 %v17287_v56  ;;  %7258 = vmatprep.subr.mxu0 %v17288_v51  ;;  %v5649_v28 = vpop.f32.mrf.mxu0  ;;  %v17294_v51 = vld [vmem:[#allocation246_spill] sm:$0xff] }
 0x45f   : > { %7433 = vmatprep.subr.mxu1 %v17289_v36  ;;  %7262 = vmatpush2.msra.mxu0 %v17290_v47  ;;  %v5650_v14 = vadd.f32 %v5649_v28, %v13942_v34 }
 0x460   : > { %7435 = vmatpush2.msra.mxu1 %v17291_v18  ;;  %7266 = vmatprep.subr.mxu0 %v17292_v50  ;;  %v17296_v18 = vld [vmem:[#allocation249_spill] sm:$0xff]  ;;  %v17297_v50 = vld [vmem:[#allocation254_spill] sm:$0xff] }
 0x461   : > { %7437 = vmatprep.subr.mxu1 %v17183_v24  ;;  %7270 = vmatpush2.msra.mxu0 %v17293_v33  ;;  %v5655_v37 = vpop.f32.mrf.mxu0  ;;  %v5800_v53 = vpop.f32.mrf.mxu1  ;;  %v17298_v33 = vld [vmem:[#allocation183_spill] sm:$0xff] }
 0x462   : > { %7439 = vmatpush2.msra.mxu1 %v17057_v20  ;;  %7274 = vmatprep.subr.mxu0 %v17294_v51  ;;  %v5656_v47 = vadd.f32 %v5655_v37, %v13952_v61  ;;  %v14093_v36 = vadd.f32 %v5800_v53, %v5640_v2  ;;  %v17300_v51 = vld [vmem:[#allocation256_spill] sm:$0xff]  ;;  %v17302_v61 = vld [vmem:[#allocation261_spill] sm:$0xff]  ;;  %v17303_v2 = vld [vmem:[#allocation266_spill] sm:$0xff] }
 0x463   : > { %7441 = vmatprep.subr.mxu1 %v17059_v1  ;;  %7278 = vmatpush2.msra.mxu0 %v17296_v18  ;;  %v5657_v34 = vpop.f32.mrf.mxu0  ;;  %v5802_v28 = vpop.f32.mrf.mxu1  ;;  %v17301_v1 = vld [vmem:[#allocation187_spill] sm:$0xff] }
 0x464   : > { %17295 = vst [vmem:[#allocation190_spill] sm:$0xff] %v14093_v36  ;;  %7443 = vmatpush2.msra.mxu1 %v17062_v32  ;;  %7282 = vmatprep.subr.mxu0 %v17297_v50  ;;  %v5658_v20 = vadd.f32 %v5657_v34, %v13958_v49  ;;  %v14100_v24 = vadd.f32 %v5802_v28, %v5642_v41  ;;  %v17304_v36 = vld [vmem:[#allocation267_spill] sm:$0xff]  ;;  %v9701_v50 = vld [vmem:[#allocation3] sm:$0xff] }
 0x465   : > { %7445 = vmatprep.subr.mxu1 %v17298_v33  ;;  %7286 = vmatpush2.msra.mxu0 %v17300_v51  ;;  %v17306_v34 = vld [vmem:[#allocation271_spill] sm:$0xff]  ;;  %v3968_v18 = vmul.f32 %v9701_v50, %v9701_v50 }
 0x466   : > { %17299 = vst [vmem:[#allocation193_spill] sm:$0xff] %v14100_v24  ;;  %7447 = vmatpush2.msra.mxu1 %v17301_v1  ;;  %7290 = vmatprep.subr.mxu0 %v17302_v61  ;;  %v17307_v61 = vld [vmem:[#allocation272_spill] sm:$0xff]  ;;  %v9706_v50 = vld [vmem:[#allocation3 + $0x28] sm:$0xff] }
 0x467   : > { %7449 = vmatprep.subr.mxu1 %v17192_v5  ;;  %7294 = vmatpush2.msra.mxu0 %v17303_v2  ;;  %v5663_v37 = vpop.f32.mrf.mxu0 }
 0x468   : > { %7451 = vmatpush2.msra.mxu1 %v17194_v23  ;;  %v5808_v53 = vpop.f32.mrf.mxu1  ;;  %7298 = vmatprep.subr.mxu0 %v17304_v36  ;;  %v5664_v49 = vadd.f32 %v5663_v37, %v13966_v0  ;;  %v17309_v36 = vld [vmem:[#allocation273_spill] sm:$0xff]  ;;  %v17310_v0 = vld [vmem:[#allocation282_spill] sm:$0xff] }
 0x469   : > { %7453 = vmatprep.subr.mxu1 %v17196_v52  ;;  %v14111_v41 = vadd.f32 %v5808_v53, %v5648_v60  ;;  %7302 = vmatpush2.msra.mxu0 %v17306_v34  ;;  %v5665_v28 = vpop.f32.mrf.mxu0  ;;  %v17311_v60 = vld [vmem:[#allocation283_spill] sm:$0xff]  ;;  %v17312_v37 = vld [vmem:[#allocation297_spill] sm:$0xff] }
 0x46a   : > { %7455 = vmatpush2.msra.mxu1 %v17198_v42  ;;  %v5810_v24 = vpop.f32.mrf.mxu1  ;;  %7306 = vmatprep.subr.mxu0 %v17307_v61  ;;  %v5666_v2 = vadd.f32 %v5665_v28, %v13972_v39  ;;  %v17316_v28 = vld [vmem:[#allocation225_spill] sm:$0xff]  ;;  %v17323_v61 = vld [vmem:[#allocation94_spill] sm:$0xff]  ;;  %v17326_v34 = vld [vmem:[#allocation247_spill] sm:$0xff] }
 0x46b   : > { %17305 = vst [vmem:[#allocation197_spill] sm:$0xff] %v14111_v41  ;;  %7457 = vmatprep.subr.mxu1 %v17200_v7  ;;  %v14118_v51 = vadd.f32 %v5810_v24, %v5650_v14  ;;  %7310 = vmatpush2.msra.mxu0 %v17309_v36  ;;  %v17313_v41 = vld [vmem:[#allocation298_spill] sm:$0xff] }
 0x46c   : > { %7459 = vmatpush2.msra.mxu1 %v17202_v25  ;;  %7314 = vmatprep.subr.mxu0 %v17310_v0  ;;  %v17315_v24 = vld [vmem:[#allocation222_spill] sm:$0xff]  ;;  %v17319_v0 = vld [vmem:[#allocation179_spill] sm:$0xff] }
 0x46d   : > { %17308 = vst [vmem:[#allocation202_spill] sm:$0xff] %v14118_v51  ;;  %7461 = vmatprep.subr.mxu1 %v17204_v12  ;;  %7318 = vmatpush2.msra.mxu0 %v17311_v60  ;;  %v5816_v53 = vpop.f32.mrf.mxu1  ;;  %v17318_v60 = vld [vmem:[#allocation229_spill] sm:$0xff]  ;;  %v17320_v36 = vld [vmem:[#allocation234_spill] sm:$0xff] }
 0x46e   : > { %7320 = vmatprep.mubr.f32.mxu0 %v17312_v37  ;;  %7463 = vmatpush2.msra.mxu1 %v17207_v26  ;;  %v14128_v39 = vadd.f32 %v5816_v53, %v5656_v47  ;;  %v17321_v53 = vld [vmem:[#allocation238_spill] sm:$0xff] }
 0x46f   : > { %7322 = vmatmul.mubr.f32.vlgmr.msra.gmra.mxu0 %v17313_v41  ;;  %7465 = vmatprep.subr.mxu1 %v17315_v24  ;;  %v5818_v14 = vpop.f32.mrf.mxu1 }
 0x470   : > { %17314 = vst [vmem:[#allocation206_spill] sm:$0xff] %v14128_v39  ;;  %7640 = vmatprep.subr.mxu0 %v17228_v58  ;;  %7467 = vmatpush2.msra.mxu1 %v17316_v28  ;;  %v14134_v51 = vadd.f32 %v5818_v14, %v5658_v20  ;;  %v17324_v14 = vld [vmem:[#allocation243_spill] sm:$0xff]  ;;  %v9710_v28 = vld [vmem:[#allocation3 + $0x40] sm:$0xff] }
 0x471   : > { %7642 = vmatpush1.msra.mxu0 %v17230_v21  ;;  %7469 = vmatprep.subr.mxu1 %v17318_v60  ;;  %v17327_v21 = vld [vmem:[#allocation97_spill] sm:$0xff]  ;;  %v17328_v58 = vld [vmem:[#allocation251_spill] sm:$0xff]  ;;  %v14193_v24 = vmul.f32 %v9710_v28, %v9710_v28 }
 0x472   : > { %17317 = vst [vmem:[#allocation211_spill] sm:$0xff] %v14134_v51  ;;  %7644 = vmatprep.subr.mxu0 %v17232_v63  ;;  %7328 = vmatprep.mubr.f32.mxu0 %v17319_v0  ;;  %v5824_v47 = vpop.f32.mrf.mxu1 }
 0x473   : > { %7471 = vmatpush2.msra.mxu1 %v17320_v36  ;;  %7646 = vmatpush1.msra.mxu0 %v17235_v30  ;;  %v14142_v39 = vadd.f32 %v5824_v47, %v5664_v49  ;;  %v9702_v30 = vld [vmem:[#allocation3 + $0x8] sm:$0xff]  ;;  %v17335_v36 = vld [vmem:[#allocation301_spill] sm:$0xff] }
 0x474   : > { %7473 = vmatprep.subr.mxu1 %v17321_v53  ;;  %7330 = vmatmul.mubr.f32.gmra.mxu0 %v17323_v61  ;;  %v5826_v20 = vpop.f32.mrf.mxu1  ;;  %v14152_v49 = vmul.f32 %v9702_v30, %v9702_v30  ;;  %v9703_v47 = vld [vmem:[#allocation3 + $0x48] sm:$0xff]  ;;  %v9707_v30 = vld [vmem:[#allocation3 + $0x20] sm:$0xff] }
 0x475   : > { %17322 = vst [vmem:[#allocation115_spill] sm:$0xff] %v14142_v39  ;;  %7648 = vmatprep.subr.mxu0 %v17238_v35  ;;  %7475 = vmatpush2.msra.mxu1 %v17324_v14  ;;  %v14148_v51 = vadd.f32 %v5826_v20, %v5666_v2  ;;  %v14154_v39 = vmul.f32 %v9703_v47, %v9703_v47  ;;  %v9704_v35 = vld [vmem:[#allocation3 + $0x38] sm:$0xff]  ;;  %v9705_v2 = vld [vmem:[#allocation3 + $0x10] sm:$0xff] }
 0x476   : > { %7650 = vmatpush1.msra.mxu0 %v17240_v9  ;;  %7477 = vmatprep.subr.mxu1 %v17326_v34  ;;  %v3967_v63 = vmul.f32 %v9704_v35, %v9704_v35  ;;  %v14158_v20 = vmul.f32 %v9705_v2, %v9705_v2  ;;  %v9708_v47 = vld [vmem:[#allocation3 + $0x18] sm:$0xff]  ;;  %v17329_v35 = vld [vmem:[#allocation299_spill] sm:$0xff]  ;;  %v17332_v34 = vld [vmem:[#allocation56_spill] sm:$0xff] }
 0x477   : > { %17325 = vst [vmem:[#allocation119_spill] sm:$0xff] %v14148_v51  ;;  %7652 = vmatprep.subr.mxu0 %v17242_v3  ;;  %7336 = vmatprep.mubr.f32.mxu0 %v17327_v21  ;;  %v14162_v51 = vmul.f32 %v9706_v50, %v9706_v50  ;;  %v14164_v3 = vmul.f32 %v9707_v30, %v9707_v30  ;;  %v17330_v2 = vld [vmem:[#allocation53_spill] sm:$0xff]  ;;  %v3995_v50 = vrot.slane %v14154_v39, 1  ;;  %v17331_v30 = vld [vmem:[#allocation54_spill] sm:$0xff]  ;;  %v17333_v14 = vld [vmem:[#allocation300_spill] sm:$0xff] }
 0x478   : > { %7479 = vmatpush2.msra.mxu1 %v17328_v58  ;;  %7481 = vmatprep.mubr.f32.mxu1 %v17312_v37  ;;  %v14166_v9 = vmul.f32 %v9708_v47, %v9708_v47  ;;  %v3990_v37 = vrot.slane %v3968_v18, 1  ;;  %v3999_v47 = vrot.slane %v14158_v20, 1  ;;  %v3987_v58 = vrot.slane %v3967_v63, 1 }
 0x479   : > { %7654 = vmatpush1.msra.mxu0 %v17245_v4  ;;  %7483 = vmatmul.mubr.f32.vlgmr.msra.gmra.mxu1 %v17313_v41  ;;  %v3991_v4 = vrot.slane %v14152_v49, 1  ;;  %v3988_v41 = vrot.slane %v14162_v51, 1 }
 0x47a   : > { %7338 = vmatmul.mubr.f32.gmra.mxu0 %v17329_v35  ;;  %7656 = vmatprep.subr.mxu0 %v17248_v59  ;;  %v3997_v59 = vrot.slane %v14166_v9, 1  ;;  %v4000_v60 = vsel %vm625_vm0, %v3995_v50, %v3999_v47 }
 0x47b   : > { %7837 = vmatprep.subr.mxu1 %v17330_v2  ;;  %7658 = vmatpush1.msra.mxu0 %v16783_v10  ;;  %v3993_v2 = vrot.slane %v14164_v3, 1  ;;  %v9709_v10 = vld [vmem:[#allocation3 + $0x30] sm:$0xff] }
 0x47c   : > { %7843 = vmatpush1.msra.mxu1 %v17331_v30  ;;  %7660 = vmatprep.subr.mxu0 %v17130_v13  ;;  %v14184_v53 = vmul.f32 %v9709_v10, %v9709_v10  ;;  %v17334_v30 = vld [vmem:[#allocation60_spill] sm:$0xff]  ;;  %v3992_v13 = vsel %vm625_vm0, %v3990_v37, %v3991_v4  ;;  %v17336_v10 = vld [vmem:[#allocation66_spill] sm:$0xff] }
 0x47d   : > { %7849 = vmatprep.subr.mxu1 %v17332_v34  ;;  %7344 = vmatprep.mubr.f32.mxu0 %v17333_v14  ;;  %v3996_v34 = vsel %vm625_vm0, %v3991_v4, %v3995_v50  ;;  %v3998_v37 = vsel %vm625_vm0, %v3993_v2, %v3997_v59  ;;  %v17337_v4 = vld [vmem:[#allocation70_spill] sm:$0xff] }
 0x47e   : > { %7489 = vmatprep.mubr.f32.mxu1 %v17319_v0  ;;  %7662 = vmatpush1.msra.mxu0 %v17133_v19  ;;  %v3989_v0 = vsel %vm625_vm0, %v3987_v58, %v3988_v41  ;;  %v4018_v50 = vadd.f32 %v3996_v34, %v14152_v49  ;;  %v4003_v28 = vrot.slane %v14184_v53, 1 }
 0x47f   : > { %7855 = vmatpush1.msra.mxu1 %v17334_v30  ;;  %7346 = vmatmul.mubr.f32.gmra.mxu0 %v17335_v36  ;;  %v3994_v30 = vsel %vm625_vm0, %v3988_v41, %v3993_v2  ;;  %v4015_v58 = vadd.f32 %v3989_v0, %v3967_v63  ;;  %v17339_v2 = vld [vmem:[#allocation79_spill] sm:$0xff]  ;;  %v17341_v63 = vld [vmem:[#allocation85_spill] sm:$0xff] }
 0x480   : > { %7491 = vmatmul.mubr.f32.gmra.mxu1 %v17323_v61  ;;  %7664 = vmatprep.subr.mxu0 %v16133_v54  ;;  %v4016_v61 = vadd.f32 %v3992_v13, %v3968_v18  ;;  %v17338_v54 = vld [vmem:[#allocation76_spill] sm:$0xff]  ;;  %v4017_v41 = vadd.f32 %v3994_v30, %v14162_v51  ;;  %v14213_v13 = vadd.f32 %v3998_v37, %v14164_v3  ;;  %v4001_v18 = vrot.slane %v14193_v24, 1 }
 0x481   : > { %7861 = vmatprep.subr.mxu1 %v17336_v10  ;;  %7666 = vmatpush1.msra.mxu0 %v17136_v17  ;;  %v14207_v10 = vadd.f32 %v4000_v60, %v14154_v39  ;;  %v4004_v34 = vsel %vm625_vm0, %v3999_v47, %v4003_v28  ;;  %v17342_v30 = vld [vmem:[#allocation88_spill] sm:$0xff]  ;;  %v4035_v37 = vrot.slane %v4015_v58, 2 }
 0x482   : > { %7867 = vmatpush1.msra.mxu1 %v17337_v4  ;;  %7668 = vmatprep.subr.mxu0 %v16138_v48  ;;  %v4038_v60 = vrot.slane %v4016_v61, 2  ;;  %v4036_v4 = vrot.slane %v4017_v41, 2  ;;  %v4076_v47 = vrot.slane %v4016_v61, 4  ;;  %v4115_v48 = vrot.slane %v14154_v39, 6 }
 0x483   : > { %7873 = vmatprep.subr.mxu1 %v17338_v54  ;;  %7497 = vmatprep.mubr.f32.mxu1 %v17327_v21  ;;  %v17340_v54 = vld [vmem:[#allocation82_spill] sm:$0xff]  ;;  %v4039_v21 = vrot.slane %v4018_v50, 2  ;;  %v4043_v0 = vrot.slane %v14207_v10, 2 }
 0x484   : > { %7670 = vmatpush1.msra.mxu0 %v16140_v31  ;;  %7879 = vmatpush1.msra.mxu1 %v17339_v2  ;;  %v4002_v2 = vsel %vm625_vm0, %v3997_v59, %v4001_v18  ;;  %v17344_v59 = vld [vmem:[#allocation98_spill] sm:$0xff]  ;;  %v4079_v31 = vrot.slane %v14213_v13, 4 }
 0x485   : > { %7672 = vmatprep.subr.mxu0 %v16142_v45  ;;  %7499 = vmatmul.mubr.f32.gmra.mxu1 %v17329_v35  ;;  %v4041_v35 = vrot.slane %v14213_v13, 2  ;;  %v14241_v45 = vadd.f32 %v4002_v2, %v14166_v9  ;;  %v4112_v2 = vrot.slane %v14152_v49, 6 }
 0x486   : > { %7885 = vmatprep.subr.mxu1 %v17340_v54  ;;  %7674 = vmatpush1.msra.mxu0 %v16144_v6  ;;  %v4077_v54 = vrot.slane %v4018_v50, 4  ;;  %v17343_v6 = vld [vmem:[#allocation92_spill] sm:$0xff] }
 0x487   : > { %7891 = vmatpush1.msra.mxu1 %v17341_v63  ;;  %7676 = vmatprep.subr.mxu0 %v16146_v22  ;;  %v14231_v63 = vadd.f32 %v4004_v34, %v14158_v20  ;;  %v4081_v22 = vrot.slane %v14207_v10, 4  ;;  %v17345_v34 = vld [vmem:[#allocation102_spill] sm:$0xff] }
 0x488   : > { %7897 = vmatprep.subr.mxu1 %v17342_v30  ;;  %7505 = vmatprep.mubr.f32.mxu1 %v17333_v14  ;;  %v4040_v30 = vsel %vm674_vm1, %v4038_v60, %v4039_v21  ;;  %v4044_v14 = vsel %vm674_vm1, %v4039_v21, %v4043_v0  ;;  %v4042_v60 = vsel %vm674_vm1, %v4036_v4, %v4041_v35 }
 0x489   : > { %7678 = vmatpush1.msra.mxu0 %v16149_v38  ;;  %7903 = vmatpush1.msra.mxu1 %v17343_v6  ;;  %v4073_v38 = vrot.slane %v4015_v58, 4  ;;  %v4037_v6 = vsel %vm674_vm1, %v4035_v37, %v4036_v4  ;;  %v4064_v21 = vadd.f32 %v4040_v30, %v4016_v61  ;;  %v4066_v37 = vadd.f32 %v4044_v14, %v4018_v50  ;;  %v17348_v61 = vld [vmem:[#allocation114_spill] sm:$0xff]  ;;  %v17349_v50 = vld [vmem:[#allocation117_spill] sm:$0xff] }
 0x48a   : > { %7680 = vmatprep.subr.mxu0 %v16151_v44  ;;  %7507 = vmatmul.mubr.f32.gmra.mxu1 %v17335_v36  ;;  %v4074_v44 = vrot.slane %v4017_v41, 4  ;;  %v17346_v36 = vld [vmem:[#allocation108_spill] sm:$0xff]  ;;  %v4082_v4 = vsel %vm713_vm2, %v4077_v54, %v4081_v22  ;;  %v4065_v49 = vadd.f32 %v4042_v60, %v4017_v41  ;;  %v4111_v30 = vrot.slane %v14162_v51, 6 }
 0x48b   : > { %7909 = vmatprep.subr.mxu1 %v17344_v59  ;;  %7682 = vmatpush1.msra.mxu0 %v17146_v8  ;;  %v4078_v59 = vsel %vm713_vm2, %v4076_v47, %v4077_v54  ;;  %v4047_v8 = vrot.slane %v14231_v63, 2  ;;  %v4063_v47 = vadd.f32 %v4037_v6, %v4015_v58  ;;  %v14270_v14 = vadd.f32 %v4001_v18, %v14193_v24  ;;  %v17350_v58 = vld [vmem:[#allocation120_spill] sm:$0xff]  ;;  %v17352_v18 = vld [vmem:[#allocation130_spill] sm:$0xff] }
 0x48c   : > { %7915 = vmatpush1.msra.mxu1 %v17345_v34  ;;  %7684 = vmatprep.subr.mxu0 %v17149_v29  ;;  %v17347_v34 = vld [vmem:[#allocation111_spill] sm:$0xff]  ;;  %v14258_v29 = vadd.f32 %v4003_v28, %v14184_v53  ;;  %v4075_v54 = vsel %vm713_vm2, %v4073_v38, %v4074_v44  ;;  %v4080_v39 = vsel %vm713_vm2, %v4074_v44, %v4079_v31  ;;  %v4113_v28 = vrot.slane %v14164_v3, 6  ;;  %v17351_v60 = vld [vmem:[#allocation124_spill] sm:$0xff] }
 0x48d   : > { %7921 = vmatprep.subr.mxu1 %v17346_v36  ;;  %7686 = vmatpush1.msra.mxu0 %v16274_v15  ;;  %v4045_v36 = vrot.slane %v14241_v45, 2  ;;  %v4102_v51 = vadd.f32 %v4078_v59, %v4064_v21  ;;  %v4048_v41 = vsel %vm674_vm1, %v4043_v0, %v4047_v8  ;;  %v4085_v6 = vrot.slane %v14231_v63, 4  ;;  %v17353_v59 = vld [vmem:[#allocation134_spill] sm:$0xff] }
 0x48e   : > { %7927 = vmatpush1.msra.mxu1 %v17347_v34  ;;  %7688 = vmatprep.subr.mxu0 %v17153_v27  ;;  %v4104_v38 = vadd.f32 %v4082_v4, %v4066_v37  ;;  %v4116_v44 = vsel %vm752_vm3, %v4112_v2, %v4115_v48  ;;  %v4051_v3 = vrot.slane %v14258_v29, 2  ;;  %v4101_v34 = vadd.f32 %v4075_v54, %v4063_v47  ;;  %v17355_v54 = vld [vmem:[#allocation143_spill] sm:$0xff] }
 0x48f   : > { %7933 = vmatprep.subr.mxu1 %v17348_v61  ;;  %7690 = vmatpush1.msra.mxu0 %v17156_v57  ;;  %v4103_v61 = vadd.f32 %v4080_v39, %v4065_v49  ;;  %v4046_v21 = vsel %vm674_vm1, %v4041_v35, %v4045_v36  ;;  %v4083_v0 = vrot.slane %v14241_v45, 4  ;;  %v4114_v37 = vsel %vm752_vm3, %v4111_v30, %v4113_v28 }
 0x490   : > { %7939 = vmatpush1.msra.mxu1 %v17349_v50  ;;  %7692 = vmatprep.subr.mxu0 %v16280_v46  ;;  %v4068_v4 = vadd.f32 %v4048_v41, %v14207_v10  ;;  %v4049_v50 = vrot.slane %v14270_v14, 2  ;;  %v4136_v47 = vadd.f32 %v4112_v2, %v4102_v51  ;;  %v4086_v49 = vsel %vm713_vm2, %v4081_v22, %v4085_v6  ;;  %v17357_v2 = vld [vmem:[#allocation146_spill] sm:$0xff] }
 0x491   : > { %7945 = vmatprep.subr.mxu1 %v17350_v58  ;;  %7694 = vmatpush1.msra.mxu0 %v16282_v40  ;;  %v17354_v58 = vld [vmem:[#allocation140_spill] sm:$0xff]  ;;  %v4119_v35 = vrot.slane %v14158_v20, 6  ;;  %v14295_v39 = vadd.f32 %v4116_v44, %v4104_v38  ;;  %v4052_v10 = vsel %vm674_vm1, %v4047_v8, %v4051_v3  ;;  %v4089_v41 = vrot.slane %v14258_v29, 4  ;;  %v17358_v44 = vld [vmem:[#allocation129_spill] sm:$0xff] }
 0x492   : > { %7951 = vmatpush1.msra.mxu1 %v17351_v60  ;;  %7696 = vmatprep.subr.mxu0 %v16686_v16  ;;  %v4067_v60 = vadd.f32 %v4046_v21, %v14213_v13  ;;  %v4135_v22 = vadd.f32 %v4111_v30, %v4101_v34  ;;  %v14304_v20 = vadd.f32 %v4114_v37, %v4103_v61  ;;  %v4117_v38 = vrot.slane %v14166_v9, 6  ;;  %v17359_v13 = vld [vmem:[#allocation149_spill] sm:$0xff]  ;;  %v17361_v30 = vld [vmem:[#allocation152_spill] sm:$0xff]  ;;  %v17362_v61 = vld [vmem:[#allocation138_spill] sm:$0xff] }
 0x493   : > { %7957 = vmatprep.subr.mxu1 %v17352_v18  ;;  %7698 = vmatpush1.msra.mxu0 %v17031_v62  ;;  %v17356_v18 = vld [vmem:[#allocation126_spill] sm:$0xff]  ;;  %v4084_v51 = vsel %vm713_vm2, %v4079_v31, %v4083_v0  ;;  %v4106_v21 = vadd.f32 %v4086_v49, %v4068_v4  ;;  %v4050_v8 = vsel %vm674_vm1, %v4045_v36, %v4049_v50  ;;  %v7616_v34 = vrot.slane %v4136_v47, 2  ;;  %v17363_v37 = vld [vmem:[#allocation156_spill] sm:$0xff] }
 0x494   : > { %7963 = vmatpush1.msra.mxu1 %v17353_v59  ;;  %7700 = vmatprep.subr.mxu0 %v17033_v43  ;;  %v4087_v59 = vrot.slane %v14270_v14, 4  ;;  %v4120_v31 = vsel %vm752_vm3, %v4115_v48, %v4119_v35  ;;  %v4070_v9 = vadd.f32 %v4052_v10, %v14231_v63  ;;  %v7617_v4 = vrot.slane %v14295_v39, 2  ;;  %v17365_v47 = vld [vmem:[#allocation162_spill] sm:$0xff] }
 0x495   : > { %7969 = vmatprep.subr.mxu1 %v17354_v58  ;;  %7702 = vmatpush1.msra.mxu0 %v17035_v11  ;;  %v17360_v58 = vld [vmem:[#allocation133_spill] sm:$0xff]  ;;  %v4105_v49 = vadd.f32 %v4084_v51, %v4067_v60  ;;  %v4090_v36 = vsel %vm713_vm2, %v4085_v6, %v4089_v41  ;;  %v7613_v48 = vrot.slane %v4135_v22, 2  ;;  %v7614_v63 = vrot.slane %v14304_v20, 2  ;;  %v17367_v39 = vld [vmem:[#allocation166_spill] sm:$0xff]  ;;  %v17368_v51 = vld [vmem:[#allocation172_spill] sm:$0xff] }
 0x496   : > { %7975 = vmatpush1.msra.mxu1 %v17355_v54  ;;  %7704 = vmatprep.subr.mxu0 %v17356_v18  ;;  %v4123_v54 = vrot.slane %v14184_v53, 6  ;;  %v4118_v10 = vsel %vm752_vm3, %v4113_v28, %v4117_v38  ;;  %v4140_v60 = vadd.f32 %v4120_v31, %v4106_v21  ;;  %v4088_v6 = vsel %vm713_vm2, %v4083_v0, %v4087_v59  ;;  %v17369_v20 = vld [vmem:[#allocation175_spill] sm:$0xff]  ;;  %v17371_v21 = vld [vmem:[#allocation178_spill] sm:$0xff] }
 0x497   : > { %7981 = vmatprep.subr.mxu1 %v17357_v2  ;;  %7706 = vmatpush2.msra.mxu0 %v17358_v44  ;;  %v17364_v2 = vld [vmem:[#allocation142_spill] sm:$0xff]  ;;  %v4121_v53 = vrot.slane %v14193_v24, 6  ;;  %v4108_v22 = vadd.f32 %v4090_v36, %v4070_v9  ;;  %v4139_v28 = vadd.f32 %v4118_v10, %v4105_v49  ;;  %v7615_v24 = vsel %vm674_vm1, %v7613_v48, %v7614_v63  ;;  %v17372_v9 = vld [vmem:[#allocation161_spill] sm:$0xff] }
 0x498   : > { %7987 = vmatpush1.msra.mxu1 %v17359_v13  ;;  %7708 = vmatprep.subr.mxu0 %v17360_v58  ;;  %v4069_v13 = vadd.f32 %v4050_v8, %v14241_v45  ;;  %v7618_v45 = vsel %vm674_vm1, %v7616_v34, %v7617_v4  ;;  %v4124_v8 = vsel %vm752_vm3, %v4119_v35, %v4123_v54  ;;  %v17373_v36 = vld [vmem:[#allocation181_spill] sm:$0xff]  ;;  %v17375_v35 = vld [vmem:[#allocation184_spill] sm:$0xff] }
 0x499   : > { %7993 = vmatprep.subr.mxu1 %v17361_v30  ;;  %7710 = vmatpush2.msra.mxu0 %v17362_v61  ;;  %v17366_v30 = vld [vmem:[#allocation147_spill] sm:$0xff]  ;;  %v4072_v31 = vadd.f32 %v4051_v3, %v14258_v29  ;;  %v4122_v34 = vsel %vm752_vm3, %v4117_v38, %v4121_v53  ;;  %v17374_v49 = vld [vmem:[#allocation165_spill] sm:$0xff]  ;;  %v14351_v10 = vadd.f32 %v4124_v8, %v4108_v22  ;;  %v17377_v3 = vld [vmem:[#allocation188_spill] sm:$0xff] }
 0x49a   : > { %7999 = vmatpush1.msra.mxu1 %v17363_v37  ;;  %7712 = vmatprep.subr.mxu0 %v17364_v2  ;;  %v17370_v37 = vld [vmem:[#allocation158_spill] sm:$0xff]  ;;  %v4107_v0 = vadd.f32 %v4088_v6, %v4069_v13  ;;  %v4071_v48 = vadd.f32 %v4049_v50, %v14270_v14  ;;  %v14360_v6 = vand.u32 4294901760, %v7615_v24  ;;  %v17383_v8 = vld [vmem:[#allocation204_spill] sm:$0xff] }
 0x49b   : > { %8005 = vmatprep.subr.mxu1 %v17365_v47  ;;  %7714 = vmatpush2.msra.mxu0 %v17366_v30  ;;  %v7621_v47 = vrot.slane %v4140_v60, 2  ;;  %v17376_v13 = vld [vmem:[#allocation170_spill] sm:$0xff]  ;;  %v7619_v60 = vrot.slane %v4139_v28, 2  ;;  %v4110_v22 = vadd.f32 %v4089_v41, %v4072_v31  ;;  %v7625_v28 = vrot.slane %v14351_v10, 2  ;;  %v17387_v10 = vld [vmem:[#allocation213_spill] sm:$0xff] }
 0x49c   : > { %8011 = vmatpush1.msra.mxu1 %v17367_v39  ;;  %7716 = vmatprep.subr.mxu0 %v17285_v55  ;;  %v14358_v39 = vand.u32 4294901760, %v7618_v45  ;;  %17379 = vst [vmem:[#allocation155_spill] sm:$0xff] %v14360_v6  ;;  %v17380_v38 = vld [vmem:[#allocation174_spill] sm:$0xff]  ;;  %v14380_v41 = vsub.f32 %v7615_v24, %v14360_v6  ;;  %v17388_v24 = vld [vmem:[#allocation216_spill] sm:$0xff] }
 0x49d   : > { %8017 = vmatprep.subr.mxu1 %v17368_v51  ;;  %7718 = vmatpush2.msra.mxu0 %v17287_v56  ;;  %v17381_v51 = vld [vmem:[#allocation194_spill] sm:$0xff]  ;;  %v7622_v50 = vsel %vm674_vm1, %v7617_v4, %v7621_v47  ;;  %v7620_v31 = vsel %vm674_vm1, %v7614_v63, %v7619_v60 }
 0x49e   : > { %8023 = vmatpush1.msra.mxu1 %v17369_v20  ;;  %7720 = vmatprep.subr.mxu0 %v17370_v37  ;;  %17378 = vst [vmem:[#allocation151_spill] sm:$0xff] %v14358_v39  ;;  %v14364_v20 = vadd.f32 %v4122_v34, %v4107_v0  ;;  %v17382_v14 = vld [vmem:[#allocation198_spill] sm:$0xff]  ;;  %v17384_v0 = vld [vmem:[#allocation207_spill] sm:$0xff]  ;;  %v14377_v29 = vsub.f32 %v7618_v45, %v14358_v39  ;;  %v14385_v34 = vand.u32 4294901760, %v7622_v50  ;;  %v14392_v63 = vand.u32 4294901760, %v7620_v31 }
 0x49f   : > { %8029 = vmatprep.subr.mxu1 %v17371_v21  ;;  %7722 = vmatpush2.msra.mxu0 %v17372_v9  ;;  %v4109_v21 = vadd.f32 %v4087_v59, %v4071_v48  ;;  %v7626_v48 = vsel %vm674_vm1, %v7621_v47, %v7625_v28 }
 0x4a0   : > { %8035 = vmatpush2.msra.mxu1 %v17373_v36  ;;  %7724 = vmatprep.subr.mxu0 %v17374_v49  ;;  %v6183_v4 = vpop.f32.mrf.mxu0  ;;  %v17385_v36 = vld [vmem:[#allocation210_spill] sm:$0xff]  ;;  %17386 = vst [vmem:[#allocation183_spill] sm:$0xff] %v14385_v34  ;;  %v7623_v59 = vrot.slane %v14364_v20, 2  ;;  %17389 = vst [vmem:[#allocation187_spill] sm:$0xff] %v14392_v63  ;;  %v17390_v20 = vld [vmem:[#allocation220_spill] sm:$0xff] }
 0x4a1   : > { %8041 = vmatprep.subr.mxu1 %v17375_v35  ;;  %7726 = vmatpush2.msra.mxu0 %v17376_v13  ;;  %v4144_v35 = vadd.f32 %v4123_v54, %v4110_v22  ;;  %v15793_v54 = vand.u32 4294901760, %v14377_v29  ;;  %v15795_v22 = vand.u32 4294901760, %v14380_v41 }
 0x4a2   : > { %8047 = vmatpush2.msra.mxu1 %v17377_v3  ;;  %7728 = vmatprep.subr.mxu0 %v17380_v38  ;;  %v7624_v47 = vsel %vm674_vm1, %v7619_v60, %v7623_v59  ;;  %v17397_v60 = vld [vmem:[#allocation239_spill] sm:$0xff] }
 0x4a3   : > { %8053 = vmatprep.subr.mxu1 %v17381_v51  ;;  %7730 = vmatpush2.msra.mxu0 %v17062_v32  ;;  %v4143_v51 = vadd.f32 %v4121_v53, %v4109_v21  ;;  %v7629_v21 = vrot.slane %v4144_v35, 2  ;;  %v7770_v35 = vsub.f32 %v14377_v29, %v15793_v54  ;;  %v17403_v54 = vld [vmem:[#allocation229_spill] sm:$0xff] }
 0x4a4   : > { %8059 = vmatpush2.msra.mxu1 %v17382_v14  ;;  %7732 = vmatprep.subr.mxu0 %v17298_v33  ;;  %v6185_v14 = vpop.f32.mrf.mxu0 }
 0x4a5   : > { %8065 = vmatprep.subr.mxu1 %v17383_v8  ;;  %7734 = vmatpush2.msra.mxu0 %v17301_v1 }
 0x4a6   : > { %8071 = vmatpush2.msra.mxu1 %v17384_v0  ;;  %7736 = vmatprep.subr.mxu0 %v17192_v5  ;;  %v17391_v0 = vld [vmem:[#allocation226_spill] sm:$0xff] }
 0x4a7   : > { %8077 = vmatprep.subr.mxu1 %v17385_v36  ;;  %7738 = vmatpush2.msra.mxu0 %v17194_v23  ;;  %v14404_v36 = vsub.f32 %v7622_v50, %v14385_v34  ;;  %v7627_v50 = vrot.slane %v4143_v51, 2  ;;  %v17406_v51 = vld [vmem:[#allocation252_spill] sm:$0xff] }
 0x4a8   : > { %8083 = vmatpush2.msra.mxu1 %v17387_v10  ;;  %v6624_v45 = vpop.f32.mrf.mxu1  ;;  %7740 = vmatprep.subr.mxu0 %v17196_v52  ;;  %v14411_v10 = vand.u32 4294901760, %v7626_v48 }
 0x4a9   : > { %8089 = vmatprep.subr.mxu1 %v17388_v24  ;;  %v14395_v3 = vadd.f32 %v6624_v45, %v6183_v4  ;;  %7742 = vmatpush2.msra.mxu0 %v17198_v42  ;;  %17392 = vst [vmem:[#allocation297_spill] sm:$0xff] %v14404_v36  ;;  %v17393_v4 = vld [vmem:[#allocation230_spill] sm:$0xff]  ;;  %v17395_v45 = vld [vmem:[#allocation236_spill] sm:$0xff]  ;;  %v14416_v24 = vsub.f32 %v7620_v31, %v14392_v63 }
 0x4aa   : > { %8095 = vmatpush2.msra.mxu1 %v17390_v20  ;;  %v6626_v8 = vpop.f32.mrf.mxu1  ;;  %7744 = vmatprep.subr.mxu0 %v17200_v7  ;;  %17394 = vst [vmem:[#allocation298_spill] sm:$0xff] %v14411_v10  ;;  %v14423_v20 = vand.u32 4294901760, %v7624_v47  ;;  %v7776_v31 = vsub.f32 %v14380_v41, %v15795_v22  ;;  %v17405_v22 = vld [vmem:[#allocation234_spill] sm:$0xff] }
 0x4ab   : > { %8101 = vmatprep.subr.mxu1 %v17391_v0  ;;  %v14407_v53 = vadd.f32 %v6626_v8, %v6185_v14  ;;  %7746 = vmatpush2.msra.mxu0 %v17202_v25  ;;  %17396 = vst [vmem:[#allocation179_spill] sm:$0xff] %v14416_v24  ;;  %v17399_v14 = vld [vmem:[#allocation222_spill] sm:$0xff]  ;;  %v7630_v0 = vsel %vm674_vm1, %v7625_v28, %v7629_v21  ;;  %v7771_v28 = vand.u32 4294901760, %v7770_v35 }
 0x4ac   : > { %8107 = vmatpush2.msra.mxu1 %v17393_v4  ;;  %7748 = vmatprep.subr.mxu0 %v17204_v12  ;;  %17398 = vst [vmem:[#allocation94_spill] sm:$0xff] %v14423_v20  ;;  %v17400_v8 = vld [vmem:[#allocation242_spill] sm:$0xff]  ;;  %v17401_v4 = vld [vmem:[#allocation225_spill] sm:$0xff]  ;;  %v14444_v21 = vsub.f32 %v7624_v47, %v14423_v20  ;;  %v17414_v47 = vld [vmem:[#allocation247_spill] sm:$0xff] }
 0x4ad   : > { %8113 = vmatprep.subr.mxu1 %v17395_v45  ;;  %7750 = vmatpush2.msra.mxu0 %v17207_v26  ;;  %v17402_v45 = vld [vmem:[#allocation245_spill] sm:$0xff]  ;;  %v7628_v26 = vsel %vm674_vm1, %v7623_v59, %v7627_v50  ;;  %v17411_v59 = vld [vmem:[#allocation243_spill] sm:$0xff] }
 0x4ae   : > { %8119 = vmatpush2.msra.mxu1 %v17397_v60  ;;  %7752 = vmatprep.subr.mxu0 %v17399_v14  ;;  %v14435_v60 = vsub.f32 %v7626_v48, %v14411_v10  ;;  %v17404_v14 = vld [vmem:[#allocation248_spill] sm:$0xff]  ;;  %v17408_v48 = vld [vmem:[#allocation238_spill] sm:$0xff]  ;;  %v17412_v50 = vld [vmem:[#allocation257_spill] sm:$0xff] }
 0x4af   : > { %8125 = vmatprep.subr.mxu1 %v17400_v8  ;;  %7754 = vmatpush2.msra.mxu0 %v17401_v4  ;;  %v17409_v4 = vld [vmem:[#allocation255_spill] sm:$0xff] }
 0x4b0   : > { %8131 = vmatpush2.msra.mxu1 %v17402_v45  ;;  %7756 = vmatprep.subr.mxu0 %v17403_v54  ;;  %v14446_v45 = vand.u32 4294901760, %v7630_v0  ;;  %v7777_v54 = vand.u32 4294901760, %v7776_v31 }
 0x4b1   : > { %8137 = vmatprep.subr.mxu1 %v17404_v14  ;;  %7758 = vmatpush2.msra.mxu0 %v17405_v22  ;;  %v17410_v14 = vand.u32 4294901760, %v14404_v36  ;;  %v17415_v22 = vld [vmem:[#allocation258_spill] sm:$0xff] }
 0x4b2   : > { %8143 = vmatpush2.msra.mxu1 %v17406_v51  ;;  %17407 = vst [vmem:[#allocation97_spill] sm:$0xff] %v14446_v45  ;;  %7760 = vmatprep.subr.mxu0 %v17408_v48  ;;  %v14456_v51 = vand.u32 4294901760, %v7628_v26  ;;  %v17416_v48 = vand.u32 4294901760, %v14416_v24 }
 0x4b3   : > { %8149 = vmatprep.subr.mxu1 %v17409_v4  ;;  %v7786_v8 = vsub.f32 %v14404_v36, %v17410_v14  ;;  %7762 = vmatpush2.msra.mxu0 %v17411_v59  ;;  %v17417_v4 = vld [vmem:[#allocation251_spill] sm:$0xff]  ;;  %v14466_v59 = vsub.f32 %v7630_v0, %v14446_v45  ;;  %v17419_v36 = vld [vmem:[#allocation262_spill] sm:$0xff] }
 0x4b4   : > { %8155 = vmatpush2.msra.mxu1 %v17412_v50  ;;  %17413 = vst [vmem:[#allocation299_spill] sm:$0xff] %v14456_v51  ;;  %7764 = vmatprep.subr.mxu0 %v17414_v47  ;;  %v7792_v31 = vsub.f32 %v14416_v24, %v17416_v48  ;;  %v17418_v50 = vld [vmem:[#allocation259_spill] sm:$0xff]  ;;  %v17420_v47 = vld [vmem:[#allocation37_spill] sm:$0xff] }
 0x4b5   : > { %8161 = vmatprep.subr.mxu1 %v17415_v22  ;;  %7766 = vmatpush2.msra.mxu0 %v17417_v4  ;;  %v7787_v35 = vand.u32 4294901760, %v7786_v8  ;;  %v17421_v22 = vand.u32 4294901760, %v14435_v60  ;;  %v14475_v4 = vsub.f32 %v7628_v26, %v14456_v51  ;;  %v17423_v14 = vld [vmem:[#allocation39_spill] sm:$0xff]  ;;  %v17428_v26 = vld [vmem:[#allocation45_spill] sm:$0xff] }
 0x4b6   : > { %7772 = vmatprep.mubr.f32.mxu0 %v7771_v28  ;;  %8167 = vmatpush2.msra.mxu1 %v17418_v50  ;;  %v17422_v28 = vld [vmem:[#allocation274_spill] sm:$0xff]  ;;  %v7793_v0 = vand.u32 4294901760, %v7792_v31  ;;  %v17424_v24 = vld [vmem:[#allocation275_spill] sm:$0xff]  ;;  %v17427_v50 = vld [vmem:[#allocation276_spill] sm:$0xff] }
 0x4b7   : > { %7778 = vmatmul.mubr.f32.vlgmr.msra.gmra.mxu0 %v7777_v54  ;;  %8173 = vmatprep.subr.mxu1 %v17419_v36  ;;  %v7802_v48 = vsub.f32 %v14435_v60, %v17421_v22  ;;  %v17425_v54 = vld [vmem:[#allocation41_spill] sm:$0xff]  ;;  %v17426_v36 = vand.u32 4294901760, %v14444_v21  ;;  %v17429_v22 = vld [vmem:[#allocation279_spill] sm:$0xff]  ;;  %v15800_v31 = vand.u32 4294901760, %v14475_v4 }
 0x4b8   : > { %8251 = vmatprep.subr.mxu0 %v17420_v47  ;;  %8179 = vmatpush2.msra.mxu1 %v17422_v28  ;;  %v15801_v47 = vand.u32 4294901760, %v14466_v59 }
 0x4b9   : > { %8254 = vmatpush1.msra.mxu0 %v17423_v14  ;;  %8185 = vmatprep.subr.mxu1 %v17424_v24  ;;  %v7808_v8 = vsub.f32 %v14444_v21, %v17426_v36  ;;  %v7803_v28 = vand.u32 4294901760, %v7802_v48  ;;  %v17430_v24 = vld [vmem:[#allocation49_spill] sm:$0xff]  ;;  %v17431_v14 = vld [vmem:[#allocation280_spill] sm:$0xff] }
 0x4ba   : > { %8257 = vmatprep.subr.mxu0 %v17425_v54  ;;  %7788 = vmatprep.mubr.f32.mxu0 %v7787_v35  ;;  %v17432_v54 = vld [vmem:[#allocation51_spill] sm:$0xff]  ;;  %v7818_v35 = vsub.f32 %v14466_v59, %v15801_v47  ;;  %v17435_v48 = vld [vmem:[#allocation285_spill] sm:$0xff]  ;;  %v17455_v47 = vld [vmem:[#allocation100_spill] sm:$0xff] }
 0x4bb   : > { %8191 = vmatpush2.msra.mxu1 %v17427_v50  ;;  %8260 = vmatpush1.msra.mxu0 %v17428_v26  ;;  %v7809_v36 = vand.u32 4294901760, %v7808_v8  ;;  %v17433_v50 = vld [vmem:[#allocation284_spill] sm:$0xff]  ;;  %v17434_v26 = vld [vmem:[#allocation58_spill] sm:$0xff] }
 0x4bc   : > { %8197 = vmatprep.subr.mxu1 %v17429_v22  ;;  %7794 = vmatmul.mubr.f32.gmra.mxu0 %v7793_v0  ;;  %v7824_v0 = vsub.f32 %v14475_v4, %v15800_v31  ;;  %v17436_v22 = vld [vmem:[#allocation61_spill] sm:$0xff]  ;;  %v7819_v8 = vand.u32 4294901760, %v7818_v35  ;;  %v17452_v31 = vld [vmem:[#allocation35_spill] sm:$0xff] }
 0x4bd   : > { %8263 = vmatprep.subr.mxu0 %v17430_v24  ;;  %8203 = vmatpush2.msra.mxu1 %v17431_v14  ;;  %v17437_v24 = vld [vmem:[#allocation64_spill] sm:$0xff]  ;;  %v17445_v35 = vld [vmem:[#allocation81_spill] sm:$0xff] }
 0x4be   : > { %8266 = vmatpush1.msra.mxu0 %v17432_v54  ;;  %8209 = vmatprep.subr.mxu1 %v17433_v50  ;;  %v17438_v14 = vld [vmem:[#allocation28_spill] sm:$0xff]  ;;  %v7825_v50 = vand.u32 4294901760, %v7824_v0  ;;  %v17448_v0 = vld [vmem:[#allocation33_spill] sm:$0xff] }
 0x4bf   : > { %8269 = vmatprep.subr.mxu0 %v17434_v26  ;;  %7804 = vmatprep.mubr.f32.mxu0 %v7803_v28  ;;  %v17439_v54 = vld [vmem:[#allocation68_spill] sm:$0xff]  ;;  %v17440_v28 = vld [vmem:[#allocation29_spill] sm:$0xff] }
 0x4c0   : > { %8215 = vmatpush2.msra.mxu1 %v17435_v48  ;;  %8217 = vmatprep.mubr.f32.mxu1 %v14358_v39  ;;  %v17441_v26 = vld [vmem:[#allocation72_spill] sm:$0xff]  ;;  %v17442_v48 = vld [vmem:[#allocation30_spill] sm:$0xff] }
 0x4c1   : > { %8272 = vmatpush1.msra.mxu0 %v17436_v22  ;;  %8219 = vmatmul.mubr.f32.vlgmr.msra.gmra.mxu1 %v14360_v6  ;;  %v17444_v22 = vld [vmem:[#allocation31_spill] sm:$0xff]  ;;  %v17467_v6 = vld [vmem:[#allocation128_spill] sm:$0xff] }
 0x4c2   : > { %7810 = vmatmul.mubr.f32.gmra.mxu0 %v7809_v36  ;;  %8275 = vmatprep.subr.mxu0 %v17437_v24  ;;  %v17443_v36 = vld [vmem:[#allocation75_spill] sm:$0xff]  ;;  %v17446_v24 = vld [vmem:[#allocation32_spill] sm:$0xff] }
 0x4c3   : > { %8483 = vmatprep.subr.mxu1 %v17438_v14  ;;  %8278 = vmatpush1.msra.mxu0 %v17439_v54  ;;  %v17447_v54 = vld [vmem:[#allocation84_spill] sm:$0xff] }
 0x4c4   : > { %8485 = vmatpush1.msra.mxu1 %v17440_v28  ;;  %8281 = vmatprep.subr.mxu0 %v17441_v26  ;;  %v17449_v26 = vld [vmem:[#allocation90_spill] sm:$0xff]  ;;  %v17469_v39 = vld [vmem:[#allocation132_spill] sm:$0xff] }
 0x4c5   : > { %8487 = vmatprep.subr.mxu1 %v17442_v48  ;;  %7820 = vmatprep.mubr.f32.mxu0 %v7819_v8  ;;  %v17450_v8 = vld [vmem:[#allocation34_spill] sm:$0xff] }
 0x4c6   : > { %8225 = vmatprep.mubr.f32.mxu1 %v14385_v34  ;;  %8284 = vmatpush1.msra.mxu0 %v17443_v36  ;;  %v17451_v36 = vld [vmem:[#allocation93_spill] sm:$0xff] }
 0x4c7   : > { %8489 = vmatpush1.msra.mxu1 %v17444_v22  ;;  %7826 = vmatmul.mubr.f32.gmra.mxu0 %v7825_v50  ;;  %v17453_v50 = vld [vmem:[#allocation96_spill] sm:$0xff] }
 0x4c8   : > { %8227 = vmatmul.mubr.f32.gmra.mxu1 %v14392_v63  ;;  %8287 = vmatprep.subr.mxu0 %v17445_v35  ;;  %v17454_v35 = vld [vmem:[#allocation36_spill] sm:$0xff] }
 0x4c9   : > { %8491 = vmatprep.subr.mxu1 %v17446_v24  ;;  %8290 = vmatpush1.msra.mxu0 %v17447_v54  ;;  %v17456_v54 = vld [vmem:[#allocation38_spill] sm:$0xff]  ;;  %v17457_v63 = vld [vmem:[#allocation104_spill] sm:$0xff] }
 0x4ca   : > { %8493 = vmatpush1.msra.mxu1 %v17448_v0  ;;  %8293 = vmatprep.subr.mxu0 %v17449_v26  ;;  %v17458_v26 = vld [vmem:[#allocation40_spill] sm:$0xff] }
 0x4cb   : > { %8495 = vmatprep.subr.mxu1 %v17450_v8  ;;  %8233 = vmatprep.mubr.f32.mxu1 %v14411_v10  ;;  %v17459_v10 = vld [vmem:[#allocation107_spill] sm:$0xff] }
 0x4cc   : > { %8296 = vmatpush1.msra.mxu0 %v17451_v36  ;;  %8497 = vmatpush1.msra.mxu1 %v17452_v31  ;;  %v17460_v36 = vld [vmem:[#allocation113_spill] sm:$0xff] }
 0x4cd   : > { %8299 = vmatprep.subr.mxu0 %v17453_v50  ;;  %8235 = vmatmul.mubr.f32.gmra.mxu1 %v14423_v20  ;;  %v17461_v50 = vld [vmem:[#allocation47_spill] sm:$0xff]  ;;  %v17462_v20 = vld [vmem:[#allocation116_spill] sm:$0xff] }
 0x4ce   : > { %8499 = vmatprep.subr.mxu1 %v17454_v35  ;;  %8302 = vmatpush1.msra.mxu0 %v17455_v47  ;;  %v17463_v47 = vld [vmem:[#allocation122_spill] sm:$0xff] }
 0x4cf   : > { %8501 = vmatpush1.msra.mxu1 %v17456_v54  ;;  %8305 = vmatprep.subr.mxu0 %v17457_v63  ;;  %v17464_v63 = vld [vmem:[#allocation52_spill] sm:$0xff]  ;;  %v17481_v54 = vld [vmem:[#allocation157_spill] sm:$0xff] }
 0x4d0   : > { %8503 = vmatprep.subr.mxu1 %v17458_v26  ;;  %8241 = vmatprep.mubr.f32.mxu1 %v14446_v45  ;;  %v17465_v45 = vld [vmem:[#allocation125_spill] sm:$0xff] }
 0x4d1   : > { %8308 = vmatpush1.msra.mxu0 %v17459_v10  ;;  %8505 = vmatpush1.msra.mxu1 %v17133_v19  ;;  %v17466_v10 = vld [vmem:[#allocation59_spill] sm:$0xff]  ;;  %v17475_v19 = vld [vmem:[#allocation145_spill] sm:$0xff] }
 0x4d2   : > { %8311 = vmatprep.subr.mxu0 %v17460_v36  ;;  %8243 = vmatmul.mubr.f32.gmra.mxu1 %v14456_v51  ;;  %v17468_v36 = vld [vmem:[#allocation62_spill] sm:$0xff] }
 0x4d3   : > { %8507 = vmatprep.subr.mxu1 %v17461_v50  ;;  %8314 = vmatpush1.msra.mxu0 %v17462_v20  ;;  %v17470_v50 = vld [vmem:[#allocation65_spill] sm:$0xff]  ;;  %v17471_v20 = vld [vmem:[#allocation136_spill] sm:$0xff] }
 0x4d4   : > { %8509 = vmatpush1.msra.mxu1 %v17136_v17  ;;  %8317 = vmatprep.subr.mxu0 %v17463_v47  ;;  %v17472_v17 = vld [vmem:[#allocation69_spill] sm:$0xff]  ;;  %v17473_v47 = vld [vmem:[#allocation139_spill] sm:$0xff] }
 0x4d5   : > { %8511 = vmatprep.subr.mxu1 %v17464_v63  ;;  %v6199_v34 = vpop.f32.mrf.mxu0  ;;  %8320 = vmatpush1.msra.mxu0 %v17465_v45  ;;  %v17474_v63 = vld [vmem:[#allocation74_spill] sm:$0xff] }
 0x4d6   : > { %8513 = vmatpush1.msra.mxu1 %v17466_v10  ;;  %8323 = vmatprep.subr.mxu0 %v17467_v6  ;;  %v17476_v10 = vld [vmem:[#allocation78_spill] sm:$0xff]  ;;  %v17477_v6 = vld [vmem:[#allocation148_spill] sm:$0xff] }
 0x4d7   : > { %8515 = vmatprep.subr.mxu1 %v17468_v36  ;;  %v6201_v51 = vpop.f32.mrf.mxu0  ;;  %8326 = vmatpush1.msra.mxu0 %v17469_v39  ;;  %v17478_v36 = vld [vmem:[#allocation83_spill] sm:$0xff] }
 0x4d8   : > { %8517 = vmatpush1.msra.mxu1 %v17470_v50  ;;  %8329 = vmatprep.subr.mxu0 %v17471_v20  ;;  %v17479_v50 = vld [vmem:[#allocation154_spill] sm:$0xff]  ;;  %v17480_v20 = vld [vmem:[#allocation87_spill] sm:$0xff] }
 0x4d9   : > { %8519 = vmatprep.subr.mxu1 %v17472_v17  ;;  %8332 = vmatpush1.msra.mxu0 %v17473_v47 }
 0x4da   : > { %8521 = vmatpush1.msra.mxu1 %v17474_v63  ;;  %v6215_v45 = vpop.f32.mrf.mxu0  ;;  %8335 = vmatprep.subr.mxu0 %v17475_v19  ;;  %v17482_v63 = vld [vmem:[#allocation160_spill] sm:$0xff] }
 0x4db   : > { %8523 = vmatprep.subr.mxu1 %v17476_v10  ;;  %8338 = vmatpush1.msra.mxu0 %v17477_v6  ;;  %v17483_v6 = vld [vmem:[#allocation164_spill] sm:$0xff] }
 0x4dc   : > { %8525 = vmatpush1.msra.mxu1 %v17478_v36  ;;  %v6632_v39 = vpop.f32.mrf.mxu1  ;;  %v6217_v26 = vpop.f32.mrf.mxu0  ;;  %8341 = vmatprep.subr.mxu0 %v17479_v50  ;;  %v17484_v10 = vld [vmem:[#allocation168_spill] sm:$0xff]  ;;  %v17486_v50 = vld [vmem:[#allocation177_spill] sm:$0xff] }
 0x4dd   : > { %8527 = vmatprep.subr.mxu1 %v17480_v20  ;;  %v6633_v17 = vadd.f32 %v6632_v39, %v6199_v34  ;;  %8344 = vmatpush1.msra.mxu0 %v17481_v54  ;;  %v17485_v34 = vld [vmem:[#allocation171_spill] sm:$0xff]  ;;  %v17487_v39 = vld [vmem:[#allocation180_spill] sm:$0xff] }
 0x4de   : > { %8529 = vmatpush1.msra.mxu1 %v16274_v15  ;;  %v6634_v47 = vpop.f32.mrf.mxu1  ;;  %8347 = vmatprep.subr.mxu0 %v17482_v63 }
 0x4df   : > { %8531 = vmatprep.subr.mxu1 %v17153_v27  ;;  %v6635_v19 = vadd.f32 %v6634_v47, %v6201_v51  ;;  %8350 = vmatpush2.msra.mxu0 %v17483_v6  ;;  %v17488_v6 = vld [vmem:[#allocation186_spill] sm:$0xff] }
 0x4e0   : > { %8533 = vmatpush1.msra.mxu1 %v17156_v57  ;;  %v6231_v36 = vpop.f32.mrf.mxu0  ;;  %8353 = vmatprep.subr.mxu0 %v17484_v10 }
 0x4e1   : > { %8535 = vmatprep.subr.mxu1 %v16280_v46  ;;  %8356 = vmatpush2.msra.mxu0 %v17485_v34  ;;  %v17489_v34 = vld [vmem:[#allocation189_spill] sm:$0xff] }
 0x4e2   : > { %8537 = vmatpush1.msra.mxu1 %v16282_v40  ;;  %v6640_v54 = vpop.f32.mrf.mxu1  ;;  %8359 = vmatprep.subr.mxu0 %v17486_v50  ;;  %v6233_v51 = vpop.f32.mrf.mxu0  ;;  %v17490_v40 = vld [vmem:[#allocation192_spill] sm:$0xff] }
 0x4e3   : > { %8539 = vmatprep.subr.mxu1 %v16686_v16  ;;  %v6641_v63 = vadd.f32 %v6640_v54, %v6215_v45  ;;  %8362 = vmatpush2.msra.mxu0 %v17487_v39  ;;  %v17491_v54 = vld [vmem:[#allocation196_spill] sm:$0xff] }
 0x4e4   : > { %8541 = vmatpush1.msra.mxu1 %v17031_v62  ;;  %v6642_v47 = vpop.f32.mrf.mxu1  ;;  %8365 = vmatprep.subr.mxu0 %v17488_v6  ;;  %v17492_v6 = vld [vmem:[#allocation200_spill] sm:$0xff] }
 0x4e5   : > { %8543 = vmatprep.subr.mxu1 %v17033_v43  ;;  %v6643_v10 = vadd.f32 %v6642_v47, %v6217_v26  ;;  %8368 = vmatpush2.msra.mxu0 %v17489_v34  ;;  %v17493_v34 = vld [vmem:[#allocation203_spill] sm:$0xff] }
 0x4e6   : > { %8545 = vmatpush1.msra.mxu1 %v17035_v11  ;;  %8371 = vmatprep.subr.mxu0 %v17490_v40  ;;  %v6851_v45 = vpop.f32.mrf.mxu0  ;;  %v17494_v11 = vld [vmem:[#allocation209_spill] sm:$0xff] }
 0x4e7   : > { %8547 = vmatprep.subr.mxu1 %v17356_v18  ;;  %8374 = vmatpush2.msra.mxu0 %v17491_v54  ;;  %v6852_v50 = vadd.f32 %v6851_v45, %v14395_v3  ;;  %v17495_v3 = vld [vmem:[#allocation212_spill] sm:$0xff]  ;;  %v17496_v45 = vld [vmem:[#allocation218_spill] sm:$0xff] }
 0x4e8   : > { %8549 = vmatpush2.msra.mxu1 %v17358_v44  ;;  %v6648_v39 = vpop.f32.mrf.mxu1  ;;  %8377 = vmatprep.subr.mxu0 %v17492_v6  ;;  %v6853_v47 = vpop.f32.mrf.mxu0  ;;  %v17498_v6 = vld [vmem:[#allocation224_spill] sm:$0xff] }
 0x4e9   : > { %8551 = vmatprep.subr.mxu1 %v17360_v58  ;;  %v6649_v26 = vadd.f32 %v6648_v39, %v6231_v36  ;;  %8380 = vmatpush2.msra.mxu0 %v17493_v34  ;;  %v6854_v40 = vadd.f32 %v6853_v47, %v14407_v53  ;;  %v17497_v39 = vld [vmem:[#allocation221_spill] sm:$0xff]  ;;  %v17500_v47 = vld [vmem:[#allocation232_spill] sm:$0xff]  ;;  %v17501_v34 = vld [vmem:[#allocation235_spill] sm:$0xff] }
 0x4ea   : > { %8553 = vmatpush2.msra.mxu1 %v17362_v61  ;;  %v6650_v18 = vpop.f32.mrf.mxu1  ;;  %8383 = vmatprep.subr.mxu0 %v17494_v11 }
 0x4eb   : > { %8555 = vmatprep.subr.mxu1 %v17364_v2  ;;  %v6651_v54 = vadd.f32 %v6650_v18, %v6233_v51  ;;  %8386 = vmatpush2.msra.mxu0 %v17495_v3  ;;  %v17499_v18 = vld [vmem:[#allocation228_spill] sm:$0xff] }
 0x4ec   : > { %8557 = vmatpush2.msra.mxu1 %v17366_v30  ;;  %8389 = vmatprep.subr.mxu0 %v17496_v45  ;;  %v6861_v36 = vpop.f32.mrf.mxu0  ;;  %v17502_v45 = vld [vmem:[#allocation241_spill] sm:$0xff] }
 0x4ed   : > { %8559 = vmatprep.subr.mxu1 %v17285_v55  ;;  %8392 = vmatpush2.msra.mxu0 %v17497_v39  ;;  %v6862_v53 = vadd.f32 %v6861_v36, %v6633_v17 }
 0x4ee   : > { %8561 = vmatpush2.msra.mxu1 %v17287_v56  ;;  %8395 = vmatprep.subr.mxu0 %v17498_v6  ;;  %v6863_v11 = vpop.f32.mrf.mxu0  ;;  %v17503_v6 = vld [vmem:[#allocation244_spill] sm:$0xff] }
 0x4ef   : > { %8563 = vmatprep.subr.mxu1 %v17370_v37  ;;  %8398 = vmatpush2.msra.mxu0 %v17499_v18  ;;  %v6864_v51 = vadd.f32 %v6863_v11, %v6635_v19  ;;  %v17504_v18 = vld [vmem:[#allocation250_spill] sm:$0xff] }
 0x4f0   : > { %8565 = vmatpush2.msra.mxu1 %v17372_v9  ;;  %8401 = vmatprep.subr.mxu0 %v17500_v47 }
 0x4f1   : > { %8567 = vmatprep.subr.mxu1 %v17374_v49  ;;  %8404 = vmatpush2.msra.mxu0 %v17501_v34  ;;  %v7022_v17 = vpop.f32.mrf.mxu1 }
 0x4f2   : > { %8569 = vmatpush2.msra.mxu1 %v17376_v13  ;;  %v6871_v3 = vpop.f32.mrf.mxu0  ;;  %8407 = vmatprep.subr.mxu0 %v17502_v45  ;;  %v14602_v39 = vadd.f32 %v7022_v17, %v6852_v50  ;;  %v17505_v13 = vld [vmem:[#allocation253_spill] sm:$0xff]  ;;  %v17507_v50 = vld [vmem:[#allocation263_spill] sm:$0xff]  ;;  %v17508_v45 = vld [vmem:[#allocation264_spill] sm:$0xff] }
 0x4f3   : > { %8571 = vmatprep.subr.mxu1 %v17380_v38  ;;  %v6872_v36 = vadd.f32 %v6871_v3, %v6641_v63  ;;  %8410 = vmatpush2.msra.mxu0 %v17503_v6  ;;  %v7024_v11 = vpop.f32.mrf.mxu1  ;;  %v17506_v63 = vld [vmem:[#allocation260_spill] sm:$0xff] }
 0x4f4   : > { %8573 = vmatpush2.msra.mxu1 %v17062_v32  ;;  %v6873_v19 = vpop.f32.mrf.mxu0  ;;  %8413 = vmatprep.subr.mxu0 %v17504_v18  ;;  %v14608_v34 = vadd.f32 %v7024_v11, %v6854_v40  ;;  %v17510_v11 = vld [vmem:[#allocation269_spill] sm:$0xff] }
 0x4f5   : > { %8575 = vmatprep.subr.mxu1 %v17298_v33  ;;  %v6874_v47 = vadd.f32 %v6873_v19, %v6643_v10  ;;  %8416 = vmatpush2.msra.mxu0 %v17505_v13  ;;  %v17509_v13 = vld [vmem:[#allocation268_spill] sm:$0xff] }
 0x4f6   : > { %8577 = vmatpush2.msra.mxu1 %v17301_v1  ;;  %8419 = vmatprep.subr.mxu0 %v17506_v63 }
 0x4f7   : > { %8579 = vmatprep.subr.mxu1 %v17192_v5  ;;  %8422 = vmatpush2.msra.mxu0 %v17507_v50  ;;  %v6881_v3 = vpop.f32.mrf.mxu0  ;;  %v17511_v50 = vld [vmem:[#allocation270_spill] sm:$0xff] }
 0x4f8   : > { %8581 = vmatpush2.msra.mxu1 %v17194_v23  ;;  %v7034_v17 = vpop.f32.mrf.mxu1  ;;  %8425 = vmatprep.subr.mxu0 %v17508_v45  ;;  %v6882_v10 = vadd.f32 %v6881_v3, %v6649_v26  ;;  %v17512_v26 = vld [vmem:[#allocation277_spill] sm:$0xff]  ;;  %v17516_v45 = vld [vmem:[#allocation42_spill] sm:$0xff] }
 0x4f9   : > { %8583 = vmatprep.subr.mxu1 %v17196_v52  ;;  %v14618_v40 = vadd.f32 %v7034_v17, %v6862_v53  ;;  %8428 = vmatpush2.msra.mxu0 %v17509_v13  ;;  %v6883_v6 = vpop.f32.mrf.mxu0  ;;  %v17513_v53 = vld [vmem:[#allocation278_spill] sm:$0xff]  ;;  %v17514_v17 = vld [vmem:[#allocation219_spill] sm:$0xff] }
 0x4fa   : > { %8585 = vmatpush2.msra.mxu1 %v17198_v42  ;;  %v7036_v19 = vpop.f32.mrf.mxu1  ;;  %8431 = vmatprep.subr.mxu0 %v17510_v11  ;;  %v6884_v18 = vadd.f32 %v6883_v6, %v6651_v54  ;;  %v17517_v6 = vld [vmem:[#allocation225_spill] sm:$0xff] }
 0x4fb   : > { %8587 = vmatprep.subr.mxu1 %v17200_v7  ;;  %v14624_v63 = vadd.f32 %v7036_v19, %v6864_v51  ;;  %8434 = vmatpush2.msra.mxu0 %v17511_v50  ;;  %v17515_v51 = vld [vmem:[#allocation222_spill] sm:$0xff]  ;;  %v17518_v19 = vld [vmem:[#allocation43_spill] sm:$0xff]  ;;  %v17519_v50 = vld [vmem:[#allocation229_spill] sm:$0xff] }
 0x4fc   : > { %8589 = vmatpush2.msra.mxu1 %v17202_v25  ;;  %8437 = vmatprep.subr.mxu0 %v17512_v26  ;;  %v17520_v26 = vld [vmem:[#allocation46_spill] sm:$0xff] }
 0x4fd   : > { %8591 = vmatprep.subr.mxu1 %v17204_v12  ;;  %8440 = vmatpush2.msra.mxu0 %v17513_v53  ;;  %v7046_v3 = vpop.f32.mrf.mxu1  ;;  %v17521_v53 = vld [vmem:[#allocation297_spill] sm:$0xff]  ;;  %v17529_v12 = vld [vmem:[#allocation247_spill] sm:$0xff] }
 0x4fe   : > { %8443 = vmatprep.mubr.f32.mxu0 %v14377_v29  ;;  %8593 = vmatpush2.msra.mxu1 %v17514_v17  ;;  %v14634_v54 = vadd.f32 %v7046_v3, %v6872_v36  ;;  %v17522_v17 = vld [vmem:[#allocation234_spill] sm:$0xff]  ;;  %v17523_v3 = vld [vmem:[#allocation48_spill] sm:$0xff] }
 0x4ff   : > { %8446 = vmatmul.mubr.f32.vlgmr.msra.gmra.mxu0 %v14380_v41  ;;  %8595 = vmatprep.subr.mxu1 %v17515_v51  ;;  %v7048_v13 = vpop.f32.mrf.mxu1  ;;  %v17524_v51 = vld [vmem:[#allocation238_spill] sm:$0xff] }
 0x500   : > { %8662 = vmatprep.subr.mxu0 %v17516_v45  ;;  %8597 = vmatpush2.msra.mxu1 %v17517_v6  ;;  %v14640_v11 = vadd.f32 %v7048_v13, %v6874_v47  ;;  %v17525_v6 = vld [vmem:[#allocation179_spill] sm:$0xff] }
 0x501   : > { %8666 = vmatpush1.msra.mxu0 %v17518_v19  ;;  %8599 = vmatprep.subr.mxu1 %v17519_v50  ;;  %v17526_v19 = vld [vmem:[#allocation55_spill] sm:$0xff]  ;;  %v17528_v50 = vld [vmem:[#allocation57_spill] sm:$0xff] }
 0x502   : > { %8670 = vmatprep.subr.mxu0 %v17520_v26  ;;  %8453 = vmatprep.mubr.f32.mxu0 %v17521_v53  ;;  %v7058_v36 = vpop.f32.mrf.mxu1  ;;  %v17527_v13 = vld [vmem:[#allocation243_spill] sm:$0xff] }
 0x503   : > { %8601 = vmatpush2.msra.mxu1 %v17522_v17  ;;  %8674 = vmatpush1.msra.mxu0 %v17523_v3  ;;  %v14648_v45 = vadd.f32 %v7058_v36, %v6882_v10  ;;  %v17530_v17 = vld [vmem:[#allocation63_spill] sm:$0xff]  ;;  %v17532_v10 = vand.u32 4294901760, %v14377_v29  ;;  %v17538_v29 = vand.u32 4294901760, %v17521_v53  ;;  %v17544_v53 = vand.u32 4294901760, %v14435_v60 }
 0x504   : > { %8603 = vmatprep.subr.mxu1 %v17524_v51  ;;  %8456 = vmatmul.mubr.f32.gmra.mxu0 %v17525_v6  ;;  %v7060_v47 = vpop.f32.mrf.mxu1  ;;  %v17531_v3 = vld [vmem:[#allocation251_spill] sm:$0xff] }
 0x505   : > { %8678 = vmatprep.subr.mxu0 %v17526_v19  ;;  %8605 = vmatpush2.msra.mxu1 %v17527_v13  ;;  %v14654_v26 = vadd.f32 %v7060_v47, %v6884_v18  ;;  %v17533_v36 = vld [vmem:[#allocation67_spill] sm:$0xff]  ;;  %v17534_v19 = vand.u32 4294901760, %v14380_v41  ;;  %v17539_v47 = vld [vmem:[#allocation80_spill] sm:$0xff]  ;;  %v17540_v41 = vand.u32 4294901760, %v17525_v6 }
 0x506   : > { %8682 = vmatpush1.msra.mxu0 %v17528_v50  ;;  %8607 = vmatprep.subr.mxu1 %v17529_v12  ;;  %v17535_v18 = vld [vmem:[#allocation71_spill] sm:$0xff]  ;;  %v17536_v50 = vld [vmem:[#allocation73_spill] sm:$0xff] }
 0x507   : > { %8686 = vmatprep.subr.mxu0 %v17530_v17  ;;  %8463 = vmatprep.mubr.f32.mxu0 %v14435_v60  ;;  %v17537_v17 = vld [vmem:[#allocation77_spill] sm:$0xff]  ;;  %v17546_v6 = vld [vmem:[#allocation103_spill] sm:$0xff]  ;;  %v17552_v60 = vand.u32 4294901760, %v14466_v59 }
 0x508   : > { %8609 = vmatpush2.msra.mxu1 %v17531_v3  ;;  %8613 = vmatprep.mubr.f32.mxu1 %v17532_v10  ;;  %v17547_v10 = vand.u32 4294901760, %v14444_v21 }
 0x509   : > { %8690 = vmatpush1.msra.mxu0 %v17533_v36  ;;  %8617 = vmatmul.mubr.f32.vlgmr.msra.gmra.mxu1 %v17534_v19  ;;  %v17550_v36 = vld [vmem:[#allocation109_spill] sm:$0xff]  ;;  %v17553_v19 = vld [vmem:[#allocation112_spill] sm:$0xff] }
 0x50a   : > { %8466 = vmatmul.mubr.f32.gmra.mxu0 %v14444_v21  ;;  %8694 = vmatprep.subr.mxu0 %v17535_v18  ;;  %v17555_v18 = vld [vmem:[#allocation118_spill] sm:$0xff]  ;;  %v17556_v21 = vand.u32 4294901760, %v14475_v4 }
 0x50b   : > { %8949 = vmatprep.subr.mxu1 %v17438_v14  ;;  %8698 = vmatpush1.msra.mxu0 %v17536_v50  ;;  %v17541_v14 = vld [vmem:[#allocation86_spill] sm:$0xff]  ;;  %v17558_v50 = vld [vmem:[#allocation121_spill] sm:$0xff] }
 0x50c   : > { %8951 = vmatpush1.msra.mxu1 %v17440_v28  ;;  %8702 = vmatprep.subr.mxu0 %v17537_v17  ;;  %v17542_v28 = vld [vmem:[#allocation89_spill] sm:$0xff]  ;;  %v17559_v17 = vld [vmem:[#allocation50_spill] sm:$0xff] }
 0x50d   : > { %8953 = vmatprep.subr.mxu1 %v17442_v48  ;;  %8473 = vmatprep.mubr.f32.mxu0 %v14466_v59  ;;  %v17543_v48 = vld [vmem:[#allocation95_spill] sm:$0xff] }
 0x50e   : > { %8625 = vmatprep.mubr.f32.mxu1 %v17538_v29  ;;  %8706 = vmatpush1.msra.mxu0 %v17539_v47  ;;  %v17560_v29 = vld [vmem:[#allocation127_spill] sm:$0xff]  ;;  %v17561_v47 = vld [vmem:[#allocation52_spill] sm:$0xff] }
 0x50f   : > { %8955 = vmatpush1.msra.mxu1 %v17444_v22  ;;  %8476 = vmatmul.mubr.f32.gmra.mxu0 %v14475_v4  ;;  %v17545_v22 = vld [vmem:[#allocation99_spill] sm:$0xff]  ;;  %v17566_v4 = vld [vmem:[#allocation137_spill] sm:$0xff] }
 0x510   : > { %8629 = vmatmul.mubr.f32.gmra.mxu1 %v17540_v41  ;;  %8710 = vmatprep.subr.mxu0 %v17541_v14  ;;  %v17562_v59 = vld [vmem:[#allocation131_spill] sm:$0xff] }
 0x511   : > { %8957 = vmatprep.subr.mxu1 %v17446_v24  ;;  %8714 = vmatpush1.msra.mxu0 %v17542_v28  ;;  %v17548_v24 = vld [vmem:[#allocation105_spill] sm:$0xff]  ;;  %v17563_v41 = vld [vmem:[#allocation59_spill] sm:$0xff]  ;;  %v17565_v28 = vld [vmem:[#allocation62_spill] sm:$0xff] }
 0x512   : > { %8959 = vmatpush1.msra.mxu1 %v17448_v0  ;;  %8718 = vmatprep.subr.mxu0 %v17543_v48  ;;  %v17549_v0 = vld [vmem:[#allocation38_spill] sm:$0xff]  ;;  %v17564_v14 = vld [vmem:[#allocation135_spill] sm:$0xff]  ;;  %v17567_v48 = vld [vmem:[#allocation65_spill] sm:$0xff] }
 0x513   : > { %8961 = vmatprep.subr.mxu1 %v17450_v8  ;;  %8637 = vmatprep.mubr.f32.mxu1 %v17544_v53  ;;  %v17551_v8 = vld [vmem:[#allocation40_spill] sm:$0xff]  ;;  %v17568_v53 = vld [vmem:[#allocation141_spill] sm:$0xff] }
 0x514   : > { %8722 = vmatpush1.msra.mxu0 %v17545_v22  ;;  %8963 = vmatpush1.msra.mxu1 %v17452_v31  ;;  %v17554_v31 = vld [vmem:[#allocation44_spill] sm:$0xff]  ;;  %v17569_v22 = vld [vmem:[#allocation69_spill] sm:$0xff] }
 0x515   : > { %8726 = vmatprep.subr.mxu0 %v17546_v6  ;;  %8641 = vmatmul.mubr.f32.gmra.mxu1 %v17547_v10  ;;  %v17570_v6 = vld [vmem:[#allocation144_spill] sm:$0xff]  ;;  %v17571_v10 = vld [vmem:[#allocation74_spill] sm:$0xff] }
 0x516   : > { %8965 = vmatprep.subr.mxu1 %v17454_v35  ;;  %8730 = vmatpush1.msra.mxu0 %v17548_v24  ;;  %v17557_v35 = vld [vmem:[#allocation47_spill] sm:$0xff]  ;;  %v17572_v24 = vld [vmem:[#allocation150_spill] sm:$0xff] }
 0x517   : > { %8967 = vmatpush1.msra.mxu1 %v17549_v0  ;;  %8734 = vmatprep.subr.mxu0 %v17550_v36  ;;  %v17573_v0 = vld [vmem:[#allocation78_spill] sm:$0xff]  ;;  %v17574_v36 = vld [vmem:[#allocation153_spill] sm:$0xff] }
 0x518   : > { %8969 = vmatprep.subr.mxu1 %v17551_v8  ;;  %8649 = vmatprep.mubr.f32.mxu1 %v17552_v60  ;;  %v17575_v8 = vld [vmem:[#allocation83_spill] sm:$0xff] }
 0x519   : > { %8738 = vmatpush1.msra.mxu0 %v17553_v19  ;;  %8971 = vmatpush1.msra.mxu1 %v17554_v31  ;;  %v17576_v60 = vld [vmem:[#allocation159_spill] sm:$0xff] }
 0x51a   : > { %8742 = vmatprep.subr.mxu0 %v17555_v18  ;;  %8653 = vmatmul.mubr.f32.gmra.mxu1 %v17556_v21  ;;  %v17577_v19 = vld [vmem:[#allocation163_spill] sm:$0xff]  ;;  %v17579_v18 = vld [vmem:[#allocation169_spill] sm:$0xff] }
 0x51b   : > { %8973 = vmatprep.subr.mxu1 %v17557_v35  ;;  %8746 = vmatpush1.msra.mxu0 %v17558_v50  ;;  %v17578_v31 = vld [vmem:[#allocation167_spill] sm:$0xff]  ;;  %v17580_v21 = vld [vmem:[#allocation173_spill] sm:$0xff]  ;;  %v17581_v35 = vld [vmem:[#allocation176_spill] sm:$0xff] }
 0x51c   : > { %8975 = vmatpush1.msra.mxu1 %v17559_v17  ;;  %8750 = vmatprep.subr.mxu0 %v17560_v29  ;;  %v17582_v50 = vld [vmem:[#allocation106_spill] sm:$0xff]  ;;  %v17587_v17 = vld [vmem:[#allocation123_spill] sm:$0xff] }
 0x51d   : > { %8977 = vmatprep.subr.mxu1 %v17561_v47  ;;  %8754 = vmatpush1.msra.mxu0 %v17562_v59  ;;  %v17589_v29 = vld [vmem:[#allocation126_spill] sm:$0xff]  ;;  %v17590_v59 = vld [vmem:[#allocation201_spill] sm:$0xff] }
 0x51e   : > { %8979 = vmatpush1.msra.mxu1 %v17563_v41  ;;  %8758 = vmatprep.subr.mxu0 %v17564_v14  ;;  %v17592_v41 = vld [vmem:[#allocation208_spill] sm:$0xff] }
 0x51f   : > { %8981 = vmatprep.subr.mxu1 %v17565_v28  ;;  %8762 = vmatpush1.msra.mxu0 %v17566_v4  ;;  %v17593_v28 = vld [vmem:[#allocation214_spill] sm:$0xff]  ;;  %v17594_v4 = vld [vmem:[#allocation217_spill] sm:$0xff] }
 0x520   : > { %8983 = vmatpush1.msra.mxu1 %v17567_v48  ;;  %8766 = vmatprep.subr.mxu0 %v17568_v53  ;;  %v17598_v48 = vld [vmem:[#allocation233_spill] sm:$0xff] }
 0x521   : > { %8985 = vmatprep.subr.mxu1 %v17569_v22  ;;  %8770 = vmatpush1.msra.mxu0 %v17570_v6  ;;  %v17599_v53 = vld [vmem:[#allocation237_spill] sm:$0xff]  ;;  %v17602_v6 = vld [vmem:[#allocation246_spill] sm:$0xff] }
 0x522   : > { %8987 = vmatpush1.msra.mxu1 %v17571_v10  ;;  %8774 = vmatprep.subr.mxu0 %v17572_v24  ;;  %v17603_v10 = vld [vmem:[#allocation249_spill] sm:$0xff]  ;;  %v17604_v24 = vld [vmem:[#allocation254_spill] sm:$0xff] }
 0x523   : > { %8989 = vmatprep.subr.mxu1 %v17573_v0  ;;  %8778 = vmatpush1.msra.mxu0 %v17574_v36 }
 0x524   : > { %8991 = vmatpush1.msra.mxu1 %v17575_v8  ;;  %8782 = vmatprep.subr.mxu0 %v17576_v60  ;;  %v17605_v60 = vld [vmem:[#allocation290_spill] sm:$0xff] }
 0x525   : > { %8993 = vmatprep.subr.mxu1 %v17480_v20  ;;  %8786 = vmatpush1.msra.mxu0 %v17577_v19  ;;  %v17583_v20 = vld [vmem:[#allocation182_spill] sm:$0xff]  ;;  %v17606_v19 = vld [vmem:[#allocation256_spill] sm:$0xff] }
 0x526   : > { %8995 = vmatpush1.msra.mxu1 %v16274_v15  ;;  %8790 = vmatprep.subr.mxu0 %v17578_v31  ;;  %v17584_v15 = vld [vmem:[#allocation185_spill] sm:$0xff] }
 0x527   : > { %8997 = vmatprep.subr.mxu1 %v17153_v27  ;;  %8794 = vmatpush2.msra.mxu0 %v17579_v18  ;;  %v17585_v27 = vld [vmem:[#allocation191_spill] sm:$0xff] }
 0x528   : > { %8999 = vmatpush1.msra.mxu1 %v17156_v57  ;;  %8798 = vmatprep.subr.mxu0 %v17580_v21  ;;  %v17586_v57 = vld [vmem:[#allocation195_spill] sm:$0xff] }
 0x529   : > { %9001 = vmatprep.subr.mxu1 %v16280_v46  ;;  %8802 = vmatpush2.msra.mxu0 %v17581_v35  ;;  %v17588_v46 = vld [vmem:[#allocation199_spill] sm:$0xff]  ;;  %v17609_v35 = vld [vmem:[#allocation266_spill] sm:$0xff] }
 0x52a   : > { %9003 = vmatpush1.msra.mxu1 %v17582_v50  ;;  %8806 = vmatprep.subr.mxu0 %v17583_v20 }
 0x52b   : > { %9005 = vmatprep.subr.mxu1 %v16686_v16  ;;  %8810 = vmatpush2.msra.mxu0 %v17584_v15 }
 0x52c   : > { %9007 = vmatpush1.msra.mxu1 %v17031_v62  ;;  %8814 = vmatprep.subr.mxu0 %v17585_v27  ;;  %v17591_v62 = vld [vmem:[#allocation205_spill] sm:$0xff] }
 0x52d   : > { %9009 = vmatprep.subr.mxu1 %v17033_v43  ;;  %8818 = vmatpush2.msra.mxu0 %v17586_v57 }
 0x52e   : > { %9011 = vmatpush1.msra.mxu1 %v17587_v17  ;;  %8822 = vmatprep.subr.mxu0 %v17588_v46  ;;  %v17611_v46 = vld [vmem:[#allocation271_spill] sm:$0xff] }
 0x52f   : > { %9013 = vmatprep.subr.mxu1 %v17589_v29  ;;  %v7323_v47 = vpop.f32.mrf.mxu0  ;;  %8826 = vmatpush2.msra.mxu0 %v17590_v59 }
 0x530   : > { %9015 = vmatpush2.msra.mxu1 %v17358_v44  ;;  %v7324_v16 = vadd.f32 %v7323_v47, %v14602_v39  ;;  %8830 = vmatprep.subr.mxu0 %v17591_v62  ;;  %v17595_v44 = vld [vmem:[#allocation223_spill] sm:$0xff]  ;;  %v17612_v47 = vld [vmem:[#allocation272_spill] sm:$0xff] }
 0x531   : > { %9017 = vmatprep.subr.mxu1 %v17360_v58  ;;  %v7325_v43 = vpop.f32.mrf.mxu0  ;;  %8834 = vmatpush2.msra.mxu0 %v17592_v41  ;;  %v17596_v39 = vld [vmem:[#allocation227_spill] sm:$0xff] }
 0x532   : > { %9019 = vmatpush2.msra.mxu1 %v17362_v61  ;;  %v7326_v14 = vadd.f32 %v7325_v43, %v14608_v34  ;;  %8838 = vmatprep.subr.mxu0 %v17593_v28  ;;  %v17597_v34 = vld [vmem:[#allocation231_spill] sm:$0xff]  ;;  %v17613_v43 = vld [vmem:[#allocation273_spill] sm:$0xff]  ;;  %v17615_v28 = vld [vmem:[#allocation282_spill] sm:$0xff] }
 0x533   : > { %9021 = vmatprep.subr.mxu1 %v17364_v2  ;;  %8842 = vmatpush2.msra.mxu0 %v17594_v4  ;;  %v17616_v4 = vld [vmem:[#allocation215_spill] sm:$0xff] }
 0x534   : > { %9023 = vmatpush2.msra.mxu1 %v17366_v30  ;;  %8846 = vmatprep.subr.mxu0 %v17595_v44  ;;  %v7331_v58 = vpop.f32.mrf.mxu0 }
 0x535   : > { %9025 = vmatprep.subr.mxu1 %v17285_v55  ;;  %8850 = vmatpush2.msra.mxu0 %v17596_v39  ;;  %v7332_v61 = vadd.f32 %v7331_v58, %v14618_v40  ;;  %v17600_v55 = vld [vmem:[#allocation240_spill] sm:$0xff]  ;;  %v17618_v39 = vld [vmem:[#allocation151_spill] sm:$0xff] }
 0x536   : > { %9027 = vmatpush2.msra.mxu1 %v17287_v56  ;;  %8854 = vmatprep.subr.mxu0 %v17597_v34  ;;  %v7333_v2 = vpop.f32.mrf.mxu0  ;;  %v17601_v56 = vld [vmem:[#allocation170_spill] sm:$0xff] }
 0x537   : > { %9029 = vmatprep.subr.mxu1 %v17370_v37  ;;  %8858 = vmatpush2.msra.mxu0 %v17598_v48  ;;  %v7334_v30 = vadd.f32 %v7333_v2, %v14624_v63  ;;  %v17620_v2 = vld [vmem:[#allocation155_spill] sm:$0xff] }
 0x538   : > { %9031 = vmatpush2.msra.mxu1 %v17372_v9  ;;  %8862 = vmatprep.subr.mxu0 %v17599_v53 }
 0x539   : > { %9033 = vmatprep.subr.mxu1 %v17374_v49  ;;  %8866 = vmatpush2.msra.mxu0 %v17600_v55  ;;  %v7484_v22 = vpop.f32.mrf.mxu1  ;;  %v17621_v55 = vld [vmem:[#allocation293_spill] sm:$0xff] }
 0x53a   : > { %9035 = vmatpush2.msra.mxu1 %v17601_v56  ;;  %v7339_v40 = vpop.f32.mrf.mxu0  ;;  %8870 = vmatprep.subr.mxu0 %v17602_v6  ;;  %v7485_v9 = vadd.f32 %v7484_v22, %v7324_v16  ;;  %v7548_v56 = vmul.f32 2.0, %v17621_v55  ;;  %v17623_v22 = vld [vmem:[#allocation183_spill] sm:$0xff] }
 0x53b   : > { %9037 = vmatprep.subr.mxu1 %v17380_v38  ;;  %v7340_v37 = vadd.f32 %v7339_v40, %v14634_v54  ;;  %8874 = vmatpush2.msra.mxu0 %v17603_v10  ;;  %v7486_v49 = vpop.f32.mrf.mxu1  ;;  %v7545_v38 = vmul.f32 2.0, %v17605_v60  ;;  %v14784_v54 = vstv %s10262_s6  ;;  %v17622_v40 = vld [vmem:[#allocation222_spill] sm:$0xff] }
 0x53c   : > { %9039 = vmatpush2.msra.mxu1 %v17062_v32  ;;  %v7341_v63 = vpop.f32.mrf.mxu0  ;;  %8878 = vmatprep.subr.mxu0 %v17604_v24  ;;  %v7570_v0 = vmul.f32 49.0, %v7485_v9  ;;  %v7487_v8 = vadd.f32 %v7486_v49, %v7326_v14  ;;  %v17607_v32 = vld [vmem:[#allocation261_spill] sm:$0xff] }
 0x53d   : > { %9041 = vmatprep.subr.mxu1 %v17298_v33  ;;  %v7342_v36 = vadd.f32 %v7341_v63, %v14640_v11  ;;  %8882 = vmatpush2.msra.mxu0 %v17606_v19  ;;  %v17608_v33 = vld [vmem:[#allocation265_spill] sm:$0xff]  ;;  %v14793_v11 = vstv %s10264_s14  ;;  %v7554_v17 = vadd.f32 %v14784_v54, %v7545_v38  ;;  %v17627_v19 = vld [vmem:[#allocation234_spill] sm:$0xff] }
 0x53e   : > { %9043 = vmatpush2.msra.mxu1 %v17301_v1  ;;  %8886 = vmatprep.subr.mxu0 %v17607_v32  ;;  %v7578_v31 = vsub.f32 %v7570_v0, %v17605_v60  ;;  %v7571_v18 = vmul.f32 49.0, %v7487_v8  ;;  %v7546_v21 = vmul.f32 2.0, %v17608_v33  ;;  %v17610_v1 = vld [vmem:[#allocation267_spill] sm:$0xff]  ;;  %v17624_v63 = vld [vmem:[#allocation225_spill] sm:$0xff] }
 0x53f   : > { %9045 = vmatprep.subr.mxu1 %v17192_v5  ;;  %8890 = vmatpush2.msra.mxu0 %v17609_v35  ;;  %v7347_v50 = vpop.f32.mrf.mxu0  ;;  %v17626_v60 = vld [vmem:[#allocation91_spill] sm:$0xff]  ;;  %v7557_v35 = vadd.f32 %v14784_v54, %v7548_v56 }
 0x540   : > { %9047 = vmatpush2.msra.mxu1 %v17194_v23  ;;  %v7492_v20 = vpop.f32.mrf.mxu1  ;;  %8894 = vmatprep.subr.mxu0 %v17610_v1  ;;  %v7586_v15 = vmul.f32 2.0, %v7578_v31  ;;  %v7579_v5 = vsub.f32 %v7571_v18, %v17608_v33  ;;  %v7348_v27 = vadd.f32 %v7347_v50, %v14648_v45  ;;  %v7555_v45 = vadd.f32 %v14784_v54, %v7546_v21  ;;  %v17628_v32 = vld [vmem:[#allocation187_spill] sm:$0xff]  ;;  %v17630_v1 = vld [vmem:[#allocation110_spill] sm:$0xff] }
 0x541   : > { %9049 = vmatprep.subr.mxu1 %v17196_v52  ;;  %v7493_v57 = vadd.f32 %v7492_v20, %v7332_v61  ;;  %8898 = vmatpush2.msra.mxu0 %v17611_v46  ;;  %v7349_v23 = vpop.f32.mrf.mxu0  ;;  %v7549_v38 = vmul.f32 2.0, %v17626_v60 }
 0x542   : > { %9051 = vmatpush2.msra.mxu1 %v17198_v42  ;;  %v7494_v29 = vpop.f32.mrf.mxu1  ;;  %8902 = vmatprep.subr.mxu0 %v17612_v47  ;;  %v7595_v52 = vadd.f32 %v14793_v11, %v7586_v15  ;;  %v7587_v59 = vmul.f32 2.0, %v7579_v5  ;;  %v7350_v62 = vadd.f32 %v7349_v23, %v14654_v26  ;;  %v17614_v42 = vld [vmem:[#allocation292_spill] sm:$0xff]  ;;  %v17617_v26 = vld [vmem:[#allocation283_spill] sm:$0xff]  ;;  %v7550_v15 = vmul.f32 2.0, %v17630_v1  ;;  %v17631_v47 = vld [vmem:[#allocation94_spill] sm:$0xff] }
 0x543   : > { %9053 = vmatprep.subr.mxu1 %v17200_v7  ;;  %v7572_v16 = vmul.f32 49.0, %v7493_v57  ;;  %8906 = vmatpush2.msra.mxu0 %v17613_v43  ;;  %v7495_v41 = vadd.f32 %v7494_v29, %v7334_v30  ;;  %v7547_v14 = vmul.f32 2.0, %v17614_v42 }
 0x544   : > { %9055 = vmatpush2.msra.mxu1 %v17202_v25  ;;  %8910 = vmatprep.subr.mxu0 %v17615_v28  ;;  %v14812_v7 = vmul.f32 %v7595_v52, %v7554_v17  ;;  %v7596_v44 = vadd.f32 %v14793_v11, %v7587_v59  ;;  %v17619_v25 = vld [vmem:[#allocation219_spill] sm:$0xff] }
 0x545   : > { %9057 = vmatprep.subr.mxu1 %v17616_v4  ;;  %v7580_v58 = vsub.f32 %v7572_v16, %v17614_v42  ;;  %8914 = vmatpush2.msra.mxu0 %v17617_v26  ;;  %v7573_v61 = vmul.f32 49.0, %v7495_v41  ;;  %v7500_v34 = vpop.f32.mrf.mxu1  ;;  %v7556_v10 = vadd.f32 %v14784_v54, %v7547_v14  ;;  %v17633_v16 = vld [vmem:[#allocation97_spill] sm:$0xff]  ;;  %v17634_v41 = vld [vmem:[#allocation295_spill] sm:$0xff] }
 0x546   : > { %8916 = vmatprep.mubr.f32.mxu0 %v17618_v39  ;;  %9059 = vmatpush2.msra.mxu1 %v17619_v25  ;;  %v14820_v48 = vmul.f32 %v7596_v44, %v7555_v45  ;;  %v7501_v53 = vadd.f32 %v7500_v34, %v7340_v37  ;;  %v17625_v37 = vld [vmem:[#allocation229_spill] sm:$0xff]  ;;  %v7552_v42 = vmul.f32 2.0, %v17634_v41  ;;  %v17636_v4 = vld [vmem:[#allocation299_spill] sm:$0xff] }
 0x547   : > { %8918 = vmatmul.mubr.f32.vlgmr.msra.gmra.mxu0 %v17620_v2  ;;  %v7588_v30 = vmul.f32 2.0, %v7580_v58  ;;  %9061 = vmatprep.subr.mxu1 %v17622_v40  ;;  %v7581_v6 = vsub.f32 %v7573_v61, %v17621_v55  ;;  %v7502_v9 = vpop.f32.mrf.mxu1 }
 0x548   : > { %8924 = vmatprep.mubr.f32.mxu0 %v17623_v22  ;;  %9063 = vmatpush2.msra.mxu1 %v17624_v63  ;;  %v7574_v24 = vmul.f32 49.0, %v7501_v53  ;;  %v7503_v0 = vadd.f32 %v7502_v9, %v7342_v36  ;;  %v17629_v36 = vld [vmem:[#allocation298_spill] sm:$0xff]  ;;  %v7561_v61 = vadd.f32 %v14784_v54, %v7552_v42 }
 0x549   : > { %9077 = vmatprep.mubr.f32.mxu1 %v17618_v39  ;;  %v7597_v49 = vadd.f32 %v14793_v11, %v7588_v30  ;;  %9065 = vmatprep.subr.mxu1 %v17625_v37  ;;  %v7589_v8 = vmul.f32 2.0, %v7581_v6 }
 0x54a   : > { %9067 = vmatpush2.msra.mxu1 %v17627_v19  ;;  %v7582_v18 = vsub.f32 %v7574_v24, %v17626_v60  ;;  %v7575_v33 = vmul.f32 49.0, %v7503_v0  ;;  %v7508_v21 = vpop.f32.mrf.mxu1 }
 0x54b   : > { %8926 = vmatmul.mubr.f32.gmra.mxu0 %v17628_v32  ;;  %v14834_v31 = vmul.f32 %v7597_v49, %v7556_v10  ;;  %9069 = vmatprep.subr.mxu1 %v17524_v51  ;;  %v7598_v50 = vadd.f32 %v14793_v11, %v7589_v8  ;;  %v7509_v20 = vadd.f32 %v7508_v21, %v7348_v27 }
 0x54c   : > { %8932 = vmatprep.mubr.f32.mxu0 %v17629_v36  ;;  %9071 = vmatpush2.msra.mxu1 %v17527_v13  ;;  %v7590_v5 = vmul.f32 2.0, %v7582_v18  ;;  %v7583_v57 = vsub.f32 %v7575_v33, %v17630_v1  ;;  %v7510_v17 = vpop.f32.mrf.mxu1  ;;  %v7558_v51 = vadd.f32 %v14784_v54, %v7549_v38  ;;  %v17632_v13 = vld [vmem:[#allocation286_spill] sm:$0xff] }
 0x54d   : > { %9073 = vmatprep.subr.mxu1 %v17529_v12  ;;  %v14845_v46 = vmul.f32 %v7598_v50, %v7557_v35  ;;  %v7576_v23 = vmul.f32 49.0, %v7509_v20  ;;  %v7511_v29 = vadd.f32 %v7510_v17, %v7350_v62  ;;  %v7551_v59 = vmul.f32 2.0, %v17632_v13  ;;  %v17639_v17 = vld [vmem:[#allocation190_spill] sm:$0xff] }
 0x54e   : > { %9075 = vmatpush2.msra.mxu1 %v17531_v3  ;;  %v7599_v27 = vadd.f32 %v14793_v11, %v7590_v5  ;;  %v7591_v52 = vmul.f32 2.0, %v7583_v57  ;;  %v7559_v62 = vadd.f32 %v14784_v54, %v7550_v15 }
 0x54f   : > { %8934 = vmatmul.mubr.f32.gmra.mxu0 %v17631_v47  ;;  %9079 = vmatmul.mubr.f32.vlgmr.msra.gmra.mxu1 %v17620_v2  ;;  %v7584_v12 = vsub.f32 %v7576_v23, %v17632_v13  ;;  %v7577_v45 = vmul.f32 49.0, %v7511_v29  ;;  %v7560_v58 = vadd.f32 %v14784_v54, %v7551_v59  ;;  %v17641_v59 = vld [vmem:[#allocation197_spill] sm:$0xff] }
 0x550   : > { %8940 = vmatprep.mubr.f32.mxu0 %v17633_v16  ;;  %9085 = vmatprep.mubr.f32.mxu1 %v17623_v22  ;;  %v14857_v43 = vmul.f32 %v7599_v27, %v7558_v51  ;;  %v7600_v3 = vadd.f32 %v14793_v11, %v7591_v52  ;;  %v17640_v51 = vld [vmem:[#allocation193_spill] sm:$0xff] }
 0x551   : > { %v7592_v14 = vmul.f32 2.0, %v7584_v12  ;;  %v7585_v28 = vsub.f32 %v7577_v45, %v17634_v41 }
 0x552   : > { %v14863_v44 = vmul.f32 %v7600_v3, %v7559_v62  ;;  %v17642_v3 = vld [vmem:[#allocation202_spill] sm:$0xff] }
 0x553   : > { %8942 = vmatmul.mubr.f32.gmra.mxu0 %v17636_v4  ;;  %9087 = vmatmul.mubr.f32.gmra.mxu1 %v17628_v32  ;;  %v7601_v26 = vadd.f32 %v14793_v11, %v7592_v14  ;;  %v7593_v39 = vmul.f32 2.0, %v7585_v28 }
 0x554   : > { %9093 = vmatprep.mubr.f32.mxu1 %v17629_v36 }
 0x555   : > { %v14870_v34 = vmul.f32 %v7601_v26, %v7560_v58  ;;  %v7602_v25 = vadd.f32 %v14793_v11, %v7593_v39 }
 0x557   : > { %9095 = vmatmul.mubr.f32.gmra.mxu1 %v17631_v47  ;;  %v14874_v2 = vmul.f32 %v7602_v25, %v7561_v61 }
 0x558   : > { %9101 = vmatprep.mubr.f32.mxu1 %v17633_v16 }
 0x55b   : > { %9103 = vmatmul.mubr.f32.gmra.mxu1 %v17636_v4 }
 0x577   : > { %v7779_v30 = vpop.f32.mrf.mxu0 }
 0x578   : > { %v7780_v23 = vadd.f32 %v7779_v30, %v17639_v17  ;;  %v17644_v17 = vld [vmem:[#allocation281_spill] sm:$0xff] }
 0x579   : > { %v7781_v53 = vpop.f32.mrf.mxu0 }
 0x57a   : > { %v7782_v47 = vadd.f32 %v7781_v53, %v17640_v51  ;;  %v17643_v53 = vld [vmem:[#allocation291_spill] sm:$0xff] }
 0x57c   : > { %v7795_v55 = vpop.f32.mrf.mxu0 }
 0x57d   : > { %v7796_v16 = vadd.f32 %v7795_v55, %v17641_v59  ;;  %v7563_v55 = vadd.f32 %v14784_v54, %v17644_v17 }
 0x57e   : > { %v7797_v40 = vpop.f32.mrf.mxu0 }
 0x57f   : > { %v7798_v41 = vadd.f32 %v7797_v40, %v17642_v3 }
 0x581   : > { %v8220_v56 = vpop.f32.mrf.mxu1 }
 0x582   : > { %v7811_v6 = vpop.f32.mrf.mxu0  ;;  %v8221_v27 = vadd.f32 %v8220_v56, %v7780_v23  ;;  %v7562_v56 = vadd.f32 %v14784_v54, %v17643_v53 }
 0x583   : > { %v8222_v22 = vpop.f32.mrf.mxu1 }
 0x584   : > { %v7813_v10 = vpop.f32.mrf.mxu0  ;;  %v8223_v12 = vadd.f32 %v8222_v22, %v7782_v47  ;;  %v17645_v22 = vld [vmem:[#allocation206_spill] sm:$0xff]  ;;  %v17646_v47 = vld [vmem:[#allocation288_spill] sm:$0xff] }
 0x587   : > { %v7827_v49 = vpop.f32.mrf.mxu0 }
 0x588   : > { %v8228_v9 = vpop.f32.mrf.mxu1 }
 0x589   : > { %v7829_v0 = vpop.f32.mrf.mxu0  ;;  %v8229_v42 = vadd.f32 %v8228_v9, %v7796_v16 }
 0x58a   : > { %v8230_v63 = vpop.f32.mrf.mxu1 }
 0x58b   : > { %v8231_v26 = vadd.f32 %v8230_v63, %v7798_v41  ;;  %v7564_v63 = vadd.f32 %v14784_v54, %v17646_v47 }
 0x58d   : > { %v8236_v24 = vpop.f32.mrf.mxu1 }
 0x58f   : > { %v8238_v37 = vpop.f32.mrf.mxu1 }
 0x592   : > { %v8244_v60 = vpop.f32.mrf.mxu1 }
 0x594   : > { %v8246_v19 = vpop.f32.mrf.mxu1 }
 0x5bf   : > { %v8447_v8 = vpop.f32.mrf.mxu0 }
 0x5c0   : > { %v8448_v45 = vadd.f32 %v8447_v8, %v8221_v27  ;;  %v7812_v8 = vadd.f32 %v7811_v6, %v17645_v22  ;;  %v17649_v6 = vld [vmem:[#allocation119_spill] sm:$0xff] }
 0x5c1   : > { %v8449_v38 = vpop.f32.mrf.mxu0 }
 0x5c2   : > { %v8450_v14 = vadd.f32 %v8449_v38, %v8223_v12  ;;  %v8237_v59 = vadd.f32 %v8236_v24, %v7812_v8 }
 0x5c4   : > { %v8457_v32 = vpop.f32.mrf.mxu0 }
 0x5c5   : > { %v8458_v39 = vadd.f32 %v8457_v32, %v8229_v42  ;;  %v17647_v32 = vld [vmem:[#allocation211_spill] sm:$0xff]  ;;  %v7830_v42 = vadd.f32 %v7829_v0, %v17649_v6 }
 0x5c6   : > { %v8459_v33 = vpop.f32.mrf.mxu0 }
 0x5c7   : > { %v8460_v40 = vadd.f32 %v8459_v33, %v8231_v26 }
 0x5c9   : > { %v8618_v18 = vpop.f32.mrf.mxu1 }
 0x5ca   : > { %v8467_v35 = vpop.f32.mrf.mxu0  ;;  %v8619_v28 = vadd.f32 %v8618_v18, %v8448_v45 }
 0x5cb   : > { %v8620_v21 = vpop.f32.mrf.mxu1 }
 0x5cc   : > { %v8469_v50 = vpop.f32.mrf.mxu0  ;;  %v8621_v61 = vadd.f32 %v8620_v21, %v8450_v14  ;;  %v7814_v21 = vadd.f32 %v7813_v10, %v17647_v32 }
 0x5ce   : > { %v8239_v33 = vadd.f32 %v8238_v37, %v7814_v21 }
 0x5cf   : > { %v8477_v1 = vpop.f32.mrf.mxu0 }
 0x5d0   : > { %v8630_v36 = vpop.f32.mrf.mxu1 }
 0x5d1   : > { %v8479_v5 = vpop.f32.mrf.mxu0  ;;  %v8631_v9 = vadd.f32 %v8630_v36, %v8458_v39 }
 0x5d2   : > { %v8632_v20 = vpop.f32.mrf.mxu1 }
 0x5d3   : > { %v8633_v12 = vadd.f32 %v8632_v20, %v8460_v40 }
 0x5d5   : > { %v8642_v15 = vpop.f32.mrf.mxu1 }
 0x5d7   : > { %v8644_v57 = vpop.f32.mrf.mxu1 }
 0x5da   : > { %v8654_v13 = vpop.f32.mrf.mxu1 }
 0x5dc   : > { %v8656_v58 = vpop.f32.mrf.mxu1 }
 0x607   : > { %v8919_v29 = vpop.f32.mrf.mxu0 }
 0x608   : > { %v8920_v25 = vadd.f32 %v8919_v29, %v8619_v28  ;;  %v17648_v29 = vld [vmem:[#allocation115_spill] sm:$0xff] }
 0x609   : > { %v8921_v52 = vpop.f32.mrf.mxu0  ;;  %v7828_v27 = vadd.f32 %v7827_v49, %v17648_v29  ;;  %v8470_v49 = vadd.f32 %v8469_v50, %v8239_v33 }
 0x60a   : > { %v8922_v38 = vadd.f32 %v8921_v52, %v8621_v61  ;;  %v8468_v52 = vadd.f32 %v8467_v35, %v8237_v59 }
 0x60b   : > { %v8927_v62 = vpop.f32.mrf.mxu0  ;;  %v8245_v36 = vadd.f32 %v8244_v60, %v7828_v27  ;;  %v8645_v35 = vadd.f32 %v8644_v57, %v8470_v49  ;;  %v17650_v57 = vld [vmem:[#allocation289_spill] sm:$0xff]  ;;  %v17654_v49 = vld [vmem:[#allocation296_spill] sm:$0xff] }
 0x60c   : > { %v8928_v45 = vadd.f32 %v8927_v62, %v8631_v9  ;;  %v8643_v22 = vadd.f32 %v8642_v15, %v8468_v52 }
 0x60d   : > { %v8929_v4 = vpop.f32.mrf.mxu0  ;;  %v8478_v24 = vadd.f32 %v8477_v1, %v8245_v36  ;;  %v17652_v36 = vld [vmem:[#allocation294_spill] sm:$0xff] }
 0x60e   : > { %v8930_v28 = vadd.f32 %v8929_v4, %v8633_v12 }
 0x60f   : > { %v8935_v30 = vpop.f32.mrf.mxu0  ;;  %v9080_v23 = vpop.f32.mrf.mxu1 }
 0x610   : > { %v9081_v18 = vadd.f32 %v9080_v23, %v8920_v25  ;;  %v8247_v25 = vadd.f32 %v8246_v19, %v7830_v42  ;;  %v8655_v23 = vadd.f32 %v8654_v13, %v8478_v24  ;;  %v8936_v4 = vadd.f32 %v8935_v30, %v8643_v22 }
 0x611   : > { %v8937_v51 = vpop.f32.mrf.mxu0  ;;  %v9082_v16 = vpop.f32.mrf.mxu1  ;;  %v7565_v30 = vadd.f32 %v14784_v54, %v17650_v57 }
 0x612   : > { %v9109_v3 = vmul.f32 49.0, %v9081_v18  ;;  %v9083_v41 = vadd.f32 %v9082_v16, %v8922_v38  ;;  %v8480_v60 = vadd.f32 %v8479_v5, %v8247_v25  ;;  %v8938_v38 = vadd.f32 %v8937_v51, %v8645_v35  ;;  %v17651_v16 = vld [vmem:[#allocation101_spill] sm:$0xff] }
 0x613   : > { %v9088_v14 = vpop.f32.mrf.mxu1  ;;  %v8943_v61 = vpop.f32.mrf.mxu0  ;;  %v7566_v42 = vadd.f32 %v14784_v54, %v17651_v16 }
 0x614   : > { %v9117_v26 = vsub.f32 %v9109_v3, %v17643_v53  ;;  %v9110_v39 = vmul.f32 49.0, %v9083_v41  ;;  %v9089_v10 = vadd.f32 %v9088_v14, %v8928_v45  ;;  %v8657_v15 = vadd.f32 %v8656_v58, %v8480_v60 }
 0x615   : > { %v9090_v20 = vpop.f32.mrf.mxu1  ;;  %v8945_v50 = vpop.f32.mrf.mxu0  ;;  %v8944_v18 = vadd.f32 %v8943_v61, %v8655_v23 }
 0x616   : > { %v9125_v62 = vadd.f32 %v9117_v26, %v14793_v11  ;;  %v9118_v8 = vsub.f32 %v9110_v39, %v17644_v17  ;;  %v9111_v0 = vmul.f32 49.0, %v9089_v10  ;;  %v9091_v37 = vadd.f32 %v9090_v20, %v8930_v28 }
 0x617   : > { %v9096_v40 = vpop.f32.mrf.mxu1  ;;  %v7567_v26 = vadd.f32 %v14784_v54, %v17652_v36  ;;  %v7569_v20 = vadd.f32 %v14784_v54, %v17654_v49 }
 0x618   : > { %v9133_v53 = vmul.f32 %v9125_v62, %v7562_v56  ;;  %v9126_v9 = vadd.f32 %v9118_v8, %v14793_v11  ;;  %v9119_v19 = vsub.f32 %v9111_v0, %v17646_v47  ;;  %v9112_v1 = vmul.f32 49.0, %v9091_v37 }
 0x619   : > { %v9097_v32 = vadd.f32 %v9096_v40, %v8936_v4  ;;  %v9098_v21 = vpop.f32.mrf.mxu1  ;;  %v8946_v56 = vadd.f32 %v8945_v50, %v8657_v15 }
 0x61a   : > { %9639 = vrcp.f32 %v9133_v53  ;;  %v9134_v17 = vmul.f32 %v9126_v9, %v7563_v55  ;;  %v9127_v5 = vadd.f32 %v9119_v19, %v14793_v11  ;;  %v9120_v13 = vsub.f32 %v9112_v1, %v17650_v57 }
 0x61b   : > { %v9113_v29 = vmul.f32 49.0, %v9097_v32  ;;  %v9099_v27 = vadd.f32 %v9098_v21, %v8938_v38  ;;  %v9104_v47 = vpop.f32.mrf.mxu1  ;;  %v9189_v57 = vlaneseq }
 0x61c   : > { %9641 = vrcp.f32 %v9134_v17  ;;  %v9135_v59 = vmul.f32 %v9127_v5, %v7564_v63  ;;  %v9128_v58 = vadd.f32 %v9120_v13, %v14793_v11  ;;  %v9105_v51 = vadd.f32 %v9104_v47, %v8944_v18  ;;  %v17653_v63 = vld [vmem:[#allocation287_spill] sm:$0xff] }
 0x61d   : > { %v9121_v12 = vsub.f32 %v9113_v29, %v17651_v16  ;;  %v9114_v45 = vmul.f32 49.0, %v9099_v27  ;;  %v9106_v55 = vpop.f32.mrf.mxu1  ;;  %v7568_v10 = vadd.f32 %v14784_v54, %v17653_v63 }
 0x61e   : > { %9643 = vrcp.f32 %v9135_v59  ;;  %v9136_v3 = vmul.f32 %v9128_v58, %v7565_v30  ;;  %v9115_v41 = vmul.f32 49.0, %v9105_v51  ;;  %v9107_v6 = vadd.f32 %v9106_v55, %v8946_v56 }
 0x61f   : > { %v9129_v33 = vadd.f32 %v9121_v12, %v14793_v11  ;;  %v9122_v52 = vsub.f32 %v9114_v45, %v17652_v36 }
 0x620   : > { %9645 = vrcp.f32 %v9136_v3  ;;  %v9123_v14 = vsub.f32 %v9115_v41, %v17653_v63  ;;  %v9116_v28 = vmul.f32 49.0, %v9107_v6 }
 0x621   : > { %v9137_v39 = vmul.f32 %v9129_v33, %v7566_v42  ;;  %v9130_v61 = vadd.f32 %v9122_v52, %v14793_v11 }
 0x622   : > { %v9131_v25 = vadd.f32 %v9123_v14, %v14793_v11  ;;  %v9124_v24 = vsub.f32 %v9116_v28, %v17654_v49  ;;  %v9206_v14 = vld [vmem:[#allocation5] sm:$0xff] }
 0x623   : > { %9647 = vrcp.f32 %v9137_v39  ;;  %v9138_v22 = vmul.f32 %v9130_v61, %v7567_v26 }
 0x624   : > { %v9139_v62 = vmul.f32 %v9131_v25, %v7568_v10  ;;  %v9132_v8 = vadd.f32 %v9124_v24, %v14793_v11  ;;  %v9207_v10 = vld [vmem:[#allocation5 + $0x8] sm:$0xff] }
 0x625   : > { %9649 = vrcp.f32 %v9138_v22 }
 0x626   : > { %9651 = vrcp.f32 %v9139_v62  ;;  %v9140_v0 = vmul.f32 %v9132_v8, %v7569_v20 }
 0x627   : > { %v9640_v37 = vpop.eup %9639 }
 0x628   : > { %v9149_v60 = vmul.f32 %v9640_v37, %v9133_v53  ;;  %9653 = vrcp.f32 %v9140_v0 }
 0x629   : > { %v9642_v35 = vpop.eup %9641 }
 0x62a   : > { %v9157_v23 = vsub.f32 2.0, %v9149_v60  ;;  %v9150_v4 = vmul.f32 %v9642_v35, %v9134_v17 }
 0x62b   : > { %v9644_v40 = vpop.eup %9643 }
 0x62c   : > { %v9165_v9 = vmul.f32 %v9640_v37, %v9157_v23  ;;  %v9158_v19 = vsub.f32 2.0, %v9150_v4  ;;  %v9151_v50 = vmul.f32 %v9644_v40, %v9135_v59 }
 0x62d   : > { %v9646_v1 = vpop.eup %9645 }
 0x62e   : > { %v9181_v15 = vmul.f32 %v14812_v7, %v9165_v9  ;;  %v9166_v54 = vmul.f32 %v9642_v35, %v9158_v19  ;;  %v9159_v38 = vsub.f32 2.0, %v9151_v50  ;;  %v9152_v18 = vmul.f32 %v9646_v1, %v9136_v3 }
 0x630   : > { %v9648_v11 = vpop.eup %9647  ;;  %v9182_v32 = vmul.f32 %v14820_v48, %v9166_v54  ;;  %v9167_v21 = vmul.f32 %v9644_v40, %v9159_v38  ;;  %v9160_v5 = vsub.f32 2.0, %v9152_v18  ;;  %v9190_v48 = vand.u32 127, %v9189_v57 }
 0x631   : > { %v9153_v53 = vmul.f32 %v9648_v11, %v9137_v39 }
 0x632   : > { %v9650_v13 = vpop.eup %9649  ;;  %v9183_v17 = vmul.f32 %v14834_v31, %v9167_v21  ;;  %v9168_v30 = vmul.f32 %v9646_v1, %v9160_v5  ;;  %v9191_v36 = vadd.s32 128, %v9190_v48 }
 0x633   : > { %v9652_v56 = vpop.eup %9651  ;;  %v9161_v29 = vsub.f32 2.0, %v9153_v53  ;;  %v9154_v27 = vmul.f32 %v9650_v13, %v9138_v22 }
 0x634   : > { %v9194_v47 = vadd.f32 %v9183_v17, %v9181_v15  ;;  %v9184_v7 = vmul.f32 %v14845_v46, %v9168_v30  ;;  %v9155_v59 = vmul.f32 %v9652_v56, %v9139_v62  ;;  %vm9193_vm4 = vcmp.lt.s32.totalorder %v9191_v36, 250 }
 0x635   : > { %v9654_v58 = vpop.eup %9653  ;;  %v9169_v51 = vmul.f32 %v9648_v11, %v9161_v29  ;;  %v9162_v16 = vsub.f32 2.0, %v9154_v27 }
 0x636   : > { %v9197_v12 = vadd.f32 %v9184_v7, %v9182_v32  ;;  %v9163_v45 = vsub.f32 2.0, %v9155_v59  ;;  %v9156_v55 = vmul.f32 %v9654_v58, %v9140_v0 }
 0x637   : > { %v9185_v3 = vmul.f32 %v14857_v43, %v9169_v51  ;;  %v9170_v41 = vmul.f32 %v9650_v13, %v9162_v16 }
 0x638   : > { %v9171_v31 = vmul.f32 %v9652_v56, %v9163_v45  ;;  %v9164_v6 = vsub.f32 2.0, %v9156_v55 }
 0x639   : > { %v9195_v42 = vadd.f32 %v9194_v47, %v9185_v3  ;;  %v9186_v33 = vmul.f32 %v14863_v44, %v9170_v41 }
 0x63a   : > { %v9187_v46 = vmul.f32 %v14870_v34, %v9171_v31  ;;  %v9172_v52 = vmul.f32 %v9654_v58, %v9164_v6 }
 0x63b   : > { %v9198_v63 = vadd.f32 %v9197_v12, %v9186_v33 }
 0x63c   : > { %v9196_v28 = vadd.f32 %v9195_v42, %v9187_v46  ;;  %v9188_v26 = vmul.f32 %v14874_v2, %v9172_v52 }
 0x63e   : > { %v9208_v39 = vadd.f32 %v9206_v14, %v9196_v28  ;;  %v9199_v61 = vadd.f32 %v9198_v63, %v9188_v26 }
 0x63f   : > { %9216 = sbr.rel (%p14881_p13) target bundleno = 1627 (0x65b), region = 72 }
 0x640   : > { %9210 = vst [vmem:[#allocation5] sm:$0xff] %v9208_v39  ;;  %v9205_v43 = vsel %vm9193_vm4, %v9199_v61, 0.0 }
 0x641   : > { %v9209_v25 = vadd.f32 %v9207_v10, %v9205_v43 }
 0x643   : > { %9211 = vst [vmem:[#allocation5 + $0x8] sm:$0xff] %v9209_v25 }
 0x644   : > { %v9217_v44 = vsel %vm674_vm1, %v9181_v15, 0.0  ;;  %v9224_v34 = vsel %vm674_vm1, %v9182_v32, 0.0  ;;  %v9976_v20 = vmov 1966171168   ;;  %v9241_v23 = vshrl.u32 %v9189_v57, 7 }
 0x645   : > { %v9218_v49 = vrot.slane %v9217_v44, 4  ;;  %v9225_v24 = vrot.slane %v9224_v34, 4  ;;  %v9238_v62 = vunpack.c.l.s4 %v9976_v20  ;;  %vm9255_vm5 = vcmp.lt.s32.totalorder %v9189_v57, 256 }
 0x647   : > { %v9219_v22 = vadd.f32 %v9218_v49, %v9217_v44  ;;  %v9226_v2 = vadd.f32 %v9225_v24, %v9224_v34  ;;  %v9239_v35 = vunpack.c.0.s8 %v9238_v62 }
 0x649   : > { %v9220_v8 = vrot.slane %v9219_v22, 2  ;;  %v9227_v0 = vrot.slane %v9226_v2, 2  ;;  %v9242_v50 = vsub.s32 %v9239_v35, %v9241_v23 }
 0x64a   : > { %v9231_v38 = vld [vmem:[#allocation5] ss:$8 sm:$0x3] }
 0x64b   : > { %v9221_v37 = vadd.f32 %v9220_v8, %v9219_v22  ;;  %v9228_v60 = vadd.f32 %v9227_v0, %v9226_v2 }
 0x64d   : > { %v9222_v4 = vrot.slane %v9221_v37, 1  ;;  %v9229_v40 = vrot.slane %v9228_v60, 1 }
 0x64f   : > { %v9223_v9 = vadd.f32 %v9222_v4, %v9221_v37  ;;  %v9230_v19 = vadd.f32 %v9229_v40, %v9228_v60 }
 0x651   : > { %v9233_v1 = vsel %vm9193_vm4, %v9230_v19, 0.0 }
 0x652   : > { %v9236_v15 = vcombine.low %v9223_v9, %v9233_v1 }
 0x654   : > { %v9243_v54 = vrot.slane %v9236_v15, %v9242_v50 }
 0x656   : > { %v9250_v18 = vrot.slane %v9243_v54, %v9242_v50 }
 0x658   : > { %v9252_v11 = vsub.f32 %v9231_v38, %v9250_v18 }
 0x65a   : > { %9257 = vst.msk [vmem:[#allocation5] ss:$8 sm:$0x3] %vm9255_vm5, %v9252_v11 }
 0x65b PF: > { %s17655_s22 = sld [smem:[#allocation23_spill]] }
 0x661   : > { %p9500_p0 = scmp.ne.s32.totalorder %s17655_s22, 1 }
 0x663   : > { %9262 = sbr.rel (%p9500_p0) target bundleno = 1849 (0x739), region = 76 }
 0x668   : > { %v9263_v32 = vld [vmem:[#allocation4 + $0x8] sm:$0xff]  ;;  %v9264_v21 = vld [vmem:[#allocation4] sm:$0xff]  ;;  %v9278_v5 = vld [vmem:[#allocation5] sm:$0xff]  ;;  %vm9276_vm6 = vcmask 0  }
 0x669   : > { %v9265_v53 = vadd.f32 %v9264_v21, %v9263_v32  ;;  %v9279_v13 = vld [vmem:[#allocation5 + $0x8] sm:$0xff] }
 0x66a   : > { %v9280_v17 = vadd.f32 %v9279_v13, %v9278_v5 }
 0x66b   : > { %9266 = vadd.xlane.f32.xlu0 %v9265_v53 }
 0x66f   : > { %9281 = vadd.xlane.f32.xlu0 %v9280_v17 }
 0x6f4   : > { %v9267_v30 = vpop.xlane.xlu0 %9266 }
 0x6f5   : > { %v9268_v56 = vrot.slane %v9267_v30, 4 }
 0x6f7   : > { %v9269_v29 = vadd.f32 %v9268_v56, %v9267_v30 }
 0x6f8   : > { %v9282_v27 = vpop.xlane.xlu0 %9281 }
 0x6f9   : > { %v9270_v57 = vrot.slane %v9269_v29, 2  ;;  %v9283_v47 = vrot.slane %v9282_v27, 4 }
 0x6fb   : > { %v9284_v7 = vadd.f32 %v9283_v47, %v9282_v27  ;;  %v9271_v59 = vadd.f32 %v9270_v57, %v9269_v29 }
 0x6fd   : > { %v9285_v58 = vrot.slane %v9284_v7, 2  ;;  %v9272_v51 = vrot.slane %v9271_v59, 1 }
 0x6ff   : > { %v9286_v16 = vadd.f32 %v9285_v58, %v9284_v7  ;;  %v9273_v48 = vadd.f32 %v9272_v51, %v9271_v59 }
 0x701   : > { %9509 = vpush %v9273_v48  ;;  %v9287_v12 = vrot.slane %v9286_v16, 1 }
 0x703   : > { %v9288_v45 = vadd.f32 %v9287_v12, %v9286_v16 }
 0x705   : > { %9511 = vpush %v9288_v45 }
 0x732   : > { %s9510_s25 = spop %9509 }
 0x733   : > { %v9275_v55 = vstv %s9510_s25 }
 0x734   : > { %9277 = vst.msk [vmem:[%s437_s30] sm:$0x1] %vm9276_vm6, %v9275_v55 }
 0x736   : > { %s9512_s9 = spop %9511 }
 0x737   : > { %v9290_v3 = vstv %s9512_s9 }
 0x738   : > { %9291 = vst.msk [vmem:[%s440_s16] sm:$0x1] %vm9276_vm6, %v9290_v3 }
 0x739 PF: > { %s31_s13 = sadd.s32 1, %s9965_s13   ;;  %s17658_s23 = sld [smem:[#allocation22_spill]] }
 0x73a   : > { %p28_p7 = scmp.ge.s32.totalorder %s31_s13, 6   ;;  %s17659_s1 = sld [smem:[#allocation27_spill]] }
 0x73b   : > { %s17660_s20 = smov %s17677_s10  ;;  %s17661_s17 = smov %s17675_s27 }
 0x73c   : > { %s17663_s28 = smov %s9933_s29  ;;  %s17664_s29 = smov %s10201_s2 }
 0x73d   : > { %s17665_s30 = smov %s9941_s8  ;;  %s17666_s8 = smov %s9945_s0 }
 0x73e   : > { %s17668_s9 = smov %s9957_s11  ;;  %s17669_s10 = smov %s9961_s12 }
 0x73f   : > { %s17662_s27 = smov %s17658_s23  ;;  %s17670_s11 = smov %s17660_s20 }
 0x740   : > { %s17667_s0 = smov %s17659_s1  ;;  %s17671_s12 = smov %s17661_s17 }
 0x741   :  { %30 = sbr.rel (!%p28_p7) target bundleno = 22 (0x16), region = 149 }
 0x746   :  { %9321 = vsyncpa [#allocation9], 1 }
 0x747   :  { %9323 = vsyncpa [#allocation9 + $0x1], 1 }
 0x748   :  { %9324 = vsyncpa [#allocation11], 1 }
 0x749   :  { %9326 = vsyncpa [#allocation11 + $0x1], 1 }
 0x74a   :  { %9327 = vsyncpa [#allocation14], 1 }
 0x74b   :  { %9329 = vsyncpa [#allocation14 + $0x1], 1 }

</bundles_post_ra>
